<compile_context>
chip_gen: v6e
topology: v6e:2x2x1
jax: 0.10.0
libtpu: 0.0.40
codegen_flags: <defaults>
</compile_context>

<pallas_src>
import functools

import jax
import jax.numpy as jnp
from jax.experimental import pallas as pl
from jax.experimental.pallas import tpu as pltpu

_BN_EPS = 1e-5


# ----------------------------------------------------------------------------------
# Tiling / VMEM helpers
# ----------------------------------------------------------------------------------
def _round_up(x, m):
    return (x + m - 1) // m * m


def _tile_1d(n, unit, cap):
    """Largest tile that is a multiple of `unit`, <= cap, and divides the (possibly
    zero-padded) extent.  Returns (tile, padded_n)."""
    cap = max(unit, cap // unit * unit)
    n_pad = _round_up(n, unit)
    if n_pad <= cap:
        return n_pad, n_pad
    best = unit
    for t in range(unit, cap + 1, unit):
        if n_pad % t == 0:
            best = t
    return best, n_pad


@functools.lru_cache(maxsize=None)
def _vmem_limit_bytes():
    # ~48 MiB on v7x (64 MiB physical), up to 96 MiB on v5e/v6e (128 MiB physical).
    cap = 64 * 1024 * 1024
    try:
        cap = int(getattr(pltpu.get_tpu_info(), "vmem_capacity_bytes", cap))
    except Exception:
        pass
    return max(32 * 1024 * 1024, min(cap * 3 // 4, 96 * 1024 * 1024))


def _mosaic_params(*semantics):
    return pltpu.CompilerParams(dimension_semantics=semantics,
                                vmem_limit_bytes=_vmem_limit_bytes())


# ----------------------------------------------------------------------------------
# Pallas kernels
# ----------------------------------------------------------------------------------
def _direct_conv_kernel(*args, n_in, tap_dref, tap_start, L, relu):
    # args: n_in flattened padded-plane refs (1, 1, P, C), w_ref (T, C, Cout) bf16,
    # s_ref/b_ref (1, Cout) f32, o_ref (1, 1, L, Cout).
    x_refs = args[:n_in]
    w_ref, s_ref, b_ref, o_ref = args[n_in:n_in + 4]
    Cout = o_ref.shape[-1]
    acc = jnp.zeros((L, Cout), jnp.float32)
    for t in range(len(tap_dref)):
        st = tap_start[t]
        tap = x_refs[tap_dref[t]][0, 0, st:st + L, :].astype(jnp.bfloat16)
        acc = acc + jnp.dot(tap, w_ref[t], preferred_element_type=jnp.float32)
    out = acc * s_ref[...] + b_ref[...]
    if relu:
        out = jnp.maximum(out, 0.0)
    o_ref[0, 0] = out.astype(o_ref.dtype)


def _prob0_kernel(*args, n_in, tap_dref, tap_start, L):
    # Conv3d(C -> 1): NT-oriented dots so the output is lane-dense (1, L).
    # w_ref: (27, 8, C) bf16 (rows replicated), sb_ref: SMEM f32[2] = [scale, bias].
    x_refs = args[:n_in]
    w_ref, sb_ref, o_ref = args[n_in:n_in + 3]
    acc = jnp.zeros((8, L), jnp.float32)
    for t in range(len(tap_dref)):
        st = tap_start[t]
        tap = x_refs[tap_dref[t]][0, 0, st:st + L, :].astype(jnp.bfloat16)   # (L, C)
        acc = acc + jax.lax.dot_general(
            w_ref[t], tap, dimension_numbers=(((1,), (1,)), ((), ())),
            preferred_element_type=jnp.float32)                              # (8, L)
    o_ref[0, 0] = acc[0:1, :] * sb_ref[0] + sb_ref[1]


def _matmul_affine_kernel(x_ref, w_ref, s_ref, b_ref, o_ref, *, relu):
    # x_ref: (1, TM, K) f32, w_ref: (K, Cout) bf16, s/b: (1, Cout), o_ref: (1, TM, Cout).
    acc = jnp.dot(x_ref[0].astype(jnp.bfloat16), w_ref[...],
                  preferred_element_type=jnp.float32)
    acc = acc * s_ref[...] + b_ref[...]
    if relu:
        acc = jnp.maximum(acc, 0.0)
    o_ref[0] = acc.astype(o_ref.dtype)


def _variance_kernel(*args, inv_n):
    # args: nviews sublane-dense input blocks (1, T, 128) + output block (1, T, 128).
    o_ref = args[-1]
    v0 = args[0][...]
    # reproduce the in-place `ref_volume.pow_(2)` quirk: the running sum starts at ref^2
    s = v0 * v0
    sq = v0 * v0
    for r in args[1:-1]:
        w = r[...]
        s = s + w
        sq = sq + w * w
    o_ref[...] = sq * inv_n - (s * inv_n) * (s * inv_n)


def _softmax_depth_kernel(c_ref, d_ref, p_ref, z_ref):
    # c/d/p: (1, D, T) lane-dense spatial tiles, z: (1, 1, T).
    c = c_ref[0]                                  # (D, T)
    m = jnp.max(c, axis=0, keepdims=True)
    e = jnp.exp(c - m)
    s = jnp.sum(e, axis=0, keepdims=True)
    inv = pl.reciprocal(s, approx=True)           # EUP slot, ~free
    p = e * inv
    p_ref[0] = p
    z_ref[0] = jnp.sum(p * d_ref[0], axis=0, keepdims=True)


# ----------------------------------------------------------------------------------
# Direct tap-accumulation conv wrapper (shared by 2-D / 3-D / transposed convs)
# ----------------------------------------------------------------------------------
_TAPS_3D = tuple((dz, dy, dx) for dz in range(3) for dy in range(3) for dx in range(3))
_TAPS_2D = tuple((0, dy, dx) for dy in range(3) for dx in range(3))


def _direct_conv(xp, d_offsets, taps, w, scale, bias, *, Do, H, W, relu=True):
    """xp: (B, Dp, Hp, Wp, C) zero-padded input.  taps: tuple of (dz, dy, dx) offsets
    into the padded volume (dz in d_offsets).  w: (T, C, Cout) bf16, tap-major.
    Returns (B, Do, H, W, Cout) f32."""
    B, Dp, Hp, Wp, C = xp.shape
    Cout = w.shape[-1]
    if C % 8:                          # only the RGB input layer (C=3): pad to 8 lanes
        cpad = _round_up(C, 8) - C
        xp = jnp.pad(xp, ((0, 0), (0, 0), (0, 0), (0, 0), (0, cpad)))
        w = jnp.pad(w, ((0, 0), (0, cpad), (0, 0)))
        C += cpad
    P = Hp * Wp
    L = H * Wp
    assert max(dy * Wp + dx for _, dy, dx in taps) + L <= P, "insufficient spatial padding"
    xf = xp.reshape(B, Dp, P, C)
    didx = {dz: i for i, dz in enumerate(d_offsets)}
    tap_dref = tuple(didx[dz] for dz, _, _ in taps)
    tap_start = tuple(dy * Wp + dx for _, dy, dx in taps)
    kern = functools.partial(_direct_conv_kernel, n_in=len(d_offsets),
                             tap_dref=tap_dref, tap_start=tap_start, L=L, relu=relu)
    in_specs = [pl.BlockSpec((1, 1, P, C), (lambda b, d, dz=dz: (b, d + dz, 0, 0)))
                for dz in d_offsets]
    in_specs += [pl.BlockSpec((w.shape[0], C, Cout), lambda b, d: (0, 0, 0)),
                 pl.BlockSpec((1, Cout), lambda b, d: (0, 0)),
                 pl.BlockSpec((1, Cout), lambda b, d: (0, 0))]
    out = pl.pallas_call(
        kern,
        out_shape=jax.ShapeDtypeStruct((B, Do, L, Cout), jnp.float32),
        grid=(B, Do),
        in_specs=in_specs,
        out_specs=pl.BlockSpec((1, 1, L, Cout), lambda b, d: (b, d, 0, 0)),
        compiler_params=_mosaic_params("parallel", "parallel"),
    )(*([xf] * len(d_offsets) + [w, scale.reshape(1, Cout), bias.reshape(1, Cout)]))
    # slice off the junk columns of the flattened-plane trick (w in [W, Wp))
    return out.reshape(B, Do, H, Wp, Cout)[:, :, :, :W, :]


def conv3d_bn_relu(x, p, relu=True):
    # 3x3x3, stride 1, pad 1 (Conv3d/ConvTranspose3d(s=1) + BN + ReLU), direct kernel.
    B, D, H, W, C = x.shape
    xp = jnp.pad(x, ((0, 0), (1, 1), (1, 2), (1, 1), (0, 0)))
    return _direct_conv(xp, (0, 1, 2), _TAPS_3D, p['w'], p['scale'], p['bias'],
                        Do=D, H=H, W=W, relu=relu)


def conv2d_bn_relu(x, p):
    # 3x3, stride 1, pad 1 (Conv2d(no bias) + BN + ReLU), whole-image direct kernel.
    B, H, W, C = x.shape
    xp = jnp.pad(x, ((0, 0), (1, 2), (1, 1), (0, 0)))[:, None]   # (B, 1, H+3, W+2, C)
    out = _direct_conv(xp, (0,), _TAPS_2D, p['w'], p['scale'], p['bias'],
                       Do=1, H=H, W=W, relu=True)
    return out[:, 0]


# Per-axis transposed-conv parity taps for stride=2, pad=1, output_padding=1:
#   even output -> [(input_offset 0, kernel index 1)]
#   odd  output -> [(0, 2), (1, 0)]
_TC_AXIS_TAPS = ([(0, 1)], [(0, 2), (1, 0)])
_PARITIES = tuple((pd, ph, pw) for pd in (0, 1) for ph in (0, 1) for pw in (0, 1))


def conv_transpose3d_s2_bn_relu(x, p):
    # ConvTranspose3d(k=3, s=2, pad=1, output_padding=1) + BN + ReLU, decomposed into
    # 8 output-parity direct sub-convolutions over the undilated input (no im2col).
    B, D, H, W, C = x.shape
    Cout = p['w_par'][0].shape[-1]
    xp = jnp.pad(x, ((0, 0), (0, 1), (0, 2), (0, 1), (0, 0)))   # far-edge pad only
    ys = []
    for idx, (pd, ph, pw) in enumerate(_PARITIES):
        taps = tuple((od, oh, ow)
                     for od, _ in _TC_AXIS_TAPS[pd]
                     for oh, _ in _TC_AXIS_TAPS[ph]
                     for ow, _ in _TC_AXIS_TAPS[pw])
        d_offsets = (0,) if pd == 0 else (0, 1)
        ys.append(_direct_conv(xp, d_offsets, taps, p['w_par'][idx],
                               p['scale'], p['bias'], Do=D, H=H, W=W, relu=True))
    # TODO(synk): the parity interleave stays in XLA (stack + transpose); a direct
    # interleaved out BlockSpec would violate the (8,128) block constraint.
    y = jnp.stack(ys, axis=4).reshape(B, D, H, W, 2, 2, 2, Cout)
    y = jnp.transpose(y, (0, 1, 4, 2, 5, 3, 6, 7))
    return y.reshape(B, 2 * D, 2 * H, 2 * W, Cout)


def conv3d_prob0(x, p):
    # Conv3d(16 -> 1, k=3, pad=1, bias=True) direct kernel with lane-dense output.
    B, D, H, W, C = x.shape
    xp = jnp.pad(x, ((0, 0), (1, 1), (1, 2), (1, 1), (0, 0)))
    Hp, Wp = H + 3, W + 2
    P = Hp * Wp
    L = H * Wp
    xf = xp.reshape(B, D + 2, P, C)
    tap_start = tuple(dy * Wp + dx for _, dy, dx in _TAPS_3D)
    tap_dref = tuple(dz for dz, _, _ in _TAPS_3D)
    kern = functools.partial(_prob0_kernel, n_in=3, tap_dref=tap_dref,
                             tap_start=tap_start, L=L)
    in_specs = [pl.BlockSpec((1, 1, P, C), (lambda b, d, dz=dz: (b, d + dz, 0, 0)))
                for dz in range(3)]
    in_specs += [pl.BlockSpec((27, 8, C), lambda b, d: (0, 0, 0)),
                 pl.BlockSpec(memory_space=pltpu.MemorySpace.SMEM)]
    out = pl.pallas_call(
        kern,
        out_shape=jax.ShapeDtypeStruct((B, D, 1, L), jnp.float32),
        grid=(B, D),
        in_specs=in_specs,
        out_specs=pl.BlockSpec((1, 1, 1, L), lambda b, d: (b, d, 0, 0)),
        compiler_params=_mosaic_params("parallel", "parallel"),
    )(xf, xf, xf, p['w8'], p['sb'])
    return out.reshape(B, D, H, Wp)[:, :, :, :W]


# ----------------------------------------------------------------------------------
# Stride-2 Conv3d (conv1): small XLA im2col + MXU-aligned Pallas matmul
# ----------------------------------------------------------------------------------
def _im2col3d_s2(xp, Do, Ho, Wo):
    B = xp.shape[0]
    C = xp.shape[-1]
    taps = []
    for dz in range(3):
        for dy in range(3):
            for dx in range(3):
                taps.append(xp[:, dz:dz + 2 * Do - 1:2,
                               dy:dy + 2 * Ho - 1:2,
                               dx:dx + 2 * Wo - 1:2, :])
    cols = jnp.concatenate(taps, axis=-1)
    return cols.reshape(B, Do * Ho * Wo, 27 * C)


def fused_matmul(cols, w, scale, bias, relu):
    # cols: (B, N, K) @ w: (K, Cout) bf16, fused folded-BN scale/bias (+ReLU).
    B, N, K = cols.shape
    Cout = w.shape[-1]
    cap = max(256, min(2048, (4 << 20) // (4 * K) // 256 * 256))
    TM, Np = _tile_1d(N, 256, cap)
    if Np != N:
        cols = jnp.pad(cols, ((0, 0), (0, Np - N), (0, 0)))
    kern = functools.partial(_matmul_affine_kernel, relu=relu)
    out = pl.pallas_call(
        kern,
        out_shape=jax.ShapeDtypeStruct((B, Np, Cout), jnp.float32),
        grid=(B, Np // TM),
        in_specs=[pl.BlockSpec((1, TM, K), lambda b, m: (b, m, 0)),
                  pl.BlockSpec((K, Cout), lambda b, m: (0, 0)),
                  pl.BlockSpec((1, Cout), lambda b, m: (0, 0)),
                  pl.BlockSpec((1, Cout), lambda b, m: (0, 0))],
        out_specs=pl.BlockSpec((1, TM, Cout), lambda b, m: (b, m, 0)),
        compiler_params=_mosaic_params("parallel", "parallel"),
    )(cols, w, scale.reshape(1, Cout), bias.reshape(1, Cout))
    if Np != N:
        out = out[:, :N]
    return out


def conv3d_s2_bn_relu(x, p):
    # TODO(synk): direct stride-2 taps need strided in-kernel slices; kept as im2col
    # (single layer, cols ~3.4x the layer input volume vs 27x for stride-1 layers).
    B, D, H, W, C = x.shape
    xp = jnp.pad(x, ((0, 0), (1, 1), (1, 1), (1, 1), (0, 0)))
    Do, Ho, Wo = (D - 1) // 2 + 1, (H - 1) // 2 + 1, (W - 1) // 2 + 1
    cols = _im2col3d_s2(xp, Do, Ho, Wo)
    out = fused_matmul(cols, p['w'], p['scale'], p['bias'], relu=True)
    return out.reshape(B, Do, Ho, Wo, -1)


# ----------------------------------------------------------------------------------
# Variance cost volume and softmax + depth regression
# ----------------------------------------------------------------------------------
def variance_cost_volume(ref_vol, warped_list):
    # ref_vol / warped: (B, D, H, W, C).  Views passed as separate inputs (no stack
    # round-trip), tiled as sublane-dense (T, 128) blocks for full VPU throughput.
    B, D, H, W, C = ref_vol.shape
    M = D * H * W * C
    Mp = _round_up(M, 1024)
    views = [ref_vol.reshape(B, M)] + [w.reshape(B, M) for w in warped_list]
    if Mp != M:
        views = [jnp.pad(v, ((0, 0), (0, Mp - M))) for v in views]
    R = Mp // 128
    views = [v.reshape(B, R, 128) for v in views]
    T, _ = _tile_1d(R, 8, 512)
    kern = functools.partial(_variance_kernel, inv_n=1.0 / len(views))
    out = pl.pallas_call(
        kern,
        out_shape=jax.ShapeDtypeStruct((B, R, 128), jnp.float32),
        grid=(B, R // T),
        in_specs=[pl.BlockSpec((1, T, 128), lambda b, m: (b, m, 0)) for _ in views],
        out_specs=pl.BlockSpec((1, T, 128), lambda b, m: (b, m, 0)),
        compiler_params=_mosaic_params("parallel", "parallel"),
    )(*views)
    return out.reshape(B, Mp)[:, :M].reshape(B, D, H, W, C)


def softmax_depth_regression(cost, depth_vals):
    # cost, depth_vals: (B, D, H, W) -> prob (B, D, H, W), depth (B, H, W).
    B, D, H, W = cost.shape
    HW = H * W
    c = cost.reshape(B, D, HW)
    d = depth_vals.reshape(B, D, HW)
    T, HWp = _tile_1d(HW, 128, 2048)
    if HWp != HW:
        c = jnp.pad(c, ((0, 0), (0, 0), (0, HWp - HW)))
        d = jnp.pad(d, ((0, 0), (0, 0), (0, HWp - HW)))
    prob, depth = pl.pallas_call(
        _softmax_depth_kernel,
        out_shape=(jax.ShapeDtypeStruct((B, D, HWp), jnp.float32),
                   jax.ShapeDtypeStruct((B, 1, HWp), jnp.float32)),
        grid=(B, HWp // T),
        in_specs=[pl.BlockSpec((1, D, T), lambda b, m: (b, 0, m)),
                  pl.BlockSpec((1, D, T), lambda b, m: (b, 0, m))],
        out_specs=(pl.BlockSpec((1, D, T), lambda b, m: (b, 0, m)),
                   pl.BlockSpec((1, 1, T), lambda b, m: (b, 0, m))),
        compiler_params=_mosaic_params("parallel", "parallel"),
    )(c, d)
    prob = prob[:, :, :HW].reshape(B, D, H, W)
    depth = depth[:, 0, :HW].reshape(B, H, W)
    return prob, depth


# ----------------------------------------------------------------------------------
# Sub-networks
# ----------------------------------------------------------------------------------
_FP_LAYERS = [('conv0aa', 3, 64), ('conv0ba', 64, 64), ('conv0bb', 64, 64),
              ('conv0bc', 64, 32), ('conv0bd', 32, 32), ('conv0be', 32, 32),
              ('conv0bf', 32, 16), ('conv0bg', 16, 16), ('conv0bh', 16, 16)]


def _avg_pool_2x2(x):
    # Exact match of F.interpolate(scale_factor=0.5, bilinear, align_corners=False)
    B, H, W, C = x.shape
    return x.reshape(B, H // 2, 2, W // 2, 2, C).mean(axis=(2, 4))


def feature_pyramid_forward(fp_params, img_nhwc, scales):
    def run(x):
        for name, _, _ in _FP_LAYERS:
            x = conv2d_bn_relu(x, fp_params[name])
        return x
    fps = [run(img_nhwc)]
    img = img_nhwc
    for _ in range(scales - 1):
        img = _avg_pool_2x2(img)
        fps.append(run(img))
    return fps


def cost_reg_net(cp, x):
    # x: (B, D, H, W, 16) -> (B, D, H, W)
    c0 = conv3d_bn_relu(x, cp['conv0'])
    c0 = conv3d_bn_relu(c0, cp['conv0a'])
    c1 = conv3d_s2_bn_relu(c0, cp['conv1'])
    c2 = conv3d_bn_relu(c1, cp['conv2'])
    c2 = conv3d_bn_relu(c2, cp['conv2a'])
    c3 = conv3d_bn_relu(c2, cp['conv3'])
    c4 = conv3d_bn_relu(c3, cp['conv4'])
    c4 = conv3d_bn_relu(c4, cp['conv4a'])
    c5 = c2 + conv3d_bn_relu(c4, cp['conv5'])                 # ConvTranspose3d stride=1
    c6 = c0 + conv_transpose3d_s2_bn_relu(c5, cp['conv6'])    # ConvTranspose3d stride=2
    return conv3d_prob0(c6, cp['prob0'])                      # Conv3d(16->1) + bias


# ----------------------------------------------------------------------------------
# Geometry glue (plain JAX)
# ----------------------------------------------------------------------------------
def condition_intrinsics(intrin, img_h, fp_shapes_hw):
    outs = []
    for (fh, _fw) in fp_shapes_hw:
        r = img_h / fh
        outs.append(intrin.at[:, :2, :].set(intrin[:, :2, :] / r))
    return jnp.stack(outs, axis=1)  # (B, nscale, 3, 3)


def cal_sweeping_depth_hypo(depth_min, depth_max, nhyp):
    B = depth_min.shape[0]
    d = jnp.linspace(depth_min[0], depth_max[0], nhyp)
    return jnp.tile(d[None], (B, 1))


def cal_depth_hypo_train(depth_up, d=4, depth_interval=6.8085):
    # TODO(synk): test-mode geometric per-pixel interval of calDepthHypo not implemented
    # (train-mode constant interval reproduced).
    offs = jnp.arange(-d, d, dtype=jnp.float32) * depth_interval
    return depth_up[:, None] + offs[None, :, None, None]


def build_proj(ref_in, src_in, ref_ex, src_ex):
    B = ref_in.shape[0]
    last = jnp.broadcast_to(jnp.array([[0., 0., 0., 1.]], jnp.float32), (B, 1, 4))
    src_proj = jnp.concatenate([jnp.matmul(src_in, src_ex[:, :3, :]), last], axis=1)
    ref_proj = jnp.concatenate([jnp.matmul(ref_in, ref_ex[:, :3, :]), last], axis=1)
    proj = jnp.matmul(src_proj, jnp.linalg.inv(ref_proj))
    return proj[:, :3, :3], proj[:, :3, 3:4]


def bilinear_sample_zeros(feat, px, py):
    # TODO(synk): grid_sample gather stays in JAX (data-dependent gather; a Pallas
    # DMA-gather with PrefetchScalarGridSpec would be the next optimization step).
    B, Hs, Ws, C = feat.shape
    x0 = jnp.floor(px); y0 = jnp.floor(py)
    x1 = x0 + 1.0;      y1 = y0 + 1.0
    wx1 = px - x0; wx0 = 1.0 - wx1
    wy1 = py - y0; wy0 = 1.0 - wy1
    flat = feat.reshape(B, Hs * Ws, C)

    def corner(xi, yi):
        valid = ((xi >= 0) & (xi <= Ws - 1) & (yi >= 0) & (yi <= Hs - 1))
        xc = jnp.clip(xi, 0, Ws - 1).astype(jnp.int32)
        yc = jnp.clip(yi, 0, Hs - 1).astype(jnp.int32)
        idx = yc * Ws + xc
        g = jax.vmap(lambda f, i: jnp.take(f, i, axis=0))(flat, idx)
        return g * valid[..., None].astype(feat.dtype)

    g00 = corner(x0, y0); g01 = corner(x1, y0)
    g10 = corner(x0, y1); g11 = corner(x1, y1)
    return (g00 * (wx0 * wy0)[..., None] + g01 * (wx1 * wy0)[..., None]
            + g10 * (wx0 * wy1)[..., None] + g11 * (wx1 * wy1)[..., None])


def warp_src_feature(src_feat, rot, trans, depth, H, W):
    # src_feat: (B, Hs, Ws, C), depth: (B, D, H*W) -> (B, D, H, W, C)
    B, Hs, Ws, C = src_feat.shape
    D = depth.shape[1]
    y, x = jnp.meshgrid(jnp.arange(H, dtype=jnp.float32),
                        jnp.arange(W, dtype=jnp.float32), indexing='ij')
    xyz = jnp.stack([x.ravel(), y.ravel(), jnp.ones(H * W, jnp.float32)], axis=0)
    rot_xyz = jnp.einsum('bij,jn->bin', rot, xyz)
    proj_xyz = rot_xyz[:, :, None, :] * depth[:, None, :, :] + trans[:, :, None, :]
    z = proj_xyz[:, 2]
    gx = (proj_xyz[:, 0] / z) / ((Ws - 1) / 2.0) - 1.0
    gy = (proj_xyz[:, 1] / z) / ((Hs - 1) / 2.0) - 1.0
    # F.grid_sample default align_corners=False: pixel = ((g + 1) * size - 1) / 2
    px = ((gx + 1.0) * Ws - 1.0) / 2.0
    py = ((gy + 1.0) * Hs - 1.0) / 2.0
    sampled = bilinear_sample_zeros(src_feat, px.reshape(B, -1), py.reshape(B, -1))
    return sampled.reshape(B, D, H, W, C)


# ----------------------------------------------------------------------------------
# Full network forward
# ----------------------------------------------------------------------------------
def network_forward(params, args, ref_img, src_imgs, ref_in, src_in,
                    ref_ex, src_ex, depth_min, depth_max):
    B, _, H0, W0 = ref_img.shape
    nsrc, nscale = args['nsrc'], args['nscale']
    nviews = 1 + nsrc

    # run the shared-weight FeaturePyramid once on the stacked (ref + src) images
    imgs = jnp.concatenate([ref_img[:, None], src_imgs], axis=1)          # (B, V, 3, H, W)
    imgs_nhwc = jnp.transpose(imgs.reshape(B * nviews, 3, H0, W0), (0, 2, 3, 1))
    fps_all = feature_pyramid_forward(params['fp'], imgs_nhwc, nscale)
    ref_fp, src_fps = [], [[] for _ in range(nsrc)]
    for f in fps_all:
        fv = f.reshape(B, nviews, f.shape[1], f.shape[2], f.shape[3])
        ref_fp.append(fv[:, 0])
        for i in range(nsrc):
            src_fps[i].append(fv[:, 1 + i])

    fp_shapes = [(f.shape[1], f.shape[2]) for f in ref_fp]
    ref_in_ms = condition_intrinsics(ref_in, H0, fp_shapes)                 # (B, S, 3, 3)
    src_in_ms = jnp.stack([condition_intrinsics(src_in[:, i], H0, fp_shapes)
                           for i in range(nsrc)], axis=1)                   # (B, nsrc, S, 3, 3)

    depth_hypos = cal_sweeping_depth_hypo(depth_min, depth_max, args['nhypo'])
    D = depth_hypos.shape[1]

    # ------------------ coarsest-level plane-sweep cost volume ------------------
    ref_feat = ref_fp[-1]
    _, Hc, Wc, C = ref_feat.shape
    ref_volume = jnp.broadcast_to(ref_feat[:, None], (B, D, Hc, Wc, C))
    warped = []
    for i in range(nsrc):
        rot, trans = build_proj(ref_in_ms[:, -1], src_in_ms[:, i, -1], ref_ex, src_ex[:, i])
        dmap = jnp.broadcast_to(depth_hypos[:, :, None], (B, D, Hc * Wc))
        warped.append(warp_src_feature(src_fps[i][-1], rot, trans, dmap, Hc, Wc))
    cost_volume = variance_cost_volume(ref_volume, warped)

    cost_reg = cost_reg_net(params['reg'], cost_volume)
    dvals = jnp.broadcast_to(depth_hypos[:, :, None, None], cost_reg.shape)
    prob_volume, depth = softmax_depth_regression(cost_reg, dvals)
    depth_est_list = [depth]

    # ------------------ iterative refinement over finer levels ------------------
    for level in range(nscale - 2, -1, -1):
        Hn, Wn = 2 * depth.shape[1], 2 * depth.shape[2]
        # TODO(synk): PyTorch bicubic uses Keys a=-0.75; jax.image.resize cubic differs slightly.
        depth_up = jax.image.resize(depth, (B, Hn, Wn), method='bicubic')
        hyp = cal_depth_hypo_train(depth_up)                                # (B, Dr, Hn, Wn)
        Dr = hyp.shape[1]
        ref_feat_l = ref_fp[level]
        _, Hl, Wl, Cl = ref_feat_l.shape
        ref_volume = jnp.broadcast_to(ref_feat_l[:, None], (B, Dr, Hl, Wl, Cl))
        warped = []
        for i in range(nsrc):
            rot, trans = build_proj(ref_in_ms[:, level], src_in_ms[:, i, level],
                                    ref_ex, src_ex[:, i])
            dmap = hyp.reshape(B, Dr, Hl * Wl)
            warped.append(warp_src_feature(src_fps[i][level], rot, trans, dmap, Hl, Wl))
        cost_volume = variance_cost_volume(ref_volume, warped)
        cost_reg2 = cost_reg_net(params['reg'], cost_volume)
        prob_volume, depth = softmax_depth_regression(cost_reg2, hyp)
        depth_est_list.append(depth)

    # ------------------ photometric confidence ------------------
    Dl = prob_volume.shape[1]
    pp = jnp.pad(prob_volume, ((0, 0), (1, 2), (0, 0), (0, 0)))
    prob_sum4 = pp[:, 0:Dl] + pp[:, 1:Dl + 1] + pp[:, 2:Dl + 2] + pp[:, 3:Dl + 3]
    d_idx = jnp.sum(prob_volume * jnp.arange(Dl, dtype=jnp.float32)[None, :, None, None], axis=1)
    d_idx = jnp.clip(d_idx.astype(jnp.int32), 0, Dl - 1)
    prob_conf = jnp.take_along_axis(prob_sum4, d_idx[:, None], axis=1)[:, 0]

    return {'depth_est_list': depth_est_list[::-1], 'prob_confidence': prob_conf}


# ----------------------------------------------------------------------------------
# Deterministic parameter initialization (synthetic; no checkpoint loading)
# ----------------------------------------------------------------------------------
def _fold_bn(key, cout):
    k1, k2, k3, k4 = jax.random.split(key, 4)
    gamma = 1.0 + 0.1 * jax.random.normal(k1, (cout,), jnp.float32)
    beta = 0.1 * jax.random.normal(k2, (cout,), jnp.float32)
    mean = 0.1 * jax.random.normal(k3, (cout,), jnp.float32)
    var = 0.5 + jax.random.uniform(k4, (cout,), jnp.float32)
    scale = gamma / jnp.sqrt(var + _BN_EPS)
    return scale, beta - mean * scale


def make_conv2d_bn(key, cin, cout):
    kw, kb = jax.random.split(key)
    w_pt = jax.random.normal(kw, (cout, cin, 3, 3), jnp.float32) * (1.0 / (9 * cin) ** 0.5)
    scale, bias = _fold_bn(kb, cout)
    w = jnp.transpose(w_pt, (2, 3, 1, 0)).reshape(9, cin, cout)     # tap-major (dy, dx)
    return {'w': w.astype(jnp.bfloat16), 'scale': scale, 'bias': bias}


def make_conv3d_bn(key, cin, cout, flat=False):
    kw, kb = jax.random.split(key)
    w_pt = jax.random.normal(kw, (cout, cin, 3, 3, 3), jnp.float32) * (1.0 / (27 * cin) ** 0.5)
    scale, bias = _fold_bn(kb, cout)
    w = jnp.transpose(w_pt, (2, 3, 4, 1, 0)).reshape(27, cin, cout)  # tap-major (dz, dy, dx)
    if flat:
        w = w.reshape(27 * cin, cout)                                # im2col layout (conv1)
    return {'w': w.astype(jnp.bfloat16), 'scale': scale, 'bias': bias}


def make_convtrans3d_bn_s1(key, cin, cout):
    # stride-1 ConvTranspose3d == dense conv with flipped / channel-swapped weights.
    kw, kb = jax.random.split(key)
    w_pt = jax.random.normal(kw, (cin, cout, 3, 3, 3), jnp.float32) * (1.0 / (27 * cin) ** 0.5)
    scale, bias = _fold_bn(kb, cout)
    w = jnp.flip(w_pt, axis=(2, 3, 4)).transpose(2, 3, 4, 0, 1).reshape(27, cin, cout)
    return {'w': w.astype(jnp.bfloat16), 'scale': scale, 'bias': bias}


def make_convtrans3d_bn_s2(key, cin, cout):
    # stride-2 ConvTranspose3d: per-output-parity weight subsets (tap-major).
    kw, kb = jax.random.split(key)
    w_pt = jax.random.normal(kw, (cin, cout, 3, 3, 3), jnp.float32) * (1.0 / (27 * cin) ** 0.5)
    scale, bias = _fold_bn(kb, cout)
    w_par = []
    for pd, ph, pw in _PARITIES:
        ws = []
        for _, kd in _TC_AXIS_TAPS[pd]:
            for _, kh in _TC_AXIS_TAPS[ph]:
                for _, kw_ in _TC_AXIS_TAPS[pw]:
                    ws.append(w_pt[:, :, kd, kh, kw_])               # (Cin, Cout)
        w_par.append(jnp.stack(ws, axis=0).astype(jnp.bfloat16))     # (T, Cin, Cout)
    return {'w_par': tuple(w_par), 'scale': scale, 'bias': bias}


def make_conv3d_prob0(key, cin):
    kw, kb = jax.random.split(key)
    w_pt = jax.random.normal(kw, (1, cin, 3, 3, 3), jnp.float32) * (1.0 / (27 * cin) ** 0.5)
    b = 0.01 * jax.random.normal(kb, (1,), jnp.float32)
    wt = jnp.transpose(w_pt[0], (1, 2, 3, 0)).reshape(27, cin)        # tap-major rows
    w8 = jnp.tile(wt[:, None, :], (1, 8, 1)).astype(jnp.bfloat16)     # sublane-replicated
    sb = jnp.concatenate([jnp.ones((1,), jnp.float32), b])            # [scale=1, bias]
    return {'w8': w8, 'sb': sb}


def init_params(key):
    ks = iter(jax.random.split(key, 64))
    fp = {name: make_conv2d_bn(next(ks), ci, co) for name, ci, co in _FP_LAYERS}
    reg = {}
    for name, ci, co in [('conv0', 16, 16), ('conv0a', 16, 16), ('conv2', 32, 32),
                         ('conv2a', 32, 32), ('conv3', 32, 64), ('conv4', 64, 64),
                         ('conv4a', 64, 64)]:
        reg[name] = make_conv3d_bn(next(ks), ci, co)
    reg['conv1'] = make_conv3d_bn(next(ks), 16, 32, flat=True)        # stride-2 / im2col
    reg['conv5'] = make_convtrans3d_bn_s1(next(ks), 64, 32)
    reg['conv6'] = make_convtrans3d_bn_s2(next(ks), 32, 16)
    reg['prob0'] = make_conv3d_prob0(next(ks), 16)
    return {'fp': fp, 'reg': reg}


# ----------------------------------------------------------------------------------
if __name__ == "__main__":
    key = jax.random.PRNGKey(0)
    keys = jax.random.split(key, 8)

    # small shapes: B=1, nsrc=2, nscale=2, 32x32 images, 8 depth hypotheses
    args = dict(nsrc=2, nscale=2, mode='train', nhypo=8)
    B, H0, W0 = 1, 32, 32

    params = init_params(keys[0])
    ref_img = jax.random.uniform(keys[1], (B, 3, H0, W0), jnp.float32)
    src_imgs = jax.random.uniform(keys[2], (B, args['nsrc'], 3, H0, W0), jnp.float32)

    Kmat = jnp.array([[32.0, 0.0, W0 / 2.0],
                      [0.0, 32.0, H0 / 2.0],
                      [0.0, 0.0, 1.0]], jnp.float32)
    ref_in = jnp.tile(Kmat[None], (B, 1, 1))
    src_in = jnp.tile(Kmat[None, None], (B, args['nsrc'], 1, 1))

    ref_ex = jnp.tile(jnp.eye(4, dtype=jnp.float32)[None], (B, 1, 1))
    e1 = jnp.eye(4, dtype=jnp.float32).at[0, 3].set(10.0)
    e2 = jnp.eye(4, dtype=jnp.float32).at[0, 3].set(-10.0)
    src_ex = jnp.tile(jnp.stack([e1, e2], axis=0)[None], (B, 1, 1, 1))

    depth_min = jnp.full((B,), 425.0, jnp.float32)
    depth_max = jnp.full((B,), 935.0, jnp.float32)

    out = network_forward(params, args, ref_img, src_imgs, ref_in, src_in,
                          ref_ex, src_ex, depth_min, depth_max)
    out = jax.tree_util.tree_map(jax.block_until_ready, out)
    assert out['depth_est_list'][0].shape == (B, 32, 32)
    assert out['depth_est_list'][1].shape == (B, 16, 16)
    assert out['prob_confidence'].shape == (B, 32, 32)
    print("KERNEL_OK")
</pallas_src>

<mosaic_0001>
module attributes {stable_mosaic.version = 11 : i64} {
  func.func @_direct_conv_kernel(%arg0: i32, %arg1: i32, %arg2: memref<1x1x1190x8xf32, #tpu.memory_space<vmem>>, %arg3: memref<9x8x64xbf16, #tpu.memory_space<vmem>>, %arg4: memref<1x64xf32, #tpu.memory_space<vmem>>, %arg5: memref<1x64xf32, #tpu.memory_space<vmem>>, %arg6: memref<1x1x1088x64xf32, #tpu.memory_space<vmem>>) attributes {dimension_semantics = [#tpu.dimension_semantics<parallel>, #tpu.dimension_semantics<parallel>], iteration_bounds = array<i64: 3, 1>, scalar_prefetch = 0 : i64, scratch_operands = 0 : i64, tpu.core_type = #tpu.core_type<tc>, window_params = [{transform_indices = @transform_0, window_bounds = array<i64: 1, 1, 1190, 8>}, {pipeline_mode = #tpu.pipeline_mode<synchronous>, transform_indices = @transform_1, window_bounds = array<i64: 9, 8, 64>}, {pipeline_mode = #tpu.pipeline_mode<synchronous>, transform_indices = @transform_2, window_bounds = array<i64: 1, 64>}, {pipeline_mode = #tpu.pipeline_mode<synchronous>, transform_indices = @transform_3, window_bounds = array<i64: 1, 64>}, {transform_indices = @transform_4, window_bounds = array<i64: 1, 1, 1088, 64>}]} {
    %cst = arith.constant 0.000000e+00 : f32
    %0 = vector.broadcast %cst : f32 to vector<1088x64xf32>
    %c0 = arith.constant 0 : index
    %c0_0 = arith.constant 0 : index
    %c0_1 = arith.constant 0 : index
    %c0_2 = arith.constant 0 : index
    %1 = vector.load %arg2[%c0, %c0_0, %c0_1, %c0_2] : memref<1x1x1190x8xf32, #tpu.memory_space<vmem>>, vector<1x1x1088x8xf32>
    %2 = vector.shape_cast %1 : vector<1x1x1088x8xf32> to vector<1088x8xf32>
    %3 = arith.truncf %2 : vector<1088x8xf32> to vector<1088x8xbf16>
    %c0_3 = arith.constant 0 : index
    %c0_4 = arith.constant 0 : index
    %c0_5 = arith.constant 0 : index
    %4 = vector.load %arg3[%c0_3, %c0_4, %c0_5] : memref<9x8x64xbf16, #tpu.memory_space<vmem>>, vector<1x8x64xbf16>
    %5 = vector.shape_cast %4 : vector<1x8x64xbf16> to vector<8x64xbf16>
    %cst_6 = arith.constant dense<0.000000e+00> : vector<1088x64xf32>
    %6 = tpu.matmul %3, %5, %cst_6 {dimension_numbers = #tpu.dot_dimension_numbers<[1], [0], [0], [1], [0, 0, 1, 1], [], []>} : vector<1088x8xbf16>, vector<8x64xbf16>, vector<1088x64xf32> -> vector<1088x64xf32>
    %7 = arith.addf %0, %6 : vector<1088x64xf32>
    %c0_7 = arith.constant 0 : index
    %c0_8 = arith.constant 0 : index
    %c1 = arith.constant 1 : index
    %c0_9 = arith.constant 0 : index
    %8 = vector.load %arg2[%c0_7, %c0_8, %c1, %c0_9] : memref<1x1x1190x8xf32, #tpu.memory_space<vmem>>, vector<1x1x1088x8xf32>
    %9 = vector.shape_cast %8 : vector<1x1x1088x8xf32> to vector<1088x8xf32>
    %10 = arith.truncf %9 : vector<1088x8xf32> to vector<1088x8xbf16>
    %c1_10 = arith.constant 1 : index
    %c0_11 = arith.constant 0 : index
    %c0_12 = arith.constant 0 : index
    %11 = vector.load %arg3[%c1_10, %c0_11, %c0_12] : memref<9x8x64xbf16, #tpu.memory_space<vmem>>, vector<1x8x64xbf16>
    %12 = vector.shape_cast %11 : vector<1x8x64xbf16> to vector<8x64xbf16>
    %cst_13 = arith.constant dense<0.000000e+00> : vector<1088x64xf32>
    %13 = tpu.matmul %10, %12, %cst_13 {dimension_numbers = #tpu.dot_dimension_numbers<[1], [0], [0], [1], [0, 0, 1, 1], [], []>} : vector<1088x8xbf16>, vector<8x64xbf16>, vector<1088x64xf32> -> vector<1088x64xf32>
    %14 = arith.addf %7, %13 : vector<1088x64xf32>
    %c0_14 = arith.constant 0 : index
    %c0_15 = arith.constant 0 : index
    %c2 = arith.constant 2 : index
    %c0_16 = arith.constant 0 : index
    %15 = vector.load %arg2[%c0_14, %c0_15, %c2, %c0_16] : memref<1x1x1190x8xf32, #tpu.memory_space<vmem>>, vector<1x1x1088x8xf32>
    %16 = vector.shape_cast %15 : vector<1x1x1088x8xf32> to vector<1088x8xf32>
    %17 = arith.truncf %16 : vector<1088x8xf32> to vector<1088x8xbf16>
    %c2_17 = arith.constant 2 : index
    %c0_18 = arith.constant 0 : index
    %c0_19 = arith.constant 0 : index
    %18 = vector.load %arg3[%c2_17, %c0_18, %c0_19] : memref<9x8x64xbf16, #tpu.memory_space<vmem>>, vector<1x8x64xbf16>
    %19 = vector.shape_cast %18 : vector<1x8x64xbf16> to vector<8x64xbf16>
    %cst_20 = arith.constant dense<0.000000e+00> : vector<1088x64xf32>
    %20 = tpu.matmul %17, %19, %cst_20 {dimension_numbers = #tpu.dot_dimension_numbers<[1], [0], [0], [1], [0, 0, 1, 1], [], []>} : vector<1088x8xbf16>, vector<8x64xbf16>, vector<1088x64xf32> -> vector<1088x64xf32>
    %21 = arith.addf %14, %20 : vector<1088x64xf32>
    %c0_21 = arith.constant 0 : index
    %c0_22 = arith.constant 0 : index
    %c34 = arith.constant 34 : index
    %c0_23 = arith.constant 0 : index
    %22 = vector.load %arg2[%c0_21, %c0_22, %c34, %c0_23] : memref<1x1x1190x8xf32, #tpu.memory_space<vmem>>, vector<1x1x1088x8xf32>
    %23 = vector.shape_cast %22 : vector<1x1x1088x8xf32> to vector<1088x8xf32>
    %24 = arith.truncf %23 : vector<1088x8xf32> to vector<1088x8xbf16>
    %c3 = arith.constant 3 : index
    %c0_24 = arith.constant 0 : index
    %c0_25 = arith.constant 0 : index
    %25 = vector.load %arg3[%c3, %c0_24, %c0_25] : memref<9x8x64xbf16, #tpu.memory_space<vmem>>, vector<1x8x64xbf16>
    %26 = vector.shape_cast %25 : vector<1x8x64xbf16> to vector<8x64xbf16>
    %cst_26 = arith.constant dense<0.000000e+00> : vector<1088x64xf32>
    %27 = tpu.matmul %24, %26, %cst_26 {dimension_numbers = #tpu.dot_dimension_numbers<[1], [0], [0], [1], [0, 0, 1, 1], [], []>} : vector<1088x8xbf16>, vector<8x64xbf16>, vector<1088x64xf32> -> vector<1088x64xf32>
    %28 = arith.addf %21, %27 : vector<1088x64xf32>
    %c0_27 = arith.constant 0 : index
    %c0_28 = arith.constant 0 : index
    %c35 = arith.constant 35 : index
    %c0_29 = arith.constant 0 : index
    %29 = vector.load %arg2[%c0_27, %c0_28, %c35, %c0_29] : memref<1x1x1190x8xf32, #tpu.memory_space<vmem>>, vector<1x1x1088x8xf32>
    %30 = vector.shape_cast %29 : vector<1x1x1088x8xf32> to vector<1088x8xf32>
    %31 = arith.truncf %30 : vector<1088x8xf32> to vector<1088x8xbf16>
    %c4 = arith.constant 4 : index
    %c0_30 = arith.constant 0 : index
    %c0_31 = arith.constant 0 : index
    %32 = vector.load %arg3[%c4, %c0_30, %c0_31] : memref<9x8x64xbf16, #tpu.memory_space<vmem>>, vector<1x8x64xbf16>
    %33 = vector.shape_cast %32 : vector<1x8x64xbf16> to vector<8x64xbf16>
    %cst_32 = arith.constant dense<0.000000e+00> : vector<1088x64xf32>
    %34 = tpu.matmul %31, %33, %cst_32 {dimension_numbers = #tpu.dot_dimension_numbers<[1], [0], [0], [1], [0, 0, 1, 1], [], []>} : vector<1088x8xbf16>, vector<8x64xbf16>, vector<1088x64xf32> -> vector<1088x64xf32>
    %35 = arith.addf %28, %34 : vector<1088x64xf32>
    %c0_33 = arith.constant 0 : index
    %c0_34 = arith.constant 0 : index
    %c36 = arith.constant 36 : index
    %c0_35 = arith.constant 0 : index
    %36 = vector.load %arg2[%c0_33, %c0_34, %c36, %c0_35] : memref<1x1x1190x8xf32, #tpu.memory_space<vmem>>, vector<1x1x1088x8xf32>
    %37 = vector.shape_cast %36 : vector<1x1x1088x8xf32> to vector<1088x8xf32>
    %38 = arith.truncf %37 : vector<1088x8xf32> to vector<1088x8xbf16>
    %c5 = arith.constant 5 : index
    %c0_36 = arith.constant 0 : index
    %c0_37 = arith.constant 0 : index
    %39 = vector.load %arg3[%c5, %c0_36, %c0_37] : memref<9x8x64xbf16, #tpu.memory_space<vmem>>, vector<1x8x64xbf16>
    %40 = vector.shape_cast %39 : vector<1x8x64xbf16> to vector<8x64xbf16>
    %cst_38 = arith.constant dense<0.000000e+00> : vector<1088x64xf32>
    %41 = tpu.matmul %38, %40, %cst_38 {dimension_numbers = #tpu.dot_dimension_numbers<[1], [0], [0], [1], [0, 0, 1, 1], [], []>} : vector<1088x8xbf16>, vector<8x64xbf16>, vector<1088x64xf32> -> vector<1088x64xf32>
    %42 = arith.addf %35, %41 : vector<1088x64xf32>
    %c0_39 = arith.constant 0 : index
    %c0_40 = arith.constant 0 : index
    %c68 = arith.constant 68 : index
    %c0_41 = arith.constant 0 : index
    %43 = vector.load %arg2[%c0_39, %c0_40, %c68, %c0_41] : memref<1x1x1190x8xf32, #tpu.memory_space<vmem>>, vector<1x1x1088x8xf32>
    %44 = vector.shape_cast %43 : vector<1x1x1088x8xf32> to vector<1088x8xf32>
    %45 = arith.truncf %44 : vector<1088x8xf32> to vector<1088x8xbf16>
    %c6 = arith.constant 6 : index
    %c0_42 = arith.constant 0 : index
    %c0_43 = arith.constant 0 : index
    %46 = vector.load %arg3[%c6, %c0_42, %c0_43] : memref<9x8x64xbf16, #tpu.memory_space<vmem>>, vector<1x8x64xbf16>
    %47 = vector.shape_cast %46 : vector<1x8x64xbf16> to vector<8x64xbf16>
    %cst_44 = arith.constant dense<0.000000e+00> : vector<1088x64xf32>
    %48 = tpu.matmul %45, %47, %cst_44 {dimension_numbers = #tpu.dot_dimension_numbers<[1], [0], [0], [1], [0, 0, 1, 1], [], []>} : vector<1088x8xbf16>, vector<8x64xbf16>, vector<1088x64xf32> -> vector<1088x64xf32>
    %49 = arith.addf %42, %48 : vector<1088x64xf32>
    %c0_45 = arith.constant 0 : index
    %c0_46 = arith.constant 0 : index
    %c69 = arith.constant 69 : index
    %c0_47 = arith.constant 0 : index
    %50 = vector.load %arg2[%c0_45, %c0_46, %c69, %c0_47] : memref<1x1x1190x8xf32, #tpu.memory_space<vmem>>, vector<1x1x1088x8xf32>
    %51 = vector.shape_cast %50 : vector<1x1x1088x8xf32> to vector<1088x8xf32>
    %52 = arith.truncf %51 : vector<1088x8xf32> to vector<1088x8xbf16>
    %c7 = arith.constant 7 : index
    %c0_48 = arith.constant 0 : index
    %c0_49 = arith.constant 0 : index
    %53 = vector.load %arg3[%c7, %c0_48, %c0_49] : memref<9x8x64xbf16, #tpu.memory_space<vmem>>, vector<1x8x64xbf16>
    %54 = vector.shape_cast %53 : vector<1x8x64xbf16> to vector<8x64xbf16>
    %cst_50 = arith.constant dense<0.000000e+00> : vector<1088x64xf32>
    %55 = tpu.matmul %52, %54, %cst_50 {dimension_numbers = #tpu.dot_dimension_numbers<[1], [0], [0], [1], [0, 0, 1, 1], [], []>} : vector<1088x8xbf16>, vector<8x64xbf16>, vector<1088x64xf32> -> vector<1088x64xf32>
    %56 = arith.addf %49, %55 : vector<1088x64xf32>
    %c0_51 = arith.constant 0 : index
    %c0_52 = arith.constant 0 : index
    %c70 = arith.constant 70 : index
    %c0_53 = arith.constant 0 : index
    %57 = vector.load %arg2[%c0_51, %c0_52, %c70, %c0_53] : memref<1x1x1190x8xf32, #tpu.memory_space<vmem>>, vector<1x1x1088x8xf32>
    %58 = vector.shape_cast %57 : vector<1x1x1088x8xf32> to vector<1088x8xf32>
    %59 = arith.truncf %58 : vector<1088x8xf32> to vector<1088x8xbf16>
    %c8 = arith.constant 8 : index
    %c0_54 = arith.constant 0 : index
    %c0_55 = arith.constant 0 : index
    %60 = vector.load %arg3[%c8, %c0_54, %c0_55] : memref<9x8x64xbf16, #tpu.memory_space<vmem>>, vector<1x8x64xbf16>
    %61 = vector.shape_cast %60 : vector<1x8x64xbf16> to vector<8x64xbf16>
    %cst_56 = arith.constant dense<0.000000e+00> : vector<1088x64xf32>
    %62 = tpu.matmul %59, %61, %cst_56 {dimension_numbers = #tpu.dot_dimension_numbers<[1], [0], [0], [1], [0, 0, 1, 1], [], []>} : vector<1088x8xbf16>, vector<8x64xbf16>, vector<1088x64xf32> -> vector<1088x64xf32>
    %63 = arith.addf %56, %62 : vector<1088x64xf32>
    %c0_57 = arith.constant 0 : index
    %c0_58 = arith.constant 0 : index
    %64 = vector.load %arg4[%c0_57, %c0_58] : memref<1x64xf32, #tpu.memory_space<vmem>>, vector<1x64xf32>
    %65 = vector.broadcast %64 : vector<1x64xf32> to vector<1088x64xf32>
    %66 = arith.mulf %63, %65 : vector<1088x64xf32>
    %c0_59 = arith.constant 0 : index
    %c0_60 = arith.constant 0 : index
    %67 = vector.load %arg5[%c0_59, %c0_60] : memref<1x64xf32, #tpu.memory_space<vmem>>, vector<1x64xf32>
    %68 = vector.broadcast %67 : vector<1x64xf32> to vector<1088x64xf32>
    %69 = arith.addf %66, %68 : vector<1088x64xf32>
    %cst_61 = arith.constant 0.000000e+00 : f32
    %70 = vector.broadcast %cst_61 : f32 to vector<1088x64xf32>
    %71 = arith.maximumf %69, %70 : vector<1088x64xf32>
    %c0_62 = arith.constant 0 : index
    %c0_63 = arith.constant 0 : index
    %c0_64 = arith.constant 0 : index
    %c0_65 = arith.constant 0 : index
    %72 = vector.load %arg6[%c0_62, %c0_63, %c0_64, %c0_65] : memref<1x1x1088x64xf32, #tpu.memory_space<vmem>>, vector<1x1x1088x64xf32>
    %73 = vector.shape_cast %72 : vector<1x1x1088x64xf32> to vector<1088x64xf32>
    %74 = vector.shape_cast %71 : vector<1088x64xf32> to vector<1x1x1088x64xf32>
    tpu.vector_store %arg6[%c0_62, %c0_63, %c0_64, %c0_65], %74 {strides = array<i32>} : memref<1x1x1088x64xf32, #tpu.memory_space<vmem>>, vector<1x1x1088x64xf32>,
    return
  }
  func.func @transform_0(%arg0: i32, %arg1: i32) -> (i32, i32, i32, i32) {
    %c0_i32 = arith.constant 0 : i32
    %0 = arith.addi %arg1, %c0_i32 : i32
    %c0_i32_0 = arith.constant 0 : i32
    %c0_i32_1 = arith.constant 0 : i32
    %c0_i32_2 = arith.constant 0 : i32
    return %arg0, %0, %c0_i32_0, %c0_i32_1 : i32, i32, i32, i32
  }
  func.func @transform_1(%arg0: i32, %arg1: i32) -> (i32, i32, i32) {
    %c0_i32 = arith.constant 0 : i32
    %c0_i32_0 = arith.constant 0 : i32
    %c0_i32_1 = arith.constant 0 : i32
    %c0_i32_2 = arith.constant 0 : i32
    return %c0_i32, %c0_i32_0, %c0_i32_1 : i32, i32, i32
  }
  func.func @transform_2(%arg0: i32, %arg1: i32) -> (i32, i32) {
    %c0_i32 = arith.constant 0 : i32
    %c0_i32_0 = arith.constant 0 : i32
    %c0_i32_1 = arith.constant 0 : i32
    return %c0_i32, %c0_i32_0 : i32, i32
  }
  func.func @transform_3(%arg0: i32, %arg1: i32) -> (i32, i32) {
    %c0_i32 = arith.constant 0 : i32
    %c0_i32_0 = arith.constant 0 : i32
    %c0_i32_1 = arith.constant 0 : i32
    return %c0_i32, %c0_i32_0 : i32, i32
  }
  func.func @transform_4(%arg0: i32, %arg1: i32) -> (i32, i32, i32, i32) {
    %c0_i32 = arith.constant 0 : i32
    %c0_i32_0 = arith.constant 0 : i32
    %c0_i32_1 = arith.constant 0 : i32
    return %arg0, %arg1, %c0_i32, %c0_i32_0 : i32, i32, i32, i32
  }
}

</mosaic_0001>

<bundles_post_ra>
// kernel: tpu_custom_call.1
= control target key start
LH: loop header
LB: loop body
LE: loop exit
PB: predicated region body
PF: predicated region fallthrough
CT: control target
= control target key end

     0   :  { %s13334_s15 = smov 0   ;;  %s13336_s16 = smov 0   ;;  %s17355_s0 = inlined_call_operand.vmem [shape: f32[3,1,1190,8], index: 0, kind: input, shape index: {}]   ;;  %s17356_s1 = inlined_call_operand.vmem [shape: bf16[9,8,64], index: 1, kind: input, shape index: {}]   ;;  %s17357_s2 = inlined_call_operand.vmem [shape: f32[1,64], index: 2, kind: input, shape index: {}]   ;;  %s17358_s3 = inlined_call_operand.vmem [shape: f32[1,64], index: 3, kind: input, shape index: {}]   ;;  %s17359_s4 = inlined_call_operand.vmem [shape: f32[3,1,1088,64], index: 4, kind: output, shape index: {}]  }
   0x1   :  { %s13338_s17 = smov 0  }
   0x2 LB: > { %s26_s18 = sadd.s32 1, %s13303_s16  ;;  %p10753_p0 = scmp.ge.s32.totalorder %s13307_s17, 1  ;;  %s13307_s17 = sphi %s13338_s17, %s14_s17   ;;  %s13303_s16 = sphi %s13336_s16, %s18131_s16   ;;  %s13299_s15 = sphi %s13334_s15, %s18130_s15  }
   0x3   : > { %p28_p1 = scmp.ge.s32.totalorder %s26_s18, 3  ;;  %p182_p2 = scmp.lt.s32.totalorder %s13307_s17, 4 }
   0x5   : > { %s18133_s18 = smov (%p28_p1, %s26_s18), 0  ;;  %p183_p3 = pnand %p10753_p0, %p182_p2 }
   0x7   : > { %186 = sbr.rel (%p183_p3) target bundleno = 1449 (0x5a9), region = 36 }
   0xc   : > { %v10756_v0 = vld [vmem:[%s17356_s1 + $0x4] sm:$0xf]  ;;  %vm851_vm0 = vcmask 1043456   ;;  %p216_p4 = scmp.lt.s32.totalorder %s13299_s15, 2  ;;  %v439_v2 = vld [vmem:[%s17356_s1] sm:$0xf] }
   0xd   : > { %13246 = vmatprep.subr.msk.bf16.mxu1 %vm851_vm0, %v10756_v0  ;;  %13245 = vmatprep.subr.msk.bf16.mxu0 %vm851_vm0, %v10756_v0  ;;  %v853_v1 = vsel %vm851_vm0, %v10756_v0, 0  ;;  %v10893_v3 = vld [vmem:[%s17356_s1 + $0x8] sm:$0xf]  ;;  %vm646_vm1 = vcmask 64512   ;;  %v1637_v18 = vsel %vm851_vm0, %v439_v2, 0  ;;  %vm10520_vm2 = vcmask 523264  }
   0xe   : > { %13244 = vmatpush3.bf16.msra.mxu1 %v853_v1  ;;  %12002 = vmatpush3.bf16.msra.mxu0 %v853_v1  ;;  %s18135_s15 = smov (!%p216_p4, %s13299_s15), 2  ;;  %v2627_v15 = vsel %vm851_vm0, %v10893_v3, 0 }
   0xf   : > { %13247 = vmatprep.subr.msk.bf16.mxu1 %vm851_vm0, %v439_v2  ;;  %13248 = vmatprep.subr.msk.bf16.mxu0 %vm851_vm0, %v10893_v3  ;;  %s13255_s25 = smul.u32 1192, %s18135_s15 }
  0x10   : > { %s13256_s21 = smul.u32 1088, %s18135_s15 }
  0x11   : > { %s13372_s28 = scalar_lea.vmem %s17355_s0, %s13255_s25 }
  0x12   : > { %v440_v4 = vld [vmem:[%s13372_s28 + $0x1] sm:$0xff]  ;;  %v441_v5 = vld [vmem:[%s13372_s28 + $0x9] sm:$0xff]  ;;  %v442_v9 = vld [vmem:[%s13372_s28 + $0x11] sm:$0xff]  ;;  %s16560_s25 = scalar_lea.vmem %s17359_s4, %s13256_s21 }
  0x13   : > { %v508_v6 = vld [vmem:[%s13372_s28 + $0x221] sm:$0xff]  ;;  %v576_v7 = vpack.c.bf16 %v441_v5, %v440_v4  ;;  %v509_v8 = vld [vmem:[%s13372_s28 + $0x229] sm:$0xff]  ;;  %v443_v10 = vld [vmem:[%s13372_s28 + $0x19] sm:$0xff] }
  0x14   : > { %v610_v11 = vpack.c.bf16 %v509_v8, %v508_v6  ;;  %v577_v12 = vpack.c.bf16 %v443_v10, %v442_v9  ;;  %v510_v13 = vld [vmem:[%s13372_s28 + $0x231] sm:$0xff]  ;;  %v511_v14 = vld [vmem:[%s13372_s28 + $0x239] sm:$0xff]  ;;  %v444_v16 = vld [vmem:[%s13372_s28 + $0x21] sm:$0xff] }
  0x15   : > { %12003 = vmatprep.mubr.msk.bf16.mxu0 %vm646_vm1, %v576_v7  ;;  %v611_v17 = vpack.c.bf16 %v511_v14, %v510_v13  ;;  %v445_v19 = vld [vmem:[%s13372_s28 + $0x29] sm:$0xff]  ;;  %v512_v20 = vld [vmem:[%s13372_s28 + $0x241] sm:$0xff]  ;;  %v446_v24 = vld [vmem:[%s13372_s28 + $0x31] sm:$0xff] }
  0x16   : > { %v513_v21 = vld [vmem:[%s13372_s28 + $0x249] sm:$0xff]  ;;  %12071 = vmatprep.mubr.msk.bf16.mxu1 %vm646_vm1, %v610_v11  ;;  %12004 = vmatmul.mubr.msk.bf16.vlgmr.msra.gmra.mxu0 %vm646_vm1, %v577_v12  ;;  %v578_v22 = vpack.c.bf16 %v445_v19, %v444_v16  ;;  %v447_v25 = vld [vmem:[%s13372_s28 + $0x39] sm:$0xff]  ;;  %v514_v26 = vld [vmem:[%s13372_s28 + $0x251] sm:$0xff] }
  0x17   : > { %v612_v23 = vpack.c.bf16 %v513_v21, %v512_v20  ;;  %12072 = vmatmul.mubr.msk.bf16.vlgmr.msra.gmra.mxu1 %vm646_vm1, %v611_v17  ;;  %12278 = vmatpush3.bf16.msra.mxu0 %v2627_v15  ;;  %v515_v27 = vld [vmem:[%s13372_s28 + $0x259] sm:$0xff]  ;;  %v448_v28 = vld [vmem:[%s13372_s28 + $0x41] sm:$0xff]  ;;  %v449_v29 = vld [vmem:[%s13372_s28 + $0x49] sm:$0xff]  ;;  %v579_v32 = vpack.c.bf16 %v447_v25, %v446_v24 }
  0x18   : > { %12140 = vmatpush3.bf16.msra.mxu1 %v1637_v18  ;;  %12007 = vmatprep.mubr.msk.bf16.mxu0 %vm646_vm1, %v578_v22  ;;  %v516_v30 = vld [vmem:[%s13372_s28 + $0x261] sm:$0xff]  ;;  %v517_v31 = vld [vmem:[%s13372_s28 + $0x269] sm:$0xff]  ;;  %v613_v33 = vpack.c.bf16 %v515_v27, %v514_v26  ;;  %v580_v34 = vpack.c.bf16 %v449_v29, %v448_v28  ;;  %v450_v36 = vld [vmem:[%s13372_s28 + $0x51] sm:$0xff] }
  0x19   : > { %12075 = vmatprep.mubr.msk.bf16.mxu1 %vm646_vm1, %v612_v23  ;;  %v614_v35 = vpack.c.bf16 %v517_v31, %v516_v30  ;;  %v451_v37 = vld [vmem:[%s13372_s28 + $0x59] sm:$0xff]  ;;  %v518_v38 = vld [vmem:[%s13372_s28 + $0x271] sm:$0xff]  ;;  %v452_v40 = vld [vmem:[%s13372_s28 + $0x61] sm:$0xff] }
  0x1a   : > { %v519_v39 = vld [vmem:[%s13372_s28 + $0x279] sm:$0xff]  ;;  %v453_v41 = vld [vmem:[%s13372_s28 + $0x69] sm:$0xff]  ;;  %v520_v42 = vld [vmem:[%s13372_s28 + $0x281] sm:$0xff]  ;;  %v581_v44 = vpack.c.bf16 %v451_v37, %v450_v36 }
  0x1b   : > { %v521_v43 = vld [vmem:[%s13372_s28 + $0x289] sm:$0xff]  ;;  %v615_v45 = vpack.c.bf16 %v519_v39, %v518_v38  ;;  %v582_v46 = vpack.c.bf16 %v453_v41, %v452_v40  ;;  %v454_v48 = vld [vmem:[%s13372_s28 + $0x71] sm:$0xff]  ;;  %v455_v49 = vld [vmem:[%s13372_s28 + $0x79] sm:$0xff] }
  0x1c   : > { %v616_v47 = vpack.c.bf16 %v521_v43, %v520_v42  ;;  %v522_v50 = vld [vmem:[%s13372_s28 + $0x291] sm:$0xff]  ;;  %v523_v51 = vld [vmem:[%s13372_s28 + $0x299] sm:$0xff]  ;;  %v456_v52 = vld [vmem:[%s13372_s28 + $0x81] sm:$0xff]  ;;  %v583_v56 = vpack.c.bf16 %v455_v49, %v454_v48 }
  0x1d   : > { %v457_v53 = vld [vmem:[%s13372_s28 + $0x89] sm:$0xff]  ;;  %v524_v54 = vld [vmem:[%s13372_s28 + $0x2a1] sm:$0xff]  ;;  %v617_v57 = vpack.c.bf16 %v523_v51, %v522_v50  ;;  %v458_v60 = vld [vmem:[%s13372_s28 + $0x91] sm:$0xff] }
  0x1e   : > { %12008 = vmatmul.mubr.msk.bf16.gmra.mxu0 %vm646_vm1, %v579_v32  ;;  %v525_v55 = vld [vmem:[%s13372_s28 + $0x2a9] sm:$0xff]  ;;  %v584_v58 = vpack.c.bf16 %v457_v53, %v456_v52  ;;  %v459_v61 = vld [vmem:[%s13372_s28 + $0x99] sm:$0xff]  ;;  %v526_v62 = vld [vmem:[%s13372_s28 + $0x2b1] sm:$0xff] }
  0x1f   : > { %12076 = vmatmul.mubr.msk.bf16.gmra.mxu1 %vm646_vm1, %v613_v33  ;;  %12011 = vmatprep.mubr.msk.bf16.mxu0 %vm646_vm1, %v580_v34  ;;  %v618_v59 = vpack.c.bf16 %v525_v55, %v524_v54  ;;  %v527_v63 = vld [vmem:[%s13372_s28 + $0x2b9] sm:$0xff]  ;;  %v460_v0 = vld [vmem:[%s13372_s28 + $0xa1] sm:$0xff]  ;;  %v461_v1 = vld [vmem:[%s13372_s28 + $0xa9] sm:$0xff]  ;;  %v585_v4 = vpack.c.bf16 %v459_v61, %v458_v60 }
  0x20   : > { %12079 = vmatprep.mubr.msk.bf16.mxu1 %vm646_vm1, %v614_v35  ;;  %v528_v2 = vld [vmem:[%s13372_s28 + $0x2c1] sm:$0xff]  ;;  %v529_v3 = vld [vmem:[%s13372_s28 + $0x2c9] sm:$0xff]  ;;  %v619_v5 = vpack.c.bf16 %v527_v63, %v526_v62  ;;  %v586_v6 = vpack.c.bf16 %v461_v1, %v460_v0  ;;  %v462_v8 = vld [vmem:[%s13372_s28 + $0xb1] sm:$0xff] }
  0x21   : > { %v620_v7 = vpack.c.bf16 %v529_v3, %v528_v2  ;;  %v463_v9 = vld [vmem:[%s13372_s28 + $0xb9] sm:$0xff]  ;;  %v530_v10 = vld [vmem:[%s13372_s28 + $0x2d1] sm:$0xff]  ;;  %v464_v12 = vld [vmem:[%s13372_s28 + $0xc1] sm:$0xff] }
  0x22   : > { %v531_v11 = vld [vmem:[%s13372_s28 + $0x2d9] sm:$0xff]  ;;  %v465_v13 = vld [vmem:[%s13372_s28 + $0xc9] sm:$0xff]  ;;  %v532_v14 = vld [vmem:[%s13372_s28 + $0x2e1] sm:$0xff]  ;;  %v587_v16 = vpack.c.bf16 %v463_v9, %v462_v8 }
  0x23   : > { %v533_v15 = vld [vmem:[%s13372_s28 + $0x2e9] sm:$0xff]  ;;  %v621_v17 = vpack.c.bf16 %v531_v11, %v530_v10  ;;  %v588_v18 = vpack.c.bf16 %v465_v13, %v464_v12  ;;  %v466_v20 = vld [vmem:[%s13372_s28 + $0xd1] sm:$0xff]  ;;  %v467_v21 = vld [vmem:[%s13372_s28 + $0xd9] sm:$0xff] }
  0x24   : > { %v622_v19 = vpack.c.bf16 %v533_v15, %v532_v14  ;;  %v534_v22 = vld [vmem:[%s13372_s28 + $0x2f1] sm:$0xff]  ;;  %v535_v23 = vld [vmem:[%s13372_s28 + $0x2f9] sm:$0xff]  ;;  %v468_v24 = vld [vmem:[%s13372_s28 + $0xe1] sm:$0xff]  ;;  %v589_v29 = vpack.c.bf16 %v467_v21, %v466_v20 }
  0x25   : > { %v469_v25 = vld [vmem:[%s13372_s28 + $0xe9] sm:$0xff]  ;;  %v536_v27 = vld [vmem:[%s13372_s28 + $0x301] sm:$0xff]  ;;  %v623_v31 = vpack.c.bf16 %v535_v23, %v534_v22  ;;  %v470_v34 = vld [vmem:[%s13372_s28 + $0xf1] sm:$0xff] }
  0x26   : > { %12012 = vmatmul.mubr.msk.bf16.gmra.mxu0 %vm646_vm1, %v581_v44  ;;  %v13463_v26 = vld [vmem:[%s17356_s1 + $0xc] sm:$0xf]  ;;  %v13472_v30 = vld [vmem:[%s17356_s1 + $0x10] sm:$0xf]  ;;  %v590_v32 = vpack.c.bf16 %v469_v25, %v468_v24  ;;  %v471_v35 = vld [vmem:[%s13372_s28 + $0xf9] sm:$0xff] }
  0x27   : > { %12080 = vmatmul.mubr.msk.bf16.gmra.mxu1 %vm646_vm1, %v615_v45  ;;  %12015 = vmatprep.mubr.msk.bf16.mxu0 %vm646_vm1, %v582_v46  ;;  %v537_v28 = vld [vmem:[%s13372_s28 + $0x309] sm:$0xff]  ;;  %v538_v36 = vld [vmem:[%s13372_s28 + $0x311] sm:$0xff]  ;;  %v539_v37 = vld [vmem:[%s13372_s28 + $0x319] sm:$0xff]  ;;  %v591_v42 = vpack.c.bf16 %v471_v35, %v470_v34 }
  0x28   : > { %12083 = vmatprep.mubr.msk.bf16.mxu1 %vm646_vm1, %v616_v47  ;;  %13249 = vmatprep.subr.msk.bf16.mxu1 %vm851_vm0, %v13463_v26  ;;  %v624_v33 = vpack.c.bf16 %v537_v28, %v536_v27  ;;  %v472_v38 = vld [vmem:[%s13372_s28 + $0x101] sm:$0xff]  ;;  %v473_v39 = vld [vmem:[%s13372_s28 + $0x109] sm:$0xff]  ;;  %v625_v43 = vpack.c.bf16 %v539_v37, %v538_v36  ;;  %v474_v46 = vld [vmem:[%s13372_s28 + $0x111] sm:$0xff] }
  0x29   : > { %13250 = vmatprep.subr.msk.bf16.mxu0 %vm851_vm0, %v13472_v30  ;;  %v540_v40 = vld [vmem:[%s13372_s28 + $0x321] sm:$0xff]  ;;  %v541_v41 = vld [vmem:[%s13372_s28 + $0x329] sm:$0xff]  ;;  %v592_v44 = vpack.c.bf16 %v473_v39, %v472_v38  ;;  %v475_v47 = vld [vmem:[%s13372_s28 + $0x119] sm:$0xff] }
  0x2a   : > { %v626_v45 = vpack.c.bf16 %v541_v41, %v540_v40  ;;  %v542_v48 = vld [vmem:[%s13372_s28 + $0x331] sm:$0xff]  ;;  %v543_v49 = vld [vmem:[%s13372_s28 + $0x339] sm:$0xff]  ;;  %v476_v50 = vld [vmem:[%s13372_s28 + $0x121] sm:$0xff]  ;;  %v593_v54 = vpack.c.bf16 %v475_v47, %v474_v46 }
  0x2b   : > { %v477_v51 = vld [vmem:[%s13372_s28 + $0x129] sm:$0xff]  ;;  %v544_v52 = vld [vmem:[%s13372_s28 + $0x341] sm:$0xff]  ;;  %v627_v55 = vpack.c.bf16 %v543_v49, %v542_v48  ;;  %v546_v60 = vld [vmem:[%s13372_s28 + $0x351] sm:$0xff] }
  0x2c   : > { %v545_v53 = vld [vmem:[%s13372_s28 + $0x349] sm:$0xff]  ;;  %v547_v61 = vld [vmem:[%s13372_s28 + $0x359] sm:$0xff]  ;;  %v480_v62 = vld [vmem:[%s13372_s28 + $0x141] sm:$0xff] }
  0x2d   : > { %v481_v63 = vld [vmem:[%s13372_s28 + $0x149] sm:$0xff]  ;;  %v548_v0 = vld [vmem:[%s13372_s28 + $0x361] sm:$0xff]  ;;  %v629_v3 = vpack.c.bf16 %v547_v61, %v546_v60  ;;  %v550_v8 = vld [vmem:[%s13372_s28 + $0x371] sm:$0xff] }
  0x2e   : > { %12016 = vmatmul.mubr.msk.bf16.gmra.mxu0 %vm646_vm1, %v583_v56  ;;  %v594_v56 = vpack.c.bf16 %v477_v51, %v476_v50  ;;  %v549_v1 = vld [vmem:[%s13372_s28 + $0x369] sm:$0xff]  ;;  %v551_v9 = vld [vmem:[%s13372_s28 + $0x379] sm:$0xff]  ;;  %v484_v10 = vld [vmem:[%s13372_s28 + $0x161] sm:$0xff] }
  0x2f   : > { %12084 = vmatmul.mubr.msk.bf16.gmra.mxu1 %vm646_vm1, %v617_v57  ;;  %12019 = vmatprep.mubr.msk.bf16.mxu0 %vm646_vm1, %v584_v58  ;;  %v628_v57 = vpack.c.bf16 %v545_v53, %v544_v52  ;;  %v478_v58 = vld [vmem:[%s13372_s28 + $0x131] sm:$0xff]  ;;  %v485_v11 = vld [vmem:[%s13372_s28 + $0x169] sm:$0xff]  ;;  %v552_v12 = vld [vmem:[%s13372_s28 + $0x381] sm:$0xff]  ;;  %v631_v15 = vpack.c.bf16 %v551_v9, %v550_v8 }
  0x30   : > { %12087 = vmatprep.mubr.msk.bf16.mxu1 %vm646_vm1, %v618_v59  ;;  %v479_v59 = vld [vmem:[%s13372_s28 + $0x139] sm:$0xff]  ;;  %v553_v13 = vld [vmem:[%s13372_s28 + $0x389] sm:$0xff]  ;;  %v554_v20 = vld [vmem:[%s13372_s28 + $0x391] sm:$0xff] }
  0x31   : > { %v595_v2 = vpack.c.bf16 %v479_v59, %v478_v58  ;;  %v555_v21 = vld [vmem:[%s13372_s28 + $0x399] sm:$0xff]  ;;  %v488_v22 = vld [vmem:[%s13372_s28 + $0x181] sm:$0xff]  ;;  %v489_v23 = vld [vmem:[%s13372_s28 + $0x189] sm:$0xff] }
  0x32   : > { %v556_v24 = vld [vmem:[%s13372_s28 + $0x3a1] sm:$0xff]  ;;  %v557_v25 = vld [vmem:[%s13372_s28 + $0x3a9] sm:$0xff]  ;;  %v633_v28 = vpack.c.bf16 %v555_v21, %v554_v20  ;;  %v558_v34 = vld [vmem:[%s13372_s28 + $0x3b1] sm:$0xff] }
  0x33   : > { %v559_v35 = vld [vmem:[%s13372_s28 + $0x3b9] sm:$0xff]  ;;  %v492_v36 = vld [vmem:[%s13372_s28 + $0x1a1] sm:$0xff]  ;;  %v493_v37 = vld [vmem:[%s13372_s28 + $0x1a9] sm:$0xff] }
  0x34   : > { %v560_v38 = vld [vmem:[%s13372_s28 + $0x3c1] sm:$0xff]  ;;  %v561_v39 = vld [vmem:[%s13372_s28 + $0x3c9] sm:$0xff]  ;;  %v635_v41 = vpack.c.bf16 %v559_v35, %v558_v34  ;;  %v562_v46 = vld [vmem:[%s13372_s28 + $0x3d1] sm:$0xff] }
  0x35   : > { %v563_v47 = vld [vmem:[%s13372_s28 + $0x3d9] sm:$0xff]  ;;  %v496_v48 = vld [vmem:[%s13372_s28 + $0x1c1] sm:$0xff]  ;;  %v497_v49 = vld [vmem:[%s13372_s28 + $0x1c9] sm:$0xff] }
  0x36   : > { %12020 = vmatmul.mubr.msk.bf16.gmra.mxu0 %vm646_vm1, %v585_v4  ;;  %v596_v4 = vpack.c.bf16 %v481_v63, %v480_v62  ;;  %v564_v50 = vld [vmem:[%s13372_s28 + $0x3e1] sm:$0xff]  ;;  %v565_v51 = vld [vmem:[%s13372_s28 + $0x3e9] sm:$0xff]  ;;  %v637_v53 = vpack.c.bf16 %v563_v47, %v562_v46  ;;  %v566_v58 = vld [vmem:[%s13372_s28 + $0x3f1] sm:$0xff] }
  0x37   : > { %12088 = vmatmul.mubr.msk.bf16.gmra.mxu1 %vm646_vm1, %v619_v5  ;;  %12023 = vmatprep.mubr.msk.bf16.mxu0 %vm646_vm1, %v586_v6  ;;  %v630_v5 = vpack.c.bf16 %v549_v1, %v548_v0  ;;  %v482_v6 = vld [vmem:[%s13372_s28 + $0x151] sm:$0xff]  ;;  %v567_v59 = vld [vmem:[%s13372_s28 + $0x3f9] sm:$0xff]  ;;  %v500_v60 = vld [vmem:[%s13372_s28 + $0x1e1] sm:$0xff] }
  0x38   : > { %12091 = vmatprep.mubr.msk.bf16.mxu1 %vm646_vm1, %v620_v7  ;;  %v483_v7 = vld [vmem:[%s13372_s28 + $0x159] sm:$0xff]  ;;  %v501_v61 = vld [vmem:[%s13372_s28 + $0x1e9] sm:$0xff]  ;;  %v568_v62 = vld [vmem:[%s13372_s28 + $0x401] sm:$0xff]  ;;  %v639_v1 = vpack.c.bf16 %v567_v59, %v566_v58 }
  0x39   : > { %v597_v14 = vpack.c.bf16 %v483_v7, %v482_v6  ;;  %v569_v63 = vld [vmem:[%s13372_s28 + $0x409] sm:$0xff]  ;;  %v570_v6 = vld [vmem:[%s13372_s28 + $0x411] sm:$0xff]  ;;  %v571_v7 = vld [vmem:[%s13372_s28 + $0x419] sm:$0xff] }
  0x3a   : > { %v504_v8 = vld [vmem:[%s13372_s28 + $0x201] sm:$0xff]  ;;  %v505_v9 = vld [vmem:[%s13372_s28 + $0x209] sm:$0xff] }
  0x3b   : > { %v2216_v20 = vld [vmem:[%s13372_s28 + $0x2] sm:$0xff]  ;;  %v2217_v21 = vld [vmem:[%s13372_s28 + $0xa] sm:$0xff]  ;;  %v2223_v46 = vld [vmem:[%s13372_s28 + $0x3a] sm:$0xff] }
  0x3c   : > { %v239_v34 = vld [vmem:[%s13372_s28 + $0x20] sm:$0xff]  ;;  %v240_v35 = vld [vmem:[%s13372_s28 + $0x28] sm:$0xff] }
  0x3d   : > { %v2224_v47 = vld [vmem:[%s13372_s28 + $0x42] sm:$0xff]  ;;  %v2229_v59 = vld [vmem:[%s13372_s28 + $0x6a] sm:$0xff] }
  0x3e   : > { %12024 = vmatmul.mubr.msk.bf16.gmra.mxu0 %vm646_vm1, %v587_v16  ;;  %v598_v16 = vpack.c.bf16 %v485_v11, %v484_v10  ;;  %v572_v10 = vld [vmem:[%s13372_s28 + $0x421] sm:$0xff]  ;;  %v573_v11 = vld [vmem:[%s13372_s28 + $0x429] sm:$0xff] }
  0x3f   : > { %12092 = vmatmul.mubr.msk.bf16.gmra.mxu1 %vm646_vm1, %v621_v17  ;;  %12027 = vmatprep.mubr.msk.bf16.mxu0 %vm646_vm1, %v588_v18  ;;  %v632_v17 = vpack.c.bf16 %v553_v13, %v552_v12  ;;  %v486_v18 = vld [vmem:[%s13372_s28 + $0x171] sm:$0xff]  ;;  %v641_v13 = vpack.c.bf16 %v571_v7, %v570_v6  ;;  %v2228_v58 = vld [vmem:[%s13372_s28 + $0x62] sm:$0xff] }
  0x40   : > { %12095 = vmatprep.mubr.msk.bf16.mxu1 %vm646_vm1, %v622_v19  ;;  %v487_v19 = vld [vmem:[%s13372_s28 + $0x179] sm:$0xff]  ;;  %v2232_v6 = vld [vmem:[%s13372_s28 + $0x82] sm:$0xff]  ;;  %v2233_v7 = vld [vmem:[%s13372_s28 + $0x8a] sm:$0xff] }
  0x41   : > { %v599_v27 = vpack.c.bf16 %v487_v19, %v486_v18  ;;  %v574_v18 = vld [vmem:[%s13372_s28 + $0x431] sm:$0xff]  ;;  %v575_v19 = vld [vmem:[%s13372_s28 + $0x439] sm:$0xff] }
  0x46   : > { %12028 = vmatmul.mubr.msk.bf16.gmra.mxu0 %vm646_vm1, %v589_v29  ;;  %v600_v29 = vpack.c.bf16 %v489_v23, %v488_v22  ;;  %v235_v22 = vld [vmem:[%s13372_s28] sm:$0xff]  ;;  %v236_v23 = vld [vmem:[%s13372_s28 + $0x8] sm:$0xff] }
  0x47   : > { %12096 = vmatmul.mubr.msk.bf16.gmra.mxu1 %vm646_vm1, %v623_v31  ;;  %12031 = vmatprep.mubr.msk.bf16.mxu0 %vm646_vm1, %v590_v32  ;;  %v634_v31 = vpack.c.bf16 %v557_v25, %v556_v24  ;;  %v490_v32 = vld [vmem:[%s13372_s28 + $0x191] sm:$0xff]  ;;  %v643_v25 = vpack.c.bf16 %v575_v19, %v574_v18  ;;  %v2236_v18 = vld [vmem:[%s13372_s28 + $0xa2] sm:$0xff] }
  0x48   : > { %12099 = vmatprep.mubr.msk.bf16.mxu1 %vm646_vm1, %v624_v33  ;;  %v491_v33 = vld [vmem:[%s13372_s28 + $0x199] sm:$0xff]  ;;  %v2237_v19 = vld [vmem:[%s13372_s28 + $0xaa] sm:$0xff] }
  0x49   : > { %v601_v40 = vpack.c.bf16 %v491_v33, %v490_v32  ;;  %v237_v32 = vld [vmem:[%s13372_s28 + $0x10] sm:$0xff]  ;;  %v238_v33 = vld [vmem:[%s13372_s28 + $0x18] sm:$0xff] }
  0x4e   : > { %12032 = vmatmul.mubr.msk.bf16.gmra.mxu0 %vm646_vm1, %v591_v42  ;;  %v602_v42 = vpack.c.bf16 %v493_v37, %v492_v36  ;;  %v2220_v37 = vld [vmem:[%s13372_s28 + $0x22] sm:$0xff] }
  0x4f   : > { %12100 = vmatmul.mubr.msk.bf16.gmra.mxu1 %vm646_vm1, %v625_v43  ;;  %12035 = vmatprep.mubr.msk.bf16.mxu0 %vm646_vm1, %v592_v44  ;;  %v636_v43 = vpack.c.bf16 %v561_v39, %v560_v38  ;;  %v494_v44 = vld [vmem:[%s13372_s28 + $0x1b1] sm:$0xff]  ;;  %v372_v39 = vpack.c.bf16 %v238_v33, %v237_v32  ;;  %v2240_v32 = vld [vmem:[%s13372_s28 + $0xc2] sm:$0xff] }
  0x50   : > { %12103 = vmatprep.mubr.msk.bf16.mxu1 %vm646_vm1, %v626_v45  ;;  %v495_v45 = vld [vmem:[%s13372_s28 + $0x1b9] sm:$0xff]  ;;  %v2221_v38 = vld [vmem:[%s13372_s28 + $0x2a] sm:$0xff] }
  0x51   : > { %v603_v52 = vpack.c.bf16 %v495_v45, %v494_v44  ;;  %v241_v44 = vld [vmem:[%s13372_s28 + $0x30] sm:$0xff] }
  0x52   : > { %v2222_v45 = vld [vmem:[%s13372_s28 + $0x32] sm:$0xff]  ;;  %v2241_v33 = vld [vmem:[%s13372_s28 + $0xca] sm:$0xff] }
  0x56   : > { %12036 = vmatmul.mubr.msk.bf16.gmra.mxu0 %vm646_vm1, %v593_v54  ;;  %v604_v54 = vpack.c.bf16 %v497_v49, %v496_v48  ;;  %v2225_v48 = vld [vmem:[%s13372_s28 + $0x4a] sm:$0xff] }
  0x57   : > { %12104 = vmatmul.mubr.msk.bf16.gmra.mxu1 %vm646_vm1, %v627_v55  ;;  %12039 = vmatprep.mubr.msk.bf16.mxu0 %vm646_vm1, %v594_v56  ;;  %v638_v55 = vpack.c.bf16 %v565_v51, %v564_v50  ;;  %v498_v56 = vld [vmem:[%s13372_s28 + $0x1d1] sm:$0xff]  ;;  %v244_v49 = vld [vmem:[%s13372_s28 + $0x48] sm:$0xff]  ;;  %v2355_v50 = vpack.c.bf16 %v2223_v46, %v2222_v45  ;;  %v263_v46 = vld [vmem:[%s13372_s28 + $0xe0] sm:$0xff] }
  0x58   : > { %12107 = vmatprep.mubr.msk.bf16.mxu1 %vm646_vm1, %v628_v57  ;;  %v499_v57 = vld [vmem:[%s13372_s28 + $0x1d9] sm:$0xff]  ;;  %v2245_v45 = vld [vmem:[%s13372_s28 + $0xea] sm:$0xff] }
  0x59   : > { %v605_v0 = vpack.c.bf16 %v499_v57, %v498_v56  ;;  %v2227_v56 = vld [vmem:[%s13372_s28 + $0x5a] sm:$0xff] }
  0x5a   : > { %v246_v57 = vld [vmem:[%s13372_s28 + $0x58] sm:$0xff] }
  0x5e   : > { %12040 = vmatmul.mubr.msk.bf16.gmra.mxu0 %vm646_vm1, %v595_v2  ;;  %v606_v2 = vpack.c.bf16 %v501_v61, %v500_v60  ;;  %v247_v60 = vld [vmem:[%s13372_s28 + $0x60] sm:$0xff]  ;;  %v248_v61 = vld [vmem:[%s13372_s28 + $0x68] sm:$0xff] }
  0x5f   : > { %12108 = vmatmul.mubr.msk.bf16.gmra.mxu1 %vm646_vm1, %v629_v3  ;;  %12043 = vmatprep.mubr.msk.bf16.mxu0 %vm646_vm1, %v596_v4  ;;  %v640_v3 = vpack.c.bf16 %v569_v63, %v568_v62  ;;  %v502_v4 = vld [vmem:[%s13372_s28 + $0x1f1] sm:$0xff] }
  0x60   : > { %12111 = vmatprep.mubr.msk.bf16.mxu1 %vm646_vm1, %v630_v5  ;;  %v503_v5 = vld [vmem:[%s13372_s28 + $0x1f9] sm:$0xff] }
  0x61   : > { %v607_v12 = vpack.c.bf16 %v503_v5, %v502_v4  ;;  %v2231_v4 = vld [vmem:[%s13372_s28 + $0x7a] sm:$0xff] }
  0x62   : > { %v250_v5 = vld [vmem:[%s13372_s28 + $0x78] sm:$0xff] }
  0x66   : > { %12044 = vmatmul.mubr.msk.bf16.gmra.mxu0 %vm646_vm1, %v597_v14  ;;  %v608_v14 = vpack.c.bf16 %v505_v9, %v504_v8  ;;  %v251_v8 = vld [vmem:[%s13372_s28 + $0x80] sm:$0xff]  ;;  %v252_v9 = vld [vmem:[%s13372_s28 + $0x88] sm:$0xff] }
  0x67   : > { %12112 = vmatmul.mubr.msk.bf16.gmra.mxu1 %vm646_vm1, %v631_v15  ;;  %12047 = vmatprep.mubr.msk.bf16.mxu0 %vm646_vm1, %v598_v16  ;;  %v642_v15 = vpack.c.bf16 %v573_v11, %v572_v10  ;;  %v506_v16 = vld [vmem:[%s13372_s28 + $0x211] sm:$0xff] }
  0x68   : > { %12115 = vmatprep.mubr.msk.bf16.mxu1 %vm646_vm1, %v632_v17  ;;  %v507_v17 = vld [vmem:[%s13372_s28 + $0x219] sm:$0xff] }
  0x69   : > { %v609_v24 = vpack.c.bf16 %v507_v17, %v506_v16  ;;  %v2235_v16 = vld [vmem:[%s13372_s28 + $0x9a] sm:$0xff] }
  0x6a   : > { %v254_v17 = vld [vmem:[%s13372_s28 + $0x98] sm:$0xff] }
  0x6e   : > { %12048 = vmatmul.mubr.msk.bf16.gmra.mxu0 %vm646_vm1, %v599_v27  ;;  %v2352_v27 = vpack.c.bf16 %v2217_v21, %v2216_v20  ;;  %v255_v20 = vld [vmem:[%s13372_s28 + $0xa0] sm:$0xff]  ;;  %v256_v21 = vld [vmem:[%s13372_s28 + $0xa8] sm:$0xff] }
  0x6f   : > { %12116 = vmatmul.mubr.msk.bf16.gmra.mxu1 %vm646_vm1, %v633_v28  ;;  %12051 = vmatprep.mubr.msk.bf16.mxu0 %vm646_vm1, %v600_v29  ;;  %v371_v28 = vpack.c.bf16 %v236_v23, %v235_v22  ;;  %v2218_v29 = vld [vmem:[%s13372_s28 + $0x12] sm:$0xff] }
  0x70   : > { %12119 = vmatprep.mubr.msk.bf16.mxu1 %vm646_vm1, %v634_v31  ;;  %v2219_v31 = vld [vmem:[%s13372_s28 + $0x1a] sm:$0xff] }
  0x71   : > { %v2353_v36 = vpack.c.bf16 %v2219_v31, %v2218_v29  ;;  %v2239_v29 = vld [vmem:[%s13372_s28 + $0xba] sm:$0xff] }
  0x72   : > { %v258_v31 = vld [vmem:[%s13372_s28 + $0xb8] sm:$0xff] }
  0x76   : > { %12052 = vmatmul.mubr.msk.bf16.gmra.mxu0 %vm646_vm1, %v601_v40  ;;  %v4879_v40 = vsel %vm851_vm0, %v13472_v30, 0  ;;  %v242_v30 = vld [vmem:[%s13372_s28 + $0x38] sm:$0xff] }
  0x77   : > { %12120 = vmatmul.mubr.msk.bf16.gmra.mxu1 %vm646_vm1, %v635_v41  ;;  %12055 = vmatprep.mubr.msk.bf16.mxu0 %vm646_vm1, %v602_v42  ;;  %v373_v41 = vpack.c.bf16 %v240_v35, %v239_v34  ;;  %v3753_v42 = vsel %vm851_vm0, %v13463_v26, 0  ;;  %v243_v26 = vld [vmem:[%s13372_s28 + $0x40] sm:$0xff]  ;;  %v374_v51 = vpack.c.bf16 %v242_v30, %v241_v44  ;;  %v260_v35 = vld [vmem:[%s13372_s28 + $0xc8] sm:$0xff] }
  0x78   : > { %12123 = vmatprep.mubr.msk.bf16.mxu1 %vm646_vm1, %v636_v43  ;;  %v2354_v43 = vpack.c.bf16 %v2221_v38, %v2220_v37  ;;  %v259_v34 = vld [vmem:[%s13372_s28 + $0xc0] sm:$0xff]  ;;  %v2364_v38 = vpack.c.bf16 %v2241_v33, %v2240_v32  ;;  %v264_v30 = vld [vmem:[%s13372_s28 + $0xe8] sm:$0xff] }
  0x79   : > { %v2244_v44 = vld [vmem:[%s13372_s28 + $0xe2] sm:$0xff] }
  0x7e   : > { %12056 = vmatmul.mubr.msk.bf16.gmra.mxu0 %vm646_vm1, %v603_v52  ;;  %v2356_v52 = vpack.c.bf16 %v2225_v48, %v2224_v47 }
  0x7f   : > { %12124 = vmatmul.mubr.msk.bf16.gmra.mxu1 %vm646_vm1, %v637_v53  ;;  %12059 = vmatprep.mubr.msk.bf16.mxu0 %vm646_vm1, %v604_v54  ;;  %v375_v53 = vpack.c.bf16 %v244_v49, %v243_v26  ;;  %v245_v54 = vld [vmem:[%s13372_s28 + $0x50] sm:$0xff]  ;;  %v2366_v26 = vpack.c.bf16 %v2245_v45, %v2244_v44  ;;  %v385_v49 = vpack.c.bf16 %v264_v30, %v263_v46  ;;  %v2259_v44 = vld [vmem:[%s13372_s28 + $0x15a] sm:$0xff]  ;;  %v2260_v30 = vld [vmem:[%s13372_s28 + $0x162] sm:$0xff] }
  0x80   : > { %12127 = vmatprep.mubr.msk.bf16.mxu1 %vm646_vm1, %v638_v55  ;;  %v2226_v55 = vld [vmem:[%s13372_s28 + $0x52] sm:$0xff]  ;;  %v376_v63 = vpack.c.bf16 %v246_v57, %v245_v54  ;;  %v2248_v54 = vld [vmem:[%s13372_s28 + $0x102] sm:$0xff] }
  0x81   : > { %v2357_v62 = vpack.c.bf16 %v2227_v56, %v2226_v55  ;;  %v2249_v55 = vld [vmem:[%s13372_s28 + $0x10a] sm:$0xff]  ;;  %v267_v56 = vld [vmem:[%s13372_s28 + $0x100] sm:$0xff]  ;;  %v278_v46 = vld [vmem:[%s13372_s28 + $0x158] sm:$0xff] }
  0x82   : > { %v268_v57 = vld [vmem:[%s13372_s28 + $0x108] sm:$0xff] }
  0x86   : > { %12060 = vmatmul.mubr.msk.bf16.gmra.mxu0 %vm646_vm1, %v605_v0  ;;  %v2358_v0 = vpack.c.bf16 %v2229_v59, %v2228_v58 }
  0x87   : > { %12128 = vmatmul.mubr.msk.bf16.gmra.mxu1 %vm646_vm1, %v639_v1  ;;  %12063 = vmatprep.mubr.msk.bf16.mxu0 %vm646_vm1, %v606_v2  ;;  %v377_v1 = vpack.c.bf16 %v248_v61, %v247_v60  ;;  %v249_v2 = vld [vmem:[%s13372_s28 + $0x70] sm:$0xff]  ;;  %v2368_v60 = vpack.c.bf16 %v2249_v55, %v2248_v54  ;;  %v387_v61 = vpack.c.bf16 %v268_v57, %v267_v56 }
  0x88   : > { %12131 = vmatprep.mubr.msk.bf16.mxu1 %vm646_vm1, %v640_v3  ;;  %v2230_v3 = vld [vmem:[%s13372_s28 + $0x72] sm:$0xff]  ;;  %v378_v11 = vpack.c.bf16 %v250_v5, %v249_v2  ;;  %v2251_v2 = vld [vmem:[%s13372_s28 + $0x11a] sm:$0xff]  ;;  %v2252_v5 = vld [vmem:[%s13372_s28 + $0x122] sm:$0xff] }
  0x89   : > { %v2359_v10 = vpack.c.bf16 %v2231_v4, %v2230_v3  ;;  %v270_v4 = vld [vmem:[%s13372_s28 + $0x118] sm:$0xff] }
  0x8e   : > { %12064 = vmatmul.mubr.msk.bf16.gmra.mxu0 %vm646_vm1, %v607_v12  ;;  %v2360_v12 = vpack.c.bf16 %v2233_v7, %v2232_v6  ;;  %v2253_v6 = vld [vmem:[%s13372_s28 + $0x12a] sm:$0xff] }
  0x8f   : > { %12132 = vmatmul.mubr.msk.bf16.gmra.mxu1 %vm646_vm1, %v641_v13  ;;  %12067 = vmatprep.mubr.msk.bf16.mxu0 %vm646_vm1, %v608_v14  ;;  %v379_v13 = vpack.c.bf16 %v252_v9, %v251_v8  ;;  %v253_v14 = vld [vmem:[%s13372_s28 + $0x90] sm:$0xff]  ;;  %v271_v8 = vld [vmem:[%s13372_s28 + $0x120] sm:$0xff]  ;;  %v272_v9 = vld [vmem:[%s13372_s28 + $0x128] sm:$0xff] }
  0x90   : > { %12135 = vmatprep.mubr.msk.bf16.mxu1 %vm646_vm1, %v642_v15  ;;  %v2234_v15 = vld [vmem:[%s13372_s28 + $0x92] sm:$0xff]  ;;  %v380_v23 = vpack.c.bf16 %v254_v17, %v253_v14  ;;  %v2370_v14 = vpack.c.bf16 %v2253_v6, %v2252_v5  ;;  %v2265_v5 = vld [vmem:[%s13372_s28 + $0x18a] sm:$0xff] }
  0x91   : > { %v2361_v22 = vpack.c.bf16 %v2235_v16, %v2234_v15  ;;  %v389_v16 = vpack.c.bf16 %v272_v9, %v271_v8  ;;  %v283_v8 = vld [vmem:[%s13372_s28 + $0x180] sm:$0xff]  ;;  %v284_v9 = vld [vmem:[%s13372_s28 + $0x188] sm:$0xff] }
  0x96   : > { %12068 = vmatmul.mubr.msk.bf16.gmra.mxu0 %vm646_vm1, %v609_v24  ;;  %v2362_v24 = vpack.c.bf16 %v2237_v19, %v2236_v18 }
  0x97   : > { %12136 = vmatmul.mubr.msk.bf16.gmra.mxu1 %vm646_vm1, %v643_v25  ;;  %12279 = vmatprep.mubr.msk.bf16.mxu0 %vm646_vm1, %v2352_v27  ;;  %v381_v25 = vpack.c.bf16 %v256_v21, %v255_v20  ;;  %v257_v27 = vld [vmem:[%s13372_s28 + $0xb0] sm:$0xff] }
  0x98   : > { %12141 = vmatprep.mubr.msk.bf16.mxu1 %vm646_vm1, %v371_v28  ;;  %v2238_v28 = vld [vmem:[%s13372_s28 + $0xb2] sm:$0xff]  ;;  %v382_v37 = vpack.c.bf16 %v258_v31, %v257_v27  ;;  %v2257_v27 = vld [vmem:[%s13372_s28 + $0x14a] sm:$0xff] }
  0x99   : > { %v273_v20 = vld [vmem:[%s13372_s28 + $0x130] sm:$0xff]  ;;  %v276_v31 = vld [vmem:[%s13372_s28 + $0x148] sm:$0xff] }
  0x9a   : > { %v2254_v21 = vld [vmem:[%s13372_s28 + $0x132] sm:$0xff] }
  0x9e   : > { %12280 = vmatmul.mubr.msk.bf16.vlgmr.msra.gmra.mxu0 %vm646_vm1, %v2353_v36  ;;  %v2363_v36 = vpack.c.bf16 %v2239_v29, %v2238_v28  ;;  %v275_v29 = vld [vmem:[%s13372_s28 + $0x140] sm:$0xff] }
  0x9f   : > { %12142 = vmatmul.mubr.msk.bf16.vlgmr.msra.gmra.mxu1 %vm646_vm1, %v372_v39  ;;  %12554 = vmatpush3.bf16.msra.mxu0 %v4879_v40  ;;  %v383_v39 = vpack.c.bf16 %v260_v35, %v259_v34  ;;  %v261_v40 = vld [vmem:[%s13372_s28 + $0xd0] sm:$0xff] }
  0xa0   : > { %12416 = vmatpush3.bf16.msra.mxu1 %v3753_v42  ;;  %12145 = vmatprep.mubr.msk.bf16.mxu1 %vm646_vm1, %v373_v41  ;;  %v2242_v41 = vld [vmem:[%s13372_s28 + $0xd2] sm:$0xff]  ;;  %v2243_v42 = vld [vmem:[%s13372_s28 + $0xda] sm:$0xff] }
  0xa1   : > { %12283 = vmatprep.mubr.msk.bf16.mxu0 %vm646_vm1, %v2354_v43  ;;  %v262_v43 = vld [vmem:[%s13372_s28 + $0xd8] sm:$0xff]  ;;  %v2365_v47 = vpack.c.bf16 %v2243_v42, %v2242_v41  ;;  %v277_v42 = vld [vmem:[%s13372_s28 + $0x150] sm:$0xff] }
  0xa2   : > { %v384_v48 = vpack.c.bf16 %v262_v43, %v261_v40  ;;  %v2258_v43 = vld [vmem:[%s13372_s28 + $0x152] sm:$0xff] }
  0xa6   : > { %12284 = vmatmul.mubr.msk.bf16.gmra.mxu0 %vm646_vm1, %v2355_v50  ;;  %v265_v50 = vld [vmem:[%s13372_s28 + $0xf0] sm:$0xff] }
  0xa7   : > { %12146 = vmatmul.mubr.msk.bf16.gmra.mxu1 %vm646_vm1, %v374_v51  ;;  %12287 = vmatprep.mubr.msk.bf16.mxu0 %vm646_vm1, %v2356_v52  ;;  %v2246_v51 = vld [vmem:[%s13372_s28 + $0xf2] sm:$0xff]  ;;  %v2247_v52 = vld [vmem:[%s13372_s28 + $0xfa] sm:$0xff] }
  0xa8   : > { %12149 = vmatprep.mubr.msk.bf16.mxu1 %vm646_vm1, %v375_v53  ;;  %v266_v53 = vld [vmem:[%s13372_s28 + $0xf8] sm:$0xff]  ;;  %v2367_v58 = vpack.c.bf16 %v2247_v52, %v2246_v51  ;;  %v2373_v51 = vpack.c.bf16 %v2259_v44, %v2258_v43  ;;  %v287_v44 = vld [vmem:[%s13372_s28 + $0x1a0] sm:$0xff] }
  0xa9   : > { %v386_v59 = vpack.c.bf16 %v266_v53, %v265_v50  ;;  %v392_v53 = vpack.c.bf16 %v278_v46, %v277_v42  ;;  %v2269_v42 = vld [vmem:[%s13372_s28 + $0x1aa] sm:$0xff] }
  0xaa   : > { %v288_v46 = vld [vmem:[%s13372_s28 + $0x1a8] sm:$0xff] }
  0xae   : > { %12288 = vmatmul.mubr.msk.bf16.gmra.mxu0 %vm646_vm1, %v2357_v62 }
  0xaf   : > { %12150 = vmatmul.mubr.msk.bf16.gmra.mxu1 %vm646_vm1, %v376_v63  ;;  %12291 = vmatprep.mubr.msk.bf16.mxu0 %vm646_vm1, %v2358_v0  ;;  %v269_v0 = vld [vmem:[%s13372_s28 + $0x110] sm:$0xff] }
  0xb0   : > { %12153 = vmatprep.mubr.msk.bf16.mxu1 %vm646_vm1, %v377_v1  ;;  %v2250_v1 = vld [vmem:[%s13372_s28 + $0x112] sm:$0xff] }
  0xb6   : > { %12292 = vmatmul.mubr.msk.bf16.gmra.mxu0 %vm646_vm1, %v2359_v10 }
  0xb7   : > { %12154 = vmatmul.mubr.msk.bf16.gmra.mxu1 %vm646_vm1, %v378_v11  ;;  %12295 = vmatprep.mubr.msk.bf16.mxu0 %vm646_vm1, %v2360_v12  ;;  %v2369_v11 = vpack.c.bf16 %v2251_v2, %v2250_v1  ;;  %v282_v2 = vld [vmem:[%s13372_s28 + $0x178] sm:$0xff] }
  0xb8   : > { %12157 = vmatprep.mubr.msk.bf16.mxu1 %vm646_vm1, %v379_v13  ;;  %v388_v13 = vpack.c.bf16 %v270_v4, %v269_v0  ;;  %v2263_v0 = vld [vmem:[%s13372_s28 + $0x17a] sm:$0xff]  ;;  %v2264_v4 = vld [vmem:[%s13372_s28 + $0x182] sm:$0xff] }
  0xbe   : > { %12296 = vmatmul.mubr.msk.bf16.gmra.mxu0 %vm646_vm1, %v2361_v22  ;;  %v2255_v22 = vld [vmem:[%s13372_s28 + $0x13a] sm:$0xff] }
  0xbf   : > { %12158 = vmatmul.mubr.msk.bf16.gmra.mxu1 %vm646_vm1, %v380_v23  ;;  %12299 = vmatprep.mubr.msk.bf16.mxu0 %vm646_vm1, %v2362_v24  ;;  %v274_v24 = vld [vmem:[%s13372_s28 + $0x138] sm:$0xff]  ;;  %v2371_v33 = vpack.c.bf16 %v2255_v22, %v2254_v21  ;;  %v395_v22 = vpack.c.bf16 %v284_v9, %v283_v8  ;;  %v2272_v9 = vld [vmem:[%s13372_s28 + $0x1c2] sm:$0xff] }
  0xc0   : > { %12161 = vmatprep.mubr.msk.bf16.mxu1 %vm646_vm1, %v381_v25  ;;  %v2256_v25 = vld [vmem:[%s13372_s28 + $0x142] sm:$0xff]  ;;  %v390_v35 = vpack.c.bf16 %v274_v24, %v273_v20  ;;  %v2376_v20 = vpack.c.bf16 %v2265_v5, %v2264_v4  ;;  %v2271_v4 = vld [vmem:[%s13372_s28 + $0x1ba] sm:$0xff] }
  0xc1   : > { %v290_v8 = vld [vmem:[%s13372_s28 + $0x1b8] sm:$0xff] }
  0xc6   : > { %12300 = vmatmul.mubr.msk.bf16.gmra.mxu0 %vm646_vm1, %v2363_v36  ;;  %v2372_v36 = vpack.c.bf16 %v2257_v27, %v2256_v25 }
  0xc7   : > { %12162 = vmatmul.mubr.msk.bf16.gmra.mxu1 %vm646_vm1, %v382_v37  ;;  %12303 = vmatprep.mubr.msk.bf16.mxu0 %vm646_vm1, %v2364_v38  ;;  %v391_v38 = vpack.c.bf16 %v276_v31, %v275_v29  ;;  %v285_v29 = vld [vmem:[%s13372_s28 + $0x190] sm:$0xff] }
  0xc8   : > { %12165 = vmatprep.mubr.msk.bf16.mxu1 %vm646_vm1, %v383_v39  ;;  %v2266_v31 = vld [vmem:[%s13372_s28 + $0x192] sm:$0xff] }
  0xce   : > { %12304 = vmatmul.mubr.msk.bf16.gmra.mxu0 %vm646_vm1, %v2365_v47  ;;  %v2261_v47 = vld [vmem:[%s13372_s28 + $0x16a] sm:$0xff] }
  0xcf   : > { %12166 = vmatmul.mubr.msk.bf16.gmra.mxu1 %vm646_vm1, %v384_v48  ;;  %12307 = vmatprep.mubr.msk.bf16.mxu0 %vm646_vm1, %v2366_v26  ;;  %v279_v26 = vld [vmem:[%s13372_s28 + $0x160] sm:$0xff]  ;;  %v2374_v54 = vpack.c.bf16 %v2261_v47, %v2260_v30 }
  0xd0   : > { %12169 = vmatprep.mubr.msk.bf16.mxu1 %vm646_vm1, %v385_v49  ;;  %v280_v49 = vld [vmem:[%s13372_s28 + $0x168] sm:$0xff] }
  0xd1   : > { %v393_v56 = vpack.c.bf16 %v280_v49, %v279_v26 }
  0xd6   : > { %v13696_v62 = vpop.f32.mrf.mxu0  ;;  %12308 = vmatmul.mubr.msk.bf16.gmra.mxu0 %vm646_vm1, %v2367_v58 }
  0xd7   : > { %v13699_v63 = vpop.f32.mrf.mxu1  ;;  %12170 = vmatmul.mubr.msk.bf16.gmra.mxu1 %vm646_vm1, %v386_v59  ;;  %12311 = vmatprep.mubr.msk.bf16.mxu0 %vm646_vm1, %v2368_v60  ;;  %v281_v60 = vld [vmem:[%s13372_s28 + $0x170] sm:$0xff] }
  0xd8   : > { %17362 = vst [vmem:[#allocation2_spill] sm:$0xff] %v13699_v63  ;;  %v13706_v3 = vpop.f32.mrf.mxu0  ;;  %12173 = vmatprep.mubr.msk.bf16.mxu1 %vm646_vm1, %v387_v61  ;;  %v2262_v61 = vld [vmem:[%s13372_s28 + $0x172] sm:$0xff] }
  0xd9   : > { %v13712_v7 = vpop.f32.mrf.mxu1 }
  0xda   : > { %17363 = vst [vmem:[#allocation3_spill] sm:$0xff] %v13712_v7  ;;  %v13716_v10 = vpop.f32.mrf.mxu0 }
  0xdb   : > { %v13718_v12 = vpop.f32.mrf.mxu1 }
  0xdc   : > { %17364 = vst [vmem:[#allocation4_spill] sm:$0xff] %v13718_v12  ;;  %v13720_v15 = vpop.f32.mrf.mxu0 }
  0xdd   : > { %v13722_v17 = vpop.f32.mrf.mxu1 }
  0xde   : > { %17365 = vst [vmem:[#allocation5_spill] sm:$0xff] %v13722_v17  ;;  %v13724_v18 = vpop.f32.mrf.mxu0  ;;  %12312 = vmatmul.mubr.msk.bf16.gmra.mxu0 %vm646_vm1, %v2369_v11 }
  0xdf   : > { %v13727_v19 = vpop.f32.mrf.mxu1  ;;  %12174 = vmatmul.mubr.msk.bf16.gmra.mxu1 %vm646_vm1, %v388_v13  ;;  %12315 = vmatprep.mubr.msk.bf16.mxu0 %vm646_vm1, %v2370_v14  ;;  %v2375_v13 = vpack.c.bf16 %v2263_v0, %v2262_v61  ;;  %v289_v0 = vld [vmem:[%s13372_s28 + $0x1b0] sm:$0xff] }
  0xe0   : > { %17366 = vst [vmem:[#allocation6_spill] sm:$0xff] %v13727_v19  ;;  %v13734_v23 = vpop.f32.mrf.mxu0  ;;  %12177 = vmatprep.mubr.msk.bf16.mxu1 %vm646_vm1, %v389_v16  ;;  %v394_v16 = vpack.c.bf16 %v282_v2, %v281_v60  ;;  %v2270_v2 = vld [vmem:[%s13372_s28 + $0x1b2] sm:$0xff] }
  0xe1   : > { %v13740_v28 = vpop.f32.mrf.mxu1  ;;  %v313_v19 = vld [vmem:[%s13372_s28 + $0x270] sm:$0xff] }
  0xe2   : > { %17367 = vst [vmem:[#allocation7_spill] sm:$0xff] %v13740_v28  ;;  %v13744_v32 = vpop.f32.mrf.mxu0 }
  0xe3   : > { %v13746_v34 = vpop.f32.mrf.mxu1 }
  0xe4   : > { %17368 = vst [vmem:[#allocation8_spill] sm:$0xff] %v13746_v34  ;;  %v13748_v37 = vpop.f32.mrf.mxu0 }
  0xe5   : > { %v13750_v39 = vpop.f32.mrf.mxu1 }
  0xe6   : > { %17369 = vst [vmem:[#allocation9_spill] sm:$0xff] %v13750_v39  ;;  %v13752_v40 = vpop.f32.mrf.mxu0  ;;  %12316 = vmatmul.mubr.msk.bf16.gmra.mxu0 %vm646_vm1, %v2371_v33  ;;  %v2267_v33 = vld [vmem:[%s13372_s28 + $0x19a] sm:$0xff] }
  0xe7   : > { %v13755_v41 = vpop.f32.mrf.mxu1  ;;  %12178 = vmatmul.mubr.msk.bf16.gmra.mxu1 %vm646_vm1, %v390_v35  ;;  %12319 = vmatprep.mubr.msk.bf16.mxu0 %vm646_vm1, %v2372_v36  ;;  %v286_v36 = vld [vmem:[%s13372_s28 + $0x198] sm:$0xff]  ;;  %v2377_v47 = vpack.c.bf16 %v2267_v33, %v2266_v31  ;;  %v2379_v31 = vpack.c.bf16 %v2271_v4, %v2270_v2 }
  0xe8   : > { %17370 = vst [vmem:[#allocation10_spill] sm:$0xff] %v13755_v41  ;;  %v13762_v45 = vpop.f32.mrf.mxu0  ;;  %12181 = vmatprep.mubr.msk.bf16.mxu1 %vm646_vm1, %v391_v38  ;;  %v2268_v38 = vld [vmem:[%s13372_s28 + $0x1a2] sm:$0xff]  ;;  %v396_v49 = vpack.c.bf16 %v286_v36, %v285_v29  ;;  %v398_v36 = vpack.c.bf16 %v290_v8, %v289_v0  ;;  %v2275_v0 = vld [vmem:[%s13372_s28 + $0x1da] sm:$0xff] }
  0xe9   : > { %v13768_v48 = vpop.f32.mrf.mxu1  ;;  %v294_v4 = vld [vmem:[%s13372_s28 + $0x1d8] sm:$0xff]  ;;  %v2276_v8 = vld [vmem:[%s13372_s28 + $0x1e2] sm:$0xff] }
  0xea   : > { %17371 = vst [vmem:[#allocation11_spill] sm:$0xff] %v13768_v48  ;;  %v13772_v50 = vpop.f32.mrf.mxu0 }
  0xeb   : > { %v13774_v52 = vpop.f32.mrf.mxu1 }
  0xec   : > { %17372 = vst [vmem:[#allocation12_spill] sm:$0xff] %v13774_v52  ;;  %v13776_v55 = vpop.f32.mrf.mxu0 }
  0xed   : > { %v13778_v57 = vpop.f32.mrf.mxu1 }
  0xee   : > { %17373 = vst [vmem:[#allocation13_spill] sm:$0xff] %v13778_v57  ;;  %v13780_v58 = vpop.f32.mrf.mxu0  ;;  %12320 = vmatmul.mubr.msk.bf16.gmra.mxu0 %vm646_vm1, %v2373_v51  ;;  %v2378_v51 = vpack.c.bf16 %v2269_v42, %v2268_v38 }
  0xef   : > { %v13783_v59 = vpop.f32.mrf.mxu1  ;;  %12182 = vmatmul.mubr.msk.bf16.gmra.mxu1 %vm646_vm1, %v392_v53  ;;  %12323 = vmatprep.mubr.msk.bf16.mxu0 %vm646_vm1, %v2374_v54  ;;  %v397_v54 = vpack.c.bf16 %v288_v46, %v287_v44 }
  0xf0   : > { %17374 = vst [vmem:[#allocation14_spill] sm:$0xff] %v13783_v59  ;;  %v13790_v1 = vpop.f32.mrf.mxu0  ;;  %12185 = vmatprep.mubr.msk.bf16.mxu1 %vm646_vm1, %v393_v56 }
  0xf1   : > { %v13796_v6 = vpop.f32.mrf.mxu1 }
  0xf2   : > { %17375 = vst [vmem:[#allocation15_spill] sm:$0xff] %v13796_v6  ;;  %v13800_v11 = vpop.f32.mrf.mxu0 }
  0xf3   : > { %v13802_v14 = vpop.f32.mrf.mxu1 }
  0xf4   : > { %17376 = vst [vmem:[#allocation16_spill] sm:$0xff] %v13802_v14  ;;  %v13804_v21 = vpop.f32.mrf.mxu0 }
  0xf5   : > { %v13806_v24 = vpop.f32.mrf.mxu1 }
  0xf6   : > { %17377 = vst [vmem:[#allocation17_spill] sm:$0xff] %v13806_v24  ;;  %v13808_v25 = vpop.f32.mrf.mxu0  ;;  %12324 = vmatmul.mubr.msk.bf16.gmra.mxu0 %vm646_vm1, %v2375_v13  ;;  %v2273_v13 = vld [vmem:[%s13372_s28 + $0x1ca] sm:$0xff] }
  0xf7   : > { %v13811_v27 = vpop.f32.mrf.mxu1  ;;  %12186 = vmatmul.mubr.msk.bf16.gmra.mxu1 %vm646_vm1, %v394_v16  ;;  %12327 = vmatprep.mubr.msk.bf16.mxu0 %vm646_vm1, %v2376_v20  ;;  %v291_v20 = vld [vmem:[%s13372_s28 + $0x1c0] sm:$0xff]  ;;  %v2380_v38 = vpack.c.bf16 %v2273_v13, %v2272_v9  ;;  %v2277_v9 = vld [vmem:[%s13372_s28 + $0x1ea] sm:$0xff] }
  0xf8   : > { %17378 = vst [vmem:[#allocation18_spill] sm:$0xff] %v13811_v27  ;;  %v13818_v35 = vpop.f32.mrf.mxu0  ;;  %12189 = vmatprep.mubr.msk.bf16.mxu1 %vm646_vm1, %v395_v22  ;;  %v292_v22 = vld [vmem:[%s13372_s28 + $0x1c8] sm:$0xff] }
  0xf9   : > { %v13824_v43 = vpop.f32.mrf.mxu1  ;;  %v399_v44 = vpack.c.bf16 %v292_v22, %v291_v20  ;;  %v295_v20 = vld [vmem:[%s13372_s28 + $0x1e0] sm:$0xff]  ;;  %v296_v22 = vld [vmem:[%s13372_s28 + $0x1e8] sm:$0xff] }
  0xfa   : > { %17379 = vst [vmem:[#allocation19_spill] sm:$0xff] %v13824_v43  ;;  %v13828_v30 = vpop.f32.mrf.mxu0 }
  0xfb   : > { %v13830_v26 = vpop.f32.mrf.mxu1 }
  0xfc   : > { %17380 = vst [vmem:[#allocation20_spill] sm:$0xff] %v13830_v26  ;;  %v13832_v53 = vpop.f32.mrf.mxu0 }
  0xfd   : > { %v13834_v56 = vpop.f32.mrf.mxu1 }
  0xfe   : > { %17381 = vst [vmem:[#allocation21_spill] sm:$0xff] %v13834_v56  ;;  %v13836_v60 = vpop.f32.mrf.mxu0  ;;  %12328 = vmatmul.mubr.msk.bf16.gmra.mxu0 %vm646_vm1, %v2377_v47 }
  0xff   : > { %v13839_v61 = vpop.f32.mrf.mxu1  ;;  %12190 = vmatmul.mubr.msk.bf16.gmra.mxu1 %vm646_vm1, %v396_v49  ;;  %12331 = vmatprep.mubr.msk.bf16.mxu0 %vm646_vm1, %v2378_v51  ;;  %v293_v51 = vld [vmem:[%s13372_s28 + $0x1d0] sm:$0xff] }
 0x100   : > { %17382 = vst [vmem:[#allocation22_spill] sm:$0xff] %v13839_v61  ;;  %v13846_v5 = vpop.f32.mrf.mxu0  ;;  %12193 = vmatprep.mubr.msk.bf16.mxu1 %vm646_vm1, %v397_v54  ;;  %v2274_v54 = vld [vmem:[%s13372_s28 + $0x1d2] sm:$0xff] }
 0x101   : > { %v13852_v16 = vpop.f32.mrf.mxu1 }
 0x102   : > { %17383 = vst [vmem:[#allocation23_spill] sm:$0xff] %v13852_v16  ;;  %v13856_v29 = vpop.f32.mrf.mxu0 }
 0x103   : > { %v13858_v33 = vpop.f32.mrf.mxu1 }
 0x104   : > { %17384 = vst [vmem:[#allocation24_spill] sm:$0xff] %v13858_v33  ;;  %v13860_v42 = vpop.f32.mrf.mxu0  ;;  %v401_v33 = vpack.c.bf16 %v296_v22, %v295_v20  ;;  %v2281_v20 = vld [vmem:[%s13372_s28 + $0x20a] sm:$0xff] }
 0x105   : > { %v13862_v46 = vpop.f32.mrf.mxu1 }
 0x106   : > { %17385 = vst [vmem:[#allocation25_spill] sm:$0xff] %v13862_v46  ;;  %v13864_v47 = vpop.f32.mrf.mxu0  ;;  %12332 = vmatmul.mubr.msk.bf16.gmra.mxu0 %vm646_vm1, %v2379_v31  ;;  %v2382_v46 = vpack.c.bf16 %v2277_v9, %v2276_v8  ;;  %v298_v8 = vld [vmem:[%s13372_s28 + $0x1f8] sm:$0xff]  ;;  %v2280_v9 = vld [vmem:[%s13372_s28 + $0x202] sm:$0xff] }
 0x107   : > { %v13867_v49 = vpop.f32.mrf.mxu1  ;;  %12194 = vmatmul.mubr.msk.bf16.gmra.mxu1 %vm646_vm1, %v398_v36  ;;  %12335 = vmatprep.mubr.msk.bf16.mxu0 %vm646_vm1, %v2380_v38  ;;  %v2381_v36 = vpack.c.bf16 %v2275_v0, %v2274_v54  ;;  %v2278_v54 = vld [vmem:[%s13372_s28 + $0x1f2] sm:$0xff]  ;;  %v2279_v0 = vld [vmem:[%s13372_s28 + $0x1fa] sm:$0xff]  ;;  %v2384_v56 = vpack.c.bf16 %v2281_v20, %v2280_v9  ;;  %v2284_v9 = vld [vmem:[%s13372_s28 + $0x222] sm:$0xff] }
 0x108   : > { %17386 = vst [vmem:[#allocation26_spill] sm:$0xff] %v13867_v49  ;;  %v13874_v2 = vpop.f32.mrf.mxu0  ;;  %12197 = vmatprep.mubr.msk.bf16.mxu1 %vm646_vm1, %v399_v44  ;;  %v400_v49 = vpack.c.bf16 %v294_v4, %v293_v51  ;;  %v297_v51 = vld [vmem:[%s13372_s28 + $0x1f0] sm:$0xff] }
 0x109   : > { %v13880_v13 = vpop.f32.mrf.mxu1  ;;  %v2285_v20 = vld [vmem:[%s13372_s28 + $0x22a] sm:$0xff] }
 0x10a   : > { %17387 = vst [vmem:[#allocation27_spill] sm:$0xff] %v13880_v13  ;;  %v13884_v31 = vpop.f32.mrf.mxu0  ;;  %v2386_v24 = vpack.c.bf16 %v2285_v20, %v2284_v9  ;;  %v2288_v9 = vld [vmem:[%s13372_s28 + $0x242] sm:$0xff]  ;;  %v2289_v20 = vld [vmem:[%s13372_s28 + $0x24a] sm:$0xff] }
 0x10b   : > { %v13886_v38 = vpop.f32.mrf.mxu1  ;;  %v2388_v57 = vpack.c.bf16 %v2289_v20, %v2288_v9  ;;  %v2292_v9 = vld [vmem:[%s13372_s28 + $0x262] sm:$0xff]  ;;  %v2293_v20 = vld [vmem:[%s13372_s28 + $0x26a] sm:$0xff] }
 0x10c   : > { %17388 = vst [vmem:[#allocation28_spill] sm:$0xff] %v13886_v38  ;;  %v13888_v44 = vpop.f32.mrf.mxu0  ;;  %v402_v38 = vpack.c.bf16 %v298_v8, %v297_v51  ;;  %v301_v51 = vld [vmem:[%s13372_s28 + $0x210] sm:$0xff]  ;;  %v2390_v39 = vpack.c.bf16 %v2293_v20, %v2292_v9 }
 0x10d   : > { %v13890_v13 = vpop.f32.mrf.mxu1  ;;  %v2297_v9 = vld [vmem:[%s13372_s28 + $0x28a] sm:$0xff]  ;;  %v14023_v20 = vld [vmem:[%s17356_s1 + $0x14] sm:$0xf] }
 0x10e   : > { %17389 = vst [vmem:[#allocation29_spill] sm:$0xff] %v13890_v13  ;;  %v13892_v16 = vpop.f32.mrf.mxu0  ;;  %12336 = vmatmul.mubr.msk.bf16.gmra.mxu0 %vm646_vm1, %v2381_v36  ;;  %v299_v36 = vld [vmem:[%s13372_s28 + $0x200] sm:$0xff]  ;;  %13251 = vmatprep.subr.msk.bf16.mxu1 %vm851_vm0, %v14023_v20 }
 0x10f   : > { %v13895_v61 = vpop.f32.mrf.mxu1  ;;  %12198 = vmatmul.mubr.msk.bf16.gmra.mxu1 %vm646_vm1, %v400_v49  ;;  %12339 = vmatprep.mubr.msk.bf16.mxu0 %vm646_vm1, %v2382_v46  ;;  %v2383_v46 = vpack.c.bf16 %v2279_v0, %v2278_v54  ;;  %v2282_v54 = vld [vmem:[%s13372_s28 + $0x212] sm:$0xff]  ;;  %v2283_v0 = vld [vmem:[%s13372_s28 + $0x21a] sm:$0xff] }
 0x110   : > { %17390 = vst [vmem:[#allocation30_spill] sm:$0xff] %v13895_v61  ;;  %v13902_v4 = vpop.f32.mrf.mxu0  ;;  %12201 = vmatprep.mubr.msk.bf16.mxu1 %vm646_vm1, %v401_v33  ;;  %v300_v61 = vld [vmem:[%s13372_s28 + $0x208] sm:$0xff] }
 0x111   : > { %v13908_v22 = vpop.f32.mrf.mxu1  ;;  %v403_v26 = vpack.c.bf16 %v300_v61, %v299_v36  ;;  %v302_v61 = vld [vmem:[%s13372_s28 + $0x218] sm:$0xff] }
 0x112   : > { %17391 = vst [vmem:[#allocation31_spill] sm:$0xff] %v13908_v22  ;;  %v13912_v49 = vpop.f32.mrf.mxu0 }
 0x113   : > { %v13914_v13 = vpop.f32.mrf.mxu1 }
 0x114   : > { %17392 = vst [vmem:[#allocation32_spill] sm:$0xff] %v13914_v13  ;;  %v13916_v33 = vpop.f32.mrf.mxu0  ;;  %v404_v13 = vpack.c.bf16 %v302_v61, %v301_v51  ;;  %v305_v51 = vld [vmem:[%s13372_s28 + $0x230] sm:$0xff] }
 0x115   : > { %v13918_v22 = vpop.f32.mrf.mxu1 }
 0x116   : > { %17393 = vst [vmem:[#allocation33_spill] sm:$0xff] %v13918_v22  ;;  %v13920_v43 = vpop.f32.mrf.mxu0  ;;  %12340 = vmatmul.mubr.msk.bf16.gmra.mxu0 %vm646_vm1, %v2383_v46  ;;  %v303_v46 = vld [vmem:[%s13372_s28 + $0x220] sm:$0xff] }
 0x117   : > { %v13923_v27 = vpop.f32.mrf.mxu1  ;;  %12202 = vmatmul.mubr.msk.bf16.gmra.mxu1 %vm646_vm1, %v402_v38  ;;  %12343 = vmatprep.mubr.msk.bf16.mxu0 %vm646_vm1, %v2384_v56  ;;  %v2385_v56 = vpack.c.bf16 %v2283_v0, %v2282_v54  ;;  %v2286_v54 = vld [vmem:[%s13372_s28 + $0x232] sm:$0xff]  ;;  %v2287_v0 = vld [vmem:[%s13372_s28 + $0x23a] sm:$0xff] }
 0x118   : > { %17394 = vst [vmem:[#allocation34_spill] sm:$0xff] %v13923_v27  ;;  %v13930_v8 = vpop.f32.mrf.mxu0  ;;  %12205 = vmatprep.mubr.msk.bf16.mxu1 %vm646_vm1, %v403_v26  ;;  %v304_v27 = vld [vmem:[%s13372_s28 + $0x228] sm:$0xff] }
 0x119   : > { %v13936_v36 = vpop.f32.mrf.mxu1  ;;  %v405_v14 = vpack.c.bf16 %v304_v27, %v303_v46  ;;  %v306_v27 = vld [vmem:[%s13372_s28 + $0x238] sm:$0xff] }
 0x11a   : > { %17395 = vst [vmem:[#allocation35_spill] sm:$0xff] %v13936_v36  ;;  %v13940_v38 = vpop.f32.mrf.mxu0 }
 0x11b   : > { %v13942_v22 = vpop.f32.mrf.mxu1 }
 0x11c   : > { %17396 = vst [vmem:[#allocation36_spill] sm:$0xff] %v13942_v22  ;;  %v13944_v26 = vpop.f32.mrf.mxu0  ;;  %v406_v22 = vpack.c.bf16 %v306_v27, %v305_v51  ;;  %v309_v51 = vld [vmem:[%s13372_s28 + $0x250] sm:$0xff] }
 0x11d   : > { %v13946_v36 = vpop.f32.mrf.mxu1 }
 0x11e   : > { %17397 = vst [vmem:[#allocation37_spill] sm:$0xff] %v13946_v36  ;;  %v13948_v6 = vpop.f32.mrf.mxu0  ;;  %12344 = vmatmul.mubr.msk.bf16.gmra.mxu0 %vm646_vm1, %v2385_v56  ;;  %v307_v56 = vld [vmem:[%s13372_s28 + $0x240] sm:$0xff] }
 0x11f   : > { %v13951_v59 = vpop.f32.mrf.mxu1  ;;  %12206 = vmatmul.mubr.msk.bf16.gmra.mxu1 %vm646_vm1, %v404_v13  ;;  %12347 = vmatprep.mubr.msk.bf16.mxu0 %vm646_vm1, %v2386_v24  ;;  %v2387_v24 = vpack.c.bf16 %v2287_v0, %v2286_v54  ;;  %v2290_v54 = vld [vmem:[%s13372_s28 + $0x252] sm:$0xff]  ;;  %v2291_v0 = vld [vmem:[%s13372_s28 + $0x25a] sm:$0xff] }
 0x120   : > { %17398 = vst [vmem:[#allocation38_spill] sm:$0xff] %v13951_v59  ;;  %v13958_v61 = vpop.f32.mrf.mxu0  ;;  %12209 = vmatprep.mubr.msk.bf16.mxu1 %vm646_vm1, %v405_v14  ;;  %v308_v59 = vld [vmem:[%s13372_s28 + $0x248] sm:$0xff] }
 0x121   : > { %v13964_v46 = vpop.f32.mrf.mxu1  ;;  %v407_v52 = vpack.c.bf16 %v308_v59, %v307_v56  ;;  %v310_v59 = vld [vmem:[%s13372_s28 + $0x258] sm:$0xff] }
 0x122   : > { %17399 = vst [vmem:[#allocation39_spill] sm:$0xff] %v13964_v46  ;;  %v13968_v13 = vpop.f32.mrf.mxu0 }
 0x123   : > { %v13970_v36 = vpop.f32.mrf.mxu1 }
 0x124   : > { %17400 = vst [vmem:[#allocation40_spill] sm:$0xff] %v13970_v36  ;;  %v13972_v14 = vpop.f32.mrf.mxu0  ;;  %v408_v36 = vpack.c.bf16 %v310_v59, %v309_v51  ;;  %v314_v51 = vld [vmem:[%s13372_s28 + $0x278] sm:$0xff] }
 0x125   : > { %17401 = vst [vmem:[#allocation41_spill] sm:$0xff] %v13972_v14  ;;  %v13974_v46 = vpop.f32.mrf.mxu1 }
 0x126   : > { %17402 = vst [vmem:[#allocation42_spill] sm:$0xff] %v13974_v46  ;;  %v13976_v48 = vpop.f32.mrf.mxu0  ;;  %12348 = vmatmul.mubr.msk.bf16.gmra.mxu0 %vm646_vm1, %v2387_v24  ;;  %v311_v24 = vld [vmem:[%s13372_s28 + $0x260] sm:$0xff] }
 0x127   : > { %17403 = vst [vmem:[#allocation43_spill] sm:$0xff] %v13976_v48  ;;  %v13979_v41 = vpop.f32.mrf.mxu1  ;;  %12210 = vmatmul.mubr.msk.bf16.gmra.mxu1 %vm646_vm1, %v406_v22  ;;  %12351 = vmatprep.mubr.msk.bf16.mxu0 %vm646_vm1, %v2388_v57  ;;  %v2389_v57 = vpack.c.bf16 %v2291_v0, %v2290_v54  ;;  %v2294_v54 = vld [vmem:[%s13372_s28 + $0x272] sm:$0xff]  ;;  %v2295_v0 = vld [vmem:[%s13372_s28 + $0x27a] sm:$0xff] }
 0x128   : > { %17404 = vst [vmem:[#allocation44_spill] sm:$0xff] %v13979_v41  ;;  %v13986_v27 = vpop.f32.mrf.mxu0  ;;  %12213 = vmatprep.mubr.msk.bf16.mxu1 %vm646_vm1, %v407_v52  ;;  %v312_v41 = vld [vmem:[%s13372_s28 + $0x268] sm:$0xff] }
 0x129   : > { %17405 = vst [vmem:[#allocation45_spill] sm:$0xff] %v13986_v27  ;;  %v13992_v56 = vpop.f32.mrf.mxu1  ;;  %v409_v34 = vpack.c.bf16 %v312_v41, %v311_v24  ;;  %v2296_v41 = vld [vmem:[%s13372_s28 + $0x282] sm:$0xff] }
 0x12a   : > { %17406 = vst [vmem:[#allocation46_spill] sm:$0xff] %v13992_v56  ;;  %v13996_v22 = vpop.f32.mrf.mxu0 }
 0x12b   : > { %17407 = vst [vmem:[#allocation47_spill] sm:$0xff] %v13996_v22  ;;  %v13998_v46 = vpop.f32.mrf.mxu1 }
 0x12c   : > { %17408 = vst [vmem:[#allocation48_spill] sm:$0xff] %v13998_v46  ;;  %v14000_v52 = vpop.f32.mrf.mxu0  ;;  %v410_v46 = vpack.c.bf16 %v314_v51, %v313_v19  ;;  %v317_v19 = vld [vmem:[%s13372_s28 + $0x290] sm:$0xff] }
 0x12d   : > { %17409 = vst [vmem:[#allocation49_spill] sm:$0xff] %v14000_v52  ;;  %v14002_v28 = vpop.f32.mrf.mxu1  ;;  %v2298_v51 = vld [vmem:[%s13372_s28 + $0x292] sm:$0xff] }
 0x12e   : > { %17410 = vst [vmem:[#allocation50_spill] sm:$0xff] %v14002_v28  ;;  %v14004_v56 = vpop.f32.mrf.mxu0  ;;  %12352 = vmatmul.mubr.msk.bf16.gmra.mxu0 %vm646_vm1, %v2389_v57  ;;  %v315_v57 = vld [vmem:[%s13372_s28 + $0x280] sm:$0xff] }
 0x12f   : > { %17411 = vst [vmem:[#allocation51_spill] sm:$0xff] %v14004_v56  ;;  %v14008_v17 = vpop.f32.mrf.mxu1  ;;  %12214 = vmatmul.mubr.msk.bf16.gmra.mxu1 %vm646_vm1, %v408_v36  ;;  %12355 = vmatprep.mubr.msk.bf16.mxu0 %vm646_vm1, %v2390_v39  ;;  %v316_v36 = vld [vmem:[%s13372_s28 + $0x288] sm:$0xff] }
 0x130   : > { %17412 = vst [vmem:[#allocation52_spill] sm:$0xff] %v14008_v17  ;;  %v14015_v59 = vpop.f32.mrf.mxu0  ;;  %12217 = vmatprep.mubr.msk.bf16.mxu1 %vm646_vm1, %v409_v34  ;;  %v2391_v17 = vpack.c.bf16 %v2295_v0, %v2294_v54  ;;  %v14036_v34 = vld [vmem:[%s17356_s1 + $0x18] sm:$0xf]  ;;  %v411_v7 = vpack.c.bf16 %v316_v36, %v315_v57  ;;  %v2300_v36 = vld [vmem:[%s13372_s28 + $0x2a2] sm:$0xff] }
 0x131   : > { %17413 = vst [vmem:[#allocation53_spill] sm:$0xff] %v14015_v59  ;;  %v14025_v24 = vpop.f32.mrf.mxu1  ;;  %13252 = vmatprep.subr.msk.bf16.mxu0 %vm851_vm0, %v14036_v34  ;;  %v318_v57 = vld [vmem:[%s13372_s28 + $0x298] sm:$0xff] }
 0x132   : > { %17414 = vst [vmem:[#allocation54_spill] sm:$0xff] %v14025_v24  ;;  %v14031_v39 = vpop.f32.mrf.mxu0  ;;  %v2392_v24 = vpack.c.bf16 %v2297_v9, %v2296_v41  ;;  %v2299_v41 = vld [vmem:[%s13372_s28 + $0x29a] sm:$0xff] }
 0x133   : > { %17415 = vst [vmem:[#allocation55_spill] sm:$0xff] %v14031_v39  ;;  %v14038_v28 = vpop.f32.mrf.mxu1 }
 0x134   : > { %17416 = vst [vmem:[#allocation56_spill] sm:$0xff] %v14038_v28  ;;  %v14042_v12 = vpop.f32.mrf.mxu0 }
 0x135   : > { %17417 = vst [vmem:[#allocation57_spill] sm:$0xff] %v14042_v12  ;;  %v14044_v54 = vpop.f32.mrf.mxu1  ;;  %v412_v12 = vpack.c.bf16 %v318_v57, %v317_v19  ;;  %v321_v19 = vld [vmem:[%s13372_s28 + $0x2b0] sm:$0xff]  ;;  %v2304_v57 = vld [vmem:[%s13372_s28 + $0x2c2] sm:$0xff] }
 0x136   : > { %17418 = vst [vmem:[#allocation58_spill] sm:$0xff] %v14044_v54  ;;  %v14046_v0 = vpop.f32.mrf.mxu0  ;;  %12356 = vmatmul.mubr.msk.bf16.gmra.mxu0 %vm646_vm1, %v2391_v17  ;;  %v2301_v54 = vld [vmem:[%s13372_s28 + $0x2aa] sm:$0xff]  ;;  %v319_v17 = vld [vmem:[%s13372_s28 + $0x2a0] sm:$0xff] }
 0x137   : > { %17419 = vst [vmem:[#allocation59_spill] sm:$0xff] %v14046_v0  ;;  %v14049_v28 = vpop.f32.mrf.mxu1  ;;  %12218 = vmatmul.mubr.msk.bf16.gmra.mxu1 %vm646_vm1, %v410_v46  ;;  %12359 = vmatprep.mubr.msk.bf16.mxu0 %vm646_vm1, %v2392_v24  ;;  %v2393_v24 = vpack.c.bf16 %v2299_v41, %v2298_v51  ;;  %v2303_v51 = vld [vmem:[%s13372_s28 + $0x2ba] sm:$0xff] }
 0x138   : > { %17420 = vst [vmem:[#allocation60_spill] sm:$0xff] %v14049_v28  ;;  %v14056_v9 = vpop.f32.mrf.mxu0  ;;  %12221 = vmatprep.mubr.msk.bf16.mxu1 %vm646_vm1, %v411_v7  ;;  %v320_v28 = vld [vmem:[%s13372_s28 + $0x2a8] sm:$0xff] }
 0x139   : > { %17421 = vst [vmem:[#allocation61_spill] sm:$0xff] %v14056_v9  ;;  %v14062_v63 = vpop.f32.mrf.mxu1  ;;  %v2394_v9 = vpack.c.bf16 %v2301_v54, %v2300_v36  ;;  %v413_v39 = vpack.c.bf16 %v320_v28, %v319_v17  ;;  %v2302_v54 = vld [vmem:[%s13372_s28 + $0x2b2] sm:$0xff]  ;;  %v2305_v36 = vld [vmem:[%s13372_s28 + $0x2ca] sm:$0xff] }
 0x13a   : > { %17422 = vst [vmem:[#allocation62_spill] sm:$0xff] %v14062_v63  ;;  %v14066_v46 = vpop.f32.mrf.mxu0  ;;  %v322_v28 = vld [vmem:[%s13372_s28 + $0x2b8] sm:$0xff] }
 0x13b   : > { %17423 = vst [vmem:[#allocation63_spill] sm:$0xff] %v14066_v46  ;;  %v14068_v0 = vpop.f32.mrf.mxu1 }
 0x13c   : > { %17424 = vst [vmem:[#allocation64_spill] sm:$0xff] %v14068_v0  ;;  %v14070_v7 = vpop.f32.mrf.mxu0  ;;  %v414_v0 = vpack.c.bf16 %v322_v28, %v321_v19  ;;  %v325_v19 = vld [vmem:[%s13372_s28 + $0x2d0] sm:$0xff] }
 0x13d   : > { %17425 = vst [vmem:[#allocation65_spill] sm:$0xff] %v14070_v7  ;;  %v14072_v63 = vpop.f32.mrf.mxu1 }
 0x13e   : > { %17426 = vst [vmem:[#allocation66_spill] sm:$0xff] %v14072_v63  ;;  %v14074_v59 = vpop.f32.mrf.mxu0  ;;  %12360 = vmatmul.mubr.msk.bf16.gmra.mxu0 %vm646_vm1, %v2393_v24  ;;  %v323_v24 = vld [vmem:[%s13372_s28 + $0x2c0] sm:$0xff] }
 0x13f   : > { %17427 = vst [vmem:[#allocation67_spill] sm:$0xff] %v14074_v59  ;;  %v14077_v46 = vpop.f32.mrf.mxu1  ;;  %12222 = vmatmul.mubr.msk.bf16.gmra.mxu1 %vm646_vm1, %v412_v12  ;;  %12363 = vmatprep.mubr.msk.bf16.mxu0 %vm646_vm1, %v2394_v9  ;;  %v2395_v9 = vpack.c.bf16 %v2303_v51, %v2302_v54  ;;  %v2306_v54 = vld [vmem:[%s13372_s28 + $0x2d2] sm:$0xff]  ;;  %v2307_v51 = vld [vmem:[%s13372_s28 + $0x2da] sm:$0xff] }
 0x140   : > { %17428 = vst [vmem:[#allocation68_spill] sm:$0xff] %v14077_v46  ;;  %v14084_v41 = vpop.f32.mrf.mxu0  ;;  %12225 = vmatprep.mubr.msk.bf16.mxu1 %vm646_vm1, %v413_v39  ;;  %v324_v46 = vld [vmem:[%s13372_s28 + $0x2c8] sm:$0xff] }
 0x141   : > { %17429 = vst [vmem:[#allocation69_spill] sm:$0xff] %v14084_v41  ;;  %v14090_v17 = vpop.f32.mrf.mxu1  ;;  %v2396_v41 = vpack.c.bf16 %v2305_v36, %v2304_v57  ;;  %v415_v59 = vpack.c.bf16 %v324_v46, %v323_v24  ;;  %v326_v46 = vld [vmem:[%s13372_s28 + $0x2d8] sm:$0xff]  ;;  %v2308_v57 = vld [vmem:[%s13372_s28 + $0x2e2] sm:$0xff]  ;;  %v2309_v36 = vld [vmem:[%s13372_s28 + $0x2ea] sm:$0xff] }
 0x142   : > { %17430 = vst [vmem:[#allocation70_spill] sm:$0xff] %v14090_v17  ;;  %v14094_v12 = vpop.f32.mrf.mxu0 }
 0x143   : > { %17431 = vst [vmem:[#allocation71_spill] sm:$0xff] %v14094_v12  ;;  %v14096_v63 = vpop.f32.mrf.mxu1 }
 0x144   : > { %17432 = vst [vmem:[#allocation72_spill] sm:$0xff] %v14096_v63  ;;  %v14098_v39 = vpop.f32.mrf.mxu0  ;;  %v416_v63 = vpack.c.bf16 %v326_v46, %v325_v19  ;;  %v329_v19 = vld [vmem:[%s13372_s28 + $0x2f0] sm:$0xff] }
 0x145   : > { %17433 = vst [vmem:[#allocation73_spill] sm:$0xff] %v14098_v39  ;;  %v14100_v17 = vpop.f32.mrf.mxu1 }
 0x146   : > { %17434 = vst [vmem:[#allocation74_spill] sm:$0xff] %v14100_v17  ;;  %v14102_v7 = vpop.f32.mrf.mxu0  ;;  %12364 = vmatmul.mubr.msk.bf16.gmra.mxu0 %vm646_vm1, %v2395_v9  ;;  %v327_v9 = vld [vmem:[%s13372_s28 + $0x2e0] sm:$0xff] }
 0x147   : > { %17435 = vst [vmem:[#allocation75_spill] sm:$0xff] %v14102_v7  ;;  %v14105_v12 = vpop.f32.mrf.mxu1  ;;  %12226 = vmatmul.mubr.msk.bf16.gmra.mxu1 %vm646_vm1, %v414_v0  ;;  %12367 = vmatprep.mubr.msk.bf16.mxu0 %vm646_vm1, %v2396_v41  ;;  %v2397_v41 = vpack.c.bf16 %v2307_v51, %v2306_v54  ;;  %v2310_v54 = vld [vmem:[%s13372_s28 + $0x2f2] sm:$0xff]  ;;  %v2311_v51 = vld [vmem:[%s13372_s28 + $0x2fa] sm:$0xff] }
 0x148   : > { %17436 = vst [vmem:[#allocation76_spill] sm:$0xff] %v14105_v12  ;;  %v14112_v28 = vpop.f32.mrf.mxu0  ;;  %12229 = vmatprep.mubr.msk.bf16.mxu1 %vm646_vm1, %v415_v59  ;;  %v328_v12 = vld [vmem:[%s13372_s28 + $0x2e8] sm:$0xff] }
 0x149   : > { %17437 = vst [vmem:[#allocation77_spill] sm:$0xff] %v14112_v28  ;;  %v14118_v24 = vpop.f32.mrf.mxu1  ;;  %v2398_v28 = vpack.c.bf16 %v2309_v36, %v2308_v57  ;;  %v417_v7 = vpack.c.bf16 %v328_v12, %v327_v9  ;;  %v330_v12 = vld [vmem:[%s13372_s28 + $0x2f8] sm:$0xff]  ;;  %v2312_v57 = vld [vmem:[%s13372_s28 + $0x302] sm:$0xff]  ;;  %v2313_v36 = vld [vmem:[%s13372_s28 + $0x30a] sm:$0xff] }
 0x14a   : > { %17438 = vst [vmem:[#allocation78_spill] sm:$0xff] %v14118_v24  ;;  %v14122_v0 = vpop.f32.mrf.mxu0 }
 0x14b   : > { %17439 = vst [vmem:[#allocation79_spill] sm:$0xff] %v14122_v0  ;;  %v14124_v17 = vpop.f32.mrf.mxu1 }
 0x14c   : > { %17440 = vst [vmem:[#allocation80_spill] sm:$0xff] %v14124_v17  ;;  %v14126_v59 = vpop.f32.mrf.mxu0  ;;  %v418_v17 = vpack.c.bf16 %v330_v12, %v329_v19  ;;  %v333_v19 = vld [vmem:[%s13372_s28 + $0x310] sm:$0xff] }
 0x14d   : > { %17441 = vst [vmem:[#allocation81_spill] sm:$0xff] %v14126_v59  ;;  %v14128_v24 = vpop.f32.mrf.mxu1 }
 0x14e   : > { %17442 = vst [vmem:[#allocation82_spill] sm:$0xff] %v14128_v24  ;;  %v14130_v39 = vpop.f32.mrf.mxu0  ;;  %12368 = vmatmul.mubr.msk.bf16.gmra.mxu0 %vm646_vm1, %v2397_v41  ;;  %v331_v41 = vld [vmem:[%s13372_s28 + $0x300] sm:$0xff] }
 0x14f   : > { %17443 = vst [vmem:[#allocation83_spill] sm:$0xff] %v14130_v39  ;;  %v14133_v0 = vpop.f32.mrf.mxu1  ;;  %12230 = vmatmul.mubr.msk.bf16.gmra.mxu1 %vm646_vm1, %v416_v63  ;;  %12371 = vmatprep.mubr.msk.bf16.mxu0 %vm646_vm1, %v2398_v28  ;;  %v2399_v28 = vpack.c.bf16 %v2311_v51, %v2310_v54  ;;  %v2314_v54 = vld [vmem:[%s13372_s28 + $0x312] sm:$0xff]  ;;  %v2315_v51 = vld [vmem:[%s13372_s28 + $0x31a] sm:$0xff] }
 0x150   : > { %17444 = vst [vmem:[#allocation84_spill] sm:$0xff] %v14133_v0  ;;  %v14140_v46 = vpop.f32.mrf.mxu0  ;;  %12233 = vmatprep.mubr.msk.bf16.mxu1 %vm646_vm1, %v417_v7  ;;  %v332_v0 = vld [vmem:[%s13372_s28 + $0x308] sm:$0xff] }
 0x151   : > { %17445 = vst [vmem:[#allocation85_spill] sm:$0xff] %v14140_v46  ;;  %v14146_v9 = vpop.f32.mrf.mxu1  ;;  %v2400_v46 = vpack.c.bf16 %v2313_v36, %v2312_v57  ;;  %v419_v39 = vpack.c.bf16 %v332_v0, %v331_v41  ;;  %v334_v0 = vld [vmem:[%s13372_s28 + $0x318] sm:$0xff]  ;;  %v2316_v57 = vld [vmem:[%s13372_s28 + $0x322] sm:$0xff]  ;;  %v2317_v36 = vld [vmem:[%s13372_s28 + $0x32a] sm:$0xff] }
 0x152   : > { %17446 = vst [vmem:[#allocation86_spill] sm:$0xff] %v14146_v9  ;;  %v14150_v63 = vpop.f32.mrf.mxu0 }
 0x153   : > { %17447 = vst [vmem:[#allocation87_spill] sm:$0xff] %v14150_v63  ;;  %v14152_v24 = vpop.f32.mrf.mxu1 }
 0x154   : > { %17448 = vst [vmem:[#allocation88_spill] sm:$0xff] %v14152_v24  ;;  %v14154_v7 = vpop.f32.mrf.mxu0  ;;  %v420_v24 = vpack.c.bf16 %v334_v0, %v333_v19  ;;  %v337_v19 = vld [vmem:[%s13372_s28 + $0x330] sm:$0xff] }
 0x155   : > { %17449 = vst [vmem:[#allocation89_spill] sm:$0xff] %v14154_v7  ;;  %v14156_v9 = vpop.f32.mrf.mxu1 }
 0x156   : > { %17450 = vst [vmem:[#allocation90_spill] sm:$0xff] %v14156_v9  ;;  %v14158_v59 = vpop.f32.mrf.mxu0  ;;  %12372 = vmatmul.mubr.msk.bf16.gmra.mxu0 %vm646_vm1, %v2399_v28  ;;  %v335_v28 = vld [vmem:[%s13372_s28 + $0x320] sm:$0xff] }
 0x157   : > { %17451 = vst [vmem:[#allocation91_spill] sm:$0xff] %v14158_v59  ;;  %v14161_v63 = vpop.f32.mrf.mxu1  ;;  %12234 = vmatmul.mubr.msk.bf16.gmra.mxu1 %vm646_vm1, %v418_v17  ;;  %12375 = vmatprep.mubr.msk.bf16.mxu0 %vm646_vm1, %v2400_v46  ;;  %v2401_v46 = vpack.c.bf16 %v2315_v51, %v2314_v54  ;;  %v2318_v54 = vld [vmem:[%s13372_s28 + $0x332] sm:$0xff]  ;;  %v2319_v51 = vld [vmem:[%s13372_s28 + $0x33a] sm:$0xff] }
 0x158   : > { %17452 = vst [vmem:[#allocation92_spill] sm:$0xff] %v14161_v63  ;;  %v14168_v12 = vpop.f32.mrf.mxu0  ;;  %12237 = vmatprep.mubr.msk.bf16.mxu1 %vm646_vm1, %v419_v39  ;;  %v336_v63 = vld [vmem:[%s13372_s28 + $0x328] sm:$0xff] }
 0x159   : > { %17453 = vst [vmem:[#allocation93_spill] sm:$0xff] %v14168_v12  ;;  %v14174_v41 = vpop.f32.mrf.mxu1  ;;  %v2402_v12 = vpack.c.bf16 %v2317_v36, %v2316_v57  ;;  %v421_v59 = vpack.c.bf16 %v336_v63, %v335_v28  ;;  %v338_v63 = vld [vmem:[%s13372_s28 + $0x338] sm:$0xff]  ;;  %v2320_v36 = vld [vmem:[%s13372_s28 + $0x342] sm:$0xff]  ;;  %v2321_v28 = vld [vmem:[%s13372_s28 + $0x34a] sm:$0xff] }
 0x15a   : > { %17454 = vst [vmem:[#allocation94_spill] sm:$0xff] %v14174_v41  ;;  %v14178_v17 = vpop.f32.mrf.mxu0  ;;  %v422_v22 = vpack.c.bf16 %v338_v63, %v337_v19  ;;  %v344_v63 = vld [vmem:[%s13372_s28 + $0x368] sm:$0xff] }
 0x15b   : > { %17455 = vst [vmem:[#allocation95_spill] sm:$0xff] %v14178_v17  ;;  %v14180_v9 = vpop.f32.mrf.mxu1 }
 0x15c   : > { %17456 = vst [vmem:[#allocation96_spill] sm:$0xff] %v14180_v9  ;;  %v14182_v39 = vpop.f32.mrf.mxu0  ;;  %v339_v9 = vld [vmem:[%s13372_s28 + $0x340] sm:$0xff] }
 0x15d   : > { %17457 = vst [vmem:[#allocation97_spill] sm:$0xff] %v14182_v39  ;;  %v14184_v7 = vpop.f32.mrf.mxu1  ;;  %v340_v39 = vld [vmem:[%s13372_s28 + $0x348] sm:$0xff] }
 0x15e   : > { %17458 = vst [vmem:[#allocation98_spill] sm:$0xff] %v14184_v7  ;;  %v12281_v41 = vpop.f32.mrf.mxu0  ;;  %12376 = vmatmul.mubr.msk.bf16.gmra.mxu0 %vm646_vm1, %v2401_v46  ;;  %v423_v48 = vpack.c.bf16 %v340_v39, %v339_v9  ;;  %v2323_v9 = vld [vmem:[%s13372_s28 + $0x35a] sm:$0xff] }
 0x15f   : > { %v12143_v56 = vpop.f32.mrf.mxu1  ;;  %12238 = vmatmul.mubr.msk.bf16.gmra.mxu1 %vm646_vm1, %v420_v24  ;;  %12379 = vmatprep.mubr.msk.bf16.mxu0 %vm646_vm1, %v2402_v12  ;;  %v2403_v12 = vpack.c.bf16 %v2319_v51, %v2318_v54  ;;  %v2325_v51 = vld [vmem:[%s13372_s28 + $0x36a] sm:$0xff] }
 0x160   : > { %v1682_v0 = vadd.f32 %v12143_v56, %v13696_v62  ;;  %v2663_v57 = vpop.f32.mrf.mxu0  ;;  %12241 = vmatprep.mubr.msk.bf16.mxu1 %vm646_vm1, %v421_v59  ;;  %v2404_v62 = vpack.c.bf16 %v2321_v28, %v2320_v36 }
 0x161   : > { %v1673_v7 = vpop.f32.mrf.mxu1 }
 0x162   : > { %v14199_v46 = vadd.f32 %v12281_v41, %v1682_v0  ;;  %v1674_v24 = vadd.f32 %v1673_v7, %v13706_v3  ;;  %v12282_v17 = vpop.f32.mrf.mxu0 }
 0x163   : > { %v12144_v52 = vpop.f32.mrf.mxu1 }
 0x164   : > { %v14202_v56 = vadd.f32 %v2663_v57, %v1674_v24  ;;  %v1685_v59 = vadd.f32 %v12144_v52, %v13716_v10  ;;  %v2666_v27 = vpop.f32.mrf.mxu0  ;;  %v341_v10 = vld [vmem:[%s13372_s28 + $0x350] sm:$0xff]  ;;  %v343_v57 = vld [vmem:[%s13372_s28 + $0x360] sm:$0xff] }
 0x165   : > { %v1676_v14 = vpop.f32.mrf.mxu1  ;;  %v2322_v52 = vld [vmem:[%s13372_s28 + $0x352] sm:$0xff] }
 0x166   : > { %v14205_v41 = vadd.f32 %v12282_v17, %v1685_v59  ;;  %v1677_v3 = vadd.f32 %v1676_v14, %v13720_v15  ;;  %v12285_v7 = vpop.f32.mrf.mxu0  ;;  %12380 = vmatmul.mubr.msk.bf16.gmra.mxu0 %vm646_vm1, %v2403_v12  ;;  %v342_v15 = vld [vmem:[%s13372_s28 + $0x358] sm:$0xff]  ;;  %v2324_v14 = vld [vmem:[%s13372_s28 + $0x362] sm:$0xff]  ;;  %v2405_v24 = vpack.c.bf16 %v2323_v9, %v2322_v52 }
 0x167   : > { %v12147_v19 = vpop.f32.mrf.mxu1  ;;  %12242 = vmatmul.mubr.msk.bf16.gmra.mxu1 %vm646_vm1, %v422_v22  ;;  %12383 = vmatprep.mubr.msk.bf16.mxu0 %vm646_vm1, %v2404_v62  ;;  %v424_v12 = vpack.c.bf16 %v342_v15, %v341_v10  ;;  %v2326_v9 = vld [vmem:[%s13372_s28 + $0x372] sm:$0xff] }
 0x168   : > { %v14214_v39 = vadd.f32 %v2666_v27, %v1677_v3  ;;  %v1698_v17 = vadd.f32 %v12147_v19, %v13724_v18  ;;  %v2679_v54 = vpop.f32.mrf.mxu0  ;;  %12245 = vmatprep.mubr.msk.bf16.mxu1 %vm646_vm1, %v423_v48  ;;  %v2406_v18 = vpack.c.bf16 %v2325_v51, %v2324_v14  ;;  %v425_v3 = vpack.c.bf16 %v344_v63, %v343_v57  ;;  %v2328_v51 = vld [vmem:[%s13372_s28 + $0x382] sm:$0xff] }
 0x169   : > { %v1689_v0 = vpop.f32.mrf.mxu1  ;;  %v347_v63 = vld [vmem:[%s13372_s28 + $0x380] sm:$0xff] }
 0x16a   : > { %v14223_v36 = vadd.f32 %v12285_v7, %v1698_v17  ;;  %v1690_v22 = vadd.f32 %v1689_v0, %v13734_v23  ;;  %v12286_v28 = vpop.f32.mrf.mxu0  ;;  %v2327_v17 = vld [vmem:[%s13372_s28 + $0x37a] sm:$0xff]  ;;  %v2329_v0 = vld [vmem:[%s13372_s28 + $0x38a] sm:$0xff] }
 0x16b   : > { %v12148_v27 = vpop.f32.mrf.mxu1 }
 0x16c   : > { %v14226_v62 = vadd.f32 %v2679_v54, %v1690_v22  ;;  %v1701_v48 = vadd.f32 %v12148_v27, %v13744_v32  ;;  %v2682_v59 = vpop.f32.mrf.mxu0  ;;  %v345_v32 = vld [vmem:[%s13372_s28 + $0x370] sm:$0xff]  ;;  %v348_v22 = vld [vmem:[%s13372_s28 + $0x388] sm:$0xff] }
 0x16d   : > { %v1692_v19 = vpop.f32.mrf.mxu1 }
 0x16e   : > { %v14229_v7 = vadd.f32 %v12286_v28, %v1701_v48  ;;  %v1693_v23 = vadd.f32 %v1692_v19, %v13748_v37  ;;  %v12289_v52 = vpop.f32.mrf.mxu0  ;;  %12384 = vmatmul.mubr.msk.bf16.gmra.mxu0 %vm646_vm1, %v2405_v24  ;;  %v346_v37 = vld [vmem:[%s13372_s28 + $0x378] sm:$0xff] }
 0x16f   : > { %v12151_v10 = vpop.f32.mrf.mxu1  ;;  %12246 = vmatmul.mubr.msk.bf16.gmra.mxu1 %vm646_vm1, %v424_v12  ;;  %12387 = vmatprep.mubr.msk.bf16.mxu0 %vm646_vm1, %v2406_v18  ;;  %v2407_v12 = vpack.c.bf16 %v2327_v17, %v2326_v9  ;;  %v426_v48 = vpack.c.bf16 %v346_v37, %v345_v32  ;;  %v2330_v17 = vld [vmem:[%s13372_s28 + $0x392] sm:$0xff] }
 0x170   : > { %v14238_v54 = vadd.f32 %v2682_v59, %v1693_v23  ;;  %v1714_v15 = vadd.f32 %v12151_v10, %v13752_v40  ;;  %v2695_v14 = vpop.f32.mrf.mxu0  ;;  %12249 = vmatprep.mubr.msk.bf16.mxu1 %vm646_vm1, %v425_v3  ;;  %v2408_v40 = vpack.c.bf16 %v2329_v0, %v2328_v51  ;;  %v427_v23 = vpack.c.bf16 %v348_v22, %v347_v63  ;;  %v2332_v0 = vld [vmem:[%s13372_s28 + $0x3a2] sm:$0xff] }
 0x171   : > { %v1705_v57 = vpop.f32.mrf.mxu1  ;;  %v351_v22 = vld [vmem:[%s13372_s28 + $0x3a0] sm:$0xff] }
 0x172   : > { %v14247_v28 = vadd.f32 %v12289_v52, %v1714_v15  ;;  %v1706_v24 = vadd.f32 %v1705_v57, %v13762_v45  ;;  %v12290_v27 = vpop.f32.mrf.mxu0  ;;  %v2331_v15 = vld [vmem:[%s13372_s28 + $0x39a] sm:$0xff]  ;;  %v2333_v57 = vld [vmem:[%s13372_s28 + $0x3aa] sm:$0xff] }
 0x173   : > { %v12152_v18 = vpop.f32.mrf.mxu1 }
 0x174   : > { %v14250_v59 = vadd.f32 %v2695_v14, %v1706_v24  ;;  %v1717_v3 = vadd.f32 %v12152_v18, %v13772_v50  ;;  %v2698_v19 = vpop.f32.mrf.mxu0  ;;  %v349_v50 = vld [vmem:[%s13372_s28 + $0x390] sm:$0xff]  ;;  %v352_v24 = vld [vmem:[%s13372_s28 + $0x3a8] sm:$0xff] }
 0x175   : > { %v1708_v10 = vpop.f32.mrf.mxu1 }
 0x176   : > { %v14253_v52 = vadd.f32 %v12290_v27, %v1717_v3  ;;  %v1709_v45 = vadd.f32 %v1708_v10, %v13776_v55  ;;  %v12293_v9 = vpop.f32.mrf.mxu0  ;;  %12388 = vmatmul.mubr.msk.bf16.gmra.mxu0 %vm646_vm1, %v2407_v12  ;;  %v350_v55 = vld [vmem:[%s13372_s28 + $0x398] sm:$0xff] }
 0x177   : > { %v12155_v32 = vpop.f32.mrf.mxu1  ;;  %12250 = vmatmul.mubr.msk.bf16.gmra.mxu1 %vm646_vm1, %v426_v48  ;;  %12391 = vmatprep.mubr.msk.bf16.mxu0 %vm646_vm1, %v2408_v40  ;;  %v2409_v48 = vpack.c.bf16 %v2331_v15, %v2330_v17  ;;  %v428_v3 = vpack.c.bf16 %v350_v55, %v349_v50  ;;  %v2334_v15 = vld [vmem:[%s13372_s28 + $0x3b2] sm:$0xff] }
 0x178   : > { %v14262_v14 = vadd.f32 %v2698_v19, %v1709_v45  ;;  %v1730_v37 = vadd.f32 %v12155_v32, %v13780_v58  ;;  %v2711_v51 = vpop.f32.mrf.mxu0  ;;  %12253 = vmatprep.mubr.msk.bf16.mxu1 %vm646_vm1, %v427_v23  ;;  %v2410_v58 = vpack.c.bf16 %v2333_v57, %v2332_v0  ;;  %v429_v45 = vpack.c.bf16 %v352_v24, %v351_v22  ;;  %v2336_v57 = vld [vmem:[%s13372_s28 + $0x3c2] sm:$0xff] }
 0x179   : > { %v1721_v63 = vpop.f32.mrf.mxu1  ;;  %v355_v24 = vld [vmem:[%s13372_s28 + $0x3c0] sm:$0xff] }
 0x17a   : > { %v14271_v27 = vadd.f32 %v12293_v9, %v1730_v37  ;;  %v1722_v12 = vadd.f32 %v1721_v63, %v13790_v1  ;;  %v12294_v18 = vpop.f32.mrf.mxu0  ;;  %v2335_v37 = vld [vmem:[%s13372_s28 + $0x3ba] sm:$0xff]  ;;  %v2337_v63 = vld [vmem:[%s13372_s28 + $0x3ca] sm:$0xff] }
 0x17b   : > { %v12156_v40 = vpop.f32.mrf.mxu1 }
 0x17c   : > { %v14274_v19 = vadd.f32 %v2711_v51, %v1722_v12  ;;  %v1733_v23 = vadd.f32 %v12156_v40, %v13800_v11  ;;  %v2714_v10 = vpop.f32.mrf.mxu0  ;;  %v353_v11 = vld [vmem:[%s13372_s28 + $0x3b0] sm:$0xff]  ;;  %v356_v12 = vld [vmem:[%s13372_s28 + $0x3c8] sm:$0xff] }
 0x17d   : > { %v1724_v32 = vpop.f32.mrf.mxu1 }
 0x17e   : > { %v14277_v9 = vadd.f32 %v12294_v18, %v1733_v23  ;;  %v1725_v1 = vadd.f32 %v1724_v32, %v13804_v21  ;;  %v12297_v17 = vpop.f32.mrf.mxu0  ;;  %12392 = vmatmul.mubr.msk.bf16.gmra.mxu0 %vm646_vm1, %v2409_v48  ;;  %v354_v21 = vld [vmem:[%s13372_s28 + $0x3b8] sm:$0xff] }
 0x17f   : > { %v12159_v50 = vpop.f32.mrf.mxu1  ;;  %12254 = vmatmul.mubr.msk.bf16.gmra.mxu1 %vm646_vm1, %v428_v3  ;;  %12395 = vmatprep.mubr.msk.bf16.mxu0 %vm646_vm1, %v2410_v58  ;;  %v2411_v3 = vpack.c.bf16 %v2335_v37, %v2334_v15  ;;  %v430_v23 = vpack.c.bf16 %v354_v21, %v353_v11  ;;  %v2338_v37 = vld [vmem:[%s13372_s28 + $0x3d2] sm:$0xff] }
 0x180   : > { %v14286_v51 = vadd.f32 %v2714_v10, %v1725_v1  ;;  %v1746_v55 = vadd.f32 %v12159_v50, %v13808_v25  ;;  %v2727_v0 = vpop.f32.mrf.mxu0  ;;  %12257 = vmatprep.mubr.msk.bf16.mxu1 %vm646_vm1, %v429_v45  ;;  %v2412_v25 = vpack.c.bf16 %v2337_v63, %v2336_v57  ;;  %v431_v1 = vpack.c.bf16 %v356_v12, %v355_v24  ;;  %v2340_v63 = vld [vmem:[%s13372_s28 + $0x3e2] sm:$0xff] }
 0x181   : > { %v1737_v22 = vpop.f32.mrf.mxu1  ;;  %v359_v12 = vld [vmem:[%s13372_s28 + $0x3e0] sm:$0xff] }
 0x182   : > { %v14295_v18 = vadd.f32 %v12297_v17, %v1746_v55  ;;  %v1738_v48 = vadd.f32 %v1737_v22, %v13818_v35  ;;  %v12298_v40 = vpop.f32.mrf.mxu0  ;;  %v2339_v55 = vld [vmem:[%s13372_s28 + $0x3da] sm:$0xff]  ;;  %v2341_v22 = vld [vmem:[%s13372_s28 + $0x3ea] sm:$0xff] }
 0x183   : > { %v12160_v58 = vpop.f32.mrf.mxu1 }
 0x184   : > { %v14298_v10 = vadd.f32 %v2727_v0, %v1738_v48  ;;  %v1749_v45 = vadd.f32 %v12160_v58, %v13828_v30  ;;  %v2730_v32 = vpop.f32.mrf.mxu0  ;;  %v357_v30 = vld [vmem:[%s13372_s28 + $0x3d0] sm:$0xff]  ;;  %v360_v48 = vld [vmem:[%s13372_s28 + $0x3e8] sm:$0xff] }
 0x185   : > { %v1740_v50 = vpop.f32.mrf.mxu1 }
 0x186   : > { %v14301_v17 = vadd.f32 %v12298_v40, %v1749_v45  ;;  %v1741_v35 = vadd.f32 %v1740_v50, %v13832_v53  ;;  %v12301_v15 = vpop.f32.mrf.mxu0  ;;  %12396 = vmatmul.mubr.msk.bf16.gmra.mxu0 %vm646_vm1, %v2411_v3  ;;  %v358_v53 = vld [vmem:[%s13372_s28 + $0x3d8] sm:$0xff] }
 0x187   : > { %v12163_v11 = vpop.f32.mrf.mxu1  ;;  %12258 = vmatmul.mubr.msk.bf16.gmra.mxu1 %vm646_vm1, %v430_v23  ;;  %12399 = vmatprep.mubr.msk.bf16.mxu0 %vm646_vm1, %v2412_v25  ;;  %v2413_v23 = vpack.c.bf16 %v2339_v55, %v2338_v37  ;;  %v432_v45 = vpack.c.bf16 %v358_v53, %v357_v30  ;;  %v2342_v55 = vld [vmem:[%s13372_s28 + $0x3f2] sm:$0xff] }
 0x188   : > { %v14310_v0 = vadd.f32 %v2730_v32, %v1741_v35  ;;  %v1762_v21 = vadd.f32 %v12163_v11, %v13836_v60  ;;  %v2743_v57 = vpop.f32.mrf.mxu0  ;;  %12261 = vmatprep.mubr.msk.bf16.mxu1 %vm646_vm1, %v431_v1  ;;  %v2414_v60 = vpack.c.bf16 %v2341_v22, %v2340_v63  ;;  %v433_v35 = vpack.c.bf16 %v360_v48, %v359_v12  ;;  %v2344_v22 = vld [vmem:[%s13372_s28 + $0x402] sm:$0xff] }
 0x189   : > { %v1753_v24 = vpop.f32.mrf.mxu1  ;;  %v363_v48 = vld [vmem:[%s13372_s28 + $0x400] sm:$0xff] }
 0x18a   : > { %v14319_v40 = vadd.f32 %v12301_v15, %v1762_v21  ;;  %v1754_v3 = vadd.f32 %v1753_v24, %v13846_v5  ;;  %v12302_v58 = vpop.f32.mrf.mxu0  ;;  %v2343_v21 = vld [vmem:[%s13372_s28 + $0x3fa] sm:$0xff]  ;;  %v2345_v24 = vld [vmem:[%s13372_s28 + $0x40a] sm:$0xff] }
 0x18b   : > { %v12164_v25 = vpop.f32.mrf.mxu1 }
 0x18c   : > { %v14322_v32 = vadd.f32 %v2743_v57, %v1754_v3  ;;  %v1765_v1 = vadd.f32 %v12164_v25, %v13856_v29  ;;  %v2746_v50 = vpop.f32.mrf.mxu0  ;;  %v361_v29 = vld [vmem:[%s13372_s28 + $0x3f0] sm:$0xff]  ;;  %v364_v3 = vld [vmem:[%s13372_s28 + $0x408] sm:$0xff] }
 0x18d   : > { %v1756_v11 = vpop.f32.mrf.mxu1 }
 0x18e   : > { %v14325_v15 = vadd.f32 %v12302_v58, %v1765_v1  ;;  %v1757_v5 = vadd.f32 %v1756_v11, %v13860_v42  ;;  %v12305_v37 = vpop.f32.mrf.mxu0  ;;  %12400 = vmatmul.mubr.msk.bf16.gmra.mxu0 %vm646_vm1, %v2413_v23  ;;  %v362_v42 = vld [vmem:[%s13372_s28 + $0x3f8] sm:$0xff] }
 0x18f   : > { %v12167_v30 = vpop.f32.mrf.mxu1  ;;  %12262 = vmatmul.mubr.msk.bf16.gmra.mxu1 %vm646_vm1, %v432_v45  ;;  %12403 = vmatprep.mubr.msk.bf16.mxu0 %vm646_vm1, %v2414_v60  ;;  %v2415_v45 = vpack.c.bf16 %v2343_v21, %v2342_v55  ;;  %v434_v1 = vpack.c.bf16 %v362_v42, %v361_v29  ;;  %v2346_v21 = vld [vmem:[%s13372_s28 + $0x412] sm:$0xff] }
 0x190   : > { %v14334_v57 = vadd.f32 %v2746_v50, %v1757_v5  ;;  %v1778_v53 = vadd.f32 %v12167_v30, %v13864_v47  ;;  %v2759_v63 = vpop.f32.mrf.mxu0  ;;  %12265 = vmatprep.mubr.msk.bf16.mxu1 %vm646_vm1, %v433_v35  ;;  %v2416_v47 = vpack.c.bf16 %v2345_v24, %v2344_v22  ;;  %v435_v5 = vpack.c.bf16 %v364_v3, %v363_v48  ;;  %v2348_v24 = vld [vmem:[%s13372_s28 + $0x422] sm:$0xff] }
 0x191   : > { %v1769_v12 = vpop.f32.mrf.mxu1  ;;  %v367_v3 = vld [vmem:[%s13372_s28 + $0x420] sm:$0xff] }
 0x192   : > { %v14343_v58 = vadd.f32 %v12305_v37, %v1778_v53  ;;  %v1770_v23 = vadd.f32 %v1769_v12, %v13874_v2  ;;  %v12306_v25 = vpop.f32.mrf.mxu0  ;;  %v2347_v53 = vld [vmem:[%s13372_s28 + $0x41a] sm:$0xff]  ;;  %v2349_v12 = vld [vmem:[%s13372_s28 + $0x42a] sm:$0xff] }
 0x193   : > { %v12168_v60 = vpop.f32.mrf.mxu1 }
 0x194   : > { %v14346_v50 = vadd.f32 %v2759_v63, %v1770_v23  ;;  %v1781_v35 = vadd.f32 %v12168_v60, %v13884_v31  ;;  %v2762_v11 = vpop.f32.mrf.mxu0  ;;  %v365_v31 = vld [vmem:[%s13372_s28 + $0x410] sm:$0xff]  ;;  %v368_v23 = vld [vmem:[%s13372_s28 + $0x428] sm:$0xff] }
 0x195   : > { %v1772_v30 = vpop.f32.mrf.mxu1 }
 0x196   : > { %v14349_v37 = vadd.f32 %v12306_v25, %v1781_v35  ;;  %v1773_v2 = vadd.f32 %v1772_v30, %v13888_v44  ;;  %v12309_v55 = vpop.f32.mrf.mxu0  ;;  %12404 = vmatmul.mubr.msk.bf16.gmra.mxu0 %vm646_vm1, %v2415_v45  ;;  %v366_v44 = vld [vmem:[%s13372_s28 + $0x418] sm:$0xff] }
 0x197   : > { %v12171_v29 = vpop.f32.mrf.mxu1  ;;  %12266 = vmatmul.mubr.msk.bf16.gmra.mxu1 %vm646_vm1, %v434_v1  ;;  %12407 = vmatprep.mubr.msk.bf16.mxu0 %vm646_vm1, %v2416_v47  ;;  %v2417_v1 = vpack.c.bf16 %v2347_v53, %v2346_v21  ;;  %v436_v35 = vpack.c.bf16 %v366_v44, %v365_v31  ;;  %v2350_v53 = vld [vmem:[%s13372_s28 + $0x432] sm:$0xff] }
 0x198   : > { %v14358_v63 = vadd.f32 %v2762_v11, %v1773_v2  ;;  %v1794_v42 = vadd.f32 %v12171_v29, %v13892_v16  ;;  %v2775_v22 = vpop.f32.mrf.mxu0  ;;  %12269 = vmatprep.mubr.msk.bf16.mxu1 %vm646_vm1, %v435_v5  ;;  %v2418_v16 = vpack.c.bf16 %v2349_v12, %v2348_v24  ;;  %v437_v2 = vpack.c.bf16 %v368_v23, %v367_v3  ;;  %v4468_v12 = vld [vmem:[%s13372_s28 + $0x23] sm:$0xff] }
 0x199   : > { %v1785_v48 = vpop.f32.mrf.mxu1  ;;  %v3342_v23 = vld [vmem:[%s13372_s28 + $0x22] sm:$0xff] }
 0x19a   : > { %v14367_v25 = vadd.f32 %v12309_v55, %v1794_v42  ;;  %v1786_v45 = vadd.f32 %v1785_v48, %v13902_v4  ;;  %v12310_v60 = vpop.f32.mrf.mxu0  ;;  %v2351_v42 = vld [vmem:[%s13372_s28 + $0x43a] sm:$0xff]  ;;  %v4469_v48 = vld [vmem:[%s13372_s28 + $0x2b] sm:$0xff] }
 0x19b   : > { %v12172_v47 = vpop.f32.mrf.mxu1 }
 0x19c   : > { %v14370_v11 = vadd.f32 %v2775_v22, %v1786_v45  ;;  %v1797_v5 = vadd.f32 %v12172_v47, %v13912_v49  ;;  %v2778_v30 = vpop.f32.mrf.mxu0  ;;  %v369_v49 = vld [vmem:[%s13372_s28 + $0x430] sm:$0xff] }
 0x19d   : > { %v1788_v29 = vpop.f32.mrf.mxu1  ;;  %v3343_v45 = vld [vmem:[%s13372_s28 + $0x2a] sm:$0xff] }
 0x19e   : > { %v14373_v55 = vadd.f32 %v12310_v60, %v1797_v5  ;;  %v1789_v4 = vadd.f32 %v1788_v29, %v13916_v33  ;;  %v12313_v21 = vpop.f32.mrf.mxu0  ;;  %12408 = vmatmul.mubr.msk.bf16.gmra.mxu0 %vm646_vm1, %v2417_v1  ;;  %v370_v33 = vld [vmem:[%s13372_s28 + $0x438] sm:$0xff] }
 0x19f   : > { %v12175_v31 = vpop.f32.mrf.mxu1  ;;  %12270 = vmatmul.mubr.msk.bf16.gmra.mxu1 %vm646_vm1, %v436_v35  ;;  %12411 = vmatprep.mubr.msk.bf16.mxu0 %vm646_vm1, %v2418_v16  ;;  %v2419_v35 = vpack.c.bf16 %v2351_v42, %v2350_v53  ;;  %v438_v5 = vpack.c.bf16 %v370_v33, %v369_v49  ;;  %v4471_v42 = vld [vmem:[%s13372_s28 + $0x3b] sm:$0xff] }
 0x1a0   : > { %v14382_v22 = vadd.f32 %v2778_v30, %v1789_v4  ;;  %v1810_v44 = vadd.f32 %v12175_v31, %v13920_v43  ;;  %v2791_v24 = vpop.f32.mrf.mxu0  ;;  %12273 = vmatprep.mubr.msk.bf16.mxu1 %vm646_vm1, %v437_v2  ;;  %v4604_v43 = vpack.c.bf16 %v4469_v48, %v4468_v12  ;;  %v3478_v4 = vpack.c.bf16 %v3343_v45, %v3342_v23  ;;  %v3345_v12 = vld [vmem:[%s13372_s28 + $0x3a] sm:$0xff]  ;;  %v3347_v23 = vld [vmem:[%s13372_s28 + $0x4a] sm:$0xff] }
 0x1a1   : > { %v1801_v3 = vpop.f32.mrf.mxu1 }
 0x1a2   : > { %v14391_v60 = vadd.f32 %v12313_v21, %v1810_v44  ;;  %v1802_v1 = vadd.f32 %v1801_v3, %v13930_v8  ;;  %v12314_v47 = vpop.f32.mrf.mxu0  ;;  %v3346_v3 = vld [vmem:[%s13372_s28 + $0x42] sm:$0xff] }
 0x1a3   : > { %v12176_v16 = vpop.f32.mrf.mxu1 }
 0x1a4   : > { %v14394_v30 = vadd.f32 %v2791_v24, %v1802_v1  ;;  %v1813_v2 = vadd.f32 %v12176_v16, %v13940_v38  ;;  %v2794_v29 = vpop.f32.mrf.mxu0  ;;  %v4470_v38 = vld [vmem:[%s13372_s28 + $0x33] sm:$0xff]  ;;  %v4472_v16 = vld [vmem:[%s13372_s28 + $0x43] sm:$0xff] }
 0x1a5   : > { %v1804_v31 = vpop.f32.mrf.mxu1 }
 0x1a6   : > { %v14397_v21 = vadd.f32 %v12314_v47, %v1813_v2  ;;  %v1805_v8 = vadd.f32 %v1804_v31, %v13944_v26  ;;  %v12317_v53 = vpop.f32.mrf.mxu0  ;;  %12412 = vmatmul.mubr.msk.bf16.gmra.mxu0 %vm646_vm1, %v2419_v35  ;;  %v3344_v26 = vld [vmem:[%s13372_s28 + $0x32] sm:$0xff]  ;;  %v4605_v35 = vpack.c.bf16 %v4471_v42, %v4470_v38  ;;  %v7131_v31 = vsel %vm851_vm0, %v14036_v34, 0 }
 0x1a7   : > { %v12179_v49 = vpop.f32.mrf.mxu1  ;;  %12274 = vmatmul.mubr.msk.bf16.gmra.mxu1 %vm646_vm1, %v438_v5  ;;  %12555 = vmatprep.mubr.msk.bf16.mxu0 %vm646_vm1, %v4604_v43  ;;  %v4473_v5 = vld [vmem:[%s13372_s28 + $0x4b] sm:$0xff]  ;;  %v3479_v2 = vpack.c.bf16 %v3345_v12, %v3344_v26  ;;  %v17460_v42 = vld [vmem:[#allocation41_spill] sm:$0xff] }
 0x1a8   : > { %v14405_v44 = vadd.f32 %v2794_v29, %v1805_v8  ;;  %v1826_v24 = vadd.f32 %v12179_v49, %v13948_v6  ;;  %v2807_v33 = vpop.f32.mrf.mxu0  ;;  %12417 = vmatprep.mubr.msk.bf16.mxu1 %vm646_vm1, %v3478_v4  ;;  %v3480_v8 = vpack.c.bf16 %v3347_v23, %v3346_v3  ;;  %v4606_v49 = vpack.c.bf16 %v4473_v5, %v4472_v16  ;;  %v3348_v34 = vld [vmem:[%s13372_s28 + $0x52] sm:$0xff]  ;;  %v3350_v5 = vld [vmem:[%s13372_s28 + $0x62] sm:$0xff] }
 0x1a9   : > { %v1817_v48 = vpop.f32.mrf.mxu1  ;;  %v4474_v26 = vld [vmem:[%s13372_s28 + $0x53] sm:$0xff] }
 0x1aa   : > { %v14413_v45 = vadd.f32 %v12317_v53, %v1826_v24  ;;  %v1818_v1 = vadd.f32 %v1817_v48, %v13958_v61  ;;  %v12318_v47 = vpop.f32.mrf.mxu0  ;;  %v6005_v61 = vsel %vm851_vm0, %v14023_v20, 0  ;;  %v4475_v20 = vld [vmem:[%s13372_s28 + $0x5b] sm:$0xff]  ;;  %v17462_v48 = vld [vmem:[#allocation43_spill] sm:$0xff] }
 0x1ab   : > { %v12180_v43 = vpop.f32.mrf.mxu1 }
 0x1ac   : > { %v14418_v6 = vadd.f32 %v2807_v33, %v1818_v1  ;;  %v1829_v29 = vadd.f32 %v12180_v43, %v13968_v13  ;;  %v2810_v4 = vpop.f32.mrf.mxu0  ;;  %v3349_v1 = vld [vmem:[%s13372_s28 + $0x5a] sm:$0xff]  ;;  %v3351_v43 = vld [vmem:[%s13372_s28 + $0x6a] sm:$0xff] }
 0x1ad   : > { %v1820_v53 = vpop.f32.mrf.mxu1 }
 0x1ae   : > { %v14425_v38 = vadd.f32 %v12318_v47, %v1829_v29  ;;  %v1821_v24 = vadd.f32 %v1820_v53, %v17460_v42  ;;  %v12321_v33 = vpop.f32.mrf.mxu0  ;;  %12556 = vmatmul.mubr.msk.bf16.vlgmr.msra.gmra.mxu0 %vm646_vm1, %v4605_v35  ;;  %v4476_v47 = vld [vmem:[%s13372_s28 + $0x63] sm:$0xff]  ;;  %v4477_v35 = vld [vmem:[%s13372_s28 + $0x6b] sm:$0xff]  ;;  %v17464_v29 = vld [vmem:[#allocation45_spill] sm:$0xff]  ;;  %v4607_v53 = vpack.c.bf16 %v4475_v20, %v4474_v26 }
 0x1af   : > { %v12183_v13 = vpop.f32.mrf.mxu1  ;;  %12418 = vmatmul.mubr.msk.bf16.vlgmr.msra.gmra.mxu1 %vm646_vm1, %v3479_v2  ;;  %12830 = vmatpush3.bf16.msra.mxu0 %v7131_v31 }
 0x1b0   : > { %17459 = vst [vmem:[#allocation99_spill] sm:$0xff] %v14425_v38  ;;  %v14433_v12 = vadd.f32 %v2810_v4, %v1821_v24  ;;  %v1842_v3 = vadd.f32 %v12183_v13, %v17462_v48  ;;  %12692 = vmatpush3.bf16.msra.mxu1 %v6005_v61  ;;  %v2823_v23 = vpop.f32.mrf.mxu0  ;;  %12421 = vmatprep.mubr.msk.bf16.mxu1 %vm646_vm1, %v3480_v8  ;;  %v17466_v13 = vld [vmem:[#allocation47_spill] sm:$0xff] }
 0x1b1   : > { %v1833_v16 = vpop.f32.mrf.mxu1  ;;  %12559 = vmatprep.mubr.msk.bf16.mxu0 %vm646_vm1, %v4606_v49  ;;  %v3481_v61 = vpack.c.bf16 %v3349_v1, %v3348_v34  ;;  %v4608_v8 = vpack.c.bf16 %v4477_v35, %v4476_v47  ;;  %v3482_v49 = vpack.c.bf16 %v3351_v43, %v3350_v5  ;;  %v4478_v1 = vld [vmem:[%s13372_s28 + $0x73] sm:$0xff]  ;;  %v4479_v47 = vld [vmem:[%s13372_s28 + $0x7b] sm:$0xff] }
 0x1b2   : > { %17461 = vst [vmem:[#allocation41_spill] sm:$0xff] %v14433_v12  ;;  %v14443_v2 = vadd.f32 %v12321_v33, %v1842_v3  ;;  %v1834_v31 = vadd.f32 %v1833_v16, %v17464_v29  ;;  %v12322_v4 = vpop.f32.mrf.mxu0  ;;  %v17468_v3 = vld [vmem:[#allocation49_spill] sm:$0xff]  ;;  %v17470_v16 = vld [vmem:[#allocation51_spill] sm:$0xff] }
 0x1b3   : > { %v12184_v42 = vpop.f32.mrf.mxu1  ;;  %v4480_v29 = vld [vmem:[%s13372_s28 + $0x83] sm:$0xff] }
 0x1b4   : > { %17463 = vst [vmem:[#allocation43_spill] sm:$0xff] %v14443_v2  ;;  %v14446_v24 = vadd.f32 %v2823_v23, %v1834_v31  ;;  %v1845_v48 = vadd.f32 %v12184_v42, %v17466_v13  ;;  %v2826_v12 = vpop.f32.mrf.mxu0  ;;  %v3352_v23 = vld [vmem:[%s13372_s28 + $0x72] sm:$0xff]  ;;  %v3355_v42 = vld [vmem:[%s13372_s28 + $0x8a] sm:$0xff] }
 0x1b5   : > { %v1836_v38 = vpop.f32.mrf.mxu1  ;;  %v4481_v31 = vld [vmem:[%s13372_s28 + $0x8b] sm:$0xff] }
 0x1b6   : > { %17465 = vst [vmem:[#allocation45_spill] sm:$0xff] %v14446_v24  ;;  %v14449_v33 = vadd.f32 %v12322_v4, %v1845_v48  ;;  %v1837_v26 = vadd.f32 %v1836_v38, %v17468_v3  ;;  %v12325_v20 = vpop.f32.mrf.mxu0  ;;  %12560 = vmatmul.mubr.msk.bf16.gmra.mxu0 %vm646_vm1, %v4607_v53  ;;  %v3353_v38 = vld [vmem:[%s13372_s28 + $0x7a] sm:$0xff]  ;;  %v3354_v53 = vld [vmem:[%s13372_s28 + $0x82] sm:$0xff]  ;;  %v4609_v3 = vpack.c.bf16 %v4479_v47, %v4478_v1 }
 0x1b7   : > { %v12187_v34 = vpop.f32.mrf.mxu1  ;;  %12422 = vmatmul.mubr.msk.bf16.gmra.mxu1 %vm646_vm1, %v3481_v61  ;;  %12563 = vmatprep.mubr.msk.bf16.mxu0 %vm646_vm1, %v4608_v8  ;;  %v17472_v61 = vld [vmem:[#allocation53_spill] sm:$0xff]  ;;  %v3484_v24 = vpack.c.bf16 %v3355_v42, %v3354_v53  ;;  %v4484_v42 = vld [vmem:[%s13372_s28 + $0xa3] sm:$0xff] }
 0x1b8   : > { %17467 = vst [vmem:[#allocation47_spill] sm:$0xff] %v14449_v33  ;;  %v14458_v35 = vadd.f32 %v2826_v12, %v1837_v26  ;;  %v1858_v5 = vadd.f32 %v12187_v34, %v17470_v16  ;;  %v2839_v43 = vpop.f32.mrf.mxu0  ;;  %12425 = vmatprep.mubr.msk.bf16.mxu1 %vm646_vm1, %v3482_v49  ;;  %v3483_v26 = vpack.c.bf16 %v3353_v38, %v3352_v23  ;;  %v17474_v49 = vld [vmem:[#allocation55_spill] sm:$0xff]  ;;  %v4482_v38 = vld [vmem:[%s13372_s28 + $0x93] sm:$0xff] }
 0x1b9   : > { %v1849_v4 = vpop.f32.mrf.mxu1  ;;  %v4610_v34 = vpack.c.bf16 %v4481_v31, %v4480_v29  ;;  %v4483_v29 = vld [vmem:[%s13372_s28 + $0x9b] sm:$0xff] }
 0x1ba   : > { %17469 = vst [vmem:[#allocation49_spill] sm:$0xff] %v14458_v35  ;;  %v14467_v13 = vadd.f32 %v12325_v20, %v1858_v5  ;;  %v1850_v8 = vadd.f32 %v1849_v4, %v17472_v61  ;;  %v12326_v48 = vpop.f32.mrf.mxu0  ;;  %v17476_v5 = vld [vmem:[#allocation57_spill] sm:$0xff]  ;;  %v4485_v61 = vld [vmem:[%s13372_s28 + $0xab] sm:$0xff] }
 0x1bb   : > { %v12188_v12 = vpop.f32.mrf.mxu1 }
 0x1bc   : > { %17471 = vst [vmem:[#allocation51_spill] sm:$0xff] %v14467_v13  ;;  %v14470_v16 = vadd.f32 %v2839_v43, %v1850_v8  ;;  %v1861_v35 = vadd.f32 %v12188_v12, %v17474_v49  ;;  %v2842_v33 = vpop.f32.mrf.mxu0  ;;  %v3356_v43 = vld [vmem:[%s13372_s28 + $0x92] sm:$0xff] }
 0x1bd   : > { %v1852_v2 = vpop.f32.mrf.mxu1 }
 0x1be   : > { %17473 = vst [vmem:[#allocation53_spill] sm:$0xff] %v14470_v16  ;;  %v14473_v20 = vadd.f32 %v12326_v48, %v1861_v35  ;;  %v1853_v1 = vadd.f32 %v1852_v2, %v17476_v5  ;;  %v12329_v47 = vpop.f32.mrf.mxu0  ;;  %12564 = vmatmul.mubr.msk.bf16.gmra.mxu0 %vm646_vm1, %v4609_v3  ;;  %v17478_v35 = vld [vmem:[#allocation59_spill] sm:$0xff]  ;;  %v3357_v2 = vld [vmem:[%s13372_s28 + $0x9a] sm:$0xff]  ;;  %v4611_v5 = vpack.c.bf16 %v4483_v29, %v4482_v38 }
 0x1bf   : > { %v12191_v23 = vpop.f32.mrf.mxu1  ;;  %12426 = vmatmul.mubr.msk.bf16.gmra.mxu1 %vm646_vm1, %v3483_v26  ;;  %12567 = vmatprep.mubr.msk.bf16.mxu0 %vm646_vm1, %v4610_v34  ;;  %v3358_v48 = vld [vmem:[%s13372_s28 + $0xa2] sm:$0xff]  ;;  %v3359_v3 = vld [vmem:[%s13372_s28 + $0xaa] sm:$0xff]  ;;  %v17480_v26 = vld [vmem:[#allocation61_spill] sm:$0xff] }
 0x1c0   : > { %17475 = vst [vmem:[#allocation55_spill] sm:$0xff] %v14473_v20  ;;  %v14482_v31 = vadd.f32 %v2842_v33, %v1853_v1  ;;  %v1874_v4 = vadd.f32 %v12191_v23, %v17478_v35  ;;  %v2855_v53 = vpop.f32.mrf.mxu0  ;;  %12429 = vmatprep.mubr.msk.bf16.mxu1 %vm646_vm1, %v3484_v24  ;;  %v3485_v1 = vpack.c.bf16 %v3357_v2, %v3356_v43  ;;  %v17482_v24 = vld [vmem:[#allocation63_spill] sm:$0xff]  ;;  %v4486_v2 = vld [vmem:[%s13372_s28 + $0xb3] sm:$0xff] }
 0x1c1   : > { %v1865_v8 = vpop.f32.mrf.mxu1  ;;  %v4612_v23 = vpack.c.bf16 %v4485_v61, %v4484_v42  ;;  %v3486_v16 = vpack.c.bf16 %v3359_v3, %v3358_v48  ;;  %v4487_v42 = vld [vmem:[%s13372_s28 + $0xbb] sm:$0xff]  ;;  %v4488_v3 = vld [vmem:[%s13372_s28 + $0xc3] sm:$0xff] }
 0x1c2   : > { %17477 = vst [vmem:[#allocation57_spill] sm:$0xff] %v14482_v31  ;;  %v14491_v12 = vadd.f32 %v12329_v47, %v1874_v4  ;;  %v1866_v34 = vadd.f32 %v1865_v8, %v17480_v26  ;;  %v12330_v49 = vpop.f32.mrf.mxu0  ;;  %v17484_v4 = vld [vmem:[#allocation65_spill] sm:$0xff]  ;;  %v4489_v26 = vld [vmem:[%s13372_s28 + $0xcb] sm:$0xff] }
 0x1c3   : > { %v12192_v33 = vpop.f32.mrf.mxu1 }
 0x1c4   : > { %17479 = vst [vmem:[#allocation59_spill] sm:$0xff] %v14491_v12  ;;  %v14494_v35 = vadd.f32 %v2855_v53, %v1866_v34  ;;  %v1877_v31 = vadd.f32 %v12192_v33, %v17482_v24  ;;  %v2858_v20 = vpop.f32.mrf.mxu0  ;;  %v3360_v53 = vld [vmem:[%s13372_s28 + $0xb2] sm:$0xff] }
 0x1c5   : > { %v1868_v13 = vpop.f32.mrf.mxu1 }
 0x1c6   : > { %17481 = vst [vmem:[#allocation61_spill] sm:$0xff] %v14494_v35  ;;  %v14497_v47 = vadd.f32 %v12330_v49, %v1877_v31  ;;  %v1869_v38 = vadd.f32 %v1868_v13, %v17484_v4  ;;  %v12333_v29 = vpop.f32.mrf.mxu0  ;;  %12568 = vmatmul.mubr.msk.bf16.gmra.mxu0 %vm646_vm1, %v4611_v5  ;;  %v17486_v31 = vld [vmem:[#allocation67_spill] sm:$0xff]  ;;  %v3361_v13 = vld [vmem:[%s13372_s28 + $0xba] sm:$0xff]  ;;  %v4613_v4 = vpack.c.bf16 %v4487_v42, %v4486_v2 }
 0x1c7   : > { %v12195_v43 = vpop.f32.mrf.mxu1  ;;  %12430 = vmatmul.mubr.msk.bf16.gmra.mxu1 %vm646_vm1, %v3485_v1  ;;  %12571 = vmatprep.mubr.msk.bf16.mxu0 %vm646_vm1, %v4612_v23  ;;  %v3362_v49 = vld [vmem:[%s13372_s28 + $0xc2] sm:$0xff]  ;;  %v3363_v5 = vld [vmem:[%s13372_s28 + $0xca] sm:$0xff]  ;;  %v17488_v1 = vld [vmem:[#allocation69_spill] sm:$0xff] }
 0x1c8   : > { %17483 = vst [vmem:[#allocation63_spill] sm:$0xff] %v14497_v47  ;;  %v14506_v61 = vadd.f32 %v2858_v20, %v1869_v38  ;;  %v1890_v8 = vadd.f32 %v12195_v43, %v17486_v31  ;;  %v2871_v48 = vpop.f32.mrf.mxu0  ;;  %12433 = vmatprep.mubr.msk.bf16.mxu1 %vm646_vm1, %v3486_v16  ;;  %v3487_v38 = vpack.c.bf16 %v3361_v13, %v3360_v53  ;;  %v17490_v16 = vld [vmem:[#allocation71_spill] sm:$0xff]  ;;  %v4490_v13 = vld [vmem:[%s13372_s28 + $0xd3] sm:$0xff] }
 0x1c9   : > { %v1881_v34 = vpop.f32.mrf.mxu1  ;;  %v4614_v43 = vpack.c.bf16 %v4489_v26, %v4488_v3  ;;  %v3488_v35 = vpack.c.bf16 %v3363_v5, %v3362_v49  ;;  %v4491_v3 = vld [vmem:[%s13372_s28 + $0xdb] sm:$0xff]  ;;  %v4492_v5 = vld [vmem:[%s13372_s28 + $0xe3] sm:$0xff] }
 0x1ca   : > { %17485 = vst [vmem:[#allocation65_spill] sm:$0xff] %v14506_v61  ;;  %v14515_v33 = vadd.f32 %v12333_v29, %v1890_v8  ;;  %v1882_v23 = vadd.f32 %v1881_v34, %v17488_v1  ;;  %v12334_v24 = vpop.f32.mrf.mxu0  ;;  %v17492_v8 = vld [vmem:[#allocation73_spill] sm:$0xff]  ;;  %v4493_v1 = vld [vmem:[%s13372_s28 + $0xeb] sm:$0xff] }
 0x1cb   : > { %v12196_v20 = vpop.f32.mrf.mxu1 }
 0x1cc   : > { %17487 = vst [vmem:[#allocation67_spill] sm:$0xff] %v14515_v33  ;;  %v14518_v31 = vadd.f32 %v2871_v48, %v1882_v23  ;;  %v1893_v61 = vadd.f32 %v12196_v20, %v17490_v16  ;;  %v2874_v47 = vpop.f32.mrf.mxu0  ;;  %v3364_v48 = vld [vmem:[%s13372_s28 + $0xd2] sm:$0xff] }
 0x1cd   : > { %v1884_v12 = vpop.f32.mrf.mxu1 }
 0x1ce   : > { %17489 = vst [vmem:[#allocation69_spill] sm:$0xff] %v14518_v31  ;;  %v14521_v29 = vadd.f32 %v12334_v24, %v1893_v61  ;;  %v1885_v2 = vadd.f32 %v1884_v12, %v17492_v8  ;;  %v12337_v42 = vpop.f32.mrf.mxu0  ;;  %12572 = vmatmul.mubr.msk.bf16.gmra.mxu0 %vm646_vm1, %v4613_v4  ;;  %v17494_v61 = vld [vmem:[#allocation75_spill] sm:$0xff]  ;;  %v3365_v12 = vld [vmem:[%s13372_s28 + $0xda] sm:$0xff]  ;;  %v4615_v8 = vpack.c.bf16 %v4491_v3, %v4490_v13 }
 0x1cf   : > { %v12199_v53 = vpop.f32.mrf.mxu1  ;;  %12434 = vmatmul.mubr.msk.bf16.gmra.mxu1 %vm646_vm1, %v3487_v38  ;;  %12575 = vmatprep.mubr.msk.bf16.mxu0 %vm646_vm1, %v4614_v43  ;;  %v3366_v24 = vld [vmem:[%s13372_s28 + $0xe2] sm:$0xff]  ;;  %v3367_v4 = vld [vmem:[%s13372_s28 + $0xea] sm:$0xff]  ;;  %v17496_v38 = vld [vmem:[#allocation77_spill] sm:$0xff] }
 0x1d0   : > { %17491 = vst [vmem:[#allocation71_spill] sm:$0xff] %v14521_v29  ;;  %v14530_v26 = vadd.f32 %v2874_v47, %v1885_v2  ;;  %v1906_v34 = vadd.f32 %v12199_v53, %v17494_v61  ;;  %v2887_v49 = vpop.f32.mrf.mxu0  ;;  %12437 = vmatprep.mubr.msk.bf16.mxu1 %vm646_vm1, %v3488_v35  ;;  %v3489_v2 = vpack.c.bf16 %v3365_v12, %v3364_v48  ;;  %v17498_v35 = vld [vmem:[#allocation79_spill] sm:$0xff]  ;;  %v4494_v12 = vld [vmem:[%s13372_s28 + $0xf3] sm:$0xff] }
 0x1d1   : > { %v1897_v23 = vpop.f32.mrf.mxu1  ;;  %v4616_v53 = vpack.c.bf16 %v4493_v1, %v4492_v5  ;;  %v3490_v31 = vpack.c.bf16 %v3367_v4, %v3366_v24  ;;  %v4495_v5 = vld [vmem:[%s13372_s28 + $0xfb] sm:$0xff]  ;;  %v4496_v4 = vld [vmem:[%s13372_s28 + $0x103] sm:$0xff] }
 0x1d2   : > { %17493 = vst [vmem:[#allocation73_spill] sm:$0xff] %v14530_v26  ;;  %v14539_v20 = vadd.f32 %v12337_v42, %v1906_v34  ;;  %v1898_v43 = vadd.f32 %v1897_v23, %v17496_v38  ;;  %v12338_v16 = vpop.f32.mrf.mxu0  ;;  %v17500_v34 = vld [vmem:[#allocation81_spill] sm:$0xff]  ;;  %v4497_v38 = vld [vmem:[%s13372_s28 + $0x10b] sm:$0xff] }
 0x1d3   : > { %v12200_v47 = vpop.f32.mrf.mxu1 }
 0x1d4   : > { %17495 = vst [vmem:[#allocation75_spill] sm:$0xff] %v14539_v20  ;;  %v14542_v61 = vadd.f32 %v2887_v49, %v1898_v43  ;;  %v1909_v26 = vadd.f32 %v12200_v47, %v17498_v35  ;;  %v2890_v29 = vpop.f32.mrf.mxu0  ;;  %v3368_v49 = vld [vmem:[%s13372_s28 + $0xf2] sm:$0xff] }
 0x1d5   : > { %v1900_v33 = vpop.f32.mrf.mxu1 }
 0x1d6   : > { %17497 = vst [vmem:[#allocation77_spill] sm:$0xff] %v14542_v61  ;;  %v14545_v42 = vadd.f32 %v12338_v16, %v1909_v26  ;;  %v1901_v13 = vadd.f32 %v1900_v33, %v17500_v34  ;;  %v12341_v3 = vpop.f32.mrf.mxu0  ;;  %12576 = vmatmul.mubr.msk.bf16.gmra.mxu0 %vm646_vm1, %v4615_v8  ;;  %v17502_v26 = vld [vmem:[#allocation83_spill] sm:$0xff]  ;;  %v3369_v33 = vld [vmem:[%s13372_s28 + $0xfa] sm:$0xff]  ;;  %v4617_v34 = vpack.c.bf16 %v4495_v5, %v4494_v12 }
 0x1d7   : > { %v12203_v48 = vpop.f32.mrf.mxu1  ;;  %12438 = vmatmul.mubr.msk.bf16.gmra.mxu1 %vm646_vm1, %v3489_v2  ;;  %12579 = vmatprep.mubr.msk.bf16.mxu0 %vm646_vm1, %v4616_v53  ;;  %v3370_v16 = vld [vmem:[%s13372_s28 + $0x102] sm:$0xff]  ;;  %v3371_v8 = vld [vmem:[%s13372_s28 + $0x10a] sm:$0xff]  ;;  %v17504_v2 = vld [vmem:[#allocation85_spill] sm:$0xff] }
 0x1d8   : > { %17499 = vst [vmem:[#allocation79_spill] sm:$0xff] %v14545_v42  ;;  %v14554_v1 = vadd.f32 %v2890_v29, %v1901_v13  ;;  %v1922_v23 = vadd.f32 %v12203_v48, %v17502_v26  ;;  %v2903_v24 = vpop.f32.mrf.mxu0  ;;  %12441 = vmatprep.mubr.msk.bf16.mxu1 %vm646_vm1, %v3490_v31  ;;  %v3491_v13 = vpack.c.bf16 %v3369_v33, %v3368_v49  ;;  %v17506_v31 = vld [vmem:[#allocation87_spill] sm:$0xff]  ;;  %v4498_v33 = vld [vmem:[%s13372_s28 + $0x113] sm:$0xff] }
 0x1d9   : > { %v1913_v43 = vpop.f32.mrf.mxu1  ;;  %v4618_v48 = vpack.c.bf16 %v4497_v38, %v4496_v4  ;;  %v3492_v61 = vpack.c.bf16 %v3371_v8, %v3370_v16  ;;  %v4499_v4 = vld [vmem:[%s13372_s28 + $0x11b] sm:$0xff]  ;;  %v4500_v8 = vld [vmem:[%s13372_s28 + $0x123] sm:$0xff] }
 0x1da   : > { %17501 = vst [vmem:[#allocation81_spill] sm:$0xff] %v14554_v1  ;;  %v14563_v47 = vadd.f32 %v12341_v3, %v1922_v23  ;;  %v1914_v53 = vadd.f32 %v1913_v43, %v17504_v2  ;;  %v12342_v35 = vpop.f32.mrf.mxu0  ;;  %v17508_v23 = vld [vmem:[#allocation89_spill] sm:$0xff]  ;;  %v4501_v2 = vld [vmem:[%s13372_s28 + $0x12b] sm:$0xff] }
 0x1db   : > { %v12204_v29 = vpop.f32.mrf.mxu1 }
 0x1dc   : > { %17503 = vst [vmem:[#allocation83_spill] sm:$0xff] %v14563_v47  ;;  %v14566_v26 = vadd.f32 %v2903_v24, %v1914_v53  ;;  %v1925_v1 = vadd.f32 %v12204_v29, %v17506_v31  ;;  %v2906_v42 = vpop.f32.mrf.mxu0  ;;  %v3372_v24 = vld [vmem:[%s13372_s28 + $0x112] sm:$0xff] }
 0x1dd   : > { %v1916_v20 = vpop.f32.mrf.mxu1 }
 0x1de   : > { %17505 = vst [vmem:[#allocation85_spill] sm:$0xff] %v14566_v26  ;;  %v14569_v3 = vadd.f32 %v12342_v35, %v1925_v1  ;;  %v1917_v12 = vadd.f32 %v1916_v20, %v17508_v23  ;;  %v12345_v5 = vpop.f32.mrf.mxu0  ;;  %12580 = vmatmul.mubr.msk.bf16.gmra.mxu0 %vm646_vm1, %v4617_v34  ;;  %v17510_v1 = vld [vmem:[#allocation91_spill] sm:$0xff]  ;;  %v3373_v20 = vld [vmem:[%s13372_s28 + $0x11a] sm:$0xff]  ;;  %v4619_v23 = vpack.c.bf16 %v4499_v4, %v4498_v33 }
 0x1df   : > { %v12207_v49 = vpop.f32.mrf.mxu1  ;;  %12442 = vmatmul.mubr.msk.bf16.gmra.mxu1 %vm646_vm1, %v3491_v13  ;;  %12583 = vmatprep.mubr.msk.bf16.mxu0 %vm646_vm1, %v4618_v48  ;;  %v3374_v35 = vld [vmem:[%s13372_s28 + $0x122] sm:$0xff]  ;;  %v3375_v34 = vld [vmem:[%s13372_s28 + $0x12a] sm:$0xff]  ;;  %v17512_v13 = vld [vmem:[#allocation93_spill] sm:$0xff] }
 0x1e0   : > { %17507 = vst [vmem:[#allocation87_spill] sm:$0xff] %v14569_v3  ;;  %v14578_v38 = vadd.f32 %v2906_v42, %v1917_v12  ;;  %v1938_v43 = vadd.f32 %v12207_v49, %v17510_v1  ;;  %v2919_v16 = vpop.f32.mrf.mxu0  ;;  %12445 = vmatprep.mubr.msk.bf16.mxu1 %vm646_vm1, %v3492_v61  ;;  %v3493_v12 = vpack.c.bf16 %v3373_v20, %v3372_v24  ;;  %v17514_v61 = vld [vmem:[#allocation95_spill] sm:$0xff]  ;;  %v4502_v20 = vld [vmem:[%s13372_s28 + $0x133] sm:$0xff] }
 0x1e1   : > { %v1929_v53 = vpop.f32.mrf.mxu1  ;;  %v4620_v49 = vpack.c.bf16 %v4501_v2, %v4500_v8  ;;  %v3494_v26 = vpack.c.bf16 %v3375_v34, %v3374_v35  ;;  %v4503_v8 = vld [vmem:[%s13372_s28 + $0x13b] sm:$0xff]  ;;  %v4504_v34 = vld [vmem:[%s13372_s28 + $0x143] sm:$0xff] }
 0x1e2   : > { %17509 = vst [vmem:[#allocation89_spill] sm:$0xff] %v14578_v38  ;;  %v14587_v29 = vadd.f32 %v12345_v5, %v1938_v43  ;;  %v1930_v48 = vadd.f32 %v1929_v53, %v17512_v13  ;;  %v12346_v31 = vpop.f32.mrf.mxu0  ;;  %v17516_v43 = vld [vmem:[#allocation97_spill] sm:$0xff]  ;;  %v4505_v13 = vld [vmem:[%s13372_s28 + $0x14b] sm:$0xff] }
 0x1e3   : > { %v12208_v42 = vpop.f32.mrf.mxu1 }
 0x1e4   : > { %17511 = vst [vmem:[#allocation91_spill] sm:$0xff] %v14587_v29  ;;  %v14590_v1 = vadd.f32 %v2919_v16, %v1930_v48  ;;  %v1941_v38 = vadd.f32 %v12208_v42, %v17514_v61  ;;  %v2922_v3 = vpop.f32.mrf.mxu0  ;;  %v3376_v16 = vld [vmem:[%s13372_s28 + $0x132] sm:$0xff] }
 0x1e5   : > { %v1932_v47 = vpop.f32.mrf.mxu1 }
 0x1e6   : > { %17513 = vst [vmem:[#allocation93_spill] sm:$0xff] %v14590_v1  ;;  %v14593_v5 = vadd.f32 %v12346_v31, %v1941_v38  ;;  %v1933_v33 = vadd.f32 %v1932_v47, %v17516_v43  ;;  %v12349_v4 = vpop.f32.mrf.mxu0  ;;  %12584 = vmatmul.mubr.msk.bf16.gmra.mxu0 %vm646_vm1, %v4619_v23  ;;  %v17518_v38 = vld [vmem:[#allocation2_spill] sm:$0xff]  ;;  %v3379_v23 = vld [vmem:[%s13372_s28 + $0x14a] sm:$0xff]  ;;  %v4621_v43 = vpack.c.bf16 %v4503_v8, %v4502_v20 }
 0x1e7   : > { %v12211_v24 = vpop.f32.mrf.mxu1  ;;  %12446 = vmatmul.mubr.msk.bf16.gmra.mxu1 %vm646_vm1, %v3493_v12  ;;  %12587 = vmatprep.mubr.msk.bf16.mxu0 %vm646_vm1, %v4620_v49  ;;  %v3377_v47 = vld [vmem:[%s13372_s28 + $0x13a] sm:$0xff]  ;;  %v3378_v31 = vld [vmem:[%s13372_s28 + $0x142] sm:$0xff] }
 0x1e8   : > { %17515 = vst [vmem:[#allocation95_spill] sm:$0xff] %v14593_v5  ;;  %v14602_v2 = vadd.f32 %v2922_v3, %v1933_v33  ;;  %v1954_v53 = vadd.f32 %v12211_v24, %v17518_v38  ;;  %v2935_v35 = vpop.f32.mrf.mxu0  ;;  %12449 = vmatprep.mubr.msk.bf16.mxu1 %vm646_vm1, %v3494_v26  ;;  %v17520_v12 = vld [vmem:[#allocation3_spill] sm:$0xff]  ;;  %v3495_v33 = vpack.c.bf16 %v3377_v47, %v3376_v16  ;;  %v17522_v26 = vld [vmem:[#allocation4_spill] sm:$0xff] }
 0x1e9   : > { %v1945_v48 = vpop.f32.mrf.mxu1  ;;  %v4622_v24 = vpack.c.bf16 %v4505_v13, %v4504_v34  ;;  %v3496_v1 = vpack.c.bf16 %v3379_v23, %v3378_v31  ;;  %v4506_v47 = vld [vmem:[%s13372_s28 + $0x153] sm:$0xff]  ;;  %v4507_v34 = vld [vmem:[%s13372_s28 + $0x15b] sm:$0xff]  ;;  %v4508_v23 = vld [vmem:[%s13372_s28 + $0x163] sm:$0xff] }
 0x1ea   : > { %17517 = vst [vmem:[#allocation97_spill] sm:$0xff] %v14602_v2  ;;  %v14611_v42 = vadd.f32 %v12349_v4, %v1954_v53  ;;  %v1946_v49 = vadd.f32 %v1945_v48, %v17520_v12  ;;  %v12350_v61 = vpop.f32.mrf.mxu0  ;;  %v17524_v53 = vld [vmem:[#allocation5_spill] sm:$0xff]  ;;  %v4509_v12 = vld [vmem:[%s13372_s28 + $0x16b] sm:$0xff] }
 0x1eb   : > { %v12212_v3 = vpop.f32.mrf.mxu1 }
 0x1ec   : > { %17519 = vst [vmem:[#allocation2_spill] sm:$0xff] %v14611_v42  ;;  %v14614_v38 = vadd.f32 %v2935_v35, %v1946_v49  ;;  %v1957_v2 = vadd.f32 %v12212_v3, %v17522_v26  ;;  %v2938_v5 = vpop.f32.mrf.mxu0  ;;  %v3380_v35 = vld [vmem:[%s13372_s28 + $0x152] sm:$0xff] }
 0x1ed   : > { %v1948_v29 = vpop.f32.mrf.mxu1 }
 0x1ee   : > { %17521 = vst [vmem:[#allocation3_spill] sm:$0xff] %v14614_v38  ;;  %v14617_v4 = vadd.f32 %v12350_v61, %v1957_v2  ;;  %v1949_v20 = vadd.f32 %v1948_v29, %v17524_v53  ;;  %v12353_v8 = vpop.f32.mrf.mxu0  ;;  %12588 = vmatmul.mubr.msk.bf16.gmra.mxu0 %vm646_vm1, %v4621_v43  ;;  %v17526_v2 = vld [vmem:[#allocation6_spill] sm:$0xff]  ;;  %v3383_v43 = vld [vmem:[%s13372_s28 + $0x16a] sm:$0xff]  ;;  %v4623_v53 = vpack.c.bf16 %v4507_v34, %v4506_v47 }
 0x1ef   : > { %v12215_v16 = vpop.f32.mrf.mxu1  ;;  %12450 = vmatmul.mubr.msk.bf16.gmra.mxu1 %vm646_vm1, %v3495_v33  ;;  %12591 = vmatprep.mubr.msk.bf16.mxu0 %vm646_vm1, %v4622_v24  ;;  %v3381_v29 = vld [vmem:[%s13372_s28 + $0x15a] sm:$0xff]  ;;  %v3382_v61 = vld [vmem:[%s13372_s28 + $0x162] sm:$0xff] }
 0x1f0   : > { %17523 = vst [vmem:[#allocation4_spill] sm:$0xff] %v14617_v4  ;;  %v14626_v13 = vadd.f32 %v2938_v5, %v1949_v20  ;;  %v1970_v48 = vadd.f32 %v12215_v16, %v17526_v2  ;;  %v2951_v31 = vpop.f32.mrf.mxu0  ;;  %12453 = vmatprep.mubr.msk.bf16.mxu1 %vm646_vm1, %v3496_v1  ;;  %v17528_v33 = vld [vmem:[#allocation7_spill] sm:$0xff]  ;;  %v3497_v20 = vpack.c.bf16 %v3381_v29, %v3380_v35  ;;  %v17530_v1 = vld [vmem:[#allocation8_spill] sm:$0xff] }
 0x1f1   : > { %v1961_v49 = vpop.f32.mrf.mxu1  ;;  %v4624_v16 = vpack.c.bf16 %v4509_v12, %v4508_v23  ;;  %v3498_v38 = vpack.c.bf16 %v3383_v43, %v3382_v61  ;;  %v4510_v29 = vld [vmem:[%s13372_s28 + $0x173] sm:$0xff]  ;;  %v4511_v23 = vld [vmem:[%s13372_s28 + $0x17b] sm:$0xff]  ;;  %v4512_v43 = vld [vmem:[%s13372_s28 + $0x183] sm:$0xff] }
 0x1f2   : > { %17525 = vst [vmem:[#allocation5_spill] sm:$0xff] %v14626_v13  ;;  %v14635_v3 = vadd.f32 %v12353_v8, %v1970_v48  ;;  %v1962_v24 = vadd.f32 %v1961_v49, %v17528_v33  ;;  %v12354_v26 = vpop.f32.mrf.mxu0  ;;  %v17532_v48 = vld [vmem:[#allocation9_spill] sm:$0xff]  ;;  %v4513_v33 = vld [vmem:[%s13372_s28 + $0x18b] sm:$0xff] }
 0x1f3   : > { %v12216_v5 = vpop.f32.mrf.mxu1 }
 0x1f4   : > { %17527 = vst [vmem:[#allocation6_spill] sm:$0xff] %v14635_v3  ;;  %v14638_v2 = vadd.f32 %v2951_v31, %v1962_v24  ;;  %v1973_v13 = vadd.f32 %v12216_v5, %v17530_v1  ;;  %v2954_v4 = vpop.f32.mrf.mxu0  ;;  %v3384_v31 = vld [vmem:[%s13372_s28 + $0x172] sm:$0xff] }
 0x1f5   : > { %v1964_v42 = vpop.f32.mrf.mxu1 }
 0x1f6   : > { %17529 = vst [vmem:[#allocation7_spill] sm:$0xff] %v14638_v2  ;;  %v14641_v8 = vadd.f32 %v12354_v26, %v1973_v13  ;;  %v1965_v47 = vadd.f32 %v1964_v42, %v17532_v48  ;;  %v12357_v34 = vpop.f32.mrf.mxu0  ;;  %12592 = vmatmul.mubr.msk.bf16.gmra.mxu0 %vm646_vm1, %v4623_v53  ;;  %v17534_v13 = vld [vmem:[#allocation10_spill] sm:$0xff]  ;;  %v3387_v53 = vld [vmem:[%s13372_s28 + $0x18a] sm:$0xff]  ;;  %v4625_v48 = vpack.c.bf16 %v4511_v23, %v4510_v29 }
 0x1f7   : > { %v12219_v35 = vpop.f32.mrf.mxu1  ;;  %12454 = vmatmul.mubr.msk.bf16.gmra.mxu1 %vm646_vm1, %v3497_v20  ;;  %12595 = vmatprep.mubr.msk.bf16.mxu0 %vm646_vm1, %v4624_v16  ;;  %v3385_v42 = vld [vmem:[%s13372_s28 + $0x17a] sm:$0xff]  ;;  %v3386_v26 = vld [vmem:[%s13372_s28 + $0x182] sm:$0xff] }
 0x1f8   : > { %17531 = vst [vmem:[#allocation8_spill] sm:$0xff] %v14641_v8  ;;  %v14650_v12 = vadd.f32 %v2954_v4, %v1965_v47  ;;  %v1986_v49 = vadd.f32 %v12219_v35, %v17534_v13  ;;  %v2967_v61 = vpop.f32.mrf.mxu0  ;;  %12457 = vmatprep.mubr.msk.bf16.mxu1 %vm646_vm1, %v3498_v38  ;;  %v17536_v20 = vld [vmem:[#allocation11_spill] sm:$0xff]  ;;  %v3499_v47 = vpack.c.bf16 %v3385_v42, %v3384_v31  ;;  %v17538_v38 = vld [vmem:[#allocation12_spill] sm:$0xff] }
 0x1f9   : > { %v1977_v24 = vpop.f32.mrf.mxu1  ;;  %v4626_v35 = vpack.c.bf16 %v4513_v33, %v4512_v43  ;;  %v3500_v2 = vpack.c.bf16 %v3387_v53, %v3386_v26  ;;  %v4514_v42 = vld [vmem:[%s13372_s28 + $0x193] sm:$0xff]  ;;  %v4515_v43 = vld [vmem:[%s13372_s28 + $0x19b] sm:$0xff]  ;;  %v4516_v53 = vld [vmem:[%s13372_s28 + $0x1a3] sm:$0xff] }
 0x1fa   : > { %17533 = vst [vmem:[#allocation9_spill] sm:$0xff] %v14650_v12  ;;  %v14659_v5 = vadd.f32 %v12357_v34, %v1986_v49  ;;  %v1978_v16 = vadd.f32 %v1977_v24, %v17536_v20  ;;  %v12358_v1 = vpop.f32.mrf.mxu0  ;;  %v17540_v49 = vld [vmem:[#allocation13_spill] sm:$0xff]  ;;  %v4517_v20 = vld [vmem:[%s13372_s28 + $0x1ab] sm:$0xff] }
 0x1fb   : > { %v12220_v4 = vpop.f32.mrf.mxu1 }
 0x1fc   : > { %17535 = vst [vmem:[#allocation10_spill] sm:$0xff] %v14659_v5  ;;  %v14662_v13 = vadd.f32 %v2967_v61, %v1978_v16  ;;  %v1989_v12 = vadd.f32 %v12220_v4, %v17538_v38  ;;  %v2970_v8 = vpop.f32.mrf.mxu0  ;;  %v3388_v61 = vld [vmem:[%s13372_s28 + $0x192] sm:$0xff] }
 0x1fd   : > { %v1980_v3 = vpop.f32.mrf.mxu1 }
 0x1fe   : > { %17537 = vst [vmem:[#allocation11_spill] sm:$0xff] %v14662_v13  ;;  %v14665_v34 = vadd.f32 %v12358_v1, %v1989_v12  ;;  %v1981_v29 = vadd.f32 %v1980_v3, %v17540_v49  ;;  %v12361_v23 = vpop.f32.mrf.mxu0  ;;  %12596 = vmatmul.mubr.msk.bf16.gmra.mxu0 %vm646_vm1, %v4625_v48  ;;  %v17542_v12 = vld [vmem:[#allocation14_spill] sm:$0xff]  ;;  %v3391_v48 = vld [vmem:[%s13372_s28 + $0x1aa] sm:$0xff]  ;;  %v4627_v49 = vpack.c.bf16 %v4515_v43, %v4514_v42 }
 0x1ff   : > { %v12223_v31 = vpop.f32.mrf.mxu1  ;;  %12458 = vmatmul.mubr.msk.bf16.gmra.mxu1 %vm646_vm1, %v3499_v47  ;;  %12599 = vmatprep.mubr.msk.bf16.mxu0 %vm646_vm1, %v4626_v35  ;;  %v3389_v3 = vld [vmem:[%s13372_s28 + $0x19a] sm:$0xff]  ;;  %v3390_v1 = vld [vmem:[%s13372_s28 + $0x1a2] sm:$0xff] }
 0x200   : > { %17539 = vst [vmem:[#allocation12_spill] sm:$0xff] %v14665_v34  ;;  %v14674_v33 = vadd.f32 %v2970_v8, %v1981_v29  ;;  %v2002_v24 = vadd.f32 %v12223_v31, %v17542_v12  ;;  %v2983_v26 = vpop.f32.mrf.mxu0  ;;  %12461 = vmatprep.mubr.msk.bf16.mxu1 %vm646_vm1, %v3500_v2  ;;  %v17544_v47 = vld [vmem:[#allocation15_spill] sm:$0xff]  ;;  %v3501_v29 = vpack.c.bf16 %v3389_v3, %v3388_v61  ;;  %v17546_v2 = vld [vmem:[#allocation16_spill] sm:$0xff] }
 0x201   : > { %v1993_v16 = vpop.f32.mrf.mxu1  ;;  %v4628_v31 = vpack.c.bf16 %v4517_v20, %v4516_v53  ;;  %v3502_v13 = vpack.c.bf16 %v3391_v48, %v3390_v1  ;;  %v4518_v3 = vld [vmem:[%s13372_s28 + $0x1b3] sm:$0xff]  ;;  %v4519_v53 = vld [vmem:[%s13372_s28 + $0x1bb] sm:$0xff]  ;;  %v4520_v48 = vld [vmem:[%s13372_s28 + $0x1c3] sm:$0xff] }
 0x202   : > { %17541 = vst [vmem:[#allocation13_spill] sm:$0xff] %v14674_v33  ;;  %v14683_v4 = vadd.f32 %v12361_v23, %v2002_v24  ;;  %v1994_v35 = vadd.f32 %v1993_v16, %v17544_v47  ;;  %v12362_v38 = vpop.f32.mrf.mxu0  ;;  %v17548_v24 = vld [vmem:[#allocation17_spill] sm:$0xff]  ;;  %v4521_v47 = vld [vmem:[%s13372_s28 + $0x1cb] sm:$0xff] }
 0x203   : > { %v12224_v8 = vpop.f32.mrf.mxu1 }
 0x204   : > { %17543 = vst [vmem:[#allocation14_spill] sm:$0xff] %v14683_v4  ;;  %v14686_v12 = vadd.f32 %v2983_v26, %v1994_v35  ;;  %v2005_v33 = vadd.f32 %v12224_v8, %v17546_v2  ;;  %v2986_v34 = vpop.f32.mrf.mxu0  ;;  %v3392_v26 = vld [vmem:[%s13372_s28 + $0x1b2] sm:$0xff] }
 0x205   : > { %v1996_v5 = vpop.f32.mrf.mxu1 }
 0x206   : > { %17545 = vst [vmem:[#allocation15_spill] sm:$0xff] %v14686_v12  ;;  %v14689_v23 = vadd.f32 %v12362_v38, %v2005_v33  ;;  %v1997_v42 = vadd.f32 %v1996_v5, %v17548_v24  ;;  %v12365_v43 = vpop.f32.mrf.mxu0  ;;  %12600 = vmatmul.mubr.msk.bf16.gmra.mxu0 %vm646_vm1, %v4627_v49  ;;  %v17550_v33 = vld [vmem:[#allocation18_spill] sm:$0xff]  ;;  %v3395_v49 = vld [vmem:[%s13372_s28 + $0x1ca] sm:$0xff]  ;;  %v4629_v24 = vpack.c.bf16 %v4519_v53, %v4518_v3 }
 0x207   : > { %v12227_v61 = vpop.f32.mrf.mxu1  ;;  %12462 = vmatmul.mubr.msk.bf16.gmra.mxu1 %vm646_vm1, %v3501_v29  ;;  %12603 = vmatprep.mubr.msk.bf16.mxu0 %vm646_vm1, %v4628_v31  ;;  %v3393_v5 = vld [vmem:[%s13372_s28 + $0x1ba] sm:$0xff]  ;;  %v3394_v38 = vld [vmem:[%s13372_s28 + $0x1c2] sm:$0xff] }
 0x208   : > { %17547 = vst [vmem:[#allocation16_spill] sm:$0xff] %v14689_v23  ;;  %v14698_v20 = vadd.f32 %v2986_v34, %v1997_v42  ;;  %v2018_v16 = vadd.f32 %v12227_v61, %v17550_v33  ;;  %v2999_v1 = vpop.f32.mrf.mxu0  ;;  %12465 = vmatprep.mubr.msk.bf16.mxu1 %vm646_vm1, %v3502_v13  ;;  %v17552_v29 = vld [vmem:[#allocation19_spill] sm:$0xff]  ;;  %v3503_v42 = vpack.c.bf16 %v3393_v5, %v3392_v26  ;;  %v17554_v13 = vld [vmem:[#allocation20_spill] sm:$0xff] }
 0x209   : > { %v2009_v35 = vpop.f32.mrf.mxu1  ;;  %v4630_v61 = vpack.c.bf16 %v4521_v47, %v4520_v48  ;;  %v3504_v12 = vpack.c.bf16 %v3395_v49, %v3394_v38  ;;  %v4522_v5 = vld [vmem:[%s13372_s28 + $0x1d3] sm:$0xff]  ;;  %v4523_v48 = vld [vmem:[%s13372_s28 + $0x1db] sm:$0xff]  ;;  %v4524_v49 = vld [vmem:[%s13372_s28 + $0x1e3] sm:$0xff] }
 0x20a   : > { %17549 = vst [vmem:[#allocation17_spill] sm:$0xff] %v14698_v20  ;;  %v14707_v8 = vadd.f32 %v12365_v43, %v2018_v16  ;;  %v2010_v31 = vadd.f32 %v2009_v35, %v17552_v29  ;;  %v12366_v2 = vpop.f32.mrf.mxu0  ;;  %v17556_v16 = vld [vmem:[#allocation21_spill] sm:$0xff]  ;;  %v4525_v29 = vld [vmem:[%s13372_s28 + $0x1eb] sm:$0xff] }
 0x20b   : > { %v12228_v34 = vpop.f32.mrf.mxu1 }
 0x20c   : > { %17551 = vst [vmem:[#allocation18_spill] sm:$0xff] %v14707_v8  ;;  %v14710_v33 = vadd.f32 %v2999_v1, %v2010_v31  ;;  %v2021_v20 = vadd.f32 %v12228_v34, %v17554_v13  ;;  %v3002_v23 = vpop.f32.mrf.mxu0  ;;  %v3396_v1 = vld [vmem:[%s13372_s28 + $0x1d2] sm:$0xff] }
 0x20d   : > { %v2012_v4 = vpop.f32.mrf.mxu1 }
 0x20e   : > { %17553 = vst [vmem:[#allocation19_spill] sm:$0xff] %v14710_v33  ;;  %v14713_v43 = vadd.f32 %v12366_v2, %v2021_v20  ;;  %v2013_v3 = vadd.f32 %v2012_v4, %v17556_v16  ;;  %v12369_v53 = vpop.f32.mrf.mxu0  ;;  %12604 = vmatmul.mubr.msk.bf16.gmra.mxu0 %vm646_vm1, %v4629_v24  ;;  %v17558_v20 = vld [vmem:[#allocation22_spill] sm:$0xff]  ;;  %v3399_v24 = vld [vmem:[%s13372_s28 + $0x1ea] sm:$0xff]  ;;  %v4631_v16 = vpack.c.bf16 %v4523_v48, %v4522_v5 }
 0x20f   : > { %v12231_v26 = vpop.f32.mrf.mxu1  ;;  %12466 = vmatmul.mubr.msk.bf16.gmra.mxu1 %vm646_vm1, %v3503_v42  ;;  %12607 = vmatprep.mubr.msk.bf16.mxu0 %vm646_vm1, %v4630_v61  ;;  %v3397_v4 = vld [vmem:[%s13372_s28 + $0x1da] sm:$0xff]  ;;  %v3398_v2 = vld [vmem:[%s13372_s28 + $0x1e2] sm:$0xff] }
 0x210   : > { %17555 = vst [vmem:[#allocation20_spill] sm:$0xff] %v14713_v43  ;;  %v14722_v47 = vadd.f32 %v3002_v23, %v2013_v3  ;;  %v2034_v35 = vadd.f32 %v12231_v26, %v17558_v20  ;;  %v3015_v38 = vpop.f32.mrf.mxu0  ;;  %12469 = vmatprep.mubr.msk.bf16.mxu1 %vm646_vm1, %v3504_v12  ;;  %v17560_v42 = vld [vmem:[#allocation23_spill] sm:$0xff]  ;;  %v3505_v3 = vpack.c.bf16 %v3397_v4, %v3396_v1  ;;  %v17562_v12 = vld [vmem:[#allocation24_spill] sm:$0xff] }
 0x211   : > { %v2025_v31 = vpop.f32.mrf.mxu1  ;;  %v4632_v26 = vpack.c.bf16 %v4525_v29, %v4524_v49  ;;  %v3506_v33 = vpack.c.bf16 %v3399_v24, %v3398_v2  ;;  %v4526_v4 = vld [vmem:[%s13372_s28 + $0x1f3] sm:$0xff]  ;;  %v4527_v49 = vld [vmem:[%s13372_s28 + $0x1fb] sm:$0xff]  ;;  %v4528_v24 = vld [vmem:[%s13372_s28 + $0x203] sm:$0xff] }
 0x212   : > { %17557 = vst [vmem:[#allocation21_spill] sm:$0xff] %v14722_v47  ;;  %v14731_v34 = vadd.f32 %v12369_v53, %v2034_v35  ;;  %v2026_v61 = vadd.f32 %v2025_v31, %v17560_v42  ;;  %v12370_v13 = vpop.f32.mrf.mxu0  ;;  %v17564_v35 = vld [vmem:[#allocation25_spill] sm:$0xff]  ;;  %v4529_v42 = vld [vmem:[%s13372_s28 + $0x20b] sm:$0xff] }
 0x213   : > { %v12232_v23 = vpop.f32.mrf.mxu1 }
 0x214   : > { %17559 = vst [vmem:[#allocation22_spill] sm:$0xff] %v14731_v34  ;;  %v14734_v20 = vadd.f32 %v3015_v38, %v2026_v61  ;;  %v2037_v47 = vadd.f32 %v12232_v23, %v17562_v12  ;;  %v3018_v43 = vpop.f32.mrf.mxu0  ;;  %v3400_v38 = vld [vmem:[%s13372_s28 + $0x1f2] sm:$0xff] }
 0x215   : > { %v2028_v8 = vpop.f32.mrf.mxu1 }
 0x216   : > { %17561 = vst [vmem:[#allocation23_spill] sm:$0xff] %v14734_v20  ;;  %v14737_v53 = vadd.f32 %v12370_v13, %v2037_v47  ;;  %v2029_v5 = vadd.f32 %v2028_v8, %v17564_v35  ;;  %v12373_v48 = vpop.f32.mrf.mxu0  ;;  %12608 = vmatmul.mubr.msk.bf16.gmra.mxu0 %vm646_vm1, %v4631_v16  ;;  %v17566_v47 = vld [vmem:[#allocation26_spill] sm:$0xff]  ;;  %v3403_v16 = vld [vmem:[%s13372_s28 + $0x20a] sm:$0xff]  ;;  %v4633_v35 = vpack.c.bf16 %v4527_v49, %v4526_v4 }
 0x217   : > { %v12235_v1 = vpop.f32.mrf.mxu1  ;;  %12470 = vmatmul.mubr.msk.bf16.gmra.mxu1 %vm646_vm1, %v3505_v3  ;;  %12611 = vmatprep.mubr.msk.bf16.mxu0 %vm646_vm1, %v4632_v26  ;;  %v3401_v8 = vld [vmem:[%s13372_s28 + $0x1fa] sm:$0xff]  ;;  %v3402_v13 = vld [vmem:[%s13372_s28 + $0x202] sm:$0xff] }
 0x218   : > { %17563 = vst [vmem:[#allocation24_spill] sm:$0xff] %v14737_v53  ;;  %v14746_v29 = vadd.f32 %v3018_v43, %v2029_v5  ;;  %v2050_v31 = vadd.f32 %v12235_v1, %v17566_v47  ;;  %v3031_v2 = vpop.f32.mrf.mxu0  ;;  %12473 = vmatprep.mubr.msk.bf16.mxu1 %vm646_vm1, %v3506_v33  ;;  %v17568_v3 = vld [vmem:[#allocation27_spill] sm:$0xff]  ;;  %v3507_v5 = vpack.c.bf16 %v3401_v8, %v3400_v38  ;;  %v17570_v33 = vld [vmem:[#allocation28_spill] sm:$0xff] }
 0x219   : > { %v2041_v61 = vpop.f32.mrf.mxu1  ;;  %v4634_v1 = vpack.c.bf16 %v4529_v42, %v4528_v24  ;;  %v3508_v20 = vpack.c.bf16 %v3403_v16, %v3402_v13  ;;  %v4530_v8 = vld [vmem:[%s13372_s28 + $0x213] sm:$0xff]  ;;  %v4531_v24 = vld [vmem:[%s13372_s28 + $0x21b] sm:$0xff]  ;;  %v4532_v16 = vld [vmem:[%s13372_s28 + $0x223] sm:$0xff] }
 0x21a   : > { %17565 = vst [vmem:[#allocation25_spill] sm:$0xff] %v14746_v29  ;;  %v14755_v23 = vadd.f32 %v12373_v48, %v2050_v31  ;;  %v2042_v26 = vadd.f32 %v2041_v61, %v17568_v3  ;;  %v12374_v12 = vpop.f32.mrf.mxu0  ;;  %v17572_v31 = vld [vmem:[#allocation29_spill] sm:$0xff]  ;;  %v4533_v3 = vld [vmem:[%s13372_s28 + $0x22b] sm:$0xff] }
 0x21b   : > { %v12236_v43 = vpop.f32.mrf.mxu1 }
 0x21c   : > { %17567 = vst [vmem:[#allocation26_spill] sm:$0xff] %v14755_v23  ;;  %v14758_v47 = vadd.f32 %v3031_v2, %v2042_v26  ;;  %v2053_v29 = vadd.f32 %v12236_v43, %v17570_v33  ;;  %v3034_v53 = vpop.f32.mrf.mxu0  ;;  %v3404_v2 = vld [vmem:[%s13372_s28 + $0x212] sm:$0xff] }
 0x21d   : > { %v2044_v34 = vpop.f32.mrf.mxu1 }
 0x21e   : > { %17569 = vst [vmem:[#allocation27_spill] sm:$0xff] %v14758_v47  ;;  %v14761_v48 = vadd.f32 %v12374_v12, %v2053_v29  ;;  %v2045_v4 = vadd.f32 %v2044_v34, %v17572_v31  ;;  %v12377_v49 = vpop.f32.mrf.mxu0  ;;  %12612 = vmatmul.mubr.msk.bf16.gmra.mxu0 %vm646_vm1, %v4633_v35  ;;  %v17574_v29 = vld [vmem:[#allocation30_spill] sm:$0xff]  ;;  %v3407_v35 = vld [vmem:[%s13372_s28 + $0x22a] sm:$0xff]  ;;  %v4635_v31 = vpack.c.bf16 %v4531_v24, %v4530_v8 }
 0x21f   : > { %v12239_v38 = vpop.f32.mrf.mxu1  ;;  %12474 = vmatmul.mubr.msk.bf16.gmra.mxu1 %vm646_vm1, %v3507_v5  ;;  %12615 = vmatprep.mubr.msk.bf16.mxu0 %vm646_vm1, %v4634_v1  ;;  %v3405_v34 = vld [vmem:[%s13372_s28 + $0x21a] sm:$0xff]  ;;  %v3406_v12 = vld [vmem:[%s13372_s28 + $0x222] sm:$0xff] }
 0x220   : > { %17571 = vst [vmem:[#allocation28_spill] sm:$0xff] %v14761_v48  ;;  %v14770_v42 = vadd.f32 %v3034_v53, %v2045_v4  ;;  %v2066_v61 = vadd.f32 %v12239_v38, %v17574_v29  ;;  %v3047_v13 = vpop.f32.mrf.mxu0  ;;  %12477 = vmatprep.mubr.msk.bf16.mxu1 %vm646_vm1, %v3508_v20  ;;  %v17576_v5 = vld [vmem:[#allocation31_spill] sm:$0xff]  ;;  %v3509_v4 = vpack.c.bf16 %v3405_v34, %v3404_v2  ;;  %v17578_v20 = vld [vmem:[#allocation32_spill] sm:$0xff] }
 0x221   : > { %v2057_v26 = vpop.f32.mrf.mxu1  ;;  %v4636_v38 = vpack.c.bf16 %v4533_v3, %v4532_v16  ;;  %v3510_v47 = vpack.c.bf16 %v3407_v35, %v3406_v12  ;;  %v4534_v34 = vld [vmem:[%s13372_s28 + $0x233] sm:$0xff]  ;;  %v4535_v16 = vld [vmem:[%s13372_s28 + $0x23b] sm:$0xff]  ;;  %v4536_v35 = vld [vmem:[%s13372_s28 + $0x243] sm:$0xff] }
 0x222   : > { %17573 = vst [vmem:[#allocation29_spill] sm:$0xff] %v14770_v42  ;;  %v14779_v43 = vadd.f32 %v12377_v49, %v2066_v61  ;;  %v2058_v1 = vadd.f32 %v2057_v26, %v17576_v5  ;;  %v12378_v33 = vpop.f32.mrf.mxu0  ;;  %v17580_v61 = vld [vmem:[#allocation33_spill] sm:$0xff]  ;;  %v4537_v5 = vld [vmem:[%s13372_s28 + $0x24b] sm:$0xff] }
 0x223   : > { %v12240_v53 = vpop.f32.mrf.mxu1 }
 0x224   : > { %17575 = vst [vmem:[#allocation30_spill] sm:$0xff] %v14779_v43  ;;  %v14782_v29 = vadd.f32 %v3047_v13, %v2058_v1  ;;  %v2069_v42 = vadd.f32 %v12240_v53, %v17578_v20  ;;  %v3050_v48 = vpop.f32.mrf.mxu0  ;;  %v3408_v13 = vld [vmem:[%s13372_s28 + $0x232] sm:$0xff] }
 0x225   : > { %v2060_v23 = vpop.f32.mrf.mxu1 }
 0x226   : > { %17577 = vst [vmem:[#allocation31_spill] sm:$0xff] %v14782_v29  ;;  %v14785_v49 = vadd.f32 %v12378_v33, %v2069_v42  ;;  %v2061_v8 = vadd.f32 %v2060_v23, %v17580_v61  ;;  %v12381_v24 = vpop.f32.mrf.mxu0  ;;  %12616 = vmatmul.mubr.msk.bf16.gmra.mxu0 %vm646_vm1, %v4635_v31  ;;  %v17582_v42 = vld [vmem:[#allocation34_spill] sm:$0xff]  ;;  %v3411_v31 = vld [vmem:[%s13372_s28 + $0x24a] sm:$0xff]  ;;  %v4637_v61 = vpack.c.bf16 %v4535_v16, %v4534_v34 }
 0x227   : > { %v12243_v2 = vpop.f32.mrf.mxu1  ;;  %12478 = vmatmul.mubr.msk.bf16.gmra.mxu1 %vm646_vm1, %v3509_v4  ;;  %12619 = vmatprep.mubr.msk.bf16.mxu0 %vm646_vm1, %v4636_v38  ;;  %v3409_v23 = vld [vmem:[%s13372_s28 + $0x23a] sm:$0xff]  ;;  %v3410_v33 = vld [vmem:[%s13372_s28 + $0x242] sm:$0xff] }
 0x228   : > { %17579 = vst [vmem:[#allocation32_spill] sm:$0xff] %v14785_v49  ;;  %v14794_v3 = vadd.f32 %v3050_v48, %v2061_v8  ;;  %v2082_v26 = vadd.f32 %v12243_v2, %v17582_v42  ;;  %v3063_v12 = vpop.f32.mrf.mxu0  ;;  %12481 = vmatprep.mubr.msk.bf16.mxu1 %vm646_vm1, %v3510_v47  ;;  %v17584_v4 = vld [vmem:[#allocation35_spill] sm:$0xff]  ;;  %v3511_v8 = vpack.c.bf16 %v3409_v23, %v3408_v13  ;;  %v17586_v47 = vld [vmem:[#allocation36_spill] sm:$0xff] }
 0x229   : > { %v2073_v1 = vpop.f32.mrf.mxu1  ;;  %v4638_v2 = vpack.c.bf16 %v4537_v5, %v4536_v35  ;;  %v3512_v29 = vpack.c.bf16 %v3411_v31, %v3410_v33  ;;  %v4538_v23 = vld [vmem:[%s13372_s28 + $0x253] sm:$0xff]  ;;  %v4539_v35 = vld [vmem:[%s13372_s28 + $0x25b] sm:$0xff]  ;;  %v4540_v31 = vld [vmem:[%s13372_s28 + $0x263] sm:$0xff] }
 0x22a   : > { %17581 = vst [vmem:[#allocation33_spill] sm:$0xff] %v14794_v3  ;;  %v14803_v53 = vadd.f32 %v12381_v24, %v2082_v26  ;;  %v2074_v38 = vadd.f32 %v2073_v1, %v17584_v4  ;;  %v12382_v20 = vpop.f32.mrf.mxu0  ;;  %v17588_v26 = vld [vmem:[#allocation37_spill] sm:$0xff]  ;;  %v4541_v4 = vld [vmem:[%s13372_s28 + $0x26b] sm:$0xff] }
 0x22b   : > { %v12244_v48 = vpop.f32.mrf.mxu1 }
 0x22c   : > { %17583 = vst [vmem:[#allocation34_spill] sm:$0xff] %v14803_v53  ;;  %v14806_v42 = vadd.f32 %v3063_v12, %v2074_v38  ;;  %v2085_v3 = vadd.f32 %v12244_v48, %v17586_v47  ;;  %v3066_v49 = vpop.f32.mrf.mxu0  ;;  %v3412_v12 = vld [vmem:[%s13372_s28 + $0x252] sm:$0xff] }
 0x22d   : > { %v2076_v43 = vpop.f32.mrf.mxu1 }
 0x22e   : > { %17585 = vst [vmem:[#allocation35_spill] sm:$0xff] %v14806_v42  ;;  %v14809_v24 = vadd.f32 %v12382_v20, %v2085_v3  ;;  %v2077_v34 = vadd.f32 %v2076_v43, %v17588_v26  ;;  %v12385_v16 = vpop.f32.mrf.mxu0  ;;  %12620 = vmatmul.mubr.msk.bf16.gmra.mxu0 %vm646_vm1, %v4637_v61  ;;  %v17590_v3 = vld [vmem:[#allocation38_spill] sm:$0xff]  ;;  %v3415_v61 = vld [vmem:[%s13372_s28 + $0x26a] sm:$0xff]  ;;  %v4639_v26 = vpack.c.bf16 %v4539_v35, %v4538_v23 }
 0x22f   : > { %v12247_v13 = vpop.f32.mrf.mxu1  ;;  %12482 = vmatmul.mubr.msk.bf16.gmra.mxu1 %vm646_vm1, %v3511_v8  ;;  %12623 = vmatprep.mubr.msk.bf16.mxu0 %vm646_vm1, %v4638_v2  ;;  %v3413_v43 = vld [vmem:[%s13372_s28 + $0x25a] sm:$0xff]  ;;  %v3414_v20 = vld [vmem:[%s13372_s28 + $0x262] sm:$0xff] }
 0x230   : > { %17587 = vst [vmem:[#allocation36_spill] sm:$0xff] %v14809_v24  ;;  %v14818_v5 = vadd.f32 %v3066_v49, %v2077_v34  ;;  %v2098_v1 = vadd.f32 %v12247_v13, %v17590_v3  ;;  %v3079_v33 = vpop.f32.mrf.mxu0  ;;  %12485 = vmatprep.mubr.msk.bf16.mxu1 %vm646_vm1, %v3512_v29  ;;  %v17592_v8 = vld [vmem:[#allocation39_spill] sm:$0xff]  ;;  %v3513_v34 = vpack.c.bf16 %v3413_v43, %v3412_v12  ;;  %v17594_v29 = vld [vmem:[#allocation40_spill] sm:$0xff] }
 0x231   : > { %v2089_v38 = vpop.f32.mrf.mxu1  ;;  %v4640_v13 = vpack.c.bf16 %v4541_v4, %v4540_v31  ;;  %v3514_v42 = vpack.c.bf16 %v3415_v61, %v3414_v20  ;;  %v4542_v43 = vld [vmem:[%s13372_s28 + $0x273] sm:$0xff]  ;;  %v4543_v31 = vld [vmem:[%s13372_s28 + $0x27b] sm:$0xff]  ;;  %v4544_v61 = vld [vmem:[%s13372_s28 + $0x283] sm:$0xff] }
 0x232   : > { %17589 = vst [vmem:[#allocation37_spill] sm:$0xff] %v14818_v5  ;;  %v14827_v48 = vadd.f32 %v12385_v16, %v2098_v1  ;;  %v2090_v2 = vadd.f32 %v2089_v38, %v17592_v8  ;;  %v12386_v47 = vpop.f32.mrf.mxu0  ;;  %v17596_v1 = vld [vmem:[#allocation42_spill] sm:$0xff]  ;;  %v4545_v8 = vld [vmem:[%s13372_s28 + $0x28b] sm:$0xff] }
 0x233   : > { %v12248_v49 = vpop.f32.mrf.mxu1 }
 0x234   : > { %17591 = vst [vmem:[#allocation38_spill] sm:$0xff] %v14827_v48  ;;  %v14830_v3 = vadd.f32 %v3079_v33, %v2090_v2  ;;  %v2101_v5 = vadd.f32 %v12248_v49, %v17594_v29  ;;  %v3082_v24 = vpop.f32.mrf.mxu0  ;;  %v3416_v33 = vld [vmem:[%s13372_s28 + $0x272] sm:$0xff] }
 0x235   : > { %v2092_v53 = vpop.f32.mrf.mxu1 }
 0x236   : > { %17593 = vst [vmem:[#allocation39_spill] sm:$0xff] %v14830_v3  ;;  %v14833_v16 = vadd.f32 %v12386_v47, %v2101_v5  ;;  %v2093_v23 = vadd.f32 %v2092_v53, %v17596_v1  ;;  %v12389_v35 = vpop.f32.mrf.mxu0  ;;  %12624 = vmatmul.mubr.msk.bf16.gmra.mxu0 %vm646_vm1, %v4639_v26  ;;  %v17598_v5 = vld [vmem:[#allocation44_spill] sm:$0xff]  ;;  %v3417_v53 = vld [vmem:[%s13372_s28 + $0x27a] sm:$0xff]  ;;  %v3418_v47 = vld [vmem:[%s13372_s28 + $0x282] sm:$0xff]  ;;  %v4641_v1 = vpack.c.bf16 %v4543_v31, %v4542_v43 }
 0x237   : > { %v12251_v12 = vpop.f32.mrf.mxu1  ;;  %12486 = vmatmul.mubr.msk.bf16.gmra.mxu1 %vm646_vm1, %v3513_v34  ;;  %12627 = vmatprep.mubr.msk.bf16.mxu0 %vm646_vm1, %v4640_v13  ;;  %v3419_v26 = vld [vmem:[%s13372_s28 + $0x28a] sm:$0xff]  ;;  %v17600_v34 = vld [vmem:[#allocation46_spill] sm:$0xff] }
 0x238   : > { %17595 = vst [vmem:[#allocation40_spill] sm:$0xff] %v14833_v16  ;;  %v14842_v4 = vadd.f32 %v3082_v24, %v2093_v23  ;;  %v2114_v38 = vadd.f32 %v12251_v12, %v17598_v5  ;;  %v3095_v20 = vpop.f32.mrf.mxu0  ;;  %12489 = vmatprep.mubr.msk.bf16.mxu1 %vm646_vm1, %v3514_v42  ;;  %v3515_v23 = vpack.c.bf16 %v3417_v53, %v3416_v33  ;;  %v17602_v5 = vld [vmem:[#allocation48_spill] sm:$0xff] }
 0x239   : > { %v2105_v2 = vpop.f32.mrf.mxu1  ;;  %v4642_v12 = vpack.c.bf16 %v4545_v8, %v4544_v61  ;;  %v3516_v3 = vpack.c.bf16 %v3419_v26, %v3418_v47  ;;  %v3420_v33 = vld [vmem:[%s13372_s28 + $0x292] sm:$0xff]  ;;  %v4547_v61 = vld [vmem:[%s13372_s28 + $0x29b] sm:$0xff] }
 0x23a   : > { %17597 = vst [vmem:[#allocation42_spill] sm:$0xff] %v14842_v4  ;;  %v14851_v49 = vadd.f32 %v12389_v35, %v2114_v38  ;;  %v2106_v13 = vadd.f32 %v2105_v2, %v17600_v34  ;;  %v12390_v29 = vpop.f32.mrf.mxu0  ;;  %v17604_v38 = vld [vmem:[#allocation50_spill] sm:$0xff]  ;;  %v4546_v53 = vld [vmem:[%s13372_s28 + $0x293] sm:$0xff]  ;;  %v4549_v34 = vld [vmem:[%s13372_s28 + $0x2ab] sm:$0xff] }
 0x23b   : > { %v12252_v24 = vpop.f32.mrf.mxu1 }
 0x23c   : > { %17599 = vst [vmem:[#allocation44_spill] sm:$0xff] %v14851_v49  ;;  %v14854_v42 = vadd.f32 %v3095_v20, %v2106_v13  ;;  %v2117_v4 = vadd.f32 %v12252_v24, %v17602_v5  ;;  %v3098_v16 = vpop.f32.mrf.mxu0  ;;  %v3421_v20 = vld [vmem:[%s13372_s28 + $0x29a] sm:$0xff]  ;;  %v3423_v24 = vld [vmem:[%s13372_s28 + $0x2aa] sm:$0xff] }
 0x23d   : > { %v2108_v48 = vpop.f32.mrf.mxu1  ;;  %v14876_v13 = vld [vmem:[%s17356_s1 + $0x1c] sm:$0xf] }
 0x23e   : > { %17601 = vst [vmem:[#allocation46_spill] sm:$0xff] %v14854_v42  ;;  %v14857_v35 = vadd.f32 %v12390_v29, %v2117_v4  ;;  %v2109_v2 = vadd.f32 %v2108_v48, %v17604_v38  ;;  %v12393_v43 = vpop.f32.mrf.mxu0  ;;  %12628 = vmatmul.mubr.msk.bf16.gmra.mxu0 %vm646_vm1, %v4641_v1  ;;  %v17606_v4 = vld [vmem:[#allocation52_spill] sm:$0xff]  ;;  %v4548_v48 = vld [vmem:[%s13372_s28 + $0x2a3] sm:$0xff]  ;;  %13253 = vmatprep.subr.msk.bf16.mxu1 %vm851_vm0, %v14876_v13 }
 0x23f   : > { %v12255_v31 = vpop.f32.mrf.mxu1  ;;  %12490 = vmatmul.mubr.msk.bf16.gmra.mxu1 %vm646_vm1, %v3515_v23  ;;  %12631 = vmatprep.mubr.msk.bf16.mxu0 %vm646_vm1, %v4642_v12  ;;  %17607 = vst [vmem:[#allocation52_spill] sm:$0xff] %v14876_v13  ;;  %v3422_v1 = vld [vmem:[%s13372_s28 + $0x2a2] sm:$0xff]  ;;  %v4643_v38 = vpack.c.bf16 %v4547_v61, %v4546_v53 }
 0x240   : > { %17603 = vst [vmem:[#allocation48_spill] sm:$0xff] %v14857_v35  ;;  %v14867_v8 = vadd.f32 %v3098_v16, %v2109_v2  ;;  %v2130_v47 = vadd.f32 %v12255_v31, %v17606_v4  ;;  %v3111_v26 = vpop.f32.mrf.mxu0  ;;  %12493 = vmatprep.mubr.msk.bf16.mxu1 %vm646_vm1, %v3516_v3  ;;  %v17609_v23 = vld [vmem:[#allocation54_spill] sm:$0xff]  ;;  %v3517_v31 = vpack.c.bf16 %v3421_v20, %v3420_v33 }
 0x241   : > { %v2121_v29 = vpop.f32.mrf.mxu1  ;;  %v14888_v3 = vld [vmem:[%s17356_s1 + $0x20] sm:$0xf]  ;;  %v4644_v4 = vpack.c.bf16 %v4549_v34, %v4548_v48  ;;  %v3518_v53 = vpack.c.bf16 %v3423_v24, %v3422_v1  ;;  %v4550_v34 = vld [vmem:[%s13372_s28 + $0x2b3] sm:$0xff] }
 0x242   : > { %17605 = vst [vmem:[#allocation50_spill] sm:$0xff] %v14867_v8  ;;  %v14882_v16 = vadd.f32 %v12393_v43, %v2130_v47  ;;  %v2122_v12 = vadd.f32 %v2121_v29, %v17609_v23  ;;  %v12394_v5 = vpop.f32.mrf.mxu0  ;;  %17610 = vst [vmem:[#allocation54_spill] sm:$0xff] %v14888_v3  ;;  %13254 = vmatprep.subr.msk.bf16.mxu0 %vm851_vm0, %v14888_v3  ;;  %v17612_v47 = vld [vmem:[#allocation56_spill] sm:$0xff]  ;;  %v17614_v8 = vld [vmem:[#allocation58_spill] sm:$0xff] }
 0x243   : > { %v12256_v2 = vpop.f32.mrf.mxu1  ;;  %v4551_v1 = vld [vmem:[%s13372_s28 + $0x2bb] sm:$0xff] }
 0x244   : > { %17608 = vst [vmem:[#allocation100_spill] sm:$0xff] %v14882_v16  ;;  %v14892_v43 = vadd.f32 %v3111_v26, %v2122_v12  ;;  %v2133_v29 = vadd.f32 %v12256_v2, %v17612_v47  ;;  %v3114_v23 = vpop.f32.mrf.mxu0  ;;  %v3424_v26 = vld [vmem:[%s13372_s28 + $0x2b2] sm:$0xff]  ;;  %v4552_v47 = vld [vmem:[%s13372_s28 + $0x2c3] sm:$0xff]  ;;  %v4645_v42 = vpack.c.bf16 %v4551_v1, %v4550_v34 }
 0x245   : > { %v2124_v61 = vpop.f32.mrf.mxu1  ;;  %v17616_v12 = vld [vmem:[#allocation60_spill] sm:$0xff] }
 0x246   : > { %17611 = vst [vmem:[#allocation101_spill] sm:$0xff] %v14892_v43  ;;  %v14895_v16 = vadd.f32 %v12394_v5, %v2133_v29  ;;  %v2125_v33 = vadd.f32 %v2124_v61, %v17614_v8  ;;  %v12397_v20 = vpop.f32.mrf.mxu0  ;;  %12632 = vmatmul.mubr.msk.bf16.gmra.mxu0 %vm646_vm1, %v4643_v38  ;;  %v3425_v8 = vld [vmem:[%s13372_s28 + $0x2ba] sm:$0xff]  ;;  %v4553_v29 = vld [vmem:[%s13372_s28 + $0x2cb] sm:$0xff]  ;;  %v3426_v61 = vld [vmem:[%s13372_s28 + $0x2c2] sm:$0xff] }
 0x247   : > { %v12259_v48 = vpop.f32.mrf.mxu1  ;;  %12494 = vmatmul.mubr.msk.bf16.gmra.mxu1 %vm646_vm1, %v3517_v31  ;;  %12635 = vmatprep.mubr.msk.bf16.mxu0 %vm646_vm1, %v4644_v4  ;;  %v17618_v31 = vld [vmem:[#allocation62_spill] sm:$0xff] }
 0x248   : > { %17613 = vst [vmem:[#allocation56_spill] sm:$0xff] %v14895_v16  ;;  %v14904_v24 = vadd.f32 %v3114_v23, %v2125_v33  ;;  %v2146_v5 = vadd.f32 %v12259_v48, %v17616_v12  ;;  %v3127_v2 = vpop.f32.mrf.mxu0  ;;  %12497 = vmatprep.mubr.msk.bf16.mxu1 %vm646_vm1, %v3518_v53  ;;  %v3427_v16 = vld [vmem:[%s13372_s28 + $0x2ca] sm:$0xff]  ;;  %v3519_v33 = vpack.c.bf16 %v3425_v8, %v3424_v26  ;;  %v4555_v8 = vld [vmem:[%s13372_s28 + $0x2db] sm:$0xff] }
 0x249   : > { %v2137_v38 = vpop.f32.mrf.mxu1  ;;  %v4646_v48 = vpack.c.bf16 %v4553_v29, %v4552_v47  ;;  %v17620_v53 = vld [vmem:[#allocation64_spill] sm:$0xff]  ;;  %v3520_v13 = vpack.c.bf16 %v3427_v16, %v3426_v61 }
 0x24a   : > { %17615 = vst [vmem:[#allocation58_spill] sm:$0xff] %v14904_v24  ;;  %v14913_v43 = vadd.f32 %v12397_v20, %v2146_v5  ;;  %v2138_v4 = vadd.f32 %v2137_v38, %v17618_v31  ;;  %v12398_v35 = vpop.f32.mrf.mxu0  ;;  %v17622_v5 = vld [vmem:[#allocation66_spill] sm:$0xff]  ;;  %v4554_v16 = vld [vmem:[%s13372_s28 + $0x2d3] sm:$0xff]  ;;  %v4557_v61 = vld [vmem:[%s13372_s28 + $0x2eb] sm:$0xff] }
 0x24b   : > { %v12260_v23 = vpop.f32.mrf.mxu1  ;;  %v4556_v38 = vld [vmem:[%s13372_s28 + $0x2e3] sm:$0xff] }
 0x24c   : > { %17617 = vst [vmem:[#allocation60_spill] sm:$0xff] %v14913_v43  ;;  %v14916_v12 = vadd.f32 %v3127_v2, %v2138_v4  ;;  %v2149_v24 = vadd.f32 %v12260_v23, %v17620_v53  ;;  %v3130_v49 = vpop.f32.mrf.mxu0  ;;  %v3428_v2 = vld [vmem:[%s13372_s28 + $0x2d2] sm:$0xff]  ;;  %v3430_v31 = vld [vmem:[%s13372_s28 + $0x2e2] sm:$0xff]  ;;  %v3431_v4 = vld [vmem:[%s13372_s28 + $0x2ea] sm:$0xff] }
 0x24d   : > { %v2140_v3 = vpop.f32.mrf.mxu1 }
 0x24e   : > { %17619 = vst [vmem:[#allocation62_spill] sm:$0xff] %v14916_v12  ;;  %v14919_v20 = vadd.f32 %v12398_v35, %v2149_v24  ;;  %v2141_v34 = vadd.f32 %v2140_v3, %v17622_v5  ;;  %v12401_v1 = vpop.f32.mrf.mxu0  ;;  %12636 = vmatmul.mubr.msk.bf16.gmra.mxu0 %vm646_vm1, %v4645_v42  ;;  %v17624_v35 = vld [vmem:[#allocation68_spill] sm:$0xff]  ;;  %v3429_v3 = vld [vmem:[%s13372_s28 + $0x2da] sm:$0xff]  ;;  %v4647_v5 = vpack.c.bf16 %v4555_v8, %v4554_v16 }
 0x24f   : > { %v12263_v26 = vpop.f32.mrf.mxu1  ;;  %12498 = vmatmul.mubr.msk.bf16.gmra.mxu1 %vm646_vm1, %v3519_v33  ;;  %12639 = vmatprep.mubr.msk.bf16.mxu0 %vm646_vm1, %v4646_v48  ;;  %v17626_v33 = vld [vmem:[#allocation70_spill] sm:$0xff]  ;;  %v3522_v12 = vpack.c.bf16 %v3431_v4, %v3430_v31 }
 0x250   : > { %17621 = vst [vmem:[#allocation64_spill] sm:$0xff] %v14919_v20  ;;  %v14928_v47 = vadd.f32 %v3130_v49, %v2141_v34  ;;  %v2162_v24 = vadd.f32 %v12263_v26, %v17624_v35  ;;  %v3143_v29 = vpop.f32.mrf.mxu0  ;;  %12501 = vmatprep.mubr.msk.bf16.mxu1 %vm646_vm1, %v3520_v13  ;;  %v3521_v34 = vpack.c.bf16 %v3429_v3, %v3428_v2  ;;  %v17628_v13 = vld [vmem:[#allocation72_spill] sm:$0xff]  ;;  %v4560_v4 = vld [vmem:[%s13372_s28 + $0x303] sm:$0xff] }
 0x251   : > { %v2153_v42 = vpop.f32.mrf.mxu1  ;;  %v4648_v26 = vpack.c.bf16 %v4557_v61, %v4556_v38  ;;  %v4558_v3 = vld [vmem:[%s13372_s28 + $0x2f3] sm:$0xff]  ;;  %v4559_v38 = vld [vmem:[%s13372_s28 + $0x2fb] sm:$0xff] }
 0x252   : > { %17623 = vst [vmem:[#allocation66_spill] sm:$0xff] %v14928_v47  ;;  %v14937_v23 = vadd.f32 %v12401_v1, %v2162_v24  ;;  %v2154_v48 = vadd.f32 %v2153_v42, %v17626_v33  ;;  %v12402_v53 = vpop.f32.mrf.mxu0  ;;  %v17630_v24 = vld [vmem:[#allocation74_spill] sm:$0xff]  ;;  %v4561_v33 = vld [vmem:[%s13372_s28 + $0x30b] sm:$0xff] }
 0x253   : > { %v12264_v49 = vpop.f32.mrf.mxu1 }
 0x254   : > { %17625 = vst [vmem:[#allocation68_spill] sm:$0xff] %v14937_v23  ;;  %v14940_v35 = vadd.f32 %v3143_v29, %v2154_v48  ;;  %v2165_v47 = vadd.f32 %v12264_v49, %v17628_v13  ;;  %v3146_v20 = vpop.f32.mrf.mxu0  ;;  %v3432_v29 = vld [vmem:[%s13372_s28 + $0x2f2] sm:$0xff] }
 0x255   : > { %v2156_v43 = vpop.f32.mrf.mxu1 }
 0x256   : > { %17627 = vst [vmem:[#allocation70_spill] sm:$0xff] %v14940_v35  ;;  %v14943_v1 = vadd.f32 %v12402_v53, %v2165_v47  ;;  %v2157_v16 = vadd.f32 %v2156_v43, %v17630_v24  ;;  %v12405_v8 = vpop.f32.mrf.mxu0  ;;  %12640 = vmatmul.mubr.msk.bf16.gmra.mxu0 %vm646_vm1, %v4647_v5  ;;  %v17632_v47 = vld [vmem:[#allocation76_spill] sm:$0xff]  ;;  %v3433_v43 = vld [vmem:[%s13372_s28 + $0x2fa] sm:$0xff]  ;;  %v3434_v53 = vld [vmem:[%s13372_s28 + $0x302] sm:$0xff]  ;;  %v4649_v24 = vpack.c.bf16 %v4559_v38, %v4558_v3 }
 0x257   : > { %v12267_v2 = vpop.f32.mrf.mxu1  ;;  %12502 = vmatmul.mubr.msk.bf16.gmra.mxu1 %vm646_vm1, %v3521_v34  ;;  %12643 = vmatprep.mubr.msk.bf16.mxu0 %vm646_vm1, %v4648_v26  ;;  %v3435_v5 = vld [vmem:[%s13372_s28 + $0x30a] sm:$0xff]  ;;  %v17634_v34 = vld [vmem:[#allocation78_spill] sm:$0xff] }
 0x258   : > { %17629 = vst [vmem:[#allocation72_spill] sm:$0xff] %v14943_v1  ;;  %v14952_v61 = vadd.f32 %v3146_v20, %v2157_v16  ;;  %v2178_v42 = vadd.f32 %v12267_v2, %v17632_v47  ;;  %v3159_v31 = vpop.f32.mrf.mxu0  ;;  %12505 = vmatprep.mubr.msk.bf16.mxu1 %vm646_vm1, %v3522_v12  ;;  %v3523_v16 = vpack.c.bf16 %v3433_v43, %v3432_v29  ;;  %v17636_v12 = vld [vmem:[#allocation80_spill] sm:$0xff] }
 0x259   : > { %v2169_v48 = vpop.f32.mrf.mxu1  ;;  %v4650_v2 = vpack.c.bf16 %v4561_v33, %v4560_v4  ;;  %v3524_v35 = vpack.c.bf16 %v3435_v5, %v3434_v53  ;;  %v4562_v43 = vld [vmem:[%s13372_s28 + $0x313] sm:$0xff]  ;;  %v4563_v4 = vld [vmem:[%s13372_s28 + $0x31b] sm:$0xff]  ;;  %v4564_v5 = vld [vmem:[%s13372_s28 + $0x323] sm:$0xff] }
 0x25a   : > { %17631 = vst [vmem:[#allocation74_spill] sm:$0xff] %v14952_v61  ;;  %v14961_v49 = vadd.f32 %v12405_v8, %v2178_v42  ;;  %v2170_v26 = vadd.f32 %v2169_v48, %v17634_v34  ;;  %v12406_v13 = vpop.f32.mrf.mxu0  ;;  %v17638_v42 = vld [vmem:[#allocation82_spill] sm:$0xff]  ;;  %v4565_v34 = vld [vmem:[%s13372_s28 + $0x32b] sm:$0xff] }
 0x25b   : > { %v12268_v20 = vpop.f32.mrf.mxu1 }
 0x25c   : > { %17633 = vst [vmem:[#allocation76_spill] sm:$0xff] %v14961_v49  ;;  %v14964_v47 = vadd.f32 %v3159_v31, %v2170_v26  ;;  %v2181_v61 = vadd.f32 %v12268_v20, %v17636_v12  ;;  %v3162_v1 = vpop.f32.mrf.mxu0  ;;  %v3436_v31 = vld [vmem:[%s13372_s28 + $0x312] sm:$0xff] }
 0x25d   : > { %v2172_v23 = vpop.f32.mrf.mxu1 }
 0x25e   : > { %17635 = vst [vmem:[#allocation78_spill] sm:$0xff] %v14964_v47  ;;  %v14967_v8 = vadd.f32 %v12406_v13, %v2181_v61  ;;  %v2173_v3 = vadd.f32 %v2172_v23, %v17638_v42  ;;  %v12409_v38 = vpop.f32.mrf.mxu0  ;;  %12644 = vmatmul.mubr.msk.bf16.gmra.mxu0 %vm646_vm1, %v4649_v24  ;;  %v17640_v61 = vld [vmem:[#allocation84_spill] sm:$0xff]  ;;  %v3437_v23 = vld [vmem:[%s13372_s28 + $0x31a] sm:$0xff]  ;;  %v3438_v13 = vld [vmem:[%s13372_s28 + $0x322] sm:$0xff]  ;;  %v4651_v42 = vpack.c.bf16 %v4563_v4, %v4562_v43 }
 0x25f   : > { %v12271_v29 = vpop.f32.mrf.mxu1  ;;  %12506 = vmatmul.mubr.msk.bf16.gmra.mxu1 %vm646_vm1, %v3523_v16  ;;  %12647 = vmatprep.mubr.msk.bf16.mxu0 %vm646_vm1, %v4650_v2  ;;  %v3439_v24 = vld [vmem:[%s13372_s28 + $0x32a] sm:$0xff]  ;;  %v17642_v16 = vld [vmem:[#allocation86_spill] sm:$0xff] }
 0x260   : > { %17637 = vst [vmem:[#allocation80_spill] sm:$0xff] %v14967_v8  ;;  %v14976_v33 = vadd.f32 %v3162_v1, %v2173_v3  ;;  %v2194_v48 = vadd.f32 %v12271_v29, %v17640_v61  ;;  %v3175_v53 = vpop.f32.mrf.mxu0  ;;  %12509 = vmatprep.mubr.msk.bf16.mxu1 %vm646_vm1, %v3524_v35  ;;  %v3525_v3 = vpack.c.bf16 %v3437_v23, %v3436_v31  ;;  %v17644_v35 = vld [vmem:[#allocation88_spill] sm:$0xff] }
 0x261   : > { %v2185_v26 = vpop.f32.mrf.mxu1  ;;  %v4652_v29 = vpack.c.bf16 %v4565_v34, %v4564_v5  ;;  %v3526_v47 = vpack.c.bf16 %v3439_v24, %v3438_v13  ;;  %v4566_v23 = vld [vmem:[%s13372_s28 + $0x333] sm:$0xff]  ;;  %v4567_v5 = vld [vmem:[%s13372_s28 + $0x33b] sm:$0xff]  ;;  %v4568_v24 = vld [vmem:[%s13372_s28 + $0x343] sm:$0xff] }
 0x262   : > { %17639 = vst [vmem:[#allocation82_spill] sm:$0xff] %v14976_v33  ;;  %v14985_v20 = vadd.f32 %v12409_v38, %v2194_v48  ;;  %v2186_v2 = vadd.f32 %v2185_v26, %v17642_v16  ;;  %v12410_v12 = vpop.f32.mrf.mxu0  ;;  %v17646_v48 = vld [vmem:[#allocation90_spill] sm:$0xff]  ;;  %v4569_v16 = vld [vmem:[%s13372_s28 + $0x34b] sm:$0xff] }
 0x263   : > { %v12272_v1 = vpop.f32.mrf.mxu1 }
 0x264   : > { %17641 = vst [vmem:[#allocation84_spill] sm:$0xff] %v14985_v20  ;;  %v14988_v61 = vadd.f32 %v3175_v53, %v2186_v2  ;;  %v2197_v33 = vadd.f32 %v12272_v1, %v17644_v35  ;;  %v3178_v8 = vpop.f32.mrf.mxu0  ;;  %v3440_v53 = vld [vmem:[%s13372_s28 + $0x332] sm:$0xff] }
 0x265   : > { %v2188_v49 = vpop.f32.mrf.mxu1 }
 0x266   : > { %17643 = vst [vmem:[#allocation86_spill] sm:$0xff] %v14988_v61  ;;  %v14991_v38 = vadd.f32 %v12410_v12, %v2197_v33  ;;  %v2189_v43 = vadd.f32 %v2188_v49, %v17646_v48  ;;  %v12413_v4 = vpop.f32.mrf.mxu0  ;;  %12648 = vmatmul.mubr.msk.bf16.gmra.mxu0 %vm646_vm1, %v4651_v42  ;;  %v17648_v33 = vld [vmem:[#allocation92_spill] sm:$0xff]  ;;  %v3441_v49 = vld [vmem:[%s13372_s28 + $0x33a] sm:$0xff]  ;;  %v3442_v12 = vld [vmem:[%s13372_s28 + $0x342] sm:$0xff]  ;;  %v4653_v48 = vpack.c.bf16 %v4567_v5, %v4566_v23 }
 0x267   : > { %v12275_v31 = vpop.f32.mrf.mxu1  ;;  %12510 = vmatmul.mubr.msk.bf16.gmra.mxu1 %vm646_vm1, %v3525_v3  ;;  %12651 = vmatprep.mubr.msk.bf16.mxu0 %vm646_vm1, %v4652_v29  ;;  %v3443_v42 = vld [vmem:[%s13372_s28 + $0x34a] sm:$0xff]  ;;  %v17649_v3 = vld [vmem:[#allocation94_spill] sm:$0xff] }
 0x268   : > { %17645 = vst [vmem:[#allocation88_spill] sm:$0xff] %v14991_v38  ;;  %v15000_v34 = vadd.f32 %v3178_v8, %v2189_v43  ;;  %v2210_v26 = vadd.f32 %v12275_v31, %v17648_v33  ;;  %v3191_v13 = vpop.f32.mrf.mxu0  ;;  %12513 = vmatprep.mubr.msk.bf16.mxu1 %vm646_vm1, %v3526_v47  ;;  %v3527_v43 = vpack.c.bf16 %v3441_v49, %v3440_v53  ;;  %v17650_v47 = vld [vmem:[#allocation96_spill] sm:$0xff] }
 0x269   : > { %v2201_v2 = vpop.f32.mrf.mxu1  ;;  %v4654_v31 = vpack.c.bf16 %v4569_v16, %v4568_v24  ;;  %v3528_v61 = vpack.c.bf16 %v3443_v42, %v3442_v12  ;;  %v4570_v49 = vld [vmem:[%s13372_s28 + $0x353] sm:$0xff]  ;;  %v4571_v24 = vld [vmem:[%s13372_s28 + $0x35b] sm:$0xff]  ;;  %v4572_v12 = vld [vmem:[%s13372_s28 + $0x363] sm:$0xff] }
 0x26a   : > { %17647 = vst [vmem:[#allocation90_spill] sm:$0xff] %v15000_v34  ;;  %v15009_v1 = vadd.f32 %v12413_v4, %v2210_v26  ;;  %v2202_v29 = vadd.f32 %v2201_v2, %v17649_v3  ;;  %v12414_v35 = vpop.f32.mrf.mxu0  ;;  %v17651_v26 = vld [vmem:[#allocation98_spill] sm:$0xff]  ;;  %v4573_v42 = vld [vmem:[%s13372_s28 + $0x36b] sm:$0xff] }
 0x26b   : > { %v12276_v8 = vpop.f32.mrf.mxu1 }
 0x26c   : > { %v15012_v33 = vadd.f32 %v3191_v13, %v2202_v29  ;;  %v2213_v34 = vadd.f32 %v12276_v8, %v17650_v47  ;;  %v3194_v38 = vpop.f32.mrf.mxu0  ;;  %v3444_v13 = vld [vmem:[%s13372_s28 + $0x352] sm:$0xff]  ;;  %v3446_v29 = vld [vmem:[%s13372_s28 + $0x362] sm:$0xff] }
 0x26d   : > { %v2204_v20 = vpop.f32.mrf.mxu1 }
 0x26e   : > { %v15015_v4 = vadd.f32 %v12414_v35, %v2213_v34  ;;  %v2205_v23 = vadd.f32 %v2204_v20, %v17651_v26  ;;  %v12557_v5 = vpop.f32.mrf.mxu0  ;;  %12652 = vmatmul.mubr.msk.bf16.gmra.mxu0 %vm646_vm1, %v4653_v48  ;;  %v3445_v20 = vld [vmem:[%s13372_s28 + $0x35a] sm:$0xff]  ;;  %v3447_v35 = vld [vmem:[%s13372_s28 + $0x36a] sm:$0xff] }
 0x26f   : > { %v12419_v53 = vpop.f32.mrf.mxu1  ;;  %12514 = vmatmul.mubr.msk.bf16.gmra.mxu1 %vm646_vm1, %v3527_v43  ;;  %12655 = vmatprep.mubr.msk.bf16.mxu0 %vm646_vm1, %v4654_v31  ;;  %v4655_v31 = vpack.c.bf16 %v4571_v24, %v4570_v49  ;;  %v3529_v47 = vpack.c.bf16 %v3445_v20, %v3444_v13  ;;  %v4574_v24 = vld [vmem:[%s13372_s28 + $0x373] sm:$0xff] }
 0x270   : > { %v15024_v16 = vadd.f32 %v3194_v38, %v2205_v23  ;;  %v4334_v34 = vadd.f32 %v12419_v53, %v14199_v46  ;;  %v4915_v2 = vpop.f32.mrf.mxu0  ;;  %12517 = vmatprep.mubr.msk.bf16.mxu1 %vm646_vm1, %v3528_v61  ;;  %v4656_v46 = vpack.c.bf16 %v4573_v42, %v4572_v12  ;;  %v3530_v53 = vpack.c.bf16 %v3447_v35, %v3446_v29  ;;  %v4577_v42 = vld [vmem:[%s13372_s28 + $0x38b] sm:$0xff]  ;;  %v3450_v29 = vld [vmem:[%s13372_s28 + $0x382] sm:$0xff] }
 0x271   : > { %v3789_v3 = vpop.f32.mrf.mxu1  ;;  %v3451_v35 = vld [vmem:[%s13372_s28 + $0x38a] sm:$0xff] }
 0x272   : > { %17652 = vst [vmem:[#allocation92_spill] sm:$0xff] %v15024_v16  ;;  %v15033_v48 = vadd.f32 %v12557_v5, %v4334_v34  ;;  %v4332_v8 = vadd.f32 %v3789_v3, %v14202_v56  ;;  %v12558_v43 = vpop.f32.mrf.mxu0  ;;  %v4575_v34 = vld [vmem:[%s13372_s28 + $0x37b] sm:$0xff] }
 0x273   : > { %v12420_v38 = vpop.f32.mrf.mxu1 }
 0x274   : > { %v15036_v26 = vadd.f32 %v4915_v2, %v4332_v8  ;;  %v4335_v61 = vadd.f32 %v12420_v38, %v14205_v41  ;;  %v4918_v23 = vpop.f32.mrf.mxu0  ;;  %v3448_v41 = vld [vmem:[%s13372_s28 + $0x372] sm:$0xff]  ;;  %v4657_v38 = vpack.c.bf16 %v4575_v34, %v4574_v24 }
 0x275   : > { %v3792_v16 = vpop.f32.mrf.mxu1  ;;  %v4578_v34 = vld [vmem:[%s13372_s28 + $0x393] sm:$0xff] }
 0x276   : > { %v15039_v5 = vadd.f32 %v12558_v43, %v4335_v61  ;;  %v4333_v56 = vadd.f32 %v3792_v16, %v14214_v39  ;;  %v12561_v49 = vpop.f32.mrf.mxu0  ;;  %12656 = vmatmul.mubr.msk.bf16.gmra.mxu0 %vm646_vm1, %v4655_v31  ;;  %v3449_v39 = vld [vmem:[%s13372_s28 + $0x37a] sm:$0xff]  ;;  %v4576_v16 = vld [vmem:[%s13372_s28 + $0x383] sm:$0xff] }
 0x277   : > { %v12423_v13 = vpop.f32.mrf.mxu1  ;;  %12518 = vmatmul.mubr.msk.bf16.gmra.mxu1 %vm646_vm1, %v3529_v47  ;;  %12659 = vmatprep.mubr.msk.bf16.mxu0 %vm646_vm1, %v4656_v46  ;;  %v3531_v46 = vpack.c.bf16 %v3449_v39, %v3448_v41 }
 0x278   : > { %v15048_v2 = vadd.f32 %v4918_v23, %v4333_v56  ;;  %v4338_v20 = vadd.f32 %v12423_v13, %v14223_v36  ;;  %v4931_v12 = vpop.f32.mrf.mxu0  ;;  %12521 = vmatprep.mubr.msk.bf16.mxu1 %vm646_vm1, %v3530_v53  ;;  %v4658_v36 = vpack.c.bf16 %v4577_v42, %v4576_v16  ;;  %v3532_v56 = vpack.c.bf16 %v3451_v35, %v3450_v29  ;;  %v4580_v42 = vld [vmem:[%s13372_s28 + $0x3a3] sm:$0xff] }
 0x279   : > { %v3805_v3 = vpop.f32.mrf.mxu1  ;;  %v3454_v35 = vld [vmem:[%s13372_s28 + $0x3a2] sm:$0xff] }
 0x27a   : > { %v15057_v8 = vadd.f32 %v12561_v49, %v4338_v20  ;;  %v4336_v43 = vadd.f32 %v3805_v3, %v14226_v62  ;;  %v12562_v31 = vpop.f32.mrf.mxu0  ;;  %v4579_v20 = vld [vmem:[%s13372_s28 + $0x39b] sm:$0xff]  ;;  %v4581_v3 = vld [vmem:[%s13372_s28 + $0x3ab] sm:$0xff] }
 0x27b   : > { %v12424_v47 = vpop.f32.mrf.mxu1 }
 0x27c   : > { %v15060_v61 = vadd.f32 %v4931_v12, %v4336_v43  ;;  %v4339_v23 = vadd.f32 %v12424_v47, %v14229_v7  ;;  %v4934_v53 = vpop.f32.mrf.mxu0  ;;  %v3452_v7 = vld [vmem:[%s13372_s28 + $0x392] sm:$0xff]  ;;  %v3455_v43 = vld [vmem:[%s13372_s28 + $0x3aa] sm:$0xff] }
 0x27d   : > { %v3808_v13 = vpop.f32.mrf.mxu1 }
 0x27e   : > { %v15063_v49 = vadd.f32 %v12562_v31, %v4339_v23  ;;  %v4337_v62 = vadd.f32 %v3808_v13, %v14238_v54  ;;  %v12565_v24 = vpop.f32.mrf.mxu0  ;;  %12660 = vmatmul.mubr.msk.bf16.gmra.mxu0 %vm646_vm1, %v4657_v38  ;;  %v3453_v54 = vld [vmem:[%s13372_s28 + $0x39a] sm:$0xff] }
 0x27f   : > { %v12427_v41 = vpop.f32.mrf.mxu1  ;;  %12522 = vmatmul.mubr.msk.bf16.gmra.mxu1 %vm646_vm1, %v3531_v46  ;;  %12663 = vmatprep.mubr.msk.bf16.mxu0 %vm646_vm1, %v4658_v36  ;;  %v4659_v46 = vpack.c.bf16 %v4579_v20, %v4578_v34  ;;  %v3533_v23 = vpack.c.bf16 %v3453_v54, %v3452_v7  ;;  %v4582_v20 = vld [vmem:[%s13372_s28 + $0x3b3] sm:$0xff] }
 0x280   : > { %v15072_v12 = vadd.f32 %v4934_v53, %v4337_v62  ;;  %v4342_v39 = vadd.f32 %v12427_v41, %v14247_v28  ;;  %v4947_v16 = vpop.f32.mrf.mxu0  ;;  %12525 = vmatprep.mubr.msk.bf16.mxu1 %vm646_vm1, %v3532_v56  ;;  %v4660_v28 = vpack.c.bf16 %v4581_v3, %v4580_v42  ;;  %v3534_v62 = vpack.c.bf16 %v3455_v43, %v3454_v35  ;;  %v4584_v3 = vld [vmem:[%s13372_s28 + $0x3c3] sm:$0xff] }
 0x281   : > { %v3821_v29 = vpop.f32.mrf.mxu1  ;;  %v3458_v43 = vld [vmem:[%s13372_s28 + $0x3c2] sm:$0xff] }
 0x282   : > { %v15081_v31 = vadd.f32 %v12565_v24, %v4342_v39  ;;  %v4340_v38 = vadd.f32 %v3821_v29, %v14250_v59  ;;  %v12566_v47 = vpop.f32.mrf.mxu0  ;;  %v4583_v39 = vld [vmem:[%s13372_s28 + $0x3bb] sm:$0xff]  ;;  %v4585_v29 = vld [vmem:[%s13372_s28 + $0x3cb] sm:$0xff] }
 0x283   : > { %v12428_v36 = vpop.f32.mrf.mxu1 }
 0x284   : > { %v15084_v53 = vadd.f32 %v4947_v16, %v4340_v38  ;;  %v4343_v56 = vadd.f32 %v12428_v36, %v14253_v52  ;;  %v4950_v13 = vpop.f32.mrf.mxu0  ;;  %v3456_v52 = vld [vmem:[%s13372_s28 + $0x3b2] sm:$0xff]  ;;  %v3459_v38 = vld [vmem:[%s13372_s28 + $0x3ca] sm:$0xff] }
 0x285   : > { %v3824_v41 = vpop.f32.mrf.mxu1 }
 0x286   : > { %v15087_v24 = vadd.f32 %v12566_v47, %v4343_v56  ;;  %v4341_v59 = vadd.f32 %v3824_v41, %v14262_v14  ;;  %v12569_v34 = vpop.f32.mrf.mxu0  ;;  %12664 = vmatmul.mubr.msk.bf16.gmra.mxu0 %vm646_vm1, %v4659_v46  ;;  %v3457_v14 = vld [vmem:[%s13372_s28 + $0x3ba] sm:$0xff] }
 0x287   : > { %v12431_v7 = vpop.f32.mrf.mxu1  ;;  %12526 = vmatmul.mubr.msk.bf16.gmra.mxu1 %vm646_vm1, %v3533_v23  ;;  %12667 = vmatprep.mubr.msk.bf16.mxu0 %vm646_vm1, %v4660_v28  ;;  %v4661_v23 = vpack.c.bf16 %v4583_v39, %v4582_v20  ;;  %v3535_v56 = vpack.c.bf16 %v3457_v14, %v3456_v52  ;;  %v4586_v39 = vld [vmem:[%s13372_s28 + $0x3d3] sm:$0xff] }
 0x288   : > { %v15096_v16 = vadd.f32 %v4950_v13, %v4341_v59  ;;  %v4346_v54 = vadd.f32 %v12431_v7, %v14271_v27  ;;  %v4963_v42 = vpop.f32.mrf.mxu0  ;;  %12529 = vmatprep.mubr.msk.bf16.mxu1 %vm646_vm1, %v3534_v62  ;;  %v4662_v27 = vpack.c.bf16 %v4585_v29, %v4584_v3  ;;  %v3536_v59 = vpack.c.bf16 %v3459_v38, %v3458_v43  ;;  %v4588_v29 = vld [vmem:[%s13372_s28 + $0x3e3] sm:$0xff] }
 0x289   : > { %v3837_v35 = vpop.f32.mrf.mxu1  ;;  %v3462_v38 = vld [vmem:[%s13372_s28 + $0x3e2] sm:$0xff] }
 0x28a   : > { %v15105_v47 = vadd.f32 %v12569_v34, %v4346_v54  ;;  %v4344_v46 = vadd.f32 %v3837_v35, %v14274_v19  ;;  %v12570_v36 = vpop.f32.mrf.mxu0  ;;  %v4587_v54 = vld [vmem:[%s13372_s28 + $0x3db] sm:$0xff]  ;;  %v4589_v35 = vld [vmem:[%s13372_s28 + $0x3eb] sm:$0xff] }
 0x28b   : > { %v12432_v28 = vpop.f32.mrf.mxu1 }
 0x28c   : > { %v15108_v13 = vadd.f32 %v4963_v42, %v4344_v46  ;;  %v4347_v62 = vadd.f32 %v12432_v28, %v14277_v9  ;;  %v4966_v41 = vpop.f32.mrf.mxu0  ;;  %v3460_v9 = vld [vmem:[%s13372_s28 + $0x3d2] sm:$0xff]  ;;  %v3463_v46 = vld [vmem:[%s13372_s28 + $0x3ea] sm:$0xff] }
 0x28d   : > { %v3840_v7 = vpop.f32.mrf.mxu1 }
 0x28e   : > { %v15111_v34 = vadd.f32 %v12570_v36, %v4347_v62  ;;  %v4345_v19 = vadd.f32 %v3840_v7, %v14286_v51  ;;  %v12573_v20 = vpop.f32.mrf.mxu0  ;;  %12668 = vmatmul.mubr.msk.bf16.gmra.mxu0 %vm646_vm1, %v4661_v23  ;;  %v3461_v51 = vld [vmem:[%s13372_s28 + $0x3da] sm:$0xff] }
 0x28f   : > { %v12435_v52 = vpop.f32.mrf.mxu1  ;;  %12530 = vmatmul.mubr.msk.bf16.gmra.mxu1 %vm646_vm1, %v3535_v56  ;;  %12671 = vmatprep.mubr.msk.bf16.mxu0 %vm646_vm1, %v4662_v27  ;;  %v4663_v56 = vpack.c.bf16 %v4587_v54, %v4586_v39  ;;  %v3537_v62 = vpack.c.bf16 %v3461_v51, %v3460_v9  ;;  %v4590_v54 = vld [vmem:[%s13372_s28 + $0x3f3] sm:$0xff] }
 0x290   : > { %v15120_v42 = vadd.f32 %v4966_v41, %v4345_v19  ;;  %v4350_v14 = vadd.f32 %v12435_v52, %v14295_v18  ;;  %v4979_v3 = vpop.f32.mrf.mxu0  ;;  %12533 = vmatprep.mubr.msk.bf16.mxu1 %vm646_vm1, %v3536_v59  ;;  %v4664_v18 = vpack.c.bf16 %v4589_v35, %v4588_v29  ;;  %v3538_v19 = vpack.c.bf16 %v3463_v46, %v3462_v38  ;;  %v4592_v35 = vld [vmem:[%s13372_s28 + $0x403] sm:$0xff] }
 0x291   : > { %v3853_v43 = vpop.f32.mrf.mxu1  ;;  %v3466_v46 = vld [vmem:[%s13372_s28 + $0x402] sm:$0xff] }
 0x292   : > { %v15129_v36 = vadd.f32 %v12573_v20, %v4350_v14  ;;  %v4348_v23 = vadd.f32 %v3853_v43, %v14298_v10  ;;  %v12574_v28 = vpop.f32.mrf.mxu0  ;;  %v4591_v14 = vld [vmem:[%s13372_s28 + $0x3fb] sm:$0xff]  ;;  %v4593_v43 = vld [vmem:[%s13372_s28 + $0x40b] sm:$0xff] }
 0x293   : > { %v12436_v27 = vpop.f32.mrf.mxu1 }
 0x294   : > { %v15132_v41 = vadd.f32 %v4979_v3, %v4348_v23  ;;  %v4351_v59 = vadd.f32 %v12436_v27, %v14301_v17  ;;  %v4982_v7 = vpop.f32.mrf.mxu0  ;;  %v3464_v17 = vld [vmem:[%s13372_s28 + $0x3f2] sm:$0xff]  ;;  %v3467_v23 = vld [vmem:[%s13372_s28 + $0x40a] sm:$0xff] }
 0x295   : > { %v3856_v52 = vpop.f32.mrf.mxu1 }
 0x296   : > { %v15135_v20 = vadd.f32 %v12574_v28, %v4351_v59  ;;  %v4349_v10 = vadd.f32 %v3856_v52, %v14310_v0  ;;  %v12577_v39 = vpop.f32.mrf.mxu0  ;;  %12672 = vmatmul.mubr.msk.bf16.gmra.mxu0 %vm646_vm1, %v4663_v56  ;;  %v3465_v0 = vld [vmem:[%s13372_s28 + $0x3fa] sm:$0xff] }
 0x297   : > { %v12439_v9 = vpop.f32.mrf.mxu1  ;;  %12534 = vmatmul.mubr.msk.bf16.gmra.mxu1 %vm646_vm1, %v3537_v62  ;;  %12675 = vmatprep.mubr.msk.bf16.mxu0 %vm646_vm1, %v4664_v18  ;;  %v4665_v62 = vpack.c.bf16 %v4591_v14, %v4590_v54  ;;  %v3539_v59 = vpack.c.bf16 %v3465_v0, %v3464_v17  ;;  %v4594_v14 = vld [vmem:[%s13372_s28 + $0x413] sm:$0xff] }
 0x298   : > { %v15144_v3 = vadd.f32 %v4982_v7, %v4349_v10  ;;  %v4354_v51 = vadd.f32 %v12439_v9, %v14319_v40  ;;  %v4995_v29 = vpop.f32.mrf.mxu0  ;;  %12537 = vmatprep.mubr.msk.bf16.mxu1 %vm646_vm1, %v3538_v19  ;;  %v4666_v40 = vpack.c.bf16 %v4593_v43, %v4592_v35  ;;  %v3540_v10 = vpack.c.bf16 %v3467_v23, %v3466_v46  ;;  %v4596_v43 = vld [vmem:[%s13372_s28 + $0x423] sm:$0xff] }
 0x299   : > { %v3869_v38 = vpop.f32.mrf.mxu1  ;;  %v3470_v23 = vld [vmem:[%s13372_s28 + $0x422] sm:$0xff] }
 0x29a   : > { %v15153_v28 = vadd.f32 %v12577_v39, %v4354_v51  ;;  %v4352_v56 = vadd.f32 %v3869_v38, %v14322_v32  ;;  %v12578_v27 = vpop.f32.mrf.mxu0  ;;  %v4595_v51 = vld [vmem:[%s13372_s28 + $0x41b] sm:$0xff]  ;;  %v4597_v38 = vld [vmem:[%s13372_s28 + $0x42b] sm:$0xff] }
 0x29b   : > { %v12440_v18 = vpop.f32.mrf.mxu1 }
 0x29c   : > { %v15156_v7 = vadd.f32 %v4995_v29, %v4352_v56  ;;  %v4355_v19 = vadd.f32 %v12440_v18, %v14325_v15  ;;  %v4998_v52 = vpop.f32.mrf.mxu0  ;;  %v3468_v15 = vld [vmem:[%s13372_s28 + $0x412] sm:$0xff]  ;;  %v3471_v56 = vld [vmem:[%s13372_s28 + $0x42a] sm:$0xff] }
 0x29d   : > { %v3872_v9 = vpop.f32.mrf.mxu1 }
 0x29e   : > { %v15159_v39 = vadd.f32 %v12578_v27, %v4355_v19  ;;  %v4353_v32 = vadd.f32 %v3872_v9, %v14334_v57  ;;  %v12581_v54 = vpop.f32.mrf.mxu0  ;;  %12676 = vmatmul.mubr.msk.bf16.gmra.mxu0 %vm646_vm1, %v4665_v62  ;;  %v3469_v57 = vld [vmem:[%s13372_s28 + $0x41a] sm:$0xff] }
 0x29f   : > { %v12443_v17 = vpop.f32.mrf.mxu1  ;;  %12538 = vmatmul.mubr.msk.bf16.gmra.mxu1 %vm646_vm1, %v3539_v59  ;;  %12679 = vmatprep.mubr.msk.bf16.mxu0 %vm646_vm1, %v4666_v40  ;;  %v4667_v59 = vpack.c.bf16 %v4595_v51, %v4594_v14  ;;  %v3541_v19 = vpack.c.bf16 %v3469_v57, %v3468_v15  ;;  %v4598_v51 = vld [vmem:[%s13372_s28 + $0x433] sm:$0xff] }
 0x2a0   : > { %v15168_v29 = vadd.f32 %v4998_v52, %v4353_v32  ;;  %v4358_v0 = vadd.f32 %v12443_v17, %v14343_v58  ;;  %v5011_v35 = vpop.f32.mrf.mxu0  ;;  %12541 = vmatprep.mubr.msk.bf16.mxu1 %vm646_vm1, %v3540_v10  ;;  %v4668_v58 = vpack.c.bf16 %v4597_v38, %v4596_v43  ;;  %v3542_v32 = vpack.c.bf16 %v3471_v56, %v3470_v23  ;;  %v4600_v38 = vld [vmem:[%s13372_s28 + $0x443] sm:$0xff] }
 0x2a1   : > { %v3885_v46 = vpop.f32.mrf.mxu1  ;;  %v3474_v56 = vld [vmem:[%s13372_s28 + $0x442] sm:$0xff] }
 0x2a2   : > { %v15177_v27 = vadd.f32 %v12581_v54, %v4358_v0  ;;  %v4356_v62 = vadd.f32 %v3885_v46, %v14346_v50  ;;  %v12582_v18 = vpop.f32.mrf.mxu0  ;;  %v4599_v0 = vld [vmem:[%s13372_s28 + $0x43b] sm:$0xff]  ;;  %v4601_v46 = vld [vmem:[%s13372_s28 + $0x44b] sm:$0xff] }
 0x2a3   : > { %v12444_v40 = vpop.f32.mrf.mxu1 }
 0x2a4   : > { %v15180_v52 = vadd.f32 %v5011_v35, %v4356_v62  ;;  %v4359_v10 = vadd.f32 %v12444_v40, %v14349_v37  ;;  %v5014_v9 = vpop.f32.mrf.mxu0  ;;  %v3472_v37 = vld [vmem:[%s13372_s28 + $0x432] sm:$0xff]  ;;  %v3475_v62 = vld [vmem:[%s13372_s28 + $0x44a] sm:$0xff] }
 0x2a5   : > { %v3888_v17 = vpop.f32.mrf.mxu1 }
 0x2a6   : > { %v15183_v54 = vadd.f32 %v12582_v18, %v4359_v10  ;;  %v4357_v50 = vadd.f32 %v3888_v17, %v14358_v63  ;;  %v12585_v14 = vpop.f32.mrf.mxu0  ;;  %12680 = vmatmul.mubr.msk.bf16.gmra.mxu0 %vm646_vm1, %v4667_v59  ;;  %v3473_v63 = vld [vmem:[%s13372_s28 + $0x43a] sm:$0xff] }
 0x2a7   : > { %v12447_v15 = vpop.f32.mrf.mxu1  ;;  %12542 = vmatmul.mubr.msk.bf16.gmra.mxu1 %vm646_vm1, %v3541_v19  ;;  %12683 = vmatprep.mubr.msk.bf16.mxu0 %vm646_vm1, %v4668_v58  ;;  %v4669_v19 = vpack.c.bf16 %v4599_v0, %v4598_v51  ;;  %v3543_v10 = vpack.c.bf16 %v3473_v63, %v3472_v37  ;;  %v4602_v0 = vld [vmem:[%s13372_s28 + $0x453] sm:$0xff] }
 0x2a8   : > { %v15192_v35 = vadd.f32 %v5014_v9, %v4357_v50  ;;  %v4362_v57 = vadd.f32 %v12447_v15, %v14367_v25  ;;  %v5027_v43 = vpop.f32.mrf.mxu0  ;;  %12545 = vmatprep.mubr.msk.bf16.mxu1 %vm646_vm1, %v3542_v32  ;;  %v4670_v25 = vpack.c.bf16 %v4601_v46, %v4600_v38  ;;  %v3544_v50 = vpack.c.bf16 %v3475_v62, %v3474_v56  ;;  %v6720_v46 = vld [vmem:[%s13372_s28 + $0x44] sm:$0xff] }
 0x2a9   : > { %v3901_v23 = vpop.f32.mrf.mxu1  ;;  %v5594_v62 = vld [vmem:[%s13372_s28 + $0x24] sm:$0xff] }
 0x2aa   : > { %v15201_v18 = vadd.f32 %v12585_v14, %v4362_v57  ;;  %v4360_v59 = vadd.f32 %v3901_v23, %v14370_v11  ;;  %v12586_v40 = vpop.f32.mrf.mxu0  ;;  %v4603_v57 = vld [vmem:[%s13372_s28 + $0x45b] sm:$0xff]  ;;  %v6721_v23 = vld [vmem:[%s13372_s28 + $0x4c] sm:$0xff] }
 0x2ab   : > { %v12448_v58 = vpop.f32.mrf.mxu1 }
 0x2ac   : > { %v15204_v9 = vadd.f32 %v5027_v43, %v4360_v59  ;;  %v4363_v32 = vadd.f32 %v12448_v58, %v14373_v55  ;;  %v5030_v17 = vpop.f32.mrf.mxu0  ;;  %v3476_v55 = vld [vmem:[%s13372_s28 + $0x452] sm:$0xff] }
 0x2ad   : > { %v3904_v15 = vpop.f32.mrf.mxu1  ;;  %v5595_v59 = vld [vmem:[%s13372_s28 + $0x2c] sm:$0xff] }
 0x2ae   : > { %v15207_v14 = vadd.f32 %v12586_v40, %v4363_v32  ;;  %v4361_v11 = vadd.f32 %v3904_v15, %v14382_v22  ;;  %v12589_v51 = vpop.f32.mrf.mxu0  ;;  %12684 = vmatmul.mubr.msk.bf16.gmra.mxu0 %vm646_vm1, %v4669_v19  ;;  %v3477_v22 = vld [vmem:[%s13372_s28 + $0x45a] sm:$0xff] }
 0x2af   : > { %v12451_v37 = vpop.f32.mrf.mxu1  ;;  %12546 = vmatmul.mubr.msk.bf16.gmra.mxu1 %vm646_vm1, %v3543_v10  ;;  %12687 = vmatprep.mubr.msk.bf16.mxu0 %vm646_vm1, %v4670_v25  ;;  %v4671_v10 = vpack.c.bf16 %v4603_v57, %v4602_v0  ;;  %v3545_v32 = vpack.c.bf16 %v3477_v22, %v3476_v55  ;;  %v6723_v55 = vld [vmem:[%s13372_s28 + $0x5c] sm:$0xff] }
 0x2b0   : > { %v15216_v43 = vadd.f32 %v5030_v17, %v4361_v11  ;;  %v4366_v63 = vadd.f32 %v12451_v37, %v14391_v60  ;;  %v5043_v38 = vpop.f32.mrf.mxu0  ;;  %12549 = vmatprep.mubr.msk.bf16.mxu1 %vm646_vm1, %v3544_v50  ;;  %v6856_v60 = vpack.c.bf16 %v6721_v23, %v6720_v46  ;;  %v5730_v11 = vpack.c.bf16 %v5595_v59, %v5594_v62  ;;  %v5597_v46 = vld [vmem:[%s13372_s28 + $0x3c] sm:$0xff] }
 0x2b1   : > { %v3917_v56 = vpop.f32.mrf.mxu1 }
 0x2b2   : > { %v15225_v40 = vadd.f32 %v12589_v51, %v4366_v63  ;;  %v4364_v19 = vadd.f32 %v3917_v56, %v14394_v30  ;;  %v12590_v58 = vpop.f32.mrf.mxu0 }
 0x2b3   : > { %v12452_v25 = vpop.f32.mrf.mxu1 }
 0x2b4   : > { %v15228_v17 = vadd.f32 %v5043_v38, %v4364_v19  ;;  %v4367_v50 = vadd.f32 %v12452_v25, %v14397_v21  ;;  %v5046_v15 = vpop.f32.mrf.mxu0  ;;  %v6722_v21 = vld [vmem:[%s13372_s28 + $0x54] sm:$0xff] }
 0x2b5   : > { %v3920_v37 = vpop.f32.mrf.mxu1  ;;  %v6857_v19 = vpack.c.bf16 %v6723_v55, %v6722_v21 }
 0x2b6   : > { %v15231_v51 = vadd.f32 %v12590_v58, %v4367_v50  ;;  %v4365_v30 = vadd.f32 %v3920_v37, %v14405_v44  ;;  %v12593_v63 = vpop.f32.mrf.mxu0  ;;  %12688 = vmatmul.mubr.msk.bf16.gmra.mxu0 %vm646_vm1, %v4671_v10  ;;  %v5596_v44 = vld [vmem:[%s13372_s28 + $0x34] sm:$0xff]  ;;  %v6724_v58 = vld [vmem:[%s13372_s28 + $0x64] sm:$0xff]  ;;  %v6725_v10 = vld [vmem:[%s13372_s28 + $0x6c] sm:$0xff] }
 0x2b7   : > { %v12455_v0 = vpop.f32.mrf.mxu1  ;;  %12550 = vmatmul.mubr.msk.bf16.gmra.mxu1 %vm646_vm1, %v3545_v32  ;;  %12831 = vmatprep.mubr.msk.bf16.mxu0 %vm646_vm1, %v6856_v60  ;;  %v5731_v32 = vpack.c.bf16 %v5597_v46, %v5596_v44  ;;  %v17654_v37 = vld [vmem:[#allocation54_spill] sm:$0xff]  ;;  %v6858_v21 = vpack.c.bf16 %v6725_v10, %v6724_v58  ;;  %v6729_v10 = vld [vmem:[%s13372_s28 + $0x8c] sm:$0xff] }
 0x2b8   : > { %v15239_v57 = vadd.f32 %v5046_v15, %v4365_v30  ;;  %v4370_v38 = vadd.f32 %v12455_v0, %v14413_v45  ;;  %v5059_v22 = vpop.f32.mrf.mxu0  ;;  %12693 = vmatprep.mubr.msk.bf16.mxu1 %vm646_vm1, %v5730_v11  ;;  %v17653_v45 = vld [vmem:[#allocation99_spill] sm:$0xff]  ;;  %v9383_v30 = vsel %vm851_vm0, %v17654_v37, 0  ;;  %v17655_v0 = vld [vmem:[#allocation52_spill] sm:$0xff] }
 0x2b9   : > { %v3933_v23 = vpop.f32.mrf.mxu1 }
 0x2ba   : > { %v15245_v56 = vadd.f32 %v12593_v63, %v4370_v38  ;;  %v4368_v62 = vadd.f32 %v3933_v23, %v14418_v6  ;;  %v12594_v59 = vpop.f32.mrf.mxu0  ;;  %v8257_v6 = vsel %vm851_vm0, %v17655_v0, 0  ;;  %v17657_v38 = vld [vmem:[#allocation41_spill] sm:$0xff] }
 0x2bb   : > { %v12456_v25 = vpop.f32.mrf.mxu1  ;;  %v6726_v23 = vld [vmem:[%s13372_s28 + $0x74] sm:$0xff] }
 0x2bc   : > { %v15250_v50 = vadd.f32 %v5059_v22, %v4368_v62  ;;  %v4371_v15 = vadd.f32 %v12456_v25, %v17653_v45  ;;  %v5062_v11 = vpop.f32.mrf.mxu0  ;;  %v6727_v62 = vld [vmem:[%s13372_s28 + $0x7c] sm:$0xff]  ;;  %v17659_v45 = vld [vmem:[#allocation43_spill] sm:$0xff] }
 0x2bd   : > { %v3936_v63 = vpop.f32.mrf.mxu1  ;;  %v17661_v0 = vld [vmem:[#allocation45_spill] sm:$0xff] }
 0x2be   : > { %v15257_v55 = vadd.f32 %v12594_v59, %v4371_v15  ;;  %v4369_v44 = vadd.f32 %v3936_v63, %v17657_v38  ;;  %v12597_v46 = vpop.f32.mrf.mxu0  ;;  %12832 = vmatmul.mubr.msk.bf16.vlgmr.msra.gmra.mxu0 %vm646_vm1, %v6857_v19  ;;  %v6728_v59 = vld [vmem:[%s13372_s28 + $0x84] sm:$0xff] }
 0x2bf   : > { %v12459_v22 = vpop.f32.mrf.mxu1  ;;  %12694 = vmatmul.mubr.msk.bf16.vlgmr.msra.gmra.mxu1 %vm646_vm1, %v5731_v32  ;;  %13106 = vmatpush3.bf16.msra.mxu0 %v9383_v30 }
 0x2c0   : > { %17656 = vst [vmem:[#allocation94_spill] sm:$0xff] %v15257_v55  ;;  %v15264_v25 = vadd.f32 %v5062_v11, %v4369_v44  ;;  %v4374_v37 = vadd.f32 %v12459_v22, %v17659_v45  ;;  %12968 = vmatpush3.bf16.msra.mxu1 %v8257_v6  ;;  %v5075_v58 = vpop.f32.mrf.mxu0  ;;  %12697 = vmatprep.mubr.msk.bf16.mxu1 %vm646_vm1, %v6856_v60  ;;  %v17663_v6 = vld [vmem:[#allocation47_spill] sm:$0xff] }
 0x2c1   : > { %v3949_v15 = vpop.f32.mrf.mxu1  ;;  %12835 = vmatprep.mubr.msk.bf16.mxu0 %vm646_vm1, %v6858_v21  ;;  %v6859_v11 = vpack.c.bf16 %v6727_v62, %v6726_v23  ;;  %v6860_v44 = vpack.c.bf16 %v6729_v10, %v6728_v59  ;;  %v6730_v23 = vld [vmem:[%s13372_s28 + $0x94] sm:$0xff]  ;;  %v6731_v62 = vld [vmem:[%s13372_s28 + $0x9c] sm:$0xff]  ;;  %v17667_v59 = vld [vmem:[#allocation51_spill] sm:$0xff] }
 0x2c2   : > { %17658 = vst [vmem:[#allocation96_spill] sm:$0xff] %v15264_v25  ;;  %v15271_v63 = vadd.f32 %v12597_v46, %v4374_v37  ;;  %v4372_v32 = vadd.f32 %v3949_v15, %v17661_v0  ;;  %v12598_v30 = vpop.f32.mrf.mxu0  ;;  %v17665_v46 = vld [vmem:[#allocation49_spill] sm:$0xff] }
 0x2c3   : > { %v12460_v38 = vpop.f32.mrf.mxu1 }
 0x2c4   : > { %17660 = vst [vmem:[#allocation98_spill] sm:$0xff] %v15271_v63  ;;  %v15274_v22 = vadd.f32 %v5075_v58, %v4372_v32  ;;  %v4375_v45 = vadd.f32 %v12460_v38, %v17663_v6  ;;  %v5078_v60 = vpop.f32.mrf.mxu0  ;;  %v6732_v32 = vld [vmem:[%s13372_s28 + $0xa4] sm:$0xff]  ;;  %v17669_v6 = vld [vmem:[#allocation53_spill] sm:$0xff] }
 0x2c5   : > { %v3952_v25 = vpop.f32.mrf.mxu1 }
 0x2c6   : > { %17662 = vst [vmem:[#allocation99_spill] sm:$0xff] %v15274_v22  ;;  %v15277_v55 = vadd.f32 %v12598_v30, %v4375_v45  ;;  %v4373_v37 = vadd.f32 %v3952_v25, %v17665_v46  ;;  %v12601_v63 = vpop.f32.mrf.mxu0  ;;  %12836 = vmatmul.mubr.msk.bf16.gmra.mxu0 %vm646_vm1, %v6859_v11  ;;  %v6733_v30 = vld [vmem:[%s13372_s28 + $0xac] sm:$0xff]  ;;  %v6861_v46 = vpack.c.bf16 %v6731_v62, %v6730_v23  ;;  %v6734_v23 = vld [vmem:[%s13372_s28 + $0xb4] sm:$0xff]  ;;  %v6735_v62 = vld [vmem:[%s13372_s28 + $0xbc] sm:$0xff] }
 0x2c7   : > { %v12463_v15 = vpop.f32.mrf.mxu1  ;;  %12698 = vmatmul.mubr.msk.bf16.gmra.mxu1 %vm646_vm1, %v6857_v19  ;;  %12839 = vmatprep.mubr.msk.bf16.mxu0 %vm646_vm1, %v6860_v44  ;;  %v6862_v22 = vpack.c.bf16 %v6733_v30, %v6732_v32 }
 0x2c8   : > { %17664 = vst [vmem:[#allocation54_spill] sm:$0xff] %v15277_v55  ;;  %v15285_v58 = vadd.f32 %v5078_v60, %v4373_v37  ;;  %v4378_v10 = vadd.f32 %v12463_v15, %v17667_v59  ;;  %v5091_v0 = vpop.f32.mrf.mxu0  ;;  %12701 = vmatprep.mubr.msk.bf16.mxu1 %vm646_vm1, %v6858_v21  ;;  %v17671_v37 = vld [vmem:[#allocation55_spill] sm:$0xff] }
 0x2c9   : > { %v3965_v25 = vpop.f32.mrf.mxu1 }
 0x2ca   : > { %17666 = vst [vmem:[#allocation52_spill] sm:$0xff] %v15285_v58  ;;  %v15291_v38 = vadd.f32 %v12601_v63, %v4378_v10  ;;  %v4376_v45 = vadd.f32 %v3965_v25, %v17669_v6  ;;  %v12602_v19 = vpop.f32.mrf.mxu0  ;;  %v17673_v63 = vld [vmem:[#allocation57_spill] sm:$0xff]  ;;  %v6736_v6 = vld [vmem:[%s13372_s28 + $0xc4] sm:$0xff] }
 0x2cb   : > { %v12464_v55 = vpop.f32.mrf.mxu1 }
 0x2cc   : > { %17668 = vst [vmem:[#allocation41_spill] sm:$0xff] %v15291_v38  ;;  %v15294_v60 = vadd.f32 %v5091_v0, %v4376_v45  ;;  %v4379_v15 = vadd.f32 %v12464_v55, %v17671_v37  ;;  %v5094_v59 = vpop.f32.mrf.mxu0  ;;  %v17675_v55 = vld [vmem:[#allocation59_spill] sm:$0xff] }
 0x2cd   : > { %v3968_v21 = vpop.f32.mrf.mxu1  ;;  %v6737_v45 = vld [vmem:[%s13372_s28 + $0xcc] sm:$0xff] }
 0x2ce   : > { %17670 = vst [vmem:[#allocation43_spill] sm:$0xff] %v15294_v60  ;;  %v15297_v58 = vadd.f32 %v12602_v19, %v4379_v15  ;;  %v4377_v10 = vadd.f32 %v3968_v21, %v17673_v63  ;;  %v12605_v38 = vpop.f32.mrf.mxu0  ;;  %12840 = vmatmul.mubr.msk.bf16.gmra.mxu0 %vm646_vm1, %v6861_v46  ;;  %v17677_v15 = vld [vmem:[#allocation61_spill] sm:$0xff]  ;;  %v6863_v63 = vpack.c.bf16 %v6735_v62, %v6734_v23 }
 0x2cf   : > { %v12467_v25 = vpop.f32.mrf.mxu1  ;;  %12702 = vmatmul.mubr.msk.bf16.gmra.mxu1 %vm646_vm1, %v6859_v11  ;;  %12843 = vmatprep.mubr.msk.bf16.mxu0 %vm646_vm1, %v6862_v22  ;;  %v6864_v60 = vpack.c.bf16 %v6737_v45, %v6736_v6  ;;  %v6738_v23 = vld [vmem:[%s13372_s28 + $0xd4] sm:$0xff]  ;;  %v6739_v62 = vld [vmem:[%s13372_s28 + $0xdc] sm:$0xff] }
 0x2d0   : > { %17672 = vst [vmem:[#allocation45_spill] sm:$0xff] %v15297_v58  ;;  %v15305_v0 = vadd.f32 %v5094_v59, %v4377_v10  ;;  %v4382_v32 = vadd.f32 %v12467_v25, %v17675_v55  ;;  %v5107_v30 = vpop.f32.mrf.mxu0  ;;  %12705 = vmatprep.mubr.msk.bf16.mxu1 %vm646_vm1, %v6860_v44  ;;  %v17679_v10 = vld [vmem:[#allocation63_spill] sm:$0xff] }
 0x2d1   : > { %v3981_v19 = vpop.f32.mrf.mxu1 }
 0x2d2   : > { %17674 = vst [vmem:[#allocation47_spill] sm:$0xff] %v15305_v0  ;;  %v15311_v37 = vadd.f32 %v12605_v38, %v4382_v32  ;;  %v4380_v21 = vadd.f32 %v3981_v19, %v17677_v15  ;;  %v12606_v11 = vpop.f32.mrf.mxu0  ;;  %v17681_v38 = vld [vmem:[#allocation65_spill] sm:$0xff]  ;;  %v6740_v15 = vld [vmem:[%s13372_s28 + $0xe4] sm:$0xff] }
 0x2d3   : > { %v12468_v58 = vpop.f32.mrf.mxu1 }
 0x2d4   : > { %17676 = vst [vmem:[#allocation49_spill] sm:$0xff] %v15311_v37  ;;  %v15314_v59 = vadd.f32 %v5107_v30, %v4380_v21  ;;  %v4383_v25 = vadd.f32 %v12468_v58, %v17679_v10  ;;  %v5110_v55 = vpop.f32.mrf.mxu0  ;;  %v17683_v58 = vld [vmem:[#allocation67_spill] sm:$0xff] }
 0x2d5   : > { %v3984_v44 = vpop.f32.mrf.mxu1  ;;  %v6741_v21 = vld [vmem:[%s13372_s28 + $0xec] sm:$0xff] }
 0x2d6   : > { %17678 = vst [vmem:[#allocation51_spill] sm:$0xff] %v15314_v59  ;;  %v15317_v0 = vadd.f32 %v12606_v11, %v4383_v25  ;;  %v4381_v32 = vadd.f32 %v3984_v44, %v17681_v38  ;;  %v12609_v37 = vpop.f32.mrf.mxu0  ;;  %12844 = vmatmul.mubr.msk.bf16.gmra.mxu0 %vm646_vm1, %v6863_v63  ;;  %v17685_v25 = vld [vmem:[#allocation69_spill] sm:$0xff]  ;;  %v6865_v38 = vpack.c.bf16 %v6739_v62, %v6738_v23 }
 0x2d7   : > { %v12471_v19 = vpop.f32.mrf.mxu1  ;;  %12706 = vmatmul.mubr.msk.bf16.gmra.mxu1 %vm646_vm1, %v6861_v46  ;;  %12847 = vmatprep.mubr.msk.bf16.mxu0 %vm646_vm1, %v6864_v60  ;;  %v6866_v59 = vpack.c.bf16 %v6741_v21, %v6740_v15  ;;  %v6742_v23 = vld [vmem:[%s13372_s28 + $0xf4] sm:$0xff]  ;;  %v6743_v62 = vld [vmem:[%s13372_s28 + $0xfc] sm:$0xff] }
 0x2d8   : > { %17680 = vst [vmem:[#allocation53_spill] sm:$0xff] %v15317_v0  ;;  %v15325_v30 = vadd.f32 %v5110_v55, %v4381_v32  ;;  %v4386_v6 = vadd.f32 %v12471_v19, %v17683_v58  ;;  %v5123_v45 = vpop.f32.mrf.mxu0  ;;  %12709 = vmatprep.mubr.msk.bf16.mxu1 %vm646_vm1, %v6862_v22  ;;  %v17687_v32 = vld [vmem:[#allocation71_spill] sm:$0xff] }
 0x2d9   : > { %v3997_v11 = vpop.f32.mrf.mxu1 }
 0x2da   : > { %17682 = vst [vmem:[#allocation55_spill] sm:$0xff] %v15325_v30  ;;  %v15331_v10 = vadd.f32 %v12609_v37, %v4386_v6  ;;  %v4384_v44 = vadd.f32 %v3997_v11, %v17685_v25  ;;  %v12610_v46 = vpop.f32.mrf.mxu0  ;;  %v17689_v37 = vld [vmem:[#allocation73_spill] sm:$0xff]  ;;  %v6744_v25 = vld [vmem:[%s13372_s28 + $0x104] sm:$0xff] }
 0x2db   : > { %v12472_v0 = vpop.f32.mrf.mxu1 }
 0x2dc   : > { %17684 = vst [vmem:[#allocation57_spill] sm:$0xff] %v15331_v10  ;;  %v15334_v55 = vadd.f32 %v5123_v45, %v4384_v44  ;;  %v4387_v19 = vadd.f32 %v12472_v0, %v17687_v32  ;;  %v5126_v58 = vpop.f32.mrf.mxu0  ;;  %v17691_v0 = vld [vmem:[#allocation75_spill] sm:$0xff] }
 0x2dd   : > { %v4000_v22 = vpop.f32.mrf.mxu1  ;;  %v6745_v44 = vld [vmem:[%s13372_s28 + $0x10c] sm:$0xff] }
 0x2de   : > { %17686 = vst [vmem:[#allocation59_spill] sm:$0xff] %v15334_v55  ;;  %v15337_v30 = vadd.f32 %v12610_v46, %v4387_v19  ;;  %v4385_v6 = vadd.f32 %v4000_v22, %v17689_v37  ;;  %v12613_v10 = vpop.f32.mrf.mxu0  ;;  %12848 = vmatmul.mubr.msk.bf16.gmra.mxu0 %vm646_vm1, %v6865_v38  ;;  %v17693_v19 = vld [vmem:[#allocation77_spill] sm:$0xff]  ;;  %v6867_v37 = vpack.c.bf16 %v6743_v62, %v6742_v23 }
 0x2df   : > { %v12475_v11 = vpop.f32.mrf.mxu1  ;;  %12710 = vmatmul.mubr.msk.bf16.gmra.mxu1 %vm646_vm1, %v6863_v63  ;;  %12851 = vmatprep.mubr.msk.bf16.mxu0 %vm646_vm1, %v6866_v59  ;;  %v6868_v55 = vpack.c.bf16 %v6745_v44, %v6744_v25  ;;  %v6746_v23 = vld [vmem:[%s13372_s28 + $0x114] sm:$0xff]  ;;  %v6747_v62 = vld [vmem:[%s13372_s28 + $0x11c] sm:$0xff] }
 0x2e0   : > { %17688 = vst [vmem:[#allocation61_spill] sm:$0xff] %v15337_v30  ;;  %v15345_v45 = vadd.f32 %v5126_v58, %v4385_v6  ;;  %v4390_v15 = vadd.f32 %v12475_v11, %v17691_v0  ;;  %v5139_v21 = vpop.f32.mrf.mxu0  ;;  %12713 = vmatprep.mubr.msk.bf16.mxu1 %vm646_vm1, %v6864_v60  ;;  %v17695_v6 = vld [vmem:[#allocation79_spill] sm:$0xff] }
 0x2e1   : > { %v4013_v46 = vpop.f32.mrf.mxu1 }
 0x2e2   : > { %17690 = vst [vmem:[#allocation63_spill] sm:$0xff] %v15345_v45  ;;  %v15351_v32 = vadd.f32 %v12613_v10, %v4390_v15  ;;  %v4388_v22 = vadd.f32 %v4013_v46, %v17693_v19  ;;  %v12614_v63 = vpop.f32.mrf.mxu0  ;;  %v17697_v10 = vld [vmem:[#allocation81_spill] sm:$0xff]  ;;  %v6748_v19 = vld [vmem:[%s13372_s28 + $0x124] sm:$0xff] }
 0x2e3   : > { %v12476_v30 = vpop.f32.mrf.mxu1 }
 0x2e4   : > { %17692 = vst [vmem:[#allocation65_spill] sm:$0xff] %v15351_v32  ;;  %v15354_v58 = vadd.f32 %v5139_v21, %v4388_v22  ;;  %v4391_v11 = vadd.f32 %v12476_v30, %v17695_v6  ;;  %v5142_v0 = vpop.f32.mrf.mxu0  ;;  %v17699_v30 = vld [vmem:[#allocation83_spill] sm:$0xff] }
 0x2e5   : > { %v4016_v60 = vpop.f32.mrf.mxu1  ;;  %v6749_v22 = vld [vmem:[%s13372_s28 + $0x12c] sm:$0xff] }
 0x2e6   : > { %17694 = vst [vmem:[#allocation67_spill] sm:$0xff] %v15354_v58  ;;  %v15357_v45 = vadd.f32 %v12614_v63, %v4391_v11  ;;  %v4389_v15 = vadd.f32 %v4016_v60, %v17697_v10  ;;  %v12617_v32 = vpop.f32.mrf.mxu0  ;;  %12852 = vmatmul.mubr.msk.bf16.gmra.mxu0 %vm646_vm1, %v6867_v37  ;;  %v17701_v11 = vld [vmem:[#allocation85_spill] sm:$0xff]  ;;  %v6869_v10 = vpack.c.bf16 %v6747_v62, %v6746_v23 }
 0x2e7   : > { %v12479_v46 = vpop.f32.mrf.mxu1  ;;  %12714 = vmatmul.mubr.msk.bf16.gmra.mxu1 %vm646_vm1, %v6865_v38  ;;  %12855 = vmatprep.mubr.msk.bf16.mxu0 %vm646_vm1, %v6868_v55  ;;  %v6870_v58 = vpack.c.bf16 %v6749_v22, %v6748_v19  ;;  %v6750_v23 = vld [vmem:[%s13372_s28 + $0x134] sm:$0xff]  ;;  %v6751_v62 = vld [vmem:[%s13372_s28 + $0x13c] sm:$0xff] }
 0x2e8   : > { %17696 = vst [vmem:[#allocation69_spill] sm:$0xff] %v15357_v45  ;;  %v15365_v21 = vadd.f32 %v5142_v0, %v4389_v15  ;;  %v4394_v25 = vadd.f32 %v12479_v46, %v17699_v30  ;;  %v5155_v44 = vpop.f32.mrf.mxu0  ;;  %12717 = vmatprep.mubr.msk.bf16.mxu1 %vm646_vm1, %v6866_v59  ;;  %v17703_v15 = vld [vmem:[#allocation87_spill] sm:$0xff] }
 0x2e9   : > { %v4029_v63 = vpop.f32.mrf.mxu1 }
 0x2ea   : > { %17698 = vst [vmem:[#allocation71_spill] sm:$0xff] %v15365_v21  ;;  %v15371_v6 = vadd.f32 %v12617_v32, %v4394_v25  ;;  %v4392_v60 = vadd.f32 %v4029_v63, %v17701_v11  ;;  %v12618_v38 = vpop.f32.mrf.mxu0  ;;  %v17705_v32 = vld [vmem:[#allocation89_spill] sm:$0xff]  ;;  %v6752_v11 = vld [vmem:[%s13372_s28 + $0x144] sm:$0xff] }
 0x2eb   : > { %v12480_v45 = vpop.f32.mrf.mxu1 }
 0x2ec   : > { %17700 = vst [vmem:[#allocation73_spill] sm:$0xff] %v15371_v6  ;;  %v15374_v0 = vadd.f32 %v5155_v44, %v4392_v60  ;;  %v4395_v46 = vadd.f32 %v12480_v45, %v17703_v15  ;;  %v5158_v30 = vpop.f32.mrf.mxu0  ;;  %v17707_v45 = vld [vmem:[#allocation91_spill] sm:$0xff] }
 0x2ed   : > { %v4032_v59 = vpop.f32.mrf.mxu1  ;;  %v6753_v60 = vld [vmem:[%s13372_s28 + $0x14c] sm:$0xff] }
 0x2ee   : > { %17702 = vst [vmem:[#allocation75_spill] sm:$0xff] %v15374_v0  ;;  %v15377_v21 = vadd.f32 %v12618_v38, %v4395_v46  ;;  %v4393_v25 = vadd.f32 %v4032_v59, %v17705_v32  ;;  %v12621_v6 = vpop.f32.mrf.mxu0  ;;  %12856 = vmatmul.mubr.msk.bf16.gmra.mxu0 %vm646_vm1, %v6869_v10  ;;  %v17709_v46 = vld [vmem:[#allocation93_spill] sm:$0xff]  ;;  %v6871_v32 = vpack.c.bf16 %v6751_v62, %v6750_v23 }
 0x2ef   : > { %v12483_v63 = vpop.f32.mrf.mxu1  ;;  %12718 = vmatmul.mubr.msk.bf16.gmra.mxu1 %vm646_vm1, %v6867_v37  ;;  %12859 = vmatprep.mubr.msk.bf16.mxu0 %vm646_vm1, %v6870_v58  ;;  %v6872_v0 = vpack.c.bf16 %v6753_v60, %v6752_v11  ;;  %v6754_v23 = vld [vmem:[%s13372_s28 + $0x154] sm:$0xff]  ;;  %v6755_v62 = vld [vmem:[%s13372_s28 + $0x15c] sm:$0xff] }
 0x2f0   : > { %17704 = vst [vmem:[#allocation77_spill] sm:$0xff] %v15377_v21  ;;  %v15385_v44 = vadd.f32 %v5158_v30, %v4393_v25  ;;  %v4398_v19 = vadd.f32 %v12483_v63, %v17707_v45  ;;  %v5171_v22 = vpop.f32.mrf.mxu0  ;;  %12721 = vmatprep.mubr.msk.bf16.mxu1 %vm646_vm1, %v6868_v55  ;;  %v17711_v25 = vld [vmem:[#allocation95_spill] sm:$0xff] }
 0x2f1   : > { %v4045_v38 = vpop.f32.mrf.mxu1 }
 0x2f2   : > { %17706 = vst [vmem:[#allocation79_spill] sm:$0xff] %v15385_v44  ;;  %v15391_v15 = vadd.f32 %v12621_v6, %v4398_v19  ;;  %v4396_v59 = vadd.f32 %v4045_v38, %v17709_v46  ;;  %v12622_v37 = vpop.f32.mrf.mxu0  ;;  %v17713_v6 = vld [vmem:[#allocation97_spill] sm:$0xff]  ;;  %v6756_v46 = vld [vmem:[%s13372_s28 + $0x164] sm:$0xff] }
 0x2f3   : > { %v12484_v21 = vpop.f32.mrf.mxu1 }
 0x2f4   : > { %17708 = vst [vmem:[#allocation81_spill] sm:$0xff] %v15391_v15  ;;  %v15394_v30 = vadd.f32 %v5171_v22, %v4396_v59  ;;  %v4399_v63 = vadd.f32 %v12484_v21, %v17711_v25  ;;  %v5174_v45 = vpop.f32.mrf.mxu0  ;;  %v17715_v21 = vld [vmem:[#allocation2_spill] sm:$0xff]  ;;  %v6757_v59 = vld [vmem:[%s13372_s28 + $0x16c] sm:$0xff] }
 0x2f5   : > { %v4048_v55 = vpop.f32.mrf.mxu1 }
 0x2f6   : > { %17710 = vst [vmem:[#allocation83_spill] sm:$0xff] %v15394_v30  ;;  %v15397_v44 = vadd.f32 %v12622_v37, %v4399_v63  ;;  %v4397_v19 = vadd.f32 %v4048_v55, %v17713_v6  ;;  %v12625_v15 = vpop.f32.mrf.mxu0  ;;  %12860 = vmatmul.mubr.msk.bf16.gmra.mxu0 %vm646_vm1, %v6871_v32  ;;  %v17717_v63 = vld [vmem:[#allocation3_spill] sm:$0xff]  ;;  %v6873_v6 = vpack.c.bf16 %v6755_v62, %v6754_v23  ;;  %v6758_v23 = vld [vmem:[%s13372_s28 + $0x174] sm:$0xff]  ;;  %v6759_v62 = vld [vmem:[%s13372_s28 + $0x17c] sm:$0xff] }
 0x2f7   : > { %v12487_v38 = vpop.f32.mrf.mxu1  ;;  %12722 = vmatmul.mubr.msk.bf16.gmra.mxu1 %vm646_vm1, %v6869_v10  ;;  %12863 = vmatprep.mubr.msk.bf16.mxu0 %vm646_vm1, %v6872_v0  ;;  %v6874_v30 = vpack.c.bf16 %v6757_v59, %v6756_v46 }
 0x2f8   : > { %17712 = vst [vmem:[#allocation85_spill] sm:$0xff] %v15397_v44  ;;  %v15405_v22 = vadd.f32 %v5174_v45, %v4397_v19  ;;  %v4402_v11 = vadd.f32 %v12487_v38, %v17715_v21  ;;  %v5187_v60 = vpop.f32.mrf.mxu0  ;;  %12725 = vmatprep.mubr.msk.bf16.mxu1 %vm646_vm1, %v6870_v58  ;;  %v17719_v19 = vld [vmem:[#allocation4_spill] sm:$0xff] }
 0x2f9   : > { %v4061_v37 = vpop.f32.mrf.mxu1 }
 0x2fa   : > { %17714 = vst [vmem:[#allocation87_spill] sm:$0xff] %v15405_v22  ;;  %v15411_v25 = vadd.f32 %v12625_v15, %v4402_v11  ;;  %v4400_v55 = vadd.f32 %v4061_v37, %v17717_v63  ;;  %v12626_v10 = vpop.f32.mrf.mxu0  ;;  %v17721_v15 = vld [vmem:[#allocation5_spill] sm:$0xff]  ;;  %v6760_v63 = vld [vmem:[%s13372_s28 + $0x184] sm:$0xff] }
 0x2fb   : > { %v12488_v44 = vpop.f32.mrf.mxu1 }
 0x2fc   : > { %17716 = vst [vmem:[#allocation89_spill] sm:$0xff] %v15411_v25  ;;  %v15414_v45 = vadd.f32 %v5187_v60, %v4400_v55  ;;  %v4403_v38 = vadd.f32 %v12488_v44, %v17719_v19  ;;  %v5190_v21 = vpop.f32.mrf.mxu0  ;;  %v17723_v44 = vld [vmem:[#allocation6_spill] sm:$0xff]  ;;  %v6761_v55 = vld [vmem:[%s13372_s28 + $0x18c] sm:$0xff] }
 0x2fd   : > { %v4064_v58 = vpop.f32.mrf.mxu1 }
 0x2fe   : > { %17718 = vst [vmem:[#allocation91_spill] sm:$0xff] %v15414_v45  ;;  %v15417_v22 = vadd.f32 %v12626_v10, %v4403_v38  ;;  %v4401_v11 = vadd.f32 %v4064_v58, %v17721_v15  ;;  %v12629_v25 = vpop.f32.mrf.mxu0  ;;  %12864 = vmatmul.mubr.msk.bf16.gmra.mxu0 %vm646_vm1, %v6873_v6  ;;  %v17725_v38 = vld [vmem:[#allocation7_spill] sm:$0xff]  ;;  %v6875_v15 = vpack.c.bf16 %v6759_v62, %v6758_v23  ;;  %v6762_v23 = vld [vmem:[%s13372_s28 + $0x194] sm:$0xff]  ;;  %v6763_v62 = vld [vmem:[%s13372_s28 + $0x19c] sm:$0xff] }
 0x2ff   : > { %v12491_v37 = vpop.f32.mrf.mxu1  ;;  %12726 = vmatmul.mubr.msk.bf16.gmra.mxu1 %vm646_vm1, %v6871_v32  ;;  %12867 = vmatprep.mubr.msk.bf16.mxu0 %vm646_vm1, %v6874_v30  ;;  %v6876_v45 = vpack.c.bf16 %v6761_v55, %v6760_v63 }
 0x300   : > { %17720 = vst [vmem:[#allocation93_spill] sm:$0xff] %v15417_v22  ;;  %v15425_v60 = vadd.f32 %v5190_v21, %v4401_v11  ;;  %v4406_v46 = vadd.f32 %v12491_v37, %v17723_v44  ;;  %v5203_v59 = vpop.f32.mrf.mxu0  ;;  %12729 = vmatprep.mubr.msk.bf16.mxu1 %vm646_vm1, %v6872_v0  ;;  %v17727_v11 = vld [vmem:[#allocation8_spill] sm:$0xff] }
 0x301   : > { %v4077_v10 = vpop.f32.mrf.mxu1 }
 0x302   : > { %17722 = vst [vmem:[#allocation95_spill] sm:$0xff] %v15425_v60  ;;  %v15431_v19 = vadd.f32 %v12629_v25, %v4406_v46  ;;  %v4404_v58 = vadd.f32 %v4077_v10, %v17725_v38  ;;  %v12630_v32 = vpop.f32.mrf.mxu0  ;;  %v17729_v25 = vld [vmem:[#allocation9_spill] sm:$0xff]  ;;  %v6764_v38 = vld [vmem:[%s13372_s28 + $0x1a4] sm:$0xff] }
 0x303   : > { %v12492_v22 = vpop.f32.mrf.mxu1 }
 0x304   : > { %17724 = vst [vmem:[#allocation97_spill] sm:$0xff] %v15431_v19  ;;  %v15434_v21 = vadd.f32 %v5203_v59, %v4404_v58  ;;  %v4407_v37 = vadd.f32 %v12492_v22, %v17727_v11  ;;  %v5206_v44 = vpop.f32.mrf.mxu0  ;;  %v17731_v22 = vld [vmem:[#allocation10_spill] sm:$0xff]  ;;  %v6765_v58 = vld [vmem:[%s13372_s28 + $0x1ac] sm:$0xff] }
 0x305   : > { %v4080_v0 = vpop.f32.mrf.mxu1 }
 0x306   : > { %17726 = vst [vmem:[#allocation2_spill] sm:$0xff] %v15434_v21  ;;  %v15437_v60 = vadd.f32 %v12630_v32, %v4407_v37  ;;  %v4405_v46 = vadd.f32 %v4080_v0, %v17729_v25  ;;  %v12633_v19 = vpop.f32.mrf.mxu0  ;;  %12868 = vmatmul.mubr.msk.bf16.gmra.mxu0 %vm646_vm1, %v6875_v15  ;;  %v17733_v37 = vld [vmem:[#allocation11_spill] sm:$0xff]  ;;  %v6877_v25 = vpack.c.bf16 %v6763_v62, %v6762_v23  ;;  %v6766_v23 = vld [vmem:[%s13372_s28 + $0x1b4] sm:$0xff]  ;;  %v6767_v62 = vld [vmem:[%s13372_s28 + $0x1bc] sm:$0xff] }
 0x307   : > { %v12495_v10 = vpop.f32.mrf.mxu1  ;;  %12730 = vmatmul.mubr.msk.bf16.gmra.mxu1 %vm646_vm1, %v6873_v6  ;;  %12871 = vmatprep.mubr.msk.bf16.mxu0 %vm646_vm1, %v6876_v45  ;;  %v6878_v21 = vpack.c.bf16 %v6765_v58, %v6764_v38 }
 0x308   : > { %17728 = vst [vmem:[#allocation3_spill] sm:$0xff] %v15437_v60  ;;  %v15445_v59 = vadd.f32 %v5206_v44, %v4405_v46  ;;  %v4410_v63 = vadd.f32 %v12495_v10, %v17731_v22  ;;  %v5219_v55 = vpop.f32.mrf.mxu0  ;;  %12733 = vmatprep.mubr.msk.bf16.mxu1 %vm646_vm1, %v6874_v30  ;;  %v17735_v46 = vld [vmem:[#allocation12_spill] sm:$0xff] }
 0x309   : > { %v4093_v32 = vpop.f32.mrf.mxu1 }
 0x30a   : > { %17730 = vst [vmem:[#allocation4_spill] sm:$0xff] %v15445_v59  ;;  %v15451_v11 = vadd.f32 %v12633_v19, %v4410_v63  ;;  %v4408_v0 = vadd.f32 %v4093_v32, %v17733_v37  ;;  %v12634_v6 = vpop.f32.mrf.mxu0  ;;  %v17737_v19 = vld [vmem:[#allocation13_spill] sm:$0xff]  ;;  %v6768_v37 = vld [vmem:[%s13372_s28 + $0x1c4] sm:$0xff] }
 0x30b   : > { %v12496_v60 = vpop.f32.mrf.mxu1 }
 0x30c   : > { %17732 = vst [vmem:[#allocation5_spill] sm:$0xff] %v15451_v11  ;;  %v15454_v44 = vadd.f32 %v5219_v55, %v4408_v0  ;;  %v4411_v10 = vadd.f32 %v12496_v60, %v17735_v46  ;;  %v5222_v22 = vpop.f32.mrf.mxu0  ;;  %v17739_v60 = vld [vmem:[#allocation14_spill] sm:$0xff]  ;;  %v6769_v0 = vld [vmem:[%s13372_s28 + $0x1cc] sm:$0xff] }
 0x30d   : > { %v4096_v30 = vpop.f32.mrf.mxu1 }
 0x30e   : > { %17734 = vst [vmem:[#allocation6_spill] sm:$0xff] %v15454_v44  ;;  %v15457_v59 = vadd.f32 %v12634_v6, %v4411_v10  ;;  %v4409_v63 = vadd.f32 %v4096_v30, %v17737_v19  ;;  %v12637_v11 = vpop.f32.mrf.mxu0  ;;  %12872 = vmatmul.mubr.msk.bf16.gmra.mxu0 %vm646_vm1, %v6877_v25  ;;  %v17741_v10 = vld [vmem:[#allocation15_spill] sm:$0xff]  ;;  %v6879_v19 = vpack.c.bf16 %v6767_v62, %v6766_v23  ;;  %v6770_v23 = vld [vmem:[%s13372_s28 + $0x1d4] sm:$0xff]  ;;  %v6771_v62 = vld [vmem:[%s13372_s28 + $0x1dc] sm:$0xff] }
 0x30f   : > { %v12499_v32 = vpop.f32.mrf.mxu1  ;;  %12734 = vmatmul.mubr.msk.bf16.gmra.mxu1 %vm646_vm1, %v6875_v15  ;;  %12875 = vmatprep.mubr.msk.bf16.mxu0 %vm646_vm1, %v6878_v21  ;;  %v6880_v44 = vpack.c.bf16 %v6769_v0, %v6768_v37 }
 0x310   : > { %17736 = vst [vmem:[#allocation7_spill] sm:$0xff] %v15457_v59  ;;  %v15465_v55 = vadd.f32 %v5222_v22, %v4409_v63  ;;  %v4414_v38 = vadd.f32 %v12499_v32, %v17739_v60  ;;  %v5235_v58 = vpop.f32.mrf.mxu0  ;;  %12737 = vmatprep.mubr.msk.bf16.mxu1 %vm646_vm1, %v6876_v45  ;;  %v17743_v63 = vld [vmem:[#allocation16_spill] sm:$0xff] }
 0x311   : > { %v4109_v6 = vpop.f32.mrf.mxu1 }
 0x312   : > { %17738 = vst [vmem:[#allocation8_spill] sm:$0xff] %v15465_v55  ;;  %v15471_v46 = vadd.f32 %v12637_v11, %v4414_v38  ;;  %v4412_v30 = vadd.f32 %v4109_v6, %v17741_v10  ;;  %v12638_v15 = vpop.f32.mrf.mxu0  ;;  %v17745_v11 = vld [vmem:[#allocation17_spill] sm:$0xff]  ;;  %v6772_v10 = vld [vmem:[%s13372_s28 + $0x1e4] sm:$0xff] }
 0x313   : > { %v12500_v59 = vpop.f32.mrf.mxu1 }
 0x314   : > { %17740 = vst [vmem:[#allocation9_spill] sm:$0xff] %v15471_v46  ;;  %v15474_v22 = vadd.f32 %v5235_v58, %v4412_v30  ;;  %v4415_v32 = vadd.f32 %v12500_v59, %v17743_v63  ;;  %v5238_v60 = vpop.f32.mrf.mxu0  ;;  %v17747_v59 = vld [vmem:[#allocation18_spill] sm:$0xff]  ;;  %v6773_v30 = vld [vmem:[%s13372_s28 + $0x1ec] sm:$0xff] }
 0x315   : > { %v4112_v45 = vpop.f32.mrf.mxu1 }
 0x316   : > { %17742 = vst [vmem:[#allocation10_spill] sm:$0xff] %v15474_v22  ;;  %v15477_v55 = vadd.f32 %v12638_v15, %v4415_v32  ;;  %v4413_v38 = vadd.f32 %v4112_v45, %v17745_v11  ;;  %v12641_v46 = vpop.f32.mrf.mxu0  ;;  %12876 = vmatmul.mubr.msk.bf16.gmra.mxu0 %vm646_vm1, %v6879_v19  ;;  %v17749_v32 = vld [vmem:[#allocation19_spill] sm:$0xff]  ;;  %v6881_v11 = vpack.c.bf16 %v6771_v62, %v6770_v23  ;;  %v6774_v23 = vld [vmem:[%s13372_s28 + $0x1f4] sm:$0xff]  ;;  %v6775_v62 = vld [vmem:[%s13372_s28 + $0x1fc] sm:$0xff] }
 0x317   : > { %v12503_v6 = vpop.f32.mrf.mxu1  ;;  %12738 = vmatmul.mubr.msk.bf16.gmra.mxu1 %vm646_vm1, %v6877_v25  ;;  %12879 = vmatprep.mubr.msk.bf16.mxu0 %vm646_vm1, %v6880_v44  ;;  %v6882_v22 = vpack.c.bf16 %v6773_v30, %v6772_v10 }
 0x318   : > { %17744 = vst [vmem:[#allocation11_spill] sm:$0xff] %v15477_v55  ;;  %v15485_v58 = vadd.f32 %v5238_v60, %v4413_v38  ;;  %v4418_v37 = vadd.f32 %v12503_v6, %v17747_v59  ;;  %v5251_v0 = vpop.f32.mrf.mxu0  ;;  %12741 = vmatprep.mubr.msk.bf16.mxu1 %vm646_vm1, %v6878_v21  ;;  %v17751_v38 = vld [vmem:[#allocation20_spill] sm:$0xff] }
 0x319   : > { %v4125_v15 = vpop.f32.mrf.mxu1 }
 0x31a   : > { %17746 = vst [vmem:[#allocation12_spill] sm:$0xff] %v15485_v58  ;;  %v15491_v63 = vadd.f32 %v12641_v46, %v4418_v37  ;;  %v4416_v45 = vadd.f32 %v4125_v15, %v17749_v32  ;;  %v12642_v25 = vpop.f32.mrf.mxu0  ;;  %v17753_v46 = vld [vmem:[#allocation21_spill] sm:$0xff]  ;;  %v6776_v32 = vld [vmem:[%s13372_s28 + $0x204] sm:$0xff] }
 0x31b   : > { %v12504_v55 = vpop.f32.mrf.mxu1 }
 0x31c   : > { %17748 = vst [vmem:[#allocation13_spill] sm:$0xff] %v15491_v63  ;;  %v15494_v60 = vadd.f32 %v5251_v0, %v4416_v45  ;;  %v4419_v6 = vadd.f32 %v12504_v55, %v17751_v38  ;;  %v5254_v59 = vpop.f32.mrf.mxu0  ;;  %v17755_v55 = vld [vmem:[#allocation22_spill] sm:$0xff]  ;;  %v6777_v45 = vld [vmem:[%s13372_s28 + $0x20c] sm:$0xff] }
 0x31d   : > { %v4128_v21 = vpop.f32.mrf.mxu1 }
 0x31e   : > { %17750 = vst [vmem:[#allocation14_spill] sm:$0xff] %v15494_v60  ;;  %v15497_v58 = vadd.f32 %v12642_v25, %v4419_v6  ;;  %v4417_v37 = vadd.f32 %v4128_v21, %v17753_v46  ;;  %v12645_v63 = vpop.f32.mrf.mxu0  ;;  %12880 = vmatmul.mubr.msk.bf16.gmra.mxu0 %vm646_vm1, %v6881_v11  ;;  %v17757_v6 = vld [vmem:[#allocation23_spill] sm:$0xff]  ;;  %v6883_v46 = vpack.c.bf16 %v6775_v62, %v6774_v23  ;;  %v6778_v23 = vld [vmem:[%s13372_s28 + $0x214] sm:$0xff]  ;;  %v6779_v62 = vld [vmem:[%s13372_s28 + $0x21c] sm:$0xff] }
 0x31f   : > { %v12507_v15 = vpop.f32.mrf.mxu1  ;;  %12742 = vmatmul.mubr.msk.bf16.gmra.mxu1 %vm646_vm1, %v6879_v19  ;;  %12883 = vmatprep.mubr.msk.bf16.mxu0 %vm646_vm1, %v6882_v22  ;;  %v6884_v60 = vpack.c.bf16 %v6777_v45, %v6776_v32 }
 0x320   : > { %17752 = vst [vmem:[#allocation15_spill] sm:$0xff] %v15497_v58  ;;  %v15505_v0 = vadd.f32 %v5254_v59, %v4417_v37  ;;  %v4422_v10 = vadd.f32 %v12507_v15, %v17755_v55  ;;  %v5267_v30 = vpop.f32.mrf.mxu0  ;;  %12745 = vmatprep.mubr.msk.bf16.mxu1 %vm646_vm1, %v6880_v44  ;;  %v17759_v37 = vld [vmem:[#allocation24_spill] sm:$0xff] }
 0x321   : > { %v4141_v25 = vpop.f32.mrf.mxu1 }
 0x322   : > { %17754 = vst [vmem:[#allocation16_spill] sm:$0xff] %v15505_v0  ;;  %v15511_v38 = vadd.f32 %v12645_v63, %v4422_v10  ;;  %v4420_v21 = vadd.f32 %v4141_v25, %v17757_v6  ;;  %v12646_v19 = vpop.f32.mrf.mxu0  ;;  %v17761_v63 = vld [vmem:[#allocation25_spill] sm:$0xff]  ;;  %v6780_v6 = vld [vmem:[%s13372_s28 + $0x224] sm:$0xff] }
 0x323   : > { %v12508_v58 = vpop.f32.mrf.mxu1 }
 0x324   : > { %17756 = vst [vmem:[#allocation17_spill] sm:$0xff] %v15511_v38  ;;  %v15514_v59 = vadd.f32 %v5267_v30, %v4420_v21  ;;  %v4423_v15 = vadd.f32 %v12508_v58, %v17759_v37  ;;  %v5270_v55 = vpop.f32.mrf.mxu0  ;;  %v17763_v58 = vld [vmem:[#allocation26_spill] sm:$0xff]  ;;  %v6781_v21 = vld [vmem:[%s13372_s28 + $0x22c] sm:$0xff] }
 0x325   : > { %v4144_v44 = vpop.f32.mrf.mxu1 }
 0x326   : > { %17758 = vst [vmem:[#allocation18_spill] sm:$0xff] %v15514_v59  ;;  %v15517_v0 = vadd.f32 %v12646_v19, %v4423_v15  ;;  %v4421_v10 = vadd.f32 %v4144_v44, %v17761_v63  ;;  %v12649_v38 = vpop.f32.mrf.mxu0  ;;  %12884 = vmatmul.mubr.msk.bf16.gmra.mxu0 %vm646_vm1, %v6883_v46  ;;  %v17765_v15 = vld [vmem:[#allocation27_spill] sm:$0xff]  ;;  %v6885_v63 = vpack.c.bf16 %v6779_v62, %v6778_v23  ;;  %v6782_v23 = vld [vmem:[%s13372_s28 + $0x234] sm:$0xff]  ;;  %v6783_v62 = vld [vmem:[%s13372_s28 + $0x23c] sm:$0xff] }
 0x327   : > { %v12511_v25 = vpop.f32.mrf.mxu1  ;;  %12746 = vmatmul.mubr.msk.bf16.gmra.mxu1 %vm646_vm1, %v6881_v11  ;;  %12887 = vmatprep.mubr.msk.bf16.mxu0 %vm646_vm1, %v6884_v60  ;;  %v6886_v59 = vpack.c.bf16 %v6781_v21, %v6780_v6 }
 0x328   : > { %17760 = vst [vmem:[#allocation19_spill] sm:$0xff] %v15517_v0  ;;  %v15525_v30 = vadd.f32 %v5270_v55, %v4421_v10  ;;  %v4426_v32 = vadd.f32 %v12511_v25, %v17763_v58  ;;  %v5283_v45 = vpop.f32.mrf.mxu0  ;;  %12749 = vmatprep.mubr.msk.bf16.mxu1 %vm646_vm1, %v6882_v22  ;;  %v17767_v10 = vld [vmem:[#allocation28_spill] sm:$0xff] }
 0x329   : > { %v4157_v19 = vpop.f32.mrf.mxu1 }
 0x32a   : > { %17762 = vst [vmem:[#allocation20_spill] sm:$0xff] %v15525_v30  ;;  %v15531_v37 = vadd.f32 %v12649_v38, %v4426_v32  ;;  %v4424_v44 = vadd.f32 %v4157_v19, %v17765_v15  ;;  %v12650_v11 = vpop.f32.mrf.mxu0  ;;  %v17769_v38 = vld [vmem:[#allocation29_spill] sm:$0xff]  ;;  %v6784_v15 = vld [vmem:[%s13372_s28 + $0x244] sm:$0xff] }
 0x32b   : > { %v12512_v0 = vpop.f32.mrf.mxu1 }
 0x32c   : > { %17764 = vst [vmem:[#allocation21_spill] sm:$0xff] %v15531_v37  ;;  %v15534_v55 = vadd.f32 %v5283_v45, %v4424_v44  ;;  %v4427_v25 = vadd.f32 %v12512_v0, %v17767_v10  ;;  %v5286_v58 = vpop.f32.mrf.mxu0  ;;  %v17771_v0 = vld [vmem:[#allocation30_spill] sm:$0xff]  ;;  %v6785_v44 = vld [vmem:[%s13372_s28 + $0x24c] sm:$0xff] }
 0x32d   : > { %v4160_v22 = vpop.f32.mrf.mxu1 }
 0x32e   : > { %17766 = vst [vmem:[#allocation22_spill] sm:$0xff] %v15534_v55  ;;  %v15537_v30 = vadd.f32 %v12650_v11, %v4427_v25  ;;  %v4425_v32 = vadd.f32 %v4160_v22, %v17769_v38  ;;  %v12653_v37 = vpop.f32.mrf.mxu0  ;;  %12888 = vmatmul.mubr.msk.bf16.gmra.mxu0 %vm646_vm1, %v6885_v63  ;;  %v17773_v25 = vld [vmem:[#allocation31_spill] sm:$0xff]  ;;  %v6887_v38 = vpack.c.bf16 %v6783_v62, %v6782_v23  ;;  %v6786_v23 = vld [vmem:[%s13372_s28 + $0x254] sm:$0xff]  ;;  %v6787_v62 = vld [vmem:[%s13372_s28 + $0x25c] sm:$0xff] }
 0x32f   : > { %v12515_v19 = vpop.f32.mrf.mxu1  ;;  %12750 = vmatmul.mubr.msk.bf16.gmra.mxu1 %vm646_vm1, %v6883_v46  ;;  %12891 = vmatprep.mubr.msk.bf16.mxu0 %vm646_vm1, %v6886_v59  ;;  %v6888_v55 = vpack.c.bf16 %v6785_v44, %v6784_v15 }
 0x330   : > { %17768 = vst [vmem:[#allocation23_spill] sm:$0xff] %v15537_v30  ;;  %v15545_v45 = vadd.f32 %v5286_v58, %v4425_v32  ;;  %v4430_v6 = vadd.f32 %v12515_v19, %v17771_v0  ;;  %v5299_v21 = vpop.f32.mrf.mxu0  ;;  %12753 = vmatprep.mubr.msk.bf16.mxu1 %vm646_vm1, %v6884_v60  ;;  %v17775_v32 = vld [vmem:[#allocation32_spill] sm:$0xff] }
 0x331   : > { %v4173_v11 = vpop.f32.mrf.mxu1 }
 0x332   : > { %17770 = vst [vmem:[#allocation24_spill] sm:$0xff] %v15545_v45  ;;  %v15551_v10 = vadd.f32 %v12653_v37, %v4430_v6  ;;  %v4428_v22 = vadd.f32 %v4173_v11, %v17773_v25  ;;  %v12654_v46 = vpop.f32.mrf.mxu0  ;;  %v17777_v37 = vld [vmem:[#allocation33_spill] sm:$0xff]  ;;  %v6788_v25 = vld [vmem:[%s13372_s28 + $0x264] sm:$0xff] }
 0x333   : > { %v12516_v30 = vpop.f32.mrf.mxu1 }
 0x334   : > { %17772 = vst [vmem:[#allocation25_spill] sm:$0xff] %v15551_v10  ;;  %v15554_v58 = vadd.f32 %v5299_v21, %v4428_v22  ;;  %v4431_v19 = vadd.f32 %v12516_v30, %v17775_v32  ;;  %v5302_v0 = vpop.f32.mrf.mxu0  ;;  %v17779_v30 = vld [vmem:[#allocation34_spill] sm:$0xff]  ;;  %v6789_v22 = vld [vmem:[%s13372_s28 + $0x26c] sm:$0xff] }
 0x335   : > { %v4176_v60 = vpop.f32.mrf.mxu1 }
 0x336   : > { %17774 = vst [vmem:[#allocation26_spill] sm:$0xff] %v15554_v58  ;;  %v15557_v45 = vadd.f32 %v12654_v46, %v4431_v19  ;;  %v4429_v6 = vadd.f32 %v4176_v60, %v17777_v37  ;;  %v12657_v10 = vpop.f32.mrf.mxu0  ;;  %12892 = vmatmul.mubr.msk.bf16.gmra.mxu0 %vm646_vm1, %v6887_v38  ;;  %v17781_v19 = vld [vmem:[#allocation35_spill] sm:$0xff]  ;;  %v6889_v37 = vpack.c.bf16 %v6787_v62, %v6786_v23  ;;  %v6790_v23 = vld [vmem:[%s13372_s28 + $0x274] sm:$0xff]  ;;  %v6791_v62 = vld [vmem:[%s13372_s28 + $0x27c] sm:$0xff] }
 0x337   : > { %v12519_v11 = vpop.f32.mrf.mxu1  ;;  %12754 = vmatmul.mubr.msk.bf16.gmra.mxu1 %vm646_vm1, %v6885_v63  ;;  %12895 = vmatprep.mubr.msk.bf16.mxu0 %vm646_vm1, %v6888_v55  ;;  %v6890_v58 = vpack.c.bf16 %v6789_v22, %v6788_v25 }
 0x338   : > { %17776 = vst [vmem:[#allocation27_spill] sm:$0xff] %v15557_v45  ;;  %v15565_v21 = vadd.f32 %v5302_v0, %v4429_v6  ;;  %v4434_v15 = vadd.f32 %v12519_v11, %v17779_v30  ;;  %v5315_v44 = vpop.f32.mrf.mxu0  ;;  %12757 = vmatprep.mubr.msk.bf16.mxu1 %vm646_vm1, %v6886_v59  ;;  %v17783_v6 = vld [vmem:[#allocation36_spill] sm:$0xff] }
 0x339   : > { %v4189_v46 = vpop.f32.mrf.mxu1 }
 0x33a   : > { %17778 = vst [vmem:[#allocation28_spill] sm:$0xff] %v15565_v21  ;;  %v15571_v32 = vadd.f32 %v12657_v10, %v4434_v15  ;;  %v4432_v60 = vadd.f32 %v4189_v46, %v17781_v19  ;;  %v12658_v63 = vpop.f32.mrf.mxu0  ;;  %v17785_v10 = vld [vmem:[#allocation37_spill] sm:$0xff]  ;;  %v6792_v19 = vld [vmem:[%s13372_s28 + $0x284] sm:$0xff] }
 0x33b   : > { %v12520_v45 = vpop.f32.mrf.mxu1 }
 0x33c   : > { %17780 = vst [vmem:[#allocation29_spill] sm:$0xff] %v15571_v32  ;;  %v15574_v0 = vadd.f32 %v5315_v44, %v4432_v60  ;;  %v4435_v11 = vadd.f32 %v12520_v45, %v17783_v6  ;;  %v5318_v30 = vpop.f32.mrf.mxu0  ;;  %v17787_v45 = vld [vmem:[#allocation38_spill] sm:$0xff]  ;;  %v6793_v60 = vld [vmem:[%s13372_s28 + $0x28c] sm:$0xff] }
 0x33d   : > { %v4192_v59 = vpop.f32.mrf.mxu1 }
 0x33e   : > { %17782 = vst [vmem:[#allocation30_spill] sm:$0xff] %v15574_v0  ;;  %v15577_v21 = vadd.f32 %v12658_v63, %v4435_v11  ;;  %v4433_v15 = vadd.f32 %v4192_v59, %v17785_v10  ;;  %v12661_v32 = vpop.f32.mrf.mxu0  ;;  %12896 = vmatmul.mubr.msk.bf16.gmra.mxu0 %vm646_vm1, %v6889_v37  ;;  %v17789_v11 = vld [vmem:[#allocation39_spill] sm:$0xff]  ;;  %v6891_v10 = vpack.c.bf16 %v6791_v62, %v6790_v23  ;;  %v6794_v23 = vld [vmem:[%s13372_s28 + $0x294] sm:$0xff]  ;;  %v6795_v62 = vld [vmem:[%s13372_s28 + $0x29c] sm:$0xff] }
 0x33f   : > { %v12523_v46 = vpop.f32.mrf.mxu1  ;;  %12758 = vmatmul.mubr.msk.bf16.gmra.mxu1 %vm646_vm1, %v6887_v38  ;;  %12899 = vmatprep.mubr.msk.bf16.mxu0 %vm646_vm1, %v6890_v58  ;;  %v6892_v0 = vpack.c.bf16 %v6793_v60, %v6792_v19 }
 0x340   : > { %17784 = vst [vmem:[#allocation31_spill] sm:$0xff] %v15577_v21  ;;  %v15585_v44 = vadd.f32 %v5318_v30, %v4433_v15  ;;  %v4438_v25 = vadd.f32 %v12523_v46, %v17787_v45  ;;  %v5331_v22 = vpop.f32.mrf.mxu0  ;;  %12761 = vmatprep.mubr.msk.bf16.mxu1 %vm646_vm1, %v6888_v55  ;;  %v17791_v15 = vld [vmem:[#allocation40_spill] sm:$0xff] }
 0x341   : > { %v4205_v63 = vpop.f32.mrf.mxu1 }
 0x342   : > { %17786 = vst [vmem:[#allocation32_spill] sm:$0xff] %v15585_v44  ;;  %v15591_v6 = vadd.f32 %v12661_v32, %v4438_v25  ;;  %v4436_v59 = vadd.f32 %v4205_v63, %v17789_v11  ;;  %v12662_v38 = vpop.f32.mrf.mxu0  ;;  %v17793_v32 = vld [vmem:[#allocation42_spill] sm:$0xff] }
 0x343   : > { %v12524_v21 = vpop.f32.mrf.mxu1  ;;  %v6796_v11 = vld [vmem:[%s13372_s28 + $0x2a4] sm:$0xff] }
 0x344   : > { %17788 = vst [vmem:[#allocation33_spill] sm:$0xff] %v15591_v6  ;;  %v15594_v30 = vadd.f32 %v5331_v22, %v4436_v59  ;;  %v4439_v46 = vadd.f32 %v12524_v21, %v17791_v15  ;;  %v5334_v45 = vpop.f32.mrf.mxu0  ;;  %v17795_v21 = vld [vmem:[#allocation44_spill] sm:$0xff] }
 0x345   : > { %v4208_v55 = vpop.f32.mrf.mxu1  ;;  %v6797_v59 = vld [vmem:[%s13372_s28 + $0x2ac] sm:$0xff] }
 0x346   : > { %17790 = vst [vmem:[#allocation34_spill] sm:$0xff] %v15594_v30  ;;  %v15597_v44 = vadd.f32 %v12662_v38, %v4439_v46  ;;  %v4437_v25 = vadd.f32 %v4208_v55, %v17793_v32  ;;  %v12665_v6 = vpop.f32.mrf.mxu0  ;;  %12900 = vmatmul.mubr.msk.bf16.gmra.mxu0 %vm646_vm1, %v6891_v10  ;;  %v17797_v46 = vld [vmem:[#allocation46_spill] sm:$0xff]  ;;  %v6893_v32 = vpack.c.bf16 %v6795_v62, %v6794_v23  ;;  %v6798_v23 = vld [vmem:[%s13372_s28 + $0x2b4] sm:$0xff] }
 0x347   : > { %v12527_v63 = vpop.f32.mrf.mxu1  ;;  %12762 = vmatmul.mubr.msk.bf16.gmra.mxu1 %vm646_vm1, %v6889_v37  ;;  %12903 = vmatprep.mubr.msk.bf16.mxu0 %vm646_vm1, %v6892_v0  ;;  %v6894_v30 = vpack.c.bf16 %v6797_v59, %v6796_v11  ;;  %v6799_v62 = vld [vmem:[%s13372_s28 + $0x2bc] sm:$0xff] }
 0x348   : > { %17792 = vst [vmem:[#allocation35_spill] sm:$0xff] %v15597_v44  ;;  %v15605_v22 = vadd.f32 %v5334_v45, %v4437_v25  ;;  %v4442_v19 = vadd.f32 %v12527_v63, %v17795_v21  ;;  %v5347_v60 = vpop.f32.mrf.mxu0  ;;  %12765 = vmatprep.mubr.msk.bf16.mxu1 %vm646_vm1, %v6890_v58  ;;  %v17799_v25 = vld [vmem:[#allocation48_spill] sm:$0xff] }
 0x349   : > { %v4221_v38 = vpop.f32.mrf.mxu1 }
 0x34a   : > { %17794 = vst [vmem:[#allocation36_spill] sm:$0xff] %v15605_v22  ;;  %v15611_v15 = vadd.f32 %v12665_v6, %v4442_v19  ;;  %v4440_v55 = vadd.f32 %v4221_v38, %v17797_v46  ;;  %v12666_v37 = vpop.f32.mrf.mxu0  ;;  %v17801_v6 = vld [vmem:[#allocation50_spill] sm:$0xff] }
 0x34b   : > { %v12528_v44 = vpop.f32.mrf.mxu1  ;;  %v6800_v46 = vld [vmem:[%s13372_s28 + $0x2c4] sm:$0xff] }
 0x34c   : > { %17796 = vst [vmem:[#allocation37_spill] sm:$0xff] %v15611_v15  ;;  %v15614_v45 = vadd.f32 %v5347_v60, %v4440_v55  ;;  %v4443_v63 = vadd.f32 %v12528_v44, %v17799_v25  ;;  %v5350_v21 = vpop.f32.mrf.mxu0  ;;  %v17803_v44 = vld [vmem:[#allocation100_spill] sm:$0xff] }
 0x34d   : > { %v4224_v58 = vpop.f32.mrf.mxu1  ;;  %v6801_v55 = vld [vmem:[%s13372_s28 + $0x2cc] sm:$0xff] }
 0x34e   : > { %17798 = vst [vmem:[#allocation38_spill] sm:$0xff] %v15614_v45  ;;  %v15617_v22 = vadd.f32 %v12666_v37, %v4443_v63  ;;  %v4441_v19 = vadd.f32 %v4224_v58, %v17801_v6  ;;  %v12669_v15 = vpop.f32.mrf.mxu0  ;;  %12904 = vmatmul.mubr.msk.bf16.gmra.mxu0 %vm646_vm1, %v6893_v32  ;;  %v17805_v63 = vld [vmem:[#allocation101_spill] sm:$0xff]  ;;  %v6895_v6 = vpack.c.bf16 %v6799_v62, %v6798_v23 }
 0x34f   : > { %v12531_v38 = vpop.f32.mrf.mxu1  ;;  %12766 = vmatmul.mubr.msk.bf16.gmra.mxu1 %vm646_vm1, %v6891_v10  ;;  %12907 = vmatprep.mubr.msk.bf16.mxu0 %vm646_vm1, %v6894_v30  ;;  %v6896_v45 = vpack.c.bf16 %v6801_v55, %v6800_v46  ;;  %v6802_v23 = vld [vmem:[%s13372_s28 + $0x2d4] sm:$0xff]  ;;  %v6803_v62 = vld [vmem:[%s13372_s28 + $0x2dc] sm:$0xff] }
 0x350   : > { %17800 = vst [vmem:[#allocation39_spill] sm:$0xff] %v15617_v22  ;;  %v15625_v60 = vadd.f32 %v5350_v21, %v4441_v19  ;;  %v4446_v11 = vadd.f32 %v12531_v38, %v17803_v44  ;;  %v5363_v59 = vpop.f32.mrf.mxu0  ;;  %12769 = vmatprep.mubr.msk.bf16.mxu1 %vm646_vm1, %v6892_v0  ;;  %v17807_v19 = vld [vmem:[#allocation56_spill] sm:$0xff] }
 0x351   : > { %v4237_v37 = vpop.f32.mrf.mxu1 }
 0x352   : > { %17802 = vst [vmem:[#allocation40_spill] sm:$0xff] %v15625_v60  ;;  %v15631_v25 = vadd.f32 %v12669_v15, %v4446_v11  ;;  %v4444_v58 = vadd.f32 %v4237_v37, %v17805_v63  ;;  %v12670_v10 = vpop.f32.mrf.mxu0  ;;  %v17809_v15 = vld [vmem:[#allocation58_spill] sm:$0xff] }
 0x353   : > { %v12532_v22 = vpop.f32.mrf.mxu1  ;;  %v6804_v63 = vld [vmem:[%s13372_s28 + $0x2e4] sm:$0xff] }
 0x354   : > { %17804 = vst [vmem:[#allocation42_spill] sm:$0xff] %v15631_v25  ;;  %v15634_v21 = vadd.f32 %v5363_v59, %v4444_v58  ;;  %v4447_v38 = vadd.f32 %v12532_v22, %v17807_v19  ;;  %v5366_v44 = vpop.f32.mrf.mxu0  ;;  %v17811_v22 = vld [vmem:[#allocation60_spill] sm:$0xff] }
 0x355   : > { %v4240_v0 = vpop.f32.mrf.mxu1  ;;  %v6805_v58 = vld [vmem:[%s13372_s28 + $0x2ec] sm:$0xff] }
 0x356   : > { %17806 = vst [vmem:[#allocation44_spill] sm:$0xff] %v15634_v21  ;;  %v15637_v60 = vadd.f32 %v12670_v10, %v4447_v38  ;;  %v4445_v11 = vadd.f32 %v4240_v0, %v17809_v15  ;;  %v12673_v25 = vpop.f32.mrf.mxu0  ;;  %12908 = vmatmul.mubr.msk.bf16.gmra.mxu0 %vm646_vm1, %v6895_v6  ;;  %v17813_v38 = vld [vmem:[#allocation62_spill] sm:$0xff]  ;;  %v6897_v15 = vpack.c.bf16 %v6803_v62, %v6802_v23  ;;  %v6806_v23 = vld [vmem:[%s13372_s28 + $0x2f4] sm:$0xff] }
 0x357   : > { %v12535_v37 = vpop.f32.mrf.mxu1  ;;  %12770 = vmatmul.mubr.msk.bf16.gmra.mxu1 %vm646_vm1, %v6893_v32  ;;  %12911 = vmatprep.mubr.msk.bf16.mxu0 %vm646_vm1, %v6896_v45  ;;  %v6898_v21 = vpack.c.bf16 %v6805_v58, %v6804_v63  ;;  %v6807_v62 = vld [vmem:[%s13372_s28 + $0x2fc] sm:$0xff] }
 0x358   : > { %17808 = vst [vmem:[#allocation46_spill] sm:$0xff] %v15637_v60  ;;  %v15645_v59 = vadd.f32 %v5366_v44, %v4445_v11  ;;  %v4450_v46 = vadd.f32 %v12535_v37, %v17811_v22  ;;  %v5379_v55 = vpop.f32.mrf.mxu0  ;;  %12773 = vmatprep.mubr.msk.bf16.mxu1 %vm646_vm1, %v6894_v30  ;;  %v17815_v11 = vld [vmem:[#allocation64_spill] sm:$0xff] }
 0x359   : > { %v4253_v10 = vpop.f32.mrf.mxu1 }
 0x35a   : > { %17810 = vst [vmem:[#allocation48_spill] sm:$0xff] %v15645_v59  ;;  %v15651_v19 = vadd.f32 %v12673_v25, %v4450_v46  ;;  %v4448_v0 = vadd.f32 %v4253_v10, %v17813_v38  ;;  %v12674_v32 = vpop.f32.mrf.mxu0  ;;  %v17817_v25 = vld [vmem:[#allocation66_spill] sm:$0xff] }
 0x35b   : > { %v12536_v60 = vpop.f32.mrf.mxu1  ;;  %v6808_v38 = vld [vmem:[%s13372_s28 + $0x304] sm:$0xff] }
 0x35c   : > { %17812 = vst [vmem:[#allocation50_spill] sm:$0xff] %v15651_v19  ;;  %v15654_v44 = vadd.f32 %v5379_v55, %v4448_v0  ;;  %v4451_v37 = vadd.f32 %v12536_v60, %v17815_v11  ;;  %v5382_v22 = vpop.f32.mrf.mxu0  ;;  %v17819_v60 = vld [vmem:[#allocation68_spill] sm:$0xff] }
 0x35d   : > { %v4256_v30 = vpop.f32.mrf.mxu1  ;;  %v6809_v0 = vld [vmem:[%s13372_s28 + $0x30c] sm:$0xff] }
 0x35e   : > { %17814 = vst [vmem:[#allocation100_spill] sm:$0xff] %v15654_v44  ;;  %v15657_v59 = vadd.f32 %v12674_v32, %v4451_v37  ;;  %v4449_v46 = vadd.f32 %v4256_v30, %v17817_v25  ;;  %v12677_v19 = vpop.f32.mrf.mxu0  ;;  %12912 = vmatmul.mubr.msk.bf16.gmra.mxu0 %vm646_vm1, %v6897_v15  ;;  %v17821_v37 = vld [vmem:[#allocation70_spill] sm:$0xff]  ;;  %v6899_v25 = vpack.c.bf16 %v6807_v62, %v6806_v23  ;;  %v6810_v23 = vld [vmem:[%s13372_s28 + $0x314] sm:$0xff] }
 0x35f   : > { %v12539_v10 = vpop.f32.mrf.mxu1  ;;  %12774 = vmatmul.mubr.msk.bf16.gmra.mxu1 %vm646_vm1, %v6895_v6  ;;  %12915 = vmatprep.mubr.msk.bf16.mxu0 %vm646_vm1, %v6898_v21  ;;  %v6900_v44 = vpack.c.bf16 %v6809_v0, %v6808_v38  ;;  %v6811_v62 = vld [vmem:[%s13372_s28 + $0x31c] sm:$0xff] }
 0x360   : > { %17816 = vst [vmem:[#allocation101_spill] sm:$0xff] %v15657_v59  ;;  %v15665_v55 = vadd.f32 %v5382_v22, %v4449_v46  ;;  %v4454_v63 = vadd.f32 %v12539_v10, %v17819_v60  ;;  %v5395_v58 = vpop.f32.mrf.mxu0  ;;  %12777 = vmatprep.mubr.msk.bf16.mxu1 %vm646_vm1, %v6896_v45  ;;  %v17823_v46 = vld [vmem:[#allocation72_spill] sm:$0xff] }
 0x361   : > { %v4269_v32 = vpop.f32.mrf.mxu1 }
 0x362   : > { %17818 = vst [vmem:[#allocation56_spill] sm:$0xff] %v15665_v55  ;;  %v15671_v11 = vadd.f32 %v12677_v19, %v4454_v63  ;;  %v4452_v30 = vadd.f32 %v4269_v32, %v17821_v37  ;;  %v12678_v6 = vpop.f32.mrf.mxu0  ;;  %v17825_v19 = vld [vmem:[#allocation74_spill] sm:$0xff] }
 0x363   : > { %v12540_v59 = vpop.f32.mrf.mxu1  ;;  %v6812_v37 = vld [vmem:[%s13372_s28 + $0x324] sm:$0xff] }
 0x364   : > { %17820 = vst [vmem:[#allocation58_spill] sm:$0xff] %v15671_v11  ;;  %v15674_v22 = vadd.f32 %v5395_v58, %v4452_v30  ;;  %v4455_v10 = vadd.f32 %v12540_v59, %v17823_v46  ;;  %v5398_v60 = vpop.f32.mrf.mxu0  ;;  %v17827_v59 = vld [vmem:[#allocation76_spill] sm:$0xff] }
 0x365   : > { %v4272_v45 = vpop.f32.mrf.mxu1  ;;  %v6813_v30 = vld [vmem:[%s13372_s28 + $0x32c] sm:$0xff] }
 0x366   : > { %17822 = vst [vmem:[#allocation60_spill] sm:$0xff] %v15674_v22  ;;  %v15677_v55 = vadd.f32 %v12678_v6, %v4455_v10  ;;  %v4453_v63 = vadd.f32 %v4272_v45, %v17825_v19  ;;  %v12681_v11 = vpop.f32.mrf.mxu0  ;;  %12916 = vmatmul.mubr.msk.bf16.gmra.mxu0 %vm646_vm1, %v6899_v25  ;;  %v17829_v10 = vld [vmem:[#allocation78_spill] sm:$0xff]  ;;  %v6901_v19 = vpack.c.bf16 %v6811_v62, %v6810_v23  ;;  %v6814_v23 = vld [vmem:[%s13372_s28 + $0x334] sm:$0xff] }
 0x367   : > { %v12543_v32 = vpop.f32.mrf.mxu1  ;;  %12778 = vmatmul.mubr.msk.bf16.gmra.mxu1 %vm646_vm1, %v6897_v15  ;;  %12919 = vmatprep.mubr.msk.bf16.mxu0 %vm646_vm1, %v6900_v44  ;;  %v6902_v22 = vpack.c.bf16 %v6813_v30, %v6812_v37  ;;  %v6815_v62 = vld [vmem:[%s13372_s28 + $0x33c] sm:$0xff] }
 0x368   : > { %17824 = vst [vmem:[#allocation62_spill] sm:$0xff] %v15677_v55  ;;  %v15685_v58 = vadd.f32 %v5398_v60, %v4453_v63  ;;  %v4458_v38 = vadd.f32 %v12543_v32, %v17827_v59  ;;  %v5411_v0 = vpop.f32.mrf.mxu0  ;;  %12781 = vmatprep.mubr.msk.bf16.mxu1 %vm646_vm1, %v6898_v21  ;;  %v17831_v63 = vld [vmem:[#allocation80_spill] sm:$0xff] }
 0x369   : > { %v4285_v6 = vpop.f32.mrf.mxu1 }
 0x36a   : > { %17826 = vst [vmem:[#allocation64_spill] sm:$0xff] %v15685_v58  ;;  %v15691_v46 = vadd.f32 %v12681_v11, %v4458_v38  ;;  %v4456_v45 = vadd.f32 %v4285_v6, %v17829_v10  ;;  %v12682_v15 = vpop.f32.mrf.mxu0  ;;  %v17833_v11 = vld [vmem:[#allocation82_spill] sm:$0xff] }
 0x36b   : > { %v12544_v55 = vpop.f32.mrf.mxu1  ;;  %v6816_v10 = vld [vmem:[%s13372_s28 + $0x344] sm:$0xff] }
 0x36c   : > { %17828 = vst [vmem:[#allocation66_spill] sm:$0xff] %v15691_v46  ;;  %v15694_v60 = vadd.f32 %v5411_v0, %v4456_v45  ;;  %v4459_v32 = vadd.f32 %v12544_v55, %v17831_v63  ;;  %v5414_v59 = vpop.f32.mrf.mxu0  ;;  %v17835_v55 = vld [vmem:[#allocation84_spill] sm:$0xff] }
 0x36d   : > { %v4288_v21 = vpop.f32.mrf.mxu1  ;;  %v6817_v45 = vld [vmem:[%s13372_s28 + $0x34c] sm:$0xff] }
 0x36e   : > { %17830 = vst [vmem:[#allocation68_spill] sm:$0xff] %v15694_v60  ;;  %v15697_v58 = vadd.f32 %v12682_v15, %v4459_v32  ;;  %v4457_v38 = vadd.f32 %v4288_v21, %v17833_v11  ;;  %v12685_v46 = vpop.f32.mrf.mxu0  ;;  %12920 = vmatmul.mubr.msk.bf16.gmra.mxu0 %vm646_vm1, %v6901_v19  ;;  %v17837_v32 = vld [vmem:[#allocation86_spill] sm:$0xff]  ;;  %v6903_v11 = vpack.c.bf16 %v6815_v62, %v6814_v23  ;;  %v6818_v23 = vld [vmem:[%s13372_s28 + $0x354] sm:$0xff] }
 0x36f   : > { %v12547_v6 = vpop.f32.mrf.mxu1  ;;  %12782 = vmatmul.mubr.msk.bf16.gmra.mxu1 %vm646_vm1, %v6899_v25  ;;  %12923 = vmatprep.mubr.msk.bf16.mxu0 %vm646_vm1, %v6902_v22  ;;  %v6904_v60 = vpack.c.bf16 %v6817_v45, %v6816_v10  ;;  %v6819_v62 = vld [vmem:[%s13372_s28 + $0x35c] sm:$0xff]  ;;  %v6820_v45 = vld [vmem:[%s13372_s28 + $0x364] sm:$0xff] }
 0x370   : > { %17832 = vst [vmem:[#allocation70_spill] sm:$0xff] %v15697_v58  ;;  %v15705_v0 = vadd.f32 %v5414_v59, %v4457_v38  ;;  %v4462_v37 = vadd.f32 %v12547_v6, %v17835_v55  ;;  %v5427_v30 = vpop.f32.mrf.mxu0  ;;  %12785 = vmatprep.mubr.msk.bf16.mxu1 %vm646_vm1, %v6900_v44  ;;  %v17838_v38 = vld [vmem:[#allocation88_spill] sm:$0xff] }
 0x371   : > { %v4301_v15 = vpop.f32.mrf.mxu1 }
 0x372   : > { %17834 = vst [vmem:[#allocation72_spill] sm:$0xff] %v15705_v0  ;;  %v15711_v63 = vadd.f32 %v12685_v46, %v4462_v37  ;;  %v4460_v21 = vadd.f32 %v4301_v15, %v17837_v32  ;;  %v12686_v25 = vpop.f32.mrf.mxu0  ;;  %v17839_v46 = vld [vmem:[#allocation90_spill] sm:$0xff]  ;;  %v6821_v32 = vld [vmem:[%s13372_s28 + $0x36c] sm:$0xff] }
 0x373   : > { %v12548_v58 = vpop.f32.mrf.mxu1 }
 0x374   : > { %17836 = vst [vmem:[#allocation74_spill] sm:$0xff] %v15711_v63  ;;  %v15714_v59 = vadd.f32 %v5427_v30, %v4460_v21  ;;  %v4463_v6 = vadd.f32 %v12548_v58, %v17838_v38  ;;  %v5430_v55 = vpop.f32.mrf.mxu0 }
 0x375   : > { %v4304_v44 = vpop.f32.mrf.mxu1 }
 0x376   : > { %v15717_v0 = vadd.f32 %v12686_v25, %v4463_v6  ;;  %v4461_v37 = vadd.f32 %v4304_v44, %v17839_v46  ;;  %v12689_v63 = vpop.f32.mrf.mxu0  ;;  %12924 = vmatmul.mubr.msk.bf16.gmra.mxu0 %vm646_vm1, %v6903_v11  ;;  %v6905_v6 = vpack.c.bf16 %v6819_v62, %v6818_v23  ;;  %v6906_v46 = vpack.c.bf16 %v6821_v32, %v6820_v45  ;;  %v6822_v23 = vld [vmem:[%s13372_s28 + $0x374] sm:$0xff]  ;;  %v6823_v62 = vld [vmem:[%s13372_s28 + $0x37c] sm:$0xff]  ;;  %v6824_v32 = vld [vmem:[%s13372_s28 + $0x384] sm:$0xff] }
 0x377   : > { %v12551_v15 = vpop.f32.mrf.mxu1  ;;  %12786 = vmatmul.mubr.msk.bf16.gmra.mxu1 %vm646_vm1, %v6901_v19  ;;  %12927 = vmatprep.mubr.msk.bf16.mxu0 %vm646_vm1, %v6904_v60 }
 0x378   : > { %v15725_v30 = vadd.f32 %v5430_v55, %v4461_v37  ;;  %v4466_v58 = vadd.f32 %v12551_v15, %v15009_v1  ;;  %v5443_v10 = vpop.f32.mrf.mxu0  ;;  %12789 = vmatprep.mubr.msk.bf16.mxu1 %vm646_vm1, %v6902_v22 }
 0x379   : > { %v4317_v21 = vpop.f32.mrf.mxu1 }
 0x37a   : > { %v15731_v25 = vadd.f32 %v12689_v63, %v4466_v58  ;;  %v4464_v38 = vadd.f32 %v4317_v21, %v15012_v33  ;;  %v12690_v19 = vpop.f32.mrf.mxu0  ;;  %v17841_v63 = vld [vmem:[#allocation92_spill] sm:$0xff] }
 0x37b   : > { %v12552_v44 = vpop.f32.mrf.mxu1  ;;  %v6825_v21 = vld [vmem:[%s13372_s28 + $0x38c] sm:$0xff] }
 0x37c   : > { %17840 = vst [vmem:[#allocation76_spill] sm:$0xff] %v15731_v25  ;;  %v15734_v55 = vadd.f32 %v5443_v10, %v4464_v38  ;;  %v4467_v1 = vadd.f32 %v12552_v44, %v15015_v4  ;;  %v5446_v37 = vpop.f32.mrf.mxu0 }
 0x37d   : > { %v4320_v22 = vpop.f32.mrf.mxu1 }
 0x37e   : > { %v15737_v15 = vadd.f32 %v12690_v19, %v4467_v1  ;;  %v4465_v58 = vadd.f32 %v4320_v22, %v17841_v63  ;;  %v12833_v25 = vpop.f32.mrf.mxu0  ;;  %12928 = vmatmul.mubr.msk.bf16.gmra.mxu0 %vm646_vm1, %v6905_v6  ;;  %v6907_v1 = vpack.c.bf16 %v6823_v62, %v6822_v23  ;;  %v6908_v63 = vpack.c.bf16 %v6825_v21, %v6824_v32  ;;  %v6826_v23 = vld [vmem:[%s13372_s28 + $0x394] sm:$0xff]  ;;  %v6827_v62 = vld [vmem:[%s13372_s28 + $0x39c] sm:$0xff]  ;;  %v6828_v21 = vld [vmem:[%s13372_s28 + $0x3a4] sm:$0xff] }
 0x37f   : > { %v12695_v33 = vpop.f32.mrf.mxu1  ;;  %12790 = vmatmul.mubr.msk.bf16.gmra.mxu1 %vm646_vm1, %v6903_v11  ;;  %12931 = vmatprep.mubr.msk.bf16.mxu0 %vm646_vm1, %v6906_v46 }
 0x380   : > { %v15745_v10 = vadd.f32 %v5446_v37, %v4465_v58  ;;  %v6586_v4 = vadd.f32 %v12695_v33, %v15033_v48  ;;  %v7167_v45 = vpop.f32.mrf.mxu0  ;;  %12793 = vmatprep.mubr.msk.bf16.mxu1 %vm646_vm1, %v6904_v60 }
 0x381   : > { %v6041_v38 = vpop.f32.mrf.mxu1 }
 0x382   : > { %v15751_v19 = vadd.f32 %v12833_v25, %v6586_v4  ;;  %v6584_v44 = vadd.f32 %v6041_v38, %v15036_v26  ;;  %v12834_v11 = vpop.f32.mrf.mxu0  ;;  %v6829_v38 = vld [vmem:[%s13372_s28 + $0x3ac] sm:$0xff] }
 0x383   : > { %v12696_v22 = vpop.f32.mrf.mxu1 }
 0x384   : > { %v15754_v37 = vadd.f32 %v7167_v45, %v6584_v44  ;;  %v6587_v48 = vadd.f32 %v12696_v22, %v15039_v5  ;;  %v7170_v58 = vpop.f32.mrf.mxu0  ;;  %v6909_v22 = vpack.c.bf16 %v6827_v62, %v6826_v23  ;;  %v6830_v23 = vld [vmem:[%s13372_s28 + $0x3b4] sm:$0xff]  ;;  %v6831_v62 = vld [vmem:[%s13372_s28 + $0x3bc] sm:$0xff] }
 0x385   : > { %v6044_v60 = vpop.f32.mrf.mxu1 }
 0x386   : > { %v15757_v33 = vadd.f32 %v12834_v11, %v6587_v48  ;;  %v6585_v25 = vadd.f32 %v6044_v60, %v15048_v2  ;;  %v12837_v4 = vpop.f32.mrf.mxu0  ;;  %12932 = vmatmul.mubr.msk.bf16.gmra.mxu0 %vm646_vm1, %v6907_v1  ;;  %v6910_v60 = vpack.c.bf16 %v6829_v38, %v6828_v21  ;;  %v6832_v38 = vld [vmem:[%s13372_s28 + $0x3c4] sm:$0xff] }
 0x387   : > { %v12699_v26 = vpop.f32.mrf.mxu1  ;;  %12794 = vmatmul.mubr.msk.bf16.gmra.mxu1 %vm646_vm1, %v6905_v6  ;;  %12935 = vmatprep.mubr.msk.bf16.mxu0 %vm646_vm1, %v6908_v63 }
 0x388   : > { %v15765_v45 = vadd.f32 %v7170_v58, %v6585_v25  ;;  %v6590_v5 = vadd.f32 %v12699_v26, %v15057_v8  ;;  %v7183_v32 = vpop.f32.mrf.mxu0  ;;  %12797 = vmatprep.mubr.msk.bf16.mxu1 %vm646_vm1, %v6906_v46 }
 0x389   : > { %v6057_v2 = vpop.f32.mrf.mxu1 }
 0x38a   : > { %v15771_v44 = vadd.f32 %v12837_v4, %v6590_v5  ;;  %v6588_v11 = vadd.f32 %v6057_v2, %v15060_v61  ;;  %v12838_v6 = vpop.f32.mrf.mxu0  ;;  %v6833_v2 = vld [vmem:[%s13372_s28 + $0x3cc] sm:$0xff] }
 0x38b   : > { %v12700_v48 = vpop.f32.mrf.mxu1 }
 0x38c   : > { %v15774_v58 = vadd.f32 %v7183_v32, %v6588_v11  ;;  %v6591_v8 = vadd.f32 %v12700_v48, %v15063_v49  ;;  %v7186_v25 = vpop.f32.mrf.mxu0  ;;  %v6911_v48 = vpack.c.bf16 %v6831_v62, %v6830_v23  ;;  %v6834_v23 = vld [vmem:[%s13372_s28 + $0x3d4] sm:$0xff]  ;;  %v6835_v62 = vld [vmem:[%s13372_s28 + $0x3dc] sm:$0xff] }
 0x38d   : > { %v6060_v46 = vpop.f32.mrf.mxu1 }
 0x38e   : > { %v15777_v26 = vadd.f32 %v12838_v6, %v6591_v8  ;;  %v6589_v4 = vadd.f32 %v6060_v46, %v15072_v12  ;;  %v12841_v5 = vpop.f32.mrf.mxu0  ;;  %12936 = vmatmul.mubr.msk.bf16.gmra.mxu0 %vm646_vm1, %v6909_v22  ;;  %v6912_v46 = vpack.c.bf16 %v6833_v2, %v6832_v38  ;;  %v6836_v2 = vld [vmem:[%s13372_s28 + $0x3e4] sm:$0xff] }
 0x38f   : > { %v12703_v61 = vpop.f32.mrf.mxu1  ;;  %12798 = vmatmul.mubr.msk.bf16.gmra.mxu1 %vm646_vm1, %v6907_v1  ;;  %12939 = vmatprep.mubr.msk.bf16.mxu0 %vm646_vm1, %v6910_v60 }
 0x390   : > { %v15785_v32 = vadd.f32 %v7186_v25, %v6589_v4  ;;  %v6594_v49 = vadd.f32 %v12703_v61, %v15081_v31  ;;  %v7199_v21 = vpop.f32.mrf.mxu0  ;;  %12801 = vmatprep.mubr.msk.bf16.mxu1 %vm646_vm1, %v6908_v63 }
 0x391   : > { %v6073_v12 = vpop.f32.mrf.mxu1 }
 0x392   : > { %v15791_v11 = vadd.f32 %v12841_v5, %v6594_v49  ;;  %v6592_v6 = vadd.f32 %v6073_v12, %v15084_v53  ;;  %v12842_v1 = vpop.f32.mrf.mxu0  ;;  %v6837_v12 = vld [vmem:[%s13372_s28 + $0x3ec] sm:$0xff] }
 0x393   : > { %v12704_v8 = vpop.f32.mrf.mxu1 }
 0x394   : > { %v15794_v25 = vadd.f32 %v7199_v21, %v6592_v6  ;;  %v6595_v31 = vadd.f32 %v12704_v8, %v15087_v24  ;;  %v7202_v4 = vpop.f32.mrf.mxu0  ;;  %v6913_v8 = vpack.c.bf16 %v6835_v62, %v6834_v23  ;;  %v6838_v23 = vld [vmem:[%s13372_s28 + $0x3f4] sm:$0xff]  ;;  %v6839_v62 = vld [vmem:[%s13372_s28 + $0x3fc] sm:$0xff] }
 0x395   : > { %v6076_v63 = vpop.f32.mrf.mxu1 }
 0x396   : > { %v15797_v61 = vadd.f32 %v12842_v1, %v6595_v31  ;;  %v6593_v5 = vadd.f32 %v6076_v63, %v15096_v16  ;;  %v12845_v49 = vpop.f32.mrf.mxu0  ;;  %12940 = vmatmul.mubr.msk.bf16.gmra.mxu0 %vm646_vm1, %v6911_v48  ;;  %v6914_v63 = vpack.c.bf16 %v6837_v12, %v6836_v2  ;;  %v6840_v12 = vld [vmem:[%s13372_s28 + $0x404] sm:$0xff] }
 0x397   : > { %v12707_v53 = vpop.f32.mrf.mxu1  ;;  %12802 = vmatmul.mubr.msk.bf16.gmra.mxu1 %vm646_vm1, %v6909_v22  ;;  %12943 = vmatprep.mubr.msk.bf16.mxu0 %vm646_vm1, %v6912_v46 }
 0x398   : > { %v15805_v21 = vadd.f32 %v7202_v4, %v6593_v5  ;;  %v6598_v24 = vadd.f32 %v12707_v53, %v15105_v47  ;;  %v7215_v38 = vpop.f32.mrf.mxu0  ;;  %12805 = vmatprep.mubr.msk.bf16.mxu1 %vm646_vm1, %v6910_v60 }
 0x399   : > { %v6089_v16 = vpop.f32.mrf.mxu1 }
 0x39a   : > { %v15811_v6 = vadd.f32 %v12845_v49, %v6598_v24  ;;  %v6596_v1 = vadd.f32 %v6089_v16, %v15108_v13  ;;  %v12846_v22 = vpop.f32.mrf.mxu0  ;;  %v6841_v16 = vld [vmem:[%s13372_s28 + $0x40c] sm:$0xff] }
 0x39b   : > { %v12708_v31 = vpop.f32.mrf.mxu1 }
 0x39c   : > { %v15814_v4 = vadd.f32 %v7215_v38, %v6596_v1  ;;  %v6599_v47 = vadd.f32 %v12708_v31, %v15111_v34  ;;  %v7218_v5 = vpop.f32.mrf.mxu0  ;;  %v6915_v31 = vpack.c.bf16 %v6839_v62, %v6838_v23  ;;  %v6842_v23 = vld [vmem:[%s13372_s28 + $0x414] sm:$0xff]  ;;  %v6843_v62 = vld [vmem:[%s13372_s28 + $0x41c] sm:$0xff] }
 0x39d   : > { %v6092_v60 = vpop.f32.mrf.mxu1 }
 0x39e   : > { %v15817_v53 = vadd.f32 %v12846_v22, %v6599_v47  ;;  %v6597_v49 = vadd.f32 %v6092_v60, %v15120_v42  ;;  %v12849_v24 = vpop.f32.mrf.mxu0  ;;  %12944 = vmatmul.mubr.msk.bf16.gmra.mxu0 %vm646_vm1, %v6913_v8  ;;  %v6916_v60 = vpack.c.bf16 %v6841_v16, %v6840_v12  ;;  %v6844_v16 = vld [vmem:[%s13372_s28 + $0x424] sm:$0xff] }
 0x39f   : > { %v12711_v13 = vpop.f32.mrf.mxu1  ;;  %12806 = vmatmul.mubr.msk.bf16.gmra.mxu1 %vm646_vm1, %v6911_v48  ;;  %12947 = vmatprep.mubr.msk.bf16.mxu0 %vm646_vm1, %v6914_v63 }
 0x3a0   : > { %v15825_v38 = vadd.f32 %v7218_v5, %v6597_v49  ;;  %v6602_v34 = vadd.f32 %v12711_v13, %v15129_v36  ;;  %v7231_v2 = vpop.f32.mrf.mxu0  ;;  %12809 = vmatprep.mubr.msk.bf16.mxu1 %vm646_vm1, %v6912_v46 }
 0x3a1   : > { %v6105_v42 = vpop.f32.mrf.mxu1 }
 0x3a2   : > { %v15831_v1 = vadd.f32 %v12849_v24, %v6602_v34  ;;  %v6600_v22 = vadd.f32 %v6105_v42, %v15132_v41  ;;  %v12850_v48 = vpop.f32.mrf.mxu0  ;;  %v6845_v42 = vld [vmem:[%s13372_s28 + $0x42c] sm:$0xff] }
 0x3a3   : > { %v12712_v47 = vpop.f32.mrf.mxu1 }
 0x3a4   : > { %v15834_v5 = vadd.f32 %v7231_v2, %v6600_v22  ;;  %v6603_v36 = vadd.f32 %v12712_v47, %v15135_v20  ;;  %v7234_v49 = vpop.f32.mrf.mxu0  ;;  %v6917_v47 = vpack.c.bf16 %v6843_v62, %v6842_v23  ;;  %v6846_v23 = vld [vmem:[%s13372_s28 + $0x434] sm:$0xff]  ;;  %v6847_v62 = vld [vmem:[%s13372_s28 + $0x43c] sm:$0xff] }
 0x3a5   : > { %v6108_v46 = vpop.f32.mrf.mxu1 }
 0x3a6   : > { %v15837_v13 = vadd.f32 %v12850_v48, %v6603_v36  ;;  %v6601_v24 = vadd.f32 %v6108_v46, %v15144_v3  ;;  %v12853_v34 = vpop.f32.mrf.mxu0  ;;  %12948 = vmatmul.mubr.msk.bf16.gmra.mxu0 %vm646_vm1, %v6915_v31  ;;  %v6918_v46 = vpack.c.bf16 %v6845_v42, %v6844_v16  ;;  %v6848_v42 = vld [vmem:[%s13372_s28 + $0x444] sm:$0xff] }
 0x3a7   : > { %v12715_v41 = vpop.f32.mrf.mxu1  ;;  %12810 = vmatmul.mubr.msk.bf16.gmra.mxu1 %vm646_vm1, %v6913_v8  ;;  %12951 = vmatprep.mubr.msk.bf16.mxu0 %vm646_vm1, %v6916_v60 }
 0x3a8   : > { %v15845_v2 = vadd.f32 %v7234_v49, %v6601_v24  ;;  %v6606_v20 = vadd.f32 %v12715_v41, %v15153_v28  ;;  %v7247_v12 = vpop.f32.mrf.mxu0  ;;  %12813 = vmatprep.mubr.msk.bf16.mxu1 %vm646_vm1, %v6914_v63 }
 0x3a9   : > { %v6121_v3 = vpop.f32.mrf.mxu1 }
 0x3aa   : > { %v15851_v22 = vadd.f32 %v12853_v34, %v6606_v20  ;;  %v6604_v48 = vadd.f32 %v6121_v3, %v15156_v7  ;;  %v12854_v8 = vpop.f32.mrf.mxu0  ;;  %v6849_v3 = vld [vmem:[%s13372_s28 + $0x44c] sm:$0xff] }
 0x3ab   : > { %v12716_v36 = vpop.f32.mrf.mxu1 }
 0x3ac   : > { %v15854_v49 = vadd.f32 %v7247_v12, %v6604_v48  ;;  %v6607_v28 = vadd.f32 %v12716_v36, %v15159_v39  ;;  %v7250_v24 = vpop.f32.mrf.mxu0  ;;  %v6919_v36 = vpack.c.bf16 %v6847_v62, %v6846_v23  ;;  %v6850_v23 = vld [vmem:[%s13372_s28 + $0x454] sm:$0xff]  ;;  %v6851_v62 = vld [vmem:[%s13372_s28 + $0x45c] sm:$0xff] }
 0x3ad   : > { %v6124_v63 = vpop.f32.mrf.mxu1 }
 0x3ae   : > { %v15857_v41 = vadd.f32 %v12854_v8, %v6607_v28  ;;  %v6605_v34 = vadd.f32 %v6124_v63, %v15168_v29  ;;  %v12857_v20 = vpop.f32.mrf.mxu0  ;;  %12952 = vmatmul.mubr.msk.bf16.gmra.mxu0 %vm646_vm1, %v6917_v47  ;;  %v6920_v63 = vpack.c.bf16 %v6849_v3, %v6848_v42  ;;  %v6852_v3 = vld [vmem:[%s13372_s28 + $0x464] sm:$0xff] }
 0x3af   : > { %v12719_v7 = vpop.f32.mrf.mxu1  ;;  %12814 = vmatmul.mubr.msk.bf16.gmra.mxu1 %vm646_vm1, %v6915_v31  ;;  %12955 = vmatprep.mubr.msk.bf16.mxu0 %vm646_vm1, %v6918_v46 }
 0x3b0   : > { %v15865_v12 = vadd.f32 %v7250_v24, %v6605_v34  ;;  %v6610_v39 = vadd.f32 %v12719_v7, %v15177_v27  ;;  %v7263_v16 = vpop.f32.mrf.mxu0  ;;  %12817 = vmatprep.mubr.msk.bf16.mxu1 %vm646_vm1, %v6916_v60 }
 0x3b1   : > { %v6137_v29 = vpop.f32.mrf.mxu1 }
 0x3b2   : > { %v15871_v48 = vadd.f32 %v12857_v20, %v6610_v39  ;;  %v6608_v8 = vadd.f32 %v6137_v29, %v15180_v52  ;;  %v12858_v31 = vpop.f32.mrf.mxu0  ;;  %v6853_v29 = vld [vmem:[%s13372_s28 + $0x46c] sm:$0xff] }
 0x3b3   : > { %v12720_v28 = vpop.f32.mrf.mxu1 }
 0x3b4   : > { %v15874_v24 = vadd.f32 %v7263_v16, %v6608_v8  ;;  %v6611_v27 = vadd.f32 %v12720_v28, %v15183_v54  ;;  %v7266_v34 = vpop.f32.mrf.mxu0  ;;  %v6921_v28 = vpack.c.bf16 %v6851_v62, %v6850_v23  ;;  %v6854_v62 = vld [vmem:[%s13372_s28 + $0x474] sm:$0xff] }
 0x3b5   : > { %v6140_v60 = vpop.f32.mrf.mxu1 }
 0x3b6   : > { %v15877_v7 = vadd.f32 %v12858_v31, %v6611_v27  ;;  %v6609_v20 = vadd.f32 %v6140_v60, %v15192_v35  ;;  %v12861_v39 = vpop.f32.mrf.mxu0  ;;  %12956 = vmatmul.mubr.msk.bf16.gmra.mxu0 %vm646_vm1, %v6919_v36  ;;  %v6922_v60 = vpack.c.bf16 %v6853_v29, %v6852_v3  ;;  %v8972_v29 = vld [vmem:[%s13372_s28 + $0x46] sm:$0xff] }
 0x3b7   : > { %v12723_v52 = vpop.f32.mrf.mxu1  ;;  %12818 = vmatmul.mubr.msk.bf16.gmra.mxu1 %vm646_vm1, %v6917_v47  ;;  %12959 = vmatprep.mubr.msk.bf16.mxu0 %vm646_vm1, %v6920_v63 }
 0x3b8   : > { %v15885_v16 = vadd.f32 %v7266_v34, %v6609_v20  ;;  %v6614_v54 = vadd.f32 %v12723_v52, %v15201_v18  ;;  %v7279_v42 = vpop.f32.mrf.mxu0  ;;  %12821 = vmatprep.mubr.msk.bf16.mxu1 %vm646_vm1, %v6918_v46 }
 0x3b9   : > { %v6153_v35 = vpop.f32.mrf.mxu1 }
 0x3ba   : > { %v15891_v8 = vadd.f32 %v12861_v39, %v6614_v54  ;;  %v6612_v31 = vadd.f32 %v6153_v35, %v15204_v9  ;;  %v12862_v47 = vpop.f32.mrf.mxu0 }
 0x3bb   : > { %v12724_v27 = vpop.f32.mrf.mxu1 }
 0x3bc   : > { %v15894_v34 = vadd.f32 %v7279_v42, %v6612_v31  ;;  %v6615_v18 = vadd.f32 %v12724_v27, %v15207_v14  ;;  %v7282_v20 = vpop.f32.mrf.mxu0  ;;  %v6855_v14 = vld [vmem:[%s13372_s28 + $0x47c] sm:$0xff]  ;;  %v7846_v31 = vld [vmem:[%s13372_s28 + $0x45] sm:$0xff] }
 0x3bd   : > { %v6156_v46 = vpop.f32.mrf.mxu1 }
 0x3be   : > { %v15897_v52 = vadd.f32 %v12862_v47, %v6615_v18  ;;  %v6613_v39 = vadd.f32 %v6156_v46, %v15216_v43  ;;  %v12865_v9 = vpop.f32.mrf.mxu0  ;;  %12960 = vmatmul.mubr.msk.bf16.gmra.mxu0 %vm646_vm1, %v6921_v28  ;;  %v8973_v43 = vld [vmem:[%s13372_s28 + $0x4e] sm:$0xff] }
 0x3bf   : > { %v12727_v23 = vpop.f32.mrf.mxu1  ;;  %12822 = vmatmul.mubr.msk.bf16.gmra.mxu1 %vm646_vm1, %v6919_v36  ;;  %12963 = vmatprep.mubr.msk.bf16.mxu0 %vm646_vm1, %v6922_v60  ;;  %v7847_v47 = vld [vmem:[%s13372_s28 + $0x4d] sm:$0xff]  ;;  %v6923_v60 = vpack.c.bf16 %v6855_v14, %v6854_v62  ;;  %v9108_v46 = vpack.c.bf16 %v8973_v43, %v8972_v29  ;;  %v8974_v14 = vld [vmem:[%s13372_s28 + $0x56] sm:$0xff] }
 0x3c0   : > { %v15905_v54 = vadd.f32 %v7282_v20, %v6613_v39  ;;  %v6618_v42 = vadd.f32 %v12727_v23, %v15225_v40  ;;  %v7295_v3 = vpop.f32.mrf.mxu0  ;;  %12825 = vmatprep.mubr.msk.bf16.mxu1 %vm646_vm1, %v6920_v63  ;;  %v7982_v23 = vpack.c.bf16 %v7847_v47, %v7846_v31  ;;  %v8977_v31 = vld [vmem:[%s13372_s28 + $0x6e] sm:$0xff] }
 0x3c1   : > { %v6169_v35 = vpop.f32.mrf.mxu1 }
 0x3c2   : > { %17842 = vst [vmem:[#allocation78_spill] sm:$0xff] %v15905_v54  ;;  %v15913_v27 = vadd.f32 %v12865_v9, %v6618_v42  ;;  %v6616_v36 = vadd.f32 %v6169_v35, %v15228_v17  ;;  %v12866_v18 = vpop.f32.mrf.mxu0 }
 0x3c3   : > { %v12728_v20 = vpop.f32.mrf.mxu1 }
 0x3c4   : > { %v15916_v40 = vadd.f32 %v7295_v3, %v6616_v36  ;;  %v6619_v63 = vadd.f32 %v12728_v20, %v15231_v51  ;;  %v7298_v39 = vpop.f32.mrf.mxu0  ;;  %v7848_v51 = vld [vmem:[%s13372_s28 + $0x55] sm:$0xff]  ;;  %v8975_v3 = vld [vmem:[%s13372_s28 + $0x5e] sm:$0xff] }
 0x3c5   : > { %v6172_v54 = vpop.f32.mrf.mxu1  ;;  %v7850_v36 = vld [vmem:[%s13372_s28 + $0x65] sm:$0xff] }
 0x3c6   : > { %17843 = vst [vmem:[#allocation80_spill] sm:$0xff] %v15916_v40  ;;  %v15919_v9 = vadd.f32 %v12866_v18, %v6619_v63  ;;  %v6617_v17 = vadd.f32 %v6172_v54, %v15239_v57  ;;  %v12869_v42 = vpop.f32.mrf.mxu0  ;;  %12964 = vmatmul.mubr.msk.bf16.gmra.mxu0 %vm646_vm1, %v6923_v60  ;;  %v7849_v57 = vld [vmem:[%s13372_s28 + $0x5d] sm:$0xff]  ;;  %v8976_v54 = vld [vmem:[%s13372_s28 + $0x66] sm:$0xff] }
 0x3c7   : > { %v12731_v62 = vpop.f32.mrf.mxu1  ;;  %12826 = vmatmul.mubr.msk.bf16.gmra.mxu1 %vm646_vm1, %v6921_v28  ;;  %13107 = vmatprep.mubr.msk.bf16.mxu0 %vm646_vm1, %v9108_v46  ;;  %v7851_v18 = vld [vmem:[%s13372_s28 + $0x6d] sm:$0xff]  ;;  %v9109_v46 = vpack.c.bf16 %v8975_v3, %v8974_v14 }
 0x3c8   : > { %17844 = vst [vmem:[#allocation82_spill] sm:$0xff] %v15919_v9  ;;  %v15928_v29 = vadd.f32 %v7298_v39, %v6617_v17  ;;  %v6622_v43 = vadd.f32 %v12731_v62, %v15245_v56  ;;  %v7311_v35 = vpop.f32.mrf.mxu0  ;;  %12969 = vmatprep.mubr.msk.bf16.mxu1 %vm646_vm1, %v7982_v23  ;;  %v7983_v39 = vpack.c.bf16 %v7849_v57, %v7848_v51  ;;  %v17848_v23 = vld [vmem:[#allocation94_spill] sm:$0xff] }
 0x3c9   : > { %v6185_v47 = vpop.f32.mrf.mxu1  ;;  %v9110_v56 = vpack.c.bf16 %v8977_v31, %v8976_v54  ;;  %v7984_v9 = vpack.c.bf16 %v7851_v18, %v7850_v36  ;;  %v8979_v57 = vld [vmem:[%s13372_s28 + $0x7e] sm:$0xff]  ;;  %v8980_v18 = vld [vmem:[%s13372_s28 + $0x86] sm:$0xff] }
 0x3ca   : > { %17845 = vst [vmem:[#allocation84_spill] sm:$0xff] %v15928_v29  ;;  %v15937_v60 = vadd.f32 %v12869_v42, %v6622_v43  ;;  %v6620_v28 = vadd.f32 %v6185_v47, %v15250_v50  ;;  %v12870_v20 = vpop.f32.mrf.mxu0  ;;  %v17850_v50 = vld [vmem:[#allocation96_spill] sm:$0xff]  ;;  %v17852_v31 = vld [vmem:[#allocation98_spill] sm:$0xff] }
 0x3cb   : > { %v12732_v63 = vpop.f32.mrf.mxu1  ;;  %v7852_v43 = vld [vmem:[%s13372_s28 + $0x75] sm:$0xff] }
 0x3cc   : > { %17846 = vst [vmem:[#allocation86_spill] sm:$0xff] %v15937_v60  ;;  %v15940_v17 = vadd.f32 %v7311_v35, %v6620_v28  ;;  %v6623_v62 = vadd.f32 %v12732_v63, %v17848_v23  ;;  %v7314_v29 = vpop.f32.mrf.mxu0  ;;  %v8978_v35 = vld [vmem:[%s13372_s28 + $0x76] sm:$0xff]  ;;  %v8981_v28 = vld [vmem:[%s13372_s28 + $0x8e] sm:$0xff] }
 0x3cd   : > { %v6188_v40 = vpop.f32.mrf.mxu1  ;;  %v7855_v63 = vld [vmem:[%s13372_s28 + $0x8d] sm:$0xff] }
 0x3ce   : > { %17847 = vst [vmem:[#allocation88_spill] sm:$0xff] %v15940_v17  ;;  %v15943_v42 = vadd.f32 %v12870_v20, %v6623_v62  ;;  %v6621_v14 = vadd.f32 %v6188_v40, %v17850_v50  ;;  %v12873_v3 = vpop.f32.mrf.mxu0  ;;  %13108 = vmatmul.mubr.msk.bf16.vlgmr.msra.gmra.mxu0 %vm646_vm1, %v9109_v46  ;;  %v7853_v40 = vld [vmem:[%s13372_s28 + $0x7d] sm:$0xff]  ;;  %v7854_v46 = vld [vmem:[%s13372_s28 + $0x85] sm:$0xff]  ;;  %v9111_v50 = vpack.c.bf16 %v8979_v57, %v8978_v35 }
 0x3cf   : > { %v12735_v51 = vpop.f32.mrf.mxu1  ;;  %12970 = vmatmul.mubr.msk.bf16.vlgmr.msra.gmra.mxu1 %vm646_vm1, %v7983_v39  ;;  %13111 = vmatprep.mubr.msk.bf16.mxu0 %vm646_vm1, %v9110_v56  ;;  %v17854_v39 = vld [vmem:[#allocation99_spill] sm:$0xff]  ;;  %v7986_v17 = vpack.c.bf16 %v7855_v63, %v7854_v46 }
 0x3d0   : > { %17849 = vst [vmem:[#allocation90_spill] sm:$0xff] %v15943_v42  ;;  %v15952_v54 = vadd.f32 %v7314_v29, %v6621_v14  ;;  %v6626_v47 = vadd.f32 %v12735_v51, %v17852_v31  ;;  %v7327_v36 = vpop.f32.mrf.mxu0  ;;  %12973 = vmatprep.mubr.msk.bf16.mxu1 %vm646_vm1, %v7984_v9  ;;  %v7985_v14 = vpack.c.bf16 %v7853_v40, %v7852_v43  ;;  %v17856_v9 = vld [vmem:[#allocation54_spill] sm:$0xff]  ;;  %v8982_v40 = vld [vmem:[%s13372_s28 + $0x96] sm:$0xff] }
 0x3d1   : > { %v6201_v20 = vpop.f32.mrf.mxu1  ;;  %v9112_v51 = vpack.c.bf16 %v8981_v28, %v8980_v18  ;;  %v8983_v18 = vld [vmem:[%s13372_s28 + $0x9e] sm:$0xff]  ;;  %v8984_v63 = vld [vmem:[%s13372_s28 + $0xa6] sm:$0xff] }
 0x3d2   : > { %17851 = vst [vmem:[#allocation92_spill] sm:$0xff] %v15952_v54  ;;  %v15961_v23 = vadd.f32 %v12873_v3, %v6626_v47  ;;  %v6624_v56 = vadd.f32 %v6201_v20, %v17854_v39  ;;  %v12874_v62 = vpop.f32.mrf.mxu0  ;;  %v17858_v47 = vld [vmem:[#allocation52_spill] sm:$0xff] }
 0x3d3   : > { %v12736_v29 = vpop.f32.mrf.mxu1  ;;  %v8985_v39 = vld [vmem:[%s13372_s28 + $0xae] sm:$0xff] }
 0x3d4   : > { %17853 = vst [vmem:[#allocation94_spill] sm:$0xff] %v15961_v23  ;;  %v15964_v31 = vadd.f32 %v7327_v36, %v6624_v56  ;;  %v6627_v54 = vadd.f32 %v12736_v29, %v17856_v9  ;;  %v7330_v42 = vpop.f32.mrf.mxu0  ;;  %v7856_v36 = vld [vmem:[%s13372_s28 + $0x95] sm:$0xff] }
 0x3d5   : > { %v6204_v60 = vpop.f32.mrf.mxu1 }
 0x3d6   : > { %17855 = vst [vmem:[#allocation96_spill] sm:$0xff] %v15964_v31  ;;  %v15967_v3 = vadd.f32 %v12874_v62, %v6627_v54  ;;  %v6625_v35 = vadd.f32 %v6204_v60, %v17858_v47  ;;  %v12877_v57 = vpop.f32.mrf.mxu0  ;;  %13112 = vmatmul.mubr.msk.bf16.gmra.mxu0 %vm646_vm1, %v9111_v50  ;;  %v17860_v54 = vld [vmem:[#allocation41_spill] sm:$0xff]  ;;  %v7858_v62 = vld [vmem:[%s13372_s28 + $0xa5] sm:$0xff]  ;;  %v7859_v50 = vld [vmem:[%s13372_s28 + $0xad] sm:$0xff]  ;;  %v9113_v47 = vpack.c.bf16 %v8983_v18, %v8982_v40 }
 0x3d7   : > { %v12739_v43 = vpop.f32.mrf.mxu1  ;;  %12974 = vmatmul.mubr.msk.bf16.gmra.mxu1 %vm646_vm1, %v7985_v14  ;;  %13115 = vmatprep.mubr.msk.bf16.mxu0 %vm646_vm1, %v9112_v51  ;;  %v7857_v60 = vld [vmem:[%s13372_s28 + $0x9d] sm:$0xff]  ;;  %v17862_v14 = vld [vmem:[#allocation43_spill] sm:$0xff]  ;;  %v7988_v31 = vpack.c.bf16 %v7859_v50, %v7858_v62 }
 0x3d8   : > { %17857 = vst [vmem:[#allocation98_spill] sm:$0xff] %v15967_v3  ;;  %v15976_v28 = vadd.f32 %v7330_v42, %v6625_v35  ;;  %v6630_v20 = vadd.f32 %v12739_v43, %v17860_v54  ;;  %v7343_v46 = vpop.f32.mrf.mxu0  ;;  %12977 = vmatprep.mubr.msk.bf16.mxu1 %vm646_vm1, %v7986_v17  ;;  %v7987_v35 = vpack.c.bf16 %v7857_v60, %v7856_v36  ;;  %v17864_v17 = vld [vmem:[#allocation45_spill] sm:$0xff]  ;;  %v8988_v50 = vld [vmem:[%s13372_s28 + $0xc6] sm:$0xff] }
 0x3d9   : > { %v6217_v56 = vpop.f32.mrf.mxu1  ;;  %v9114_v43 = vpack.c.bf16 %v8985_v39, %v8984_v63  ;;  %v8986_v60 = vld [vmem:[%s13372_s28 + $0xb6] sm:$0xff]  ;;  %v8987_v63 = vld [vmem:[%s13372_s28 + $0xbe] sm:$0xff] }
 0x3da   : > { %17859 = vst [vmem:[#allocation99_spill] sm:$0xff] %v15976_v28  ;;  %v15985_v29 = vadd.f32 %v12877_v57, %v6630_v20  ;;  %v6628_v51 = vadd.f32 %v6217_v56, %v17862_v14  ;;  %v12878_v9 = vpop.f32.mrf.mxu0  ;;  %v17866_v20 = vld [vmem:[#allocation47_spill] sm:$0xff] }
 0x3db   : > { %v12740_v42 = vpop.f32.mrf.mxu1  ;;  %v8989_v14 = vld [vmem:[%s13372_s28 + $0xce] sm:$0xff] }
 0x3dc   : > { %17861 = vst [vmem:[#allocation54_spill] sm:$0xff] %v15985_v29  ;;  %v15988_v54 = vadd.f32 %v7343_v46, %v6628_v51  ;;  %v6631_v28 = vadd.f32 %v12740_v42, %v17864_v17  ;;  %v7346_v3 = vpop.f32.mrf.mxu0  ;;  %v7860_v46 = vld [vmem:[%s13372_s28 + $0xb5] sm:$0xff] }
 0x3dd   : > { %v6220_v23 = vpop.f32.mrf.mxu1 }
 0x3de   : > { %17863 = vst [vmem:[#allocation52_spill] sm:$0xff] %v15988_v54  ;;  %v15991_v57 = vadd.f32 %v12878_v9, %v6631_v28  ;;  %v6629_v40 = vadd.f32 %v6220_v23, %v17866_v20  ;;  %v12881_v18 = vpop.f32.mrf.mxu0  ;;  %13116 = vmatmul.mubr.msk.bf16.gmra.mxu0 %vm646_vm1, %v9113_v47  ;;  %v17868_v28 = vld [vmem:[#allocation49_spill] sm:$0xff]  ;;  %v7862_v9 = vld [vmem:[%s13372_s28 + $0xc5] sm:$0xff]  ;;  %v7863_v47 = vld [vmem:[%s13372_s28 + $0xcd] sm:$0xff]  ;;  %v9115_v20 = vpack.c.bf16 %v8987_v63, %v8986_v60 }
 0x3df   : > { %v12743_v36 = vpop.f32.mrf.mxu1  ;;  %12978 = vmatmul.mubr.msk.bf16.gmra.mxu1 %vm646_vm1, %v7987_v35  ;;  %13119 = vmatprep.mubr.msk.bf16.mxu0 %vm646_vm1, %v9114_v43  ;;  %v7861_v23 = vld [vmem:[%s13372_s28 + $0xbd] sm:$0xff]  ;;  %v17870_v35 = vld [vmem:[#allocation51_spill] sm:$0xff]  ;;  %v7990_v54 = vpack.c.bf16 %v7863_v47, %v7862_v9 }
 0x3e0   : > { %17865 = vst [vmem:[#allocation41_spill] sm:$0xff] %v15991_v57  ;;  %v16000_v39 = vadd.f32 %v7346_v3, %v6629_v40  ;;  %v6634_v56 = vadd.f32 %v12743_v36, %v17868_v28  ;;  %v7359_v62 = vpop.f32.mrf.mxu0  ;;  %12981 = vmatprep.mubr.msk.bf16.mxu1 %vm646_vm1, %v7988_v31  ;;  %v7989_v40 = vpack.c.bf16 %v7861_v23, %v7860_v46  ;;  %v17872_v31 = vld [vmem:[#allocation53_spill] sm:$0xff]  ;;  %v8992_v47 = vld [vmem:[%s13372_s28 + $0xe6] sm:$0xff] }
 0x3e1   : > { %v6233_v51 = vpop.f32.mrf.mxu1  ;;  %v9116_v36 = vpack.c.bf16 %v8989_v14, %v8988_v50  ;;  %v8990_v23 = vld [vmem:[%s13372_s28 + $0xd6] sm:$0xff]  ;;  %v8991_v50 = vld [vmem:[%s13372_s28 + $0xde] sm:$0xff] }
 0x3e2   : > { %17867 = vst [vmem:[#allocation43_spill] sm:$0xff] %v16000_v39  ;;  %v16009_v42 = vadd.f32 %v12881_v18, %v6634_v56  ;;  %v6632_v43 = vadd.f32 %v6233_v51, %v17870_v35  ;;  %v12882_v17 = vpop.f32.mrf.mxu0  ;;  %v17874_v56 = vld [vmem:[#allocation55_spill] sm:$0xff] }
 0x3e3   : > { %v12744_v3 = vpop.f32.mrf.mxu1  ;;  %v8993_v35 = vld [vmem:[%s13372_s28 + $0xee] sm:$0xff] }
 0x3e4   : > { %17869 = vst [vmem:[#allocation45_spill] sm:$0xff] %v16009_v42  ;;  %v16012_v28 = vadd.f32 %v7359_v62, %v6632_v43  ;;  %v6635_v39 = vadd.f32 %v12744_v3, %v17872_v31  ;;  %v7362_v57 = vpop.f32.mrf.mxu0  ;;  %v7864_v62 = vld [vmem:[%s13372_s28 + $0xd5] sm:$0xff] }
 0x3e5   : > { %v6236_v29 = vpop.f32.mrf.mxu1 }
 0x3e6   : > { %17871 = vst [vmem:[#allocation47_spill] sm:$0xff] %v16012_v28  ;;  %v16015_v18 = vadd.f32 %v12882_v17, %v6635_v39  ;;  %v6633_v60 = vadd.f32 %v6236_v29, %v17874_v56  ;;  %v12885_v63 = vpop.f32.mrf.mxu0  ;;  %13120 = vmatmul.mubr.msk.bf16.gmra.mxu0 %vm646_vm1, %v9115_v20  ;;  %v17876_v39 = vld [vmem:[#allocation57_spill] sm:$0xff]  ;;  %v7866_v17 = vld [vmem:[%s13372_s28 + $0xe5] sm:$0xff]  ;;  %v7867_v20 = vld [vmem:[%s13372_s28 + $0xed] sm:$0xff]  ;;  %v9117_v56 = vpack.c.bf16 %v8991_v50, %v8990_v23 }
 0x3e7   : > { %v12747_v46 = vpop.f32.mrf.mxu1  ;;  %12982 = vmatmul.mubr.msk.bf16.gmra.mxu1 %vm646_vm1, %v7989_v40  ;;  %13123 = vmatprep.mubr.msk.bf16.mxu0 %vm646_vm1, %v9116_v36  ;;  %v7865_v29 = vld [vmem:[%s13372_s28 + $0xdd] sm:$0xff]  ;;  %v17878_v40 = vld [vmem:[#allocation59_spill] sm:$0xff]  ;;  %v7992_v28 = vpack.c.bf16 %v7867_v20, %v7866_v17 }
 0x3e8   : > { %17873 = vst [vmem:[#allocation49_spill] sm:$0xff] %v16015_v18  ;;  %v16024_v14 = vadd.f32 %v7362_v57, %v6633_v60  ;;  %v6638_v51 = vadd.f32 %v12747_v46, %v17876_v39  ;;  %v7375_v9 = vpop.f32.mrf.mxu0  ;;  %12985 = vmatprep.mubr.msk.bf16.mxu1 %vm646_vm1, %v7990_v54  ;;  %v7991_v60 = vpack.c.bf16 %v7865_v29, %v7864_v62  ;;  %v17880_v54 = vld [vmem:[#allocation61_spill] sm:$0xff]  ;;  %v8996_v20 = vld [vmem:[%s13372_s28 + $0x106] sm:$0xff] }
 0x3e9   : > { %v6249_v43 = vpop.f32.mrf.mxu1  ;;  %v9118_v46 = vpack.c.bf16 %v8993_v35, %v8992_v47  ;;  %v8994_v29 = vld [vmem:[%s13372_s28 + $0xf6] sm:$0xff]  ;;  %v8995_v47 = vld [vmem:[%s13372_s28 + $0xfe] sm:$0xff] }
 0x3ea   : > { %17875 = vst [vmem:[#allocation51_spill] sm:$0xff] %v16024_v14  ;;  %v16033_v3 = vadd.f32 %v12885_v63, %v6638_v51  ;;  %v6636_v36 = vadd.f32 %v6249_v43, %v17878_v40  ;;  %v12886_v31 = vpop.f32.mrf.mxu0  ;;  %v17882_v51 = vld [vmem:[#allocation63_spill] sm:$0xff] }
 0x3eb   : > { %v12748_v57 = vpop.f32.mrf.mxu1  ;;  %v8997_v40 = vld [vmem:[%s13372_s28 + $0x10e] sm:$0xff] }
 0x3ec   : > { %17877 = vst [vmem:[#allocation53_spill] sm:$0xff] %v16033_v3  ;;  %v16036_v39 = vadd.f32 %v7375_v9, %v6636_v36  ;;  %v6639_v14 = vadd.f32 %v12748_v57, %v17880_v54  ;;  %v7378_v18 = vpop.f32.mrf.mxu0  ;;  %v7868_v9 = vld [vmem:[%s13372_s28 + $0xf5] sm:$0xff] }
 0x3ed   : > { %v6252_v42 = vpop.f32.mrf.mxu1 }
 0x3ee   : > { %17879 = vst [vmem:[#allocation55_spill] sm:$0xff] %v16036_v39  ;;  %v16039_v63 = vadd.f32 %v12886_v31, %v6639_v14  ;;  %v6637_v23 = vadd.f32 %v6252_v42, %v17882_v51  ;;  %v12889_v50 = vpop.f32.mrf.mxu0  ;;  %13124 = vmatmul.mubr.msk.bf16.gmra.mxu0 %vm646_vm1, %v9117_v56  ;;  %v17884_v14 = vld [vmem:[#allocation65_spill] sm:$0xff]  ;;  %v7870_v31 = vld [vmem:[%s13372_s28 + $0x105] sm:$0xff]  ;;  %v7871_v56 = vld [vmem:[%s13372_s28 + $0x10d] sm:$0xff]  ;;  %v9119_v51 = vpack.c.bf16 %v8995_v47, %v8994_v29 }
 0x3ef   : > { %v12751_v62 = vpop.f32.mrf.mxu1  ;;  %12986 = vmatmul.mubr.msk.bf16.gmra.mxu1 %vm646_vm1, %v7991_v60  ;;  %13127 = vmatprep.mubr.msk.bf16.mxu0 %vm646_vm1, %v9118_v46  ;;  %v7869_v42 = vld [vmem:[%s13372_s28 + $0xfd] sm:$0xff]  ;;  %v17886_v60 = vld [vmem:[#allocation67_spill] sm:$0xff]  ;;  %v7994_v39 = vpack.c.bf16 %v7871_v56, %v7870_v31 }
 0x3f0   : > { %17881 = vst [vmem:[#allocation57_spill] sm:$0xff] %v16039_v63  ;;  %v16048_v35 = vadd.f32 %v7378_v18, %v6637_v23  ;;  %v6642_v43 = vadd.f32 %v12751_v62, %v17884_v14  ;;  %v7391_v17 = vpop.f32.mrf.mxu0  ;;  %12989 = vmatprep.mubr.msk.bf16.mxu1 %vm646_vm1, %v7992_v28  ;;  %v7993_v23 = vpack.c.bf16 %v7869_v42, %v7868_v9  ;;  %v17888_v28 = vld [vmem:[#allocation69_spill] sm:$0xff]  ;;  %v9000_v56 = vld [vmem:[%s13372_s28 + $0x126] sm:$0xff] }
 0x3f1   : > { %v6265_v36 = vpop.f32.mrf.mxu1  ;;  %v9120_v62 = vpack.c.bf16 %v8997_v40, %v8996_v20  ;;  %v8998_v42 = vld [vmem:[%s13372_s28 + $0x116] sm:$0xff]  ;;  %v8999_v20 = vld [vmem:[%s13372_s28 + $0x11e] sm:$0xff] }
 0x3f2   : > { %17883 = vst [vmem:[#allocation59_spill] sm:$0xff] %v16048_v35  ;;  %v16057_v57 = vadd.f32 %v12889_v50, %v6642_v43  ;;  %v6640_v46 = vadd.f32 %v6265_v36, %v17886_v60  ;;  %v12890_v54 = vpop.f32.mrf.mxu0  ;;  %v17890_v43 = vld [vmem:[#allocation71_spill] sm:$0xff] }
 0x3f3   : > { %v12752_v18 = vpop.f32.mrf.mxu1  ;;  %v9001_v60 = vld [vmem:[%s13372_s28 + $0x12e] sm:$0xff] }
 0x3f4   : > { %17885 = vst [vmem:[#allocation61_spill] sm:$0xff] %v16057_v57  ;;  %v16060_v14 = vadd.f32 %v7391_v17, %v6640_v46  ;;  %v6643_v35 = vadd.f32 %v12752_v18, %v17888_v28  ;;  %v7394_v63 = vpop.f32.mrf.mxu0  ;;  %v7872_v17 = vld [vmem:[%s13372_s28 + $0x115] sm:$0xff] }
 0x3f5   : > { %v6268_v3 = vpop.f32.mrf.mxu1 }
 0x3f6   : > { %17887 = vst [vmem:[#allocation63_spill] sm:$0xff] %v16060_v14  ;;  %v16063_v50 = vadd.f32 %v12890_v54, %v6643_v35  ;;  %v6641_v29 = vadd.f32 %v6268_v3, %v17890_v43  ;;  %v12893_v47 = vpop.f32.mrf.mxu0  ;;  %13128 = vmatmul.mubr.msk.bf16.gmra.mxu0 %vm646_vm1, %v9119_v51  ;;  %v17892_v35 = vld [vmem:[#allocation73_spill] sm:$0xff]  ;;  %v7874_v54 = vld [vmem:[%s13372_s28 + $0x125] sm:$0xff]  ;;  %v7875_v51 = vld [vmem:[%s13372_s28 + $0x12d] sm:$0xff]  ;;  %v9121_v43 = vpack.c.bf16 %v8999_v20, %v8998_v42 }
 0x3f7   : > { %v12755_v9 = vpop.f32.mrf.mxu1  ;;  %12990 = vmatmul.mubr.msk.bf16.gmra.mxu1 %vm646_vm1, %v7993_v23  ;;  %13131 = vmatprep.mubr.msk.bf16.mxu0 %vm646_vm1, %v9120_v62  ;;  %v7873_v3 = vld [vmem:[%s13372_s28 + $0x11d] sm:$0xff]  ;;  %v17894_v23 = vld [vmem:[#allocation75_spill] sm:$0xff]  ;;  %v7996_v14 = vpack.c.bf16 %v7875_v51, %v7874_v54 }
 0x3f8   : > { %17889 = vst [vmem:[#allocation65_spill] sm:$0xff] %v16063_v50  ;;  %v16072_v40 = vadd.f32 %v7394_v63, %v6641_v29  ;;  %v6646_v36 = vadd.f32 %v12755_v9, %v17892_v35  ;;  %v7407_v31 = vpop.f32.mrf.mxu0  ;;  %12993 = vmatprep.mubr.msk.bf16.mxu1 %vm646_vm1, %v7994_v39  ;;  %v7995_v29 = vpack.c.bf16 %v7873_v3, %v7872_v17  ;;  %v17896_v39 = vld [vmem:[#allocation77_spill] sm:$0xff]  ;;  %v9004_v51 = vld [vmem:[%s13372_s28 + $0x146] sm:$0xff] }
 0x3f9   : > { %v6281_v46 = vpop.f32.mrf.mxu1  ;;  %v9122_v9 = vpack.c.bf16 %v9001_v60, %v9000_v56  ;;  %v9002_v3 = vld [vmem:[%s13372_s28 + $0x136] sm:$0xff]  ;;  %v9003_v56 = vld [vmem:[%s13372_s28 + $0x13e] sm:$0xff] }
 0x3fa   : > { %17891 = vst [vmem:[#allocation67_spill] sm:$0xff] %v16072_v40  ;;  %v16081_v18 = vadd.f32 %v12893_v47, %v6646_v36  ;;  %v6644_v62 = vadd.f32 %v6281_v46, %v17894_v23  ;;  %v12894_v28 = vpop.f32.mrf.mxu0  ;;  %v17898_v36 = vld [vmem:[#allocation79_spill] sm:$0xff] }
 0x3fb   : > { %v12756_v63 = vpop.f32.mrf.mxu1  ;;  %v9005_v23 = vld [vmem:[%s13372_s28 + $0x14e] sm:$0xff] }
 0x3fc   : > { %17893 = vst [vmem:[#allocation69_spill] sm:$0xff] %v16081_v18  ;;  %v16084_v35 = vadd.f32 %v7407_v31, %v6644_v62  ;;  %v6647_v40 = vadd.f32 %v12756_v63, %v17896_v39  ;;  %v7410_v50 = vpop.f32.mrf.mxu0  ;;  %v7876_v31 = vld [vmem:[%s13372_s28 + $0x135] sm:$0xff] }
 0x3fd   : > { %v6284_v57 = vpop.f32.mrf.mxu1 }
 0x3fe   : > { %17895 = vst [vmem:[#allocation71_spill] sm:$0xff] %v16084_v35  ;;  %v16087_v47 = vadd.f32 %v12894_v28, %v6647_v40  ;;  %v6645_v42 = vadd.f32 %v6284_v57, %v17898_v36  ;;  %v12897_v20 = vpop.f32.mrf.mxu0  ;;  %13132 = vmatmul.mubr.msk.bf16.gmra.mxu0 %vm646_vm1, %v9121_v43  ;;  %v17900_v40 = vld [vmem:[#allocation81_spill] sm:$0xff]  ;;  %v7878_v28 = vld [vmem:[%s13372_s28 + $0x145] sm:$0xff]  ;;  %v7879_v43 = vld [vmem:[%s13372_s28 + $0x14d] sm:$0xff]  ;;  %v9123_v36 = vpack.c.bf16 %v9003_v56, %v9002_v3 }
 0x3ff   : > { %v12759_v17 = vpop.f32.mrf.mxu1  ;;  %12994 = vmatmul.mubr.msk.bf16.gmra.mxu1 %vm646_vm1, %v7995_v29  ;;  %13135 = vmatprep.mubr.msk.bf16.mxu0 %vm646_vm1, %v9122_v9  ;;  %v7877_v57 = vld [vmem:[%s13372_s28 + $0x13d] sm:$0xff]  ;;  %v17902_v29 = vld [vmem:[#allocation83_spill] sm:$0xff]  ;;  %v7998_v35 = vpack.c.bf16 %v7879_v43, %v7878_v28 }
 0x400   : > { %17897 = vst [vmem:[#allocation73_spill] sm:$0xff] %v16087_v47  ;;  %v16096_v60 = vadd.f32 %v7410_v50, %v6645_v42  ;;  %v6650_v46 = vadd.f32 %v12759_v17, %v17900_v40  ;;  %v7423_v54 = vpop.f32.mrf.mxu0  ;;  %12997 = vmatprep.mubr.msk.bf16.mxu1 %vm646_vm1, %v7996_v14  ;;  %v7997_v42 = vpack.c.bf16 %v7877_v57, %v7876_v31  ;;  %v17904_v14 = vld [vmem:[#allocation85_spill] sm:$0xff]  ;;  %v9008_v43 = vld [vmem:[%s13372_s28 + $0x166] sm:$0xff] }
 0x401   : > { %v6297_v62 = vpop.f32.mrf.mxu1  ;;  %v9124_v17 = vpack.c.bf16 %v9005_v23, %v9004_v51  ;;  %v9006_v57 = vld [vmem:[%s13372_s28 + $0x156] sm:$0xff]  ;;  %v9007_v51 = vld [vmem:[%s13372_s28 + $0x15e] sm:$0xff] }
 0x402   : > { %17899 = vst [vmem:[#allocation75_spill] sm:$0xff] %v16096_v60  ;;  %v16105_v63 = vadd.f32 %v12897_v20, %v6650_v46  ;;  %v6648_v9 = vadd.f32 %v6297_v62, %v17902_v29  ;;  %v12898_v39 = vpop.f32.mrf.mxu0  ;;  %v17906_v46 = vld [vmem:[#allocation87_spill] sm:$0xff] }
 0x403   : > { %v12760_v50 = vpop.f32.mrf.mxu1  ;;  %v9009_v29 = vld [vmem:[%s13372_s28 + $0x16e] sm:$0xff] }
 0x404   : > { %17901 = vst [vmem:[#allocation77_spill] sm:$0xff] %v16105_v63  ;;  %v16108_v40 = vadd.f32 %v7423_v54, %v6648_v9  ;;  %v6651_v60 = vadd.f32 %v12760_v50, %v17904_v14  ;;  %v7426_v47 = vpop.f32.mrf.mxu0  ;;  %v7880_v54 = vld [vmem:[%s13372_s28 + $0x155] sm:$0xff] }
 0x405   : > { %v6300_v18 = vpop.f32.mrf.mxu1 }
 0x406   : > { %17903 = vst [vmem:[#allocation79_spill] sm:$0xff] %v16108_v40  ;;  %v16111_v20 = vadd.f32 %v12898_v39, %v6651_v60  ;;  %v6649_v3 = vadd.f32 %v6300_v18, %v17906_v46  ;;  %v12901_v56 = vpop.f32.mrf.mxu0  ;;  %13136 = vmatmul.mubr.msk.bf16.gmra.mxu0 %vm646_vm1, %v9123_v36  ;;  %v17908_v60 = vld [vmem:[#allocation89_spill] sm:$0xff]  ;;  %v7882_v39 = vld [vmem:[%s13372_s28 + $0x165] sm:$0xff]  ;;  %v7883_v36 = vld [vmem:[%s13372_s28 + $0x16d] sm:$0xff]  ;;  %v9125_v46 = vpack.c.bf16 %v9007_v51, %v9006_v57 }
 0x407   : > { %v12763_v31 = vpop.f32.mrf.mxu1  ;;  %12998 = vmatmul.mubr.msk.bf16.gmra.mxu1 %vm646_vm1, %v7997_v42  ;;  %13139 = vmatprep.mubr.msk.bf16.mxu0 %vm646_vm1, %v9124_v17  ;;  %v7881_v18 = vld [vmem:[%s13372_s28 + $0x15d] sm:$0xff]  ;;  %v17910_v42 = vld [vmem:[#allocation91_spill] sm:$0xff]  ;;  %v8000_v40 = vpack.c.bf16 %v7883_v36, %v7882_v39 }
 0x408   : > { %17905 = vst [vmem:[#allocation81_spill] sm:$0xff] %v16111_v20  ;;  %v16120_v23 = vadd.f32 %v7426_v47, %v6649_v3  ;;  %v6654_v62 = vadd.f32 %v12763_v31, %v17908_v60  ;;  %v7439_v28 = vpop.f32.mrf.mxu0  ;;  %13001 = vmatprep.mubr.msk.bf16.mxu1 %vm646_vm1, %v7998_v35  ;;  %v7999_v3 = vpack.c.bf16 %v7881_v18, %v7880_v54  ;;  %v17912_v35 = vld [vmem:[#allocation93_spill] sm:$0xff]  ;;  %v9012_v36 = vld [vmem:[%s13372_s28 + $0x186] sm:$0xff] }
 0x409   : > { %v6313_v9 = vpop.f32.mrf.mxu1  ;;  %v9126_v31 = vpack.c.bf16 %v9009_v29, %v9008_v43  ;;  %v9010_v18 = vld [vmem:[%s13372_s28 + $0x176] sm:$0xff]  ;;  %v9011_v43 = vld [vmem:[%s13372_s28 + $0x17e] sm:$0xff] }
 0x40a   : > { %17907 = vst [vmem:[#allocation83_spill] sm:$0xff] %v16120_v23  ;;  %v16129_v50 = vadd.f32 %v12901_v56, %v6654_v62  ;;  %v6652_v17 = vadd.f32 %v6313_v9, %v17910_v42  ;;  %v12902_v14 = vpop.f32.mrf.mxu0  ;;  %v17914_v62 = vld [vmem:[#allocation95_spill] sm:$0xff] }
 0x40b   : > { %v12764_v47 = vpop.f32.mrf.mxu1  ;;  %v9013_v42 = vld [vmem:[%s13372_s28 + $0x18e] sm:$0xff] }
 0x40c   : > { %17909 = vst [vmem:[#allocation85_spill] sm:$0xff] %v16129_v50  ;;  %v16132_v60 = vadd.f32 %v7439_v28, %v6652_v17  ;;  %v6655_v23 = vadd.f32 %v12764_v47, %v17912_v35  ;;  %v7442_v20 = vpop.f32.mrf.mxu0  ;;  %v7884_v28 = vld [vmem:[%s13372_s28 + $0x175] sm:$0xff] }
 0x40d   : > { %v6316_v63 = vpop.f32.mrf.mxu1 }
 0x40e   : > { %17911 = vst [vmem:[#allocation87_spill] sm:$0xff] %v16132_v60  ;;  %v16135_v56 = vadd.f32 %v12902_v14, %v6655_v23  ;;  %v6653_v57 = vadd.f32 %v6316_v63, %v17914_v62  ;;  %v12905_v51 = vpop.f32.mrf.mxu0  ;;  %13140 = vmatmul.mubr.msk.bf16.gmra.mxu0 %vm646_vm1, %v9125_v46  ;;  %v17916_v23 = vld [vmem:[#allocation97_spill] sm:$0xff]  ;;  %v7886_v14 = vld [vmem:[%s13372_s28 + $0x185] sm:$0xff]  ;;  %v7887_v46 = vld [vmem:[%s13372_s28 + $0x18d] sm:$0xff]  ;;  %v9127_v62 = vpack.c.bf16 %v9011_v43, %v9010_v18 }
 0x40f   : > { %v12767_v54 = vpop.f32.mrf.mxu1  ;;  %13002 = vmatmul.mubr.msk.bf16.gmra.mxu1 %vm646_vm1, %v7999_v3  ;;  %13143 = vmatprep.mubr.msk.bf16.mxu0 %vm646_vm1, %v9126_v31  ;;  %v7885_v63 = vld [vmem:[%s13372_s28 + $0x17d] sm:$0xff]  ;;  %v8002_v60 = vpack.c.bf16 %v7887_v46, %v7886_v14  ;;  %v9016_v46 = vld [vmem:[%s13372_s28 + $0x1a6] sm:$0xff] }
 0x410   : > { %17913 = vst [vmem:[#allocation89_spill] sm:$0xff] %v16135_v56  ;;  %v16144_v29 = vadd.f32 %v7442_v20, %v6653_v57  ;;  %v6658_v9 = vadd.f32 %v12767_v54, %v17916_v23  ;;  %v7455_v39 = vpop.f32.mrf.mxu0  ;;  %13005 = vmatprep.mubr.msk.bf16.mxu1 %vm646_vm1, %v8000_v40  ;;  %v17918_v3 = vld [vmem:[#allocation2_spill] sm:$0xff]  ;;  %v8001_v57 = vpack.c.bf16 %v7885_v63, %v7884_v28  ;;  %v17920_v40 = vld [vmem:[#allocation3_spill] sm:$0xff]  ;;  %v9014_v63 = vld [vmem:[%s13372_s28 + $0x196] sm:$0xff] }
 0x411   : > { %v6329_v17 = vpop.f32.mrf.mxu1  ;;  %v9128_v54 = vpack.c.bf16 %v9013_v42, %v9012_v36  ;;  %v9015_v36 = vld [vmem:[%s13372_s28 + $0x19e] sm:$0xff] }
 0x412   : > { %17915 = vst [vmem:[#allocation91_spill] sm:$0xff] %v16144_v29  ;;  %v16153_v47 = vadd.f32 %v12905_v51, %v6658_v9  ;;  %v6656_v31 = vadd.f32 %v6329_v17, %v17918_v3  ;;  %v12906_v35 = vpop.f32.mrf.mxu0  ;;  %v17922_v9 = vld [vmem:[#allocation4_spill] sm:$0xff] }
 0x413   : > { %v12768_v20 = vpop.f32.mrf.mxu1  ;;  %v9017_v3 = vld [vmem:[%s13372_s28 + $0x1ae] sm:$0xff] }
 0x414   : > { %17917 = vst [vmem:[#allocation93_spill] sm:$0xff] %v16153_v47  ;;  %v16156_v23 = vadd.f32 %v7455_v39, %v6656_v31  ;;  %v6659_v29 = vadd.f32 %v12768_v20, %v17920_v40  ;;  %v7458_v56 = vpop.f32.mrf.mxu0  ;;  %v7888_v39 = vld [vmem:[%s13372_s28 + $0x195] sm:$0xff] }
 0x415   : > { %v6332_v50 = vpop.f32.mrf.mxu1 }
 0x416   : > { %17919 = vst [vmem:[#allocation95_spill] sm:$0xff] %v16156_v23  ;;  %v16159_v51 = vadd.f32 %v12906_v35, %v6659_v29  ;;  %v6657_v18 = vadd.f32 %v6332_v50, %v17922_v9  ;;  %v12909_v43 = vpop.f32.mrf.mxu0  ;;  %13144 = vmatmul.mubr.msk.bf16.gmra.mxu0 %vm646_vm1, %v9127_v62  ;;  %v17924_v29 = vld [vmem:[#allocation5_spill] sm:$0xff]  ;;  %v7890_v35 = vld [vmem:[%s13372_s28 + $0x1a5] sm:$0xff]  ;;  %v7891_v62 = vld [vmem:[%s13372_s28 + $0x1ad] sm:$0xff]  ;;  %v9129_v9 = vpack.c.bf16 %v9015_v36, %v9014_v63 }
 0x417   : > { %v12771_v28 = vpop.f32.mrf.mxu1  ;;  %13006 = vmatmul.mubr.msk.bf16.gmra.mxu1 %vm646_vm1, %v8001_v57  ;;  %13147 = vmatprep.mubr.msk.bf16.mxu0 %vm646_vm1, %v9128_v54  ;;  %v7889_v50 = vld [vmem:[%s13372_s28 + $0x19d] sm:$0xff]  ;;  %v8004_v23 = vpack.c.bf16 %v7891_v62, %v7890_v35  ;;  %v9020_v62 = vld [vmem:[%s13372_s28 + $0x1c6] sm:$0xff] }
 0x418   : > { %17921 = vst [vmem:[#allocation97_spill] sm:$0xff] %v16159_v51  ;;  %v16168_v42 = vadd.f32 %v7458_v56, %v6657_v18  ;;  %v6662_v17 = vadd.f32 %v12771_v28, %v17924_v29  ;;  %v7471_v14 = vpop.f32.mrf.mxu0  ;;  %13009 = vmatprep.mubr.msk.bf16.mxu1 %vm646_vm1, %v8002_v60  ;;  %v17926_v57 = vld [vmem:[#allocation6_spill] sm:$0xff]  ;;  %v8003_v18 = vpack.c.bf16 %v7889_v50, %v7888_v39  ;;  %v17928_v60 = vld [vmem:[#allocation7_spill] sm:$0xff]  ;;  %v9018_v50 = vld [vmem:[%s13372_s28 + $0x1b6] sm:$0xff] }
 0x419   : > { %v6345_v31 = vpop.f32.mrf.mxu1  ;;  %v9130_v28 = vpack.c.bf16 %v9017_v3, %v9016_v46  ;;  %v9019_v46 = vld [vmem:[%s13372_s28 + $0x1be] sm:$0xff] }
 0x41a   : > { %17923 = vst [vmem:[#allocation2_spill] sm:$0xff] %v16168_v42  ;;  %v16177_v20 = vadd.f32 %v12909_v43, %v6662_v17  ;;  %v6660_v54 = vadd.f32 %v6345_v31, %v17926_v57  ;;  %v12910_v40 = vpop.f32.mrf.mxu0  ;;  %v17930_v17 = vld [vmem:[#allocation8_spill] sm:$0xff] }
 0x41b   : > { %v12772_v56 = vpop.f32.mrf.mxu1  ;;  %v9021_v57 = vld [vmem:[%s13372_s28 + $0x1ce] sm:$0xff] }
 0x41c   : > { %17925 = vst [vmem:[#allocation3_spill] sm:$0xff] %v16177_v20  ;;  %v16180_v29 = vadd.f32 %v7471_v14, %v6660_v54  ;;  %v6663_v42 = vadd.f32 %v12772_v56, %v17928_v60  ;;  %v7474_v51 = vpop.f32.mrf.mxu0  ;;  %v7892_v14 = vld [vmem:[%s13372_s28 + $0x1b5] sm:$0xff] }
 0x41d   : > { %v6348_v47 = vpop.f32.mrf.mxu1 }
 0x41e   : > { %17927 = vst [vmem:[#allocation4_spill] sm:$0xff] %v16180_v29  ;;  %v16183_v43 = vadd.f32 %v12910_v40, %v6663_v42  ;;  %v6661_v63 = vadd.f32 %v6348_v47, %v17930_v17  ;;  %v12913_v36 = vpop.f32.mrf.mxu0  ;;  %13148 = vmatmul.mubr.msk.bf16.gmra.mxu0 %vm646_vm1, %v9129_v9  ;;  %v17932_v42 = vld [vmem:[#allocation9_spill] sm:$0xff]  ;;  %v7894_v40 = vld [vmem:[%s13372_s28 + $0x1c5] sm:$0xff]  ;;  %v7895_v9 = vld [vmem:[%s13372_s28 + $0x1cd] sm:$0xff]  ;;  %v9131_v17 = vpack.c.bf16 %v9019_v46, %v9018_v50 }
 0x41f   : > { %v12775_v39 = vpop.f32.mrf.mxu1  ;;  %13010 = vmatmul.mubr.msk.bf16.gmra.mxu1 %vm646_vm1, %v8003_v18  ;;  %13151 = vmatprep.mubr.msk.bf16.mxu0 %vm646_vm1, %v9130_v28  ;;  %v7893_v47 = vld [vmem:[%s13372_s28 + $0x1bd] sm:$0xff]  ;;  %v8006_v29 = vpack.c.bf16 %v7895_v9, %v7894_v40  ;;  %v9024_v9 = vld [vmem:[%s13372_s28 + $0x1e6] sm:$0xff] }
 0x420   : > { %17929 = vst [vmem:[#allocation5_spill] sm:$0xff] %v16183_v43  ;;  %v16192_v3 = vadd.f32 %v7474_v51, %v6661_v63  ;;  %v6666_v31 = vadd.f32 %v12775_v39, %v17932_v42  ;;  %v7487_v35 = vpop.f32.mrf.mxu0  ;;  %13013 = vmatprep.mubr.msk.bf16.mxu1 %vm646_vm1, %v8004_v23  ;;  %v17934_v18 = vld [vmem:[#allocation10_spill] sm:$0xff]  ;;  %v8005_v63 = vpack.c.bf16 %v7893_v47, %v7892_v14  ;;  %v17936_v23 = vld [vmem:[#allocation11_spill] sm:$0xff]  ;;  %v9022_v47 = vld [vmem:[%s13372_s28 + $0x1d6] sm:$0xff] }
 0x421   : > { %v6361_v54 = vpop.f32.mrf.mxu1  ;;  %v9132_v39 = vpack.c.bf16 %v9021_v57, %v9020_v62  ;;  %v9023_v62 = vld [vmem:[%s13372_s28 + $0x1de] sm:$0xff] }
 0x422   : > { %17931 = vst [vmem:[#allocation6_spill] sm:$0xff] %v16192_v3  ;;  %v16201_v56 = vadd.f32 %v12913_v36, %v6666_v31  ;;  %v6664_v28 = vadd.f32 %v6361_v54, %v17934_v18  ;;  %v12914_v60 = vpop.f32.mrf.mxu0  ;;  %v17938_v31 = vld [vmem:[#allocation12_spill] sm:$0xff] }
 0x423   : > { %v12776_v51 = vpop.f32.mrf.mxu1  ;;  %v9025_v18 = vld [vmem:[%s13372_s28 + $0x1ee] sm:$0xff] }
 0x424   : > { %17933 = vst [vmem:[#allocation7_spill] sm:$0xff] %v16201_v56  ;;  %v16204_v42 = vadd.f32 %v7487_v35, %v6664_v28  ;;  %v6667_v3 = vadd.f32 %v12776_v51, %v17936_v23  ;;  %v7490_v43 = vpop.f32.mrf.mxu0  ;;  %v7896_v35 = vld [vmem:[%s13372_s28 + $0x1d5] sm:$0xff] }
 0x425   : > { %v6364_v20 = vpop.f32.mrf.mxu1 }
 0x426   : > { %17935 = vst [vmem:[#allocation8_spill] sm:$0xff] %v16204_v42  ;;  %v16207_v36 = vadd.f32 %v12914_v60, %v6667_v3  ;;  %v6665_v50 = vadd.f32 %v6364_v20, %v17938_v31  ;;  %v12917_v46 = vpop.f32.mrf.mxu0  ;;  %13152 = vmatmul.mubr.msk.bf16.gmra.mxu0 %vm646_vm1, %v9131_v17  ;;  %v17940_v3 = vld [vmem:[#allocation13_spill] sm:$0xff]  ;;  %v7898_v60 = vld [vmem:[%s13372_s28 + $0x1e5] sm:$0xff]  ;;  %v7899_v17 = vld [vmem:[%s13372_s28 + $0x1ed] sm:$0xff]  ;;  %v9133_v31 = vpack.c.bf16 %v9023_v62, %v9022_v47 }
 0x427   : > { %v12779_v14 = vpop.f32.mrf.mxu1  ;;  %13014 = vmatmul.mubr.msk.bf16.gmra.mxu1 %vm646_vm1, %v8005_v63  ;;  %13155 = vmatprep.mubr.msk.bf16.mxu0 %vm646_vm1, %v9132_v39  ;;  %v7897_v20 = vld [vmem:[%s13372_s28 + $0x1dd] sm:$0xff]  ;;  %v8008_v42 = vpack.c.bf16 %v7899_v17, %v7898_v60  ;;  %v9028_v17 = vld [vmem:[%s13372_s28 + $0x206] sm:$0xff] }
 0x428   : > { %17937 = vst [vmem:[#allocation9_spill] sm:$0xff] %v16207_v36  ;;  %v16216_v57 = vadd.f32 %v7490_v43, %v6665_v50  ;;  %v6670_v54 = vadd.f32 %v12779_v14, %v17940_v3  ;;  %v7503_v40 = vpop.f32.mrf.mxu0  ;;  %13017 = vmatprep.mubr.msk.bf16.mxu1 %vm646_vm1, %v8006_v29  ;;  %v17942_v63 = vld [vmem:[#allocation14_spill] sm:$0xff]  ;;  %v8007_v50 = vpack.c.bf16 %v7897_v20, %v7896_v35  ;;  %v17944_v29 = vld [vmem:[#allocation15_spill] sm:$0xff]  ;;  %v9026_v20 = vld [vmem:[%s13372_s28 + $0x1f6] sm:$0xff] }
 0x429   : > { %v6377_v28 = vpop.f32.mrf.mxu1  ;;  %v9134_v14 = vpack.c.bf16 %v9025_v18, %v9024_v9  ;;  %v9027_v9 = vld [vmem:[%s13372_s28 + $0x1fe] sm:$0xff] }
 0x42a   : > { %17939 = vst [vmem:[#allocation10_spill] sm:$0xff] %v16216_v57  ;;  %v16225_v51 = vadd.f32 %v12917_v46, %v6670_v54  ;;  %v6668_v39 = vadd.f32 %v6377_v28, %v17942_v63  ;;  %v12918_v23 = vpop.f32.mrf.mxu0  ;;  %v17946_v54 = vld [vmem:[#allocation16_spill] sm:$0xff] }
 0x42b   : > { %v12780_v43 = vpop.f32.mrf.mxu1  ;;  %v9029_v63 = vld [vmem:[%s13372_s28 + $0x20e] sm:$0xff] }
 0x42c   : > { %17941 = vst [vmem:[#allocation11_spill] sm:$0xff] %v16225_v51  ;;  %v16228_v3 = vadd.f32 %v7503_v40, %v6668_v39  ;;  %v6671_v57 = vadd.f32 %v12780_v43, %v17944_v29  ;;  %v7506_v36 = vpop.f32.mrf.mxu0  ;;  %v7900_v40 = vld [vmem:[%s13372_s28 + $0x1f5] sm:$0xff] }
 0x42d   : > { %v6380_v56 = vpop.f32.mrf.mxu1 }
 0x42e   : > { %17943 = vst [vmem:[#allocation12_spill] sm:$0xff] %v16228_v3  ;;  %v16231_v46 = vadd.f32 %v12918_v23, %v6671_v57  ;;  %v6669_v47 = vadd.f32 %v6380_v56, %v17946_v54  ;;  %v12921_v62 = vpop.f32.mrf.mxu0  ;;  %13156 = vmatmul.mubr.msk.bf16.gmra.mxu0 %vm646_vm1, %v9133_v31  ;;  %v17948_v57 = vld [vmem:[#allocation17_spill] sm:$0xff]  ;;  %v7902_v23 = vld [vmem:[%s13372_s28 + $0x205] sm:$0xff]  ;;  %v7903_v31 = vld [vmem:[%s13372_s28 + $0x20d] sm:$0xff]  ;;  %v9135_v54 = vpack.c.bf16 %v9027_v9, %v9026_v20 }
 0x42f   : > { %v12783_v35 = vpop.f32.mrf.mxu1  ;;  %13018 = vmatmul.mubr.msk.bf16.gmra.mxu1 %vm646_vm1, %v8007_v50  ;;  %13159 = vmatprep.mubr.msk.bf16.mxu0 %vm646_vm1, %v9134_v14  ;;  %v7901_v56 = vld [vmem:[%s13372_s28 + $0x1fd] sm:$0xff]  ;;  %v8010_v3 = vpack.c.bf16 %v7903_v31, %v7902_v23  ;;  %v9032_v31 = vld [vmem:[%s13372_s28 + $0x226] sm:$0xff] }
 0x430   : > { %17945 = vst [vmem:[#allocation13_spill] sm:$0xff] %v16231_v46  ;;  %v16240_v18 = vadd.f32 %v7506_v36, %v6669_v47  ;;  %v6674_v28 = vadd.f32 %v12783_v35, %v17948_v57  ;;  %v7519_v60 = vpop.f32.mrf.mxu0  ;;  %13021 = vmatprep.mubr.msk.bf16.mxu1 %vm646_vm1, %v8008_v42  ;;  %v17950_v50 = vld [vmem:[#allocation18_spill] sm:$0xff]  ;;  %v8009_v47 = vpack.c.bf16 %v7901_v56, %v7900_v40  ;;  %v17952_v42 = vld [vmem:[#allocation19_spill] sm:$0xff]  ;;  %v9030_v56 = vld [vmem:[%s13372_s28 + $0x216] sm:$0xff] }
 0x431   : > { %v6393_v39 = vpop.f32.mrf.mxu1  ;;  %v9136_v35 = vpack.c.bf16 %v9029_v63, %v9028_v17  ;;  %v9031_v17 = vld [vmem:[%s13372_s28 + $0x21e] sm:$0xff] }
 0x432   : > { %17947 = vst [vmem:[#allocation14_spill] sm:$0xff] %v16240_v18  ;;  %v16249_v43 = vadd.f32 %v12921_v62, %v6674_v28  ;;  %v6672_v14 = vadd.f32 %v6393_v39, %v17950_v50  ;;  %v12922_v29 = vpop.f32.mrf.mxu0  ;;  %v17954_v28 = vld [vmem:[#allocation20_spill] sm:$0xff] }
 0x433   : > { %v12784_v36 = vpop.f32.mrf.mxu1  ;;  %v9033_v50 = vld [vmem:[%s13372_s28 + $0x22e] sm:$0xff] }
 0x434   : > { %17949 = vst [vmem:[#allocation15_spill] sm:$0xff] %v16249_v43  ;;  %v16252_v57 = vadd.f32 %v7519_v60, %v6672_v14  ;;  %v6675_v18 = vadd.f32 %v12784_v36, %v17952_v42  ;;  %v7522_v46 = vpop.f32.mrf.mxu0  ;;  %v7904_v60 = vld [vmem:[%s13372_s28 + $0x215] sm:$0xff] }
 0x435   : > { %v6396_v51 = vpop.f32.mrf.mxu1 }
 0x436   : > { %17951 = vst [vmem:[#allocation16_spill] sm:$0xff] %v16252_v57  ;;  %v16255_v62 = vadd.f32 %v12922_v29, %v6675_v18  ;;  %v6673_v20 = vadd.f32 %v6396_v51, %v17954_v28  ;;  %v12925_v9 = vpop.f32.mrf.mxu0  ;;  %13160 = vmatmul.mubr.msk.bf16.gmra.mxu0 %vm646_vm1, %v9135_v54  ;;  %v17956_v18 = vld [vmem:[#allocation21_spill] sm:$0xff]  ;;  %v7906_v29 = vld [vmem:[%s13372_s28 + $0x225] sm:$0xff]  ;;  %v7907_v54 = vld [vmem:[%s13372_s28 + $0x22d] sm:$0xff]  ;;  %v9137_v28 = vpack.c.bf16 %v9031_v17, %v9030_v56 }
 0x437   : > { %v12787_v40 = vpop.f32.mrf.mxu1  ;;  %13022 = vmatmul.mubr.msk.bf16.gmra.mxu1 %vm646_vm1, %v8009_v47  ;;  %13163 = vmatprep.mubr.msk.bf16.mxu0 %vm646_vm1, %v9136_v35  ;;  %v7905_v51 = vld [vmem:[%s13372_s28 + $0x21d] sm:$0xff]  ;;  %v8012_v57 = vpack.c.bf16 %v7907_v54, %v7906_v29  ;;  %v9036_v54 = vld [vmem:[%s13372_s28 + $0x246] sm:$0xff] }
 0x438   : > { %17953 = vst [vmem:[#allocation17_spill] sm:$0xff] %v16255_v62  ;;  %v16264_v63 = vadd.f32 %v7522_v46, %v6673_v20  ;;  %v6678_v39 = vadd.f32 %v12787_v40, %v17956_v18  ;;  %v7535_v23 = vpop.f32.mrf.mxu0  ;;  %13025 = vmatprep.mubr.msk.bf16.mxu1 %vm646_vm1, %v8010_v3  ;;  %v17958_v47 = vld [vmem:[#allocation22_spill] sm:$0xff]  ;;  %v8011_v20 = vpack.c.bf16 %v7905_v51, %v7904_v60  ;;  %v17960_v3 = vld [vmem:[#allocation23_spill] sm:$0xff]  ;;  %v9034_v51 = vld [vmem:[%s13372_s28 + $0x236] sm:$0xff] }
 0x439   : > { %v6409_v14 = vpop.f32.mrf.mxu1  ;;  %v9138_v40 = vpack.c.bf16 %v9033_v50, %v9032_v31  ;;  %v9035_v31 = vld [vmem:[%s13372_s28 + $0x23e] sm:$0xff] }
 0x43a   : > { %17955 = vst [vmem:[#allocation18_spill] sm:$0xff] %v16264_v63  ;;  %v16273_v36 = vadd.f32 %v12925_v9, %v6678_v39  ;;  %v6676_v35 = vadd.f32 %v6409_v14, %v17958_v47  ;;  %v12926_v42 = vpop.f32.mrf.mxu0  ;;  %v17962_v39 = vld [vmem:[#allocation24_spill] sm:$0xff] }
 0x43b   : > { %v12788_v46 = vpop.f32.mrf.mxu1  ;;  %v9037_v47 = vld [vmem:[%s13372_s28 + $0x24e] sm:$0xff] }
 0x43c   : > { %17957 = vst [vmem:[#allocation19_spill] sm:$0xff] %v16273_v36  ;;  %v16276_v18 = vadd.f32 %v7535_v23, %v6676_v35  ;;  %v6679_v63 = vadd.f32 %v12788_v46, %v17960_v3  ;;  %v7538_v62 = vpop.f32.mrf.mxu0  ;;  %v7908_v23 = vld [vmem:[%s13372_s28 + $0x235] sm:$0xff] }
 0x43d   : > { %v6412_v43 = vpop.f32.mrf.mxu1 }
 0x43e   : > { %17959 = vst [vmem:[#allocation20_spill] sm:$0xff] %v16276_v18  ;;  %v16279_v9 = vadd.f32 %v12926_v42, %v6679_v63  ;;  %v6677_v56 = vadd.f32 %v6412_v43, %v17962_v39  ;;  %v12929_v17 = vpop.f32.mrf.mxu0  ;;  %13164 = vmatmul.mubr.msk.bf16.gmra.mxu0 %vm646_vm1, %v9137_v28  ;;  %v17964_v63 = vld [vmem:[#allocation25_spill] sm:$0xff]  ;;  %v7910_v42 = vld [vmem:[%s13372_s28 + $0x245] sm:$0xff]  ;;  %v7911_v28 = vld [vmem:[%s13372_s28 + $0x24d] sm:$0xff]  ;;  %v9139_v39 = vpack.c.bf16 %v9035_v31, %v9034_v51 }
 0x43f   : > { %v12791_v60 = vpop.f32.mrf.mxu1  ;;  %13026 = vmatmul.mubr.msk.bf16.gmra.mxu1 %vm646_vm1, %v8011_v20  ;;  %13167 = vmatprep.mubr.msk.bf16.mxu0 %vm646_vm1, %v9138_v40  ;;  %v7909_v43 = vld [vmem:[%s13372_s28 + $0x23d] sm:$0xff]  ;;  %v8014_v18 = vpack.c.bf16 %v7911_v28, %v7910_v42  ;;  %v9040_v28 = vld [vmem:[%s13372_s28 + $0x266] sm:$0xff] }
 0x440   : > { %17961 = vst [vmem:[#allocation21_spill] sm:$0xff] %v16279_v9  ;;  %v16288_v50 = vadd.f32 %v7538_v62, %v6677_v56  ;;  %v6682_v14 = vadd.f32 %v12791_v60, %v17964_v63  ;;  %v7551_v29 = vpop.f32.mrf.mxu0  ;;  %13029 = vmatprep.mubr.msk.bf16.mxu1 %vm646_vm1, %v8012_v57  ;;  %v17966_v20 = vld [vmem:[#allocation26_spill] sm:$0xff]  ;;  %v8013_v56 = vpack.c.bf16 %v7909_v43, %v7908_v23  ;;  %v17968_v57 = vld [vmem:[#allocation27_spill] sm:$0xff]  ;;  %v9038_v43 = vld [vmem:[%s13372_s28 + $0x256] sm:$0xff] }
 0x441   : > { %v6425_v35 = vpop.f32.mrf.mxu1  ;;  %v9140_v60 = vpack.c.bf16 %v9037_v47, %v9036_v54  ;;  %v9039_v54 = vld [vmem:[%s13372_s28 + $0x25e] sm:$0xff] }
 0x442   : > { %17963 = vst [vmem:[#allocation22_spill] sm:$0xff] %v16288_v50  ;;  %v16297_v46 = vadd.f32 %v12929_v17, %v6682_v14  ;;  %v6680_v40 = vadd.f32 %v6425_v35, %v17966_v20  ;;  %v12930_v3 = vpop.f32.mrf.mxu0  ;;  %v17970_v14 = vld [vmem:[#allocation28_spill] sm:$0xff] }
 0x443   : > { %v12792_v62 = vpop.f32.mrf.mxu1  ;;  %v9041_v20 = vld [vmem:[%s13372_s28 + $0x26e] sm:$0xff] }
 0x444   : > { %17965 = vst [vmem:[#allocation23_spill] sm:$0xff] %v16297_v46  ;;  %v16300_v63 = vadd.f32 %v7551_v29, %v6680_v40  ;;  %v6683_v50 = vadd.f32 %v12792_v62, %v17968_v57  ;;  %v7554_v9 = vpop.f32.mrf.mxu0  ;;  %v7912_v29 = vld [vmem:[%s13372_s28 + $0x255] sm:$0xff] }
 0x445   : > { %v6428_v36 = vpop.f32.mrf.mxu1 }
 0x446   : > { %17967 = vst [vmem:[#allocation24_spill] sm:$0xff] %v16300_v63  ;;  %v16303_v17 = vadd.f32 %v12930_v3, %v6683_v50  ;;  %v6681_v51 = vadd.f32 %v6428_v36, %v17970_v14  ;;  %v12933_v31 = vpop.f32.mrf.mxu0  ;;  %13168 = vmatmul.mubr.msk.bf16.gmra.mxu0 %vm646_vm1, %v9139_v39  ;;  %v17972_v50 = vld [vmem:[#allocation29_spill] sm:$0xff]  ;;  %v7914_v3 = vld [vmem:[%s13372_s28 + $0x265] sm:$0xff]  ;;  %v7915_v39 = vld [vmem:[%s13372_s28 + $0x26d] sm:$0xff]  ;;  %v9141_v14 = vpack.c.bf16 %v9039_v54, %v9038_v43 }
 0x447   : > { %v12795_v23 = vpop.f32.mrf.mxu1  ;;  %13030 = vmatmul.mubr.msk.bf16.gmra.mxu1 %vm646_vm1, %v8013_v56  ;;  %13171 = vmatprep.mubr.msk.bf16.mxu0 %vm646_vm1, %v9140_v60  ;;  %v7913_v36 = vld [vmem:[%s13372_s28 + $0x25d] sm:$0xff]  ;;  %v8016_v63 = vpack.c.bf16 %v7915_v39, %v7914_v3  ;;  %v9044_v39 = vld [vmem:[%s13372_s28 + $0x286] sm:$0xff] }
 0x448   : > { %17969 = vst [vmem:[#allocation25_spill] sm:$0xff] %v16303_v17  ;;  %v16312_v47 = vadd.f32 %v7554_v9, %v6681_v51  ;;  %v6686_v35 = vadd.f32 %v12795_v23, %v17972_v50  ;;  %v7567_v42 = vpop.f32.mrf.mxu0  ;;  %13033 = vmatprep.mubr.msk.bf16.mxu1 %vm646_vm1, %v8014_v18  ;;  %v17974_v56 = vld [vmem:[#allocation30_spill] sm:$0xff]  ;;  %v8015_v51 = vpack.c.bf16 %v7913_v36, %v7912_v29  ;;  %v17976_v18 = vld [vmem:[#allocation31_spill] sm:$0xff]  ;;  %v9042_v36 = vld [vmem:[%s13372_s28 + $0x276] sm:$0xff] }
 0x449   : > { %v6441_v40 = vpop.f32.mrf.mxu1  ;;  %v9142_v23 = vpack.c.bf16 %v9041_v20, %v9040_v28  ;;  %v9043_v28 = vld [vmem:[%s13372_s28 + $0x27e] sm:$0xff] }
 0x44a   : > { %17971 = vst [vmem:[#allocation26_spill] sm:$0xff] %v16312_v47  ;;  %v16321_v62 = vadd.f32 %v12933_v31, %v6686_v35  ;;  %v6684_v60 = vadd.f32 %v6441_v40, %v17974_v56  ;;  %v12934_v57 = vpop.f32.mrf.mxu0  ;;  %v17978_v35 = vld [vmem:[#allocation32_spill] sm:$0xff] }
 0x44b   : > { %v12796_v9 = vpop.f32.mrf.mxu1  ;;  %v9045_v56 = vld [vmem:[%s13372_s28 + $0x28e] sm:$0xff] }
 0x44c   : > { %17973 = vst [vmem:[#allocation27_spill] sm:$0xff] %v16321_v62  ;;  %v16324_v50 = vadd.f32 %v7567_v42, %v6684_v60  ;;  %v6687_v47 = vadd.f32 %v12796_v9, %v17976_v18  ;;  %v7570_v17 = vpop.f32.mrf.mxu0  ;;  %v7916_v42 = vld [vmem:[%s13372_s28 + $0x275] sm:$0xff] }
 0x44d   : > { %v6444_v46 = vpop.f32.mrf.mxu1 }
 0x44e   : > { %17975 = vst [vmem:[#allocation28_spill] sm:$0xff] %v16324_v50  ;;  %v16327_v31 = vadd.f32 %v12934_v57, %v6687_v47  ;;  %v6685_v43 = vadd.f32 %v6444_v46, %v17978_v35  ;;  %v12937_v54 = vpop.f32.mrf.mxu0  ;;  %13172 = vmatmul.mubr.msk.bf16.gmra.mxu0 %vm646_vm1, %v9141_v14  ;;  %v17980_v47 = vld [vmem:[#allocation33_spill] sm:$0xff]  ;;  %v7918_v57 = vld [vmem:[%s13372_s28 + $0x285] sm:$0xff]  ;;  %v7919_v14 = vld [vmem:[%s13372_s28 + $0x28d] sm:$0xff]  ;;  %v9143_v35 = vpack.c.bf16 %v9043_v28, %v9042_v36 }
 0x44f   : > { %v12799_v29 = vpop.f32.mrf.mxu1  ;;  %13034 = vmatmul.mubr.msk.bf16.gmra.mxu1 %vm646_vm1, %v8015_v51  ;;  %13175 = vmatprep.mubr.msk.bf16.mxu0 %vm646_vm1, %v9142_v23  ;;  %v7917_v46 = vld [vmem:[%s13372_s28 + $0x27d] sm:$0xff]  ;;  %v8018_v50 = vpack.c.bf16 %v7919_v14, %v7918_v57  ;;  %v9048_v14 = vld [vmem:[%s13372_s28 + $0x2a6] sm:$0xff] }
 0x450   : > { %17977 = vst [vmem:[#allocation29_spill] sm:$0xff] %v16327_v31  ;;  %v16336_v20 = vadd.f32 %v7570_v17, %v6685_v43  ;;  %v6690_v40 = vadd.f32 %v12799_v29, %v17980_v47  ;;  %v7583_v3 = vpop.f32.mrf.mxu0  ;;  %13037 = vmatprep.mubr.msk.bf16.mxu1 %vm646_vm1, %v8016_v63  ;;  %v17982_v51 = vld [vmem:[#allocation34_spill] sm:$0xff]  ;;  %v8017_v43 = vpack.c.bf16 %v7917_v46, %v7916_v42  ;;  %v17984_v63 = vld [vmem:[#allocation35_spill] sm:$0xff]  ;;  %v9046_v46 = vld [vmem:[%s13372_s28 + $0x296] sm:$0xff] }
 0x451   : > { %v6457_v60 = vpop.f32.mrf.mxu1  ;;  %v9144_v29 = vpack.c.bf16 %v9045_v56, %v9044_v39  ;;  %v9047_v39 = vld [vmem:[%s13372_s28 + $0x29e] sm:$0xff] }
 0x452   : > { %17979 = vst [vmem:[#allocation30_spill] sm:$0xff] %v16336_v20  ;;  %v16345_v9 = vadd.f32 %v12937_v54, %v6690_v40  ;;  %v6688_v23 = vadd.f32 %v6457_v60, %v17982_v51  ;;  %v12938_v18 = vpop.f32.mrf.mxu0  ;;  %v17986_v40 = vld [vmem:[#allocation36_spill] sm:$0xff] }
 0x453   : > { %v12800_v17 = vpop.f32.mrf.mxu1  ;;  %v9049_v51 = vld [vmem:[%s13372_s28 + $0x2ae] sm:$0xff] }
 0x454   : > { %17981 = vst [vmem:[#allocation31_spill] sm:$0xff] %v16345_v9  ;;  %v16348_v47 = vadd.f32 %v7583_v3, %v6688_v23  ;;  %v6691_v20 = vadd.f32 %v12800_v17, %v17984_v63  ;;  %v7586_v31 = vpop.f32.mrf.mxu0  ;;  %v7920_v3 = vld [vmem:[%s13372_s28 + $0x295] sm:$0xff] }
 0x455   : > { %v6460_v62 = vpop.f32.mrf.mxu1 }
 0x456   : > { %17983 = vst [vmem:[#allocation32_spill] sm:$0xff] %v16348_v47  ;;  %v16351_v54 = vadd.f32 %v12938_v18, %v6691_v20  ;;  %v6689_v36 = vadd.f32 %v6460_v62, %v17986_v40  ;;  %v12941_v28 = vpop.f32.mrf.mxu0  ;;  %13176 = vmatmul.mubr.msk.bf16.gmra.mxu0 %vm646_vm1, %v9143_v35  ;;  %v17988_v20 = vld [vmem:[#allocation37_spill] sm:$0xff]  ;;  %v7922_v18 = vld [vmem:[%s13372_s28 + $0x2a5] sm:$0xff]  ;;  %v7923_v35 = vld [vmem:[%s13372_s28 + $0x2ad] sm:$0xff]  ;;  %v9145_v40 = vpack.c.bf16 %v9047_v39, %v9046_v46 }
 0x457   : > { %v12803_v42 = vpop.f32.mrf.mxu1  ;;  %13038 = vmatmul.mubr.msk.bf16.gmra.mxu1 %vm646_vm1, %v8017_v43  ;;  %13179 = vmatprep.mubr.msk.bf16.mxu0 %vm646_vm1, %v9144_v29  ;;  %v7921_v62 = vld [vmem:[%s13372_s28 + $0x29d] sm:$0xff]  ;;  %v8020_v47 = vpack.c.bf16 %v7923_v35, %v7922_v18  ;;  %v9052_v35 = vld [vmem:[%s13372_s28 + $0x2c6] sm:$0xff] }
 0x458   : > { %17985 = vst [vmem:[#allocation33_spill] sm:$0xff] %v16351_v54  ;;  %v16360_v56 = vadd.f32 %v7586_v31, %v6689_v36  ;;  %v6694_v60 = vadd.f32 %v12803_v42, %v17988_v20  ;;  %v7599_v57 = vpop.f32.mrf.mxu0  ;;  %13041 = vmatprep.mubr.msk.bf16.mxu1 %vm646_vm1, %v8018_v50  ;;  %v17990_v43 = vld [vmem:[#allocation38_spill] sm:$0xff]  ;;  %v8019_v36 = vpack.c.bf16 %v7921_v62, %v7920_v3  ;;  %v17992_v50 = vld [vmem:[#allocation39_spill] sm:$0xff]  ;;  %v9050_v62 = vld [vmem:[%s13372_s28 + $0x2b6] sm:$0xff] }
 0x459   : > { %v6473_v23 = vpop.f32.mrf.mxu1  ;;  %v9146_v42 = vpack.c.bf16 %v9049_v51, %v9048_v14  ;;  %v9051_v14 = vld [vmem:[%s13372_s28 + $0x2be] sm:$0xff] }
 0x45a   : > { %17987 = vst [vmem:[#allocation34_spill] sm:$0xff] %v16360_v56  ;;  %v16369_v17 = vadd.f32 %v12941_v28, %v6694_v60  ;;  %v6692_v29 = vadd.f32 %v6473_v23, %v17990_v43  ;;  %v12942_v63 = vpop.f32.mrf.mxu0  ;;  %v17994_v60 = vld [vmem:[#allocation40_spill] sm:$0xff] }
 0x45b   : > { %v12804_v31 = vpop.f32.mrf.mxu1  ;;  %v9053_v43 = vld [vmem:[%s13372_s28 + $0x2ce] sm:$0xff] }
 0x45c   : > { %17989 = vst [vmem:[#allocation35_spill] sm:$0xff] %v16369_v17  ;;  %v16372_v20 = vadd.f32 %v7599_v57, %v6692_v29  ;;  %v6695_v56 = vadd.f32 %v12804_v31, %v17992_v50  ;;  %v7602_v54 = vpop.f32.mrf.mxu0  ;;  %v7924_v57 = vld [vmem:[%s13372_s28 + $0x2b5] sm:$0xff] }
 0x45d   : > { %v6476_v9 = vpop.f32.mrf.mxu1 }
 0x45e   : > { %17991 = vst [vmem:[#allocation36_spill] sm:$0xff] %v16372_v20  ;;  %v16375_v28 = vadd.f32 %v12942_v63, %v6695_v56  ;;  %v6693_v46 = vadd.f32 %v6476_v9, %v17994_v60  ;;  %v12945_v39 = vpop.f32.mrf.mxu0  ;;  %13180 = vmatmul.mubr.msk.bf16.gmra.mxu0 %vm646_vm1, %v9145_v40  ;;  %v17996_v56 = vld [vmem:[#allocation42_spill] sm:$0xff]  ;;  %v7927_v40 = vld [vmem:[%s13372_s28 + $0x2cd] sm:$0xff]  ;;  %v9147_v60 = vpack.c.bf16 %v9051_v14, %v9050_v62 }
 0x45f   : > { %v12807_v3 = vpop.f32.mrf.mxu1  ;;  %13042 = vmatmul.mubr.msk.bf16.gmra.mxu1 %vm646_vm1, %v8019_v36  ;;  %13183 = vmatprep.mubr.msk.bf16.mxu0 %vm646_vm1, %v9146_v42  ;;  %v7925_v9 = vld [vmem:[%s13372_s28 + $0x2bd] sm:$0xff]  ;;  %v7926_v63 = vld [vmem:[%s13372_s28 + $0x2c5] sm:$0xff]  ;;  %v17998_v36 = vld [vmem:[#allocation44_spill] sm:$0xff] }
 0x460   : > { %17993 = vst [vmem:[#allocation37_spill] sm:$0xff] %v16375_v28  ;;  %v16384_v51 = vadd.f32 %v7602_v54, %v6693_v46  ;;  %v6698_v23 = vadd.f32 %v12807_v3, %v17996_v56  ;;  %v7615_v18 = vpop.f32.mrf.mxu0  ;;  %13045 = vmatprep.mubr.msk.bf16.mxu1 %vm646_vm1, %v8020_v47  ;;  %v8021_v46 = vpack.c.bf16 %v7925_v9, %v7924_v57  ;;  %v18000_v47 = vld [vmem:[#allocation46_spill] sm:$0xff]  ;;  %v9054_v9 = vld [vmem:[%s13372_s28 + $0x2d6] sm:$0xff] }
 0x461   : > { %v6489_v29 = vpop.f32.mrf.mxu1  ;;  %v9148_v3 = vpack.c.bf16 %v9053_v43, %v9052_v35  ;;  %v8022_v20 = vpack.c.bf16 %v7927_v40, %v7926_v63  ;;  %v9055_v35 = vld [vmem:[%s13372_s28 + $0x2de] sm:$0xff]  ;;  %v9056_v40 = vld [vmem:[%s13372_s28 + $0x2e6] sm:$0xff] }
 0x462   : > { %17995 = vst [vmem:[#allocation38_spill] sm:$0xff] %v16384_v51  ;;  %v16393_v31 = vadd.f32 %v12945_v39, %v6698_v23  ;;  %v6696_v42 = vadd.f32 %v6489_v29, %v17998_v36  ;;  %v12946_v50 = vpop.f32.mrf.mxu0  ;;  %v18002_v23 = vld [vmem:[#allocation48_spill] sm:$0xff] }
 0x463   : > { %v12808_v54 = vpop.f32.mrf.mxu1  ;;  %v9057_v36 = vld [vmem:[%s13372_s28 + $0x2ee] sm:$0xff] }
 0x464   : > { %17997 = vst [vmem:[#allocation39_spill] sm:$0xff] %v16393_v31  ;;  %v16396_v56 = vadd.f32 %v7615_v18, %v6696_v42  ;;  %v6699_v51 = vadd.f32 %v12808_v54, %v18000_v47  ;;  %v7618_v28 = vpop.f32.mrf.mxu0  ;;  %v7928_v18 = vld [vmem:[%s13372_s28 + $0x2d5] sm:$0xff] }
 0x465   : > { %v6492_v17 = vpop.f32.mrf.mxu1 }
 0x466   : > { %17999 = vst [vmem:[#allocation40_spill] sm:$0xff] %v16396_v56  ;;  %v16399_v39 = vadd.f32 %v12946_v50, %v6699_v51  ;;  %v6697_v62 = vadd.f32 %v6492_v17, %v18002_v23  ;;  %v12949_v14 = vpop.f32.mrf.mxu0  ;;  %13184 = vmatmul.mubr.msk.bf16.gmra.mxu0 %vm646_vm1, %v9147_v60  ;;  %v18004_v51 = vld [vmem:[#allocation50_spill] sm:$0xff]  ;;  %v7931_v60 = vld [vmem:[%s13372_s28 + $0x2ed] sm:$0xff]  ;;  %v9149_v23 = vpack.c.bf16 %v9055_v35, %v9054_v9 }
 0x467   : > { %v12811_v57 = vpop.f32.mrf.mxu1  ;;  %13046 = vmatmul.mubr.msk.bf16.gmra.mxu1 %vm646_vm1, %v8021_v46  ;;  %13187 = vmatprep.mubr.msk.bf16.mxu0 %vm646_vm1, %v9148_v3  ;;  %v7929_v17 = vld [vmem:[%s13372_s28 + $0x2dd] sm:$0xff]  ;;  %v7930_v50 = vld [vmem:[%s13372_s28 + $0x2e5] sm:$0xff]  ;;  %v18006_v46 = vld [vmem:[#allocation100_spill] sm:$0xff] }
 0x468   : > { %18001 = vst [vmem:[#allocation42_spill] sm:$0xff] %v16399_v39  ;;  %v16408_v43 = vadd.f32 %v7618_v28, %v6697_v62  ;;  %v6702_v29 = vadd.f32 %v12811_v57, %v18004_v51  ;;  %v7631_v63 = vpop.f32.mrf.mxu0  ;;  %13049 = vmatprep.mubr.msk.bf16.mxu1 %vm646_vm1, %v8022_v20  ;;  %v8023_v62 = vpack.c.bf16 %v7929_v17, %v7928_v18  ;;  %v18008_v20 = vld [vmem:[#allocation101_spill] sm:$0xff] }
 0x469   : > { %v6505_v42 = vpop.f32.mrf.mxu1  ;;  %v9150_v57 = vpack.c.bf16 %v9057_v36, %v9056_v40  ;;  %v8024_v56 = vpack.c.bf16 %v7931_v60, %v7930_v50  ;;  %v9058_v17 = vld [vmem:[%s13372_s28 + $0x2f6] sm:$0xff]  ;;  %v9059_v40 = vld [vmem:[%s13372_s28 + $0x2fe] sm:$0xff]  ;;  %v9060_v60 = vld [vmem:[%s13372_s28 + $0x306] sm:$0xff] }
 0x46a   : > { %18003 = vst [vmem:[#allocation44_spill] sm:$0xff] %v16408_v43  ;;  %v16417_v54 = vadd.f32 %v12949_v14, %v6702_v29  ;;  %v6700_v3 = vadd.f32 %v6505_v42, %v18006_v46  ;;  %v12950_v47 = vpop.f32.mrf.mxu0  ;;  %v18010_v29 = vld [vmem:[#allocation56_spill] sm:$0xff] }
 0x46b   : > { %v12812_v28 = vpop.f32.mrf.mxu1  ;;  %v9061_v46 = vld [vmem:[%s13372_s28 + $0x30e] sm:$0xff] }
 0x46c   : > { %18005 = vst [vmem:[#allocation46_spill] sm:$0xff] %v16417_v54  ;;  %v16420_v51 = vadd.f32 %v7631_v63, %v6700_v3  ;;  %v6703_v43 = vadd.f32 %v12812_v28, %v18008_v20  ;;  %v7634_v39 = vpop.f32.mrf.mxu0  ;;  %v7932_v63 = vld [vmem:[%s13372_s28 + $0x2f5] sm:$0xff] }
 0x46d   : > { %v6508_v31 = vpop.f32.mrf.mxu1 }
 0x46e   : > { %18007 = vst [vmem:[#allocation48_spill] sm:$0xff] %v16420_v51  ;;  %v16423_v14 = vadd.f32 %v12950_v47, %v6703_v43  ;;  %v6701_v9 = vadd.f32 %v6508_v31, %v18010_v29  ;;  %v12953_v35 = vpop.f32.mrf.mxu0  ;;  %13188 = vmatmul.mubr.msk.bf16.gmra.mxu0 %vm646_vm1, %v9149_v23  ;;  %v18012_v43 = vld [vmem:[#allocation58_spill] sm:$0xff]  ;;  %v7935_v23 = vld [vmem:[%s13372_s28 + $0x30d] sm:$0xff]  ;;  %v9151_v29 = vpack.c.bf16 %v9059_v40, %v9058_v17 }
 0x46f   : > { %v12815_v18 = vpop.f32.mrf.mxu1  ;;  %13050 = vmatmul.mubr.msk.bf16.gmra.mxu1 %vm646_vm1, %v8023_v62  ;;  %13191 = vmatprep.mubr.msk.bf16.mxu0 %vm646_vm1, %v9150_v57  ;;  %v7933_v31 = vld [vmem:[%s13372_s28 + $0x2fd] sm:$0xff]  ;;  %v7934_v47 = vld [vmem:[%s13372_s28 + $0x305] sm:$0xff]  ;;  %v18014_v62 = vld [vmem:[#allocation60_spill] sm:$0xff] }
 0x470   : > { %18009 = vst [vmem:[#allocation50_spill] sm:$0xff] %v16423_v14  ;;  %v16432_v36 = vadd.f32 %v7634_v39, %v6701_v9  ;;  %v6706_v42 = vadd.f32 %v12815_v18, %v18012_v43  ;;  %v7647_v50 = vpop.f32.mrf.mxu0  ;;  %13053 = vmatprep.mubr.msk.bf16.mxu1 %vm646_vm1, %v8024_v56  ;;  %v8025_v9 = vpack.c.bf16 %v7933_v31, %v7932_v63  ;;  %v18016_v56 = vld [vmem:[#allocation62_spill] sm:$0xff]  ;;  %v9062_v31 = vld [vmem:[%s13372_s28 + $0x316] sm:$0xff] }
 0x471   : > { %v6521_v3 = vpop.f32.mrf.mxu1  ;;  %v9152_v18 = vpack.c.bf16 %v9061_v46, %v9060_v60  ;;  %v8026_v51 = vpack.c.bf16 %v7935_v23, %v7934_v47  ;;  %v9063_v60 = vld [vmem:[%s13372_s28 + $0x31e] sm:$0xff]  ;;  %v9064_v23 = vld [vmem:[%s13372_s28 + $0x326] sm:$0xff] }
 0x472   : > { %18011 = vst [vmem:[#allocation100_spill] sm:$0xff] %v16432_v36  ;;  %v16441_v28 = vadd.f32 %v12953_v35, %v6706_v42  ;;  %v6704_v57 = vadd.f32 %v6521_v3, %v18014_v62  ;;  %v12954_v20 = vpop.f32.mrf.mxu0  ;;  %v18018_v42 = vld [vmem:[#allocation64_spill] sm:$0xff] }
 0x473   : > { %v12816_v39 = vpop.f32.mrf.mxu1  ;;  %v9065_v62 = vld [vmem:[%s13372_s28 + $0x32e] sm:$0xff] }
 0x474   : > { %18013 = vst [vmem:[#allocation101_spill] sm:$0xff] %v16441_v28  ;;  %v16444_v43 = vadd.f32 %v7647_v50, %v6704_v57  ;;  %v6707_v36 = vadd.f32 %v12816_v39, %v18016_v56  ;;  %v7650_v14 = vpop.f32.mrf.mxu0  ;;  %v7936_v50 = vld [vmem:[%s13372_s28 + $0x315] sm:$0xff] }
 0x475   : > { %v6524_v54 = vpop.f32.mrf.mxu1 }
 0x476   : > { %18015 = vst [vmem:[#allocation56_spill] sm:$0xff] %v16444_v43  ;;  %v16447_v35 = vadd.f32 %v12954_v20, %v6707_v36  ;;  %v6705_v17 = vadd.f32 %v6524_v54, %v18018_v42  ;;  %v12957_v40 = vpop.f32.mrf.mxu0  ;;  %13192 = vmatmul.mubr.msk.bf16.gmra.mxu0 %vm646_vm1, %v9151_v29  ;;  %v18020_v36 = vld [vmem:[#allocation66_spill] sm:$0xff]  ;;  %v7939_v29 = vld [vmem:[%s13372_s28 + $0x32d] sm:$0xff]  ;;  %v9153_v42 = vpack.c.bf16 %v9063_v60, %v9062_v31 }
 0x477   : > { %v12819_v63 = vpop.f32.mrf.mxu1  ;;  %13054 = vmatmul.mubr.msk.bf16.gmra.mxu1 %vm646_vm1, %v8025_v9  ;;  %13195 = vmatprep.mubr.msk.bf16.mxu0 %vm646_vm1, %v9152_v18  ;;  %v7937_v54 = vld [vmem:[%s13372_s28 + $0x31d] sm:$0xff]  ;;  %v7938_v20 = vld [vmem:[%s13372_s28 + $0x325] sm:$0xff]  ;;  %v18021_v9 = vld [vmem:[#allocation68_spill] sm:$0xff] }
 0x478   : > { %18017 = vst [vmem:[#allocation58_spill] sm:$0xff] %v16447_v35  ;;  %v16456_v46 = vadd.f32 %v7650_v14, %v6705_v17  ;;  %v6710_v3 = vadd.f32 %v12819_v63, %v18020_v36  ;;  %v7663_v47 = vpop.f32.mrf.mxu0  ;;  %13057 = vmatprep.mubr.msk.bf16.mxu1 %vm646_vm1, %v8026_v51  ;;  %v8027_v17 = vpack.c.bf16 %v7937_v54, %v7936_v50  ;;  %v18022_v51 = vld [vmem:[#allocation70_spill] sm:$0xff]  ;;  %v9066_v54 = vld [vmem:[%s13372_s28 + $0x336] sm:$0xff] }
 0x479   : > { %v6537_v57 = vpop.f32.mrf.mxu1  ;;  %v9154_v63 = vpack.c.bf16 %v9065_v62, %v9064_v23  ;;  %v8028_v43 = vpack.c.bf16 %v7939_v29, %v7938_v20  ;;  %v9067_v23 = vld [vmem:[%s13372_s28 + $0x33e] sm:$0xff]  ;;  %v9068_v29 = vld [vmem:[%s13372_s28 + $0x346] sm:$0xff] }
 0x47a   : > { %18019 = vst [vmem:[#allocation60_spill] sm:$0xff] %v16456_v46  ;;  %v16465_v39 = vadd.f32 %v12957_v40, %v6710_v3  ;;  %v6708_v18 = vadd.f32 %v6537_v57, %v18021_v9  ;;  %v12958_v56 = vpop.f32.mrf.mxu0  ;;  %v18024_v3 = vld [vmem:[#allocation72_spill] sm:$0xff] }
 0x47b   : > { %v12820_v14 = vpop.f32.mrf.mxu1  ;;  %v9069_v9 = vld [vmem:[%s13372_s28 + $0x34e] sm:$0xff] }
 0x47c   : > { %v16468_v36 = vadd.f32 %v7663_v47, %v6708_v18  ;;  %v6711_v46 = vadd.f32 %v12820_v14, %v18022_v51  ;;  %v7666_v35 = vpop.f32.mrf.mxu0  ;;  %v7940_v47 = vld [vmem:[%s13372_s28 + $0x335] sm:$0xff]  ;;  %v9155_v51 = vpack.c.bf16 %v9067_v23, %v9066_v54 }
 0x47d   : > { %v6540_v28 = vpop.f32.mrf.mxu1  ;;  %v9070_v23 = vld [vmem:[%s13372_s28 + $0x356] sm:$0xff] }
 0x47e   : > { %v16471_v40 = vadd.f32 %v12958_v56, %v6711_v46  ;;  %v6709_v31 = vadd.f32 %v6540_v28, %v18024_v3  ;;  %v12961_v60 = vpop.f32.mrf.mxu0  ;;  %13196 = vmatmul.mubr.msk.bf16.gmra.mxu0 %vm646_vm1, %v9153_v42  ;;  %v18026_v46 = vld [vmem:[#allocation74_spill] sm:$0xff]  ;;  %v7943_v42 = vld [vmem:[%s13372_s28 + $0x34d] sm:$0xff] }
 0x47f   : > { %v12823_v50 = vpop.f32.mrf.mxu1  ;;  %13058 = vmatmul.mubr.msk.bf16.gmra.mxu1 %vm646_vm1, %v8027_v17  ;;  %13199 = vmatprep.mubr.msk.bf16.mxu0 %vm646_vm1, %v9154_v63  ;;  %v7941_v28 = vld [vmem:[%s13372_s28 + $0x33d] sm:$0xff]  ;;  %v7942_v56 = vld [vmem:[%s13372_s28 + $0x345] sm:$0xff] }
 0x480   : > { %18023 = vst [vmem:[#allocation62_spill] sm:$0xff] %v16471_v40  ;;  %v16480_v62 = vadd.f32 %v7666_v35, %v6709_v31  ;;  %v6714_v57 = vadd.f32 %v12823_v50, %v18026_v46  ;;  %v7679_v20 = vpop.f32.mrf.mxu0  ;;  %13061 = vmatprep.mubr.msk.bf16.mxu1 %vm646_vm1, %v8028_v43  ;;  %v8029_v3 = vpack.c.bf16 %v7941_v28, %v7940_v47  ;;  %v18028_v28 = vld [vmem:[#allocation76_spill] sm:$0xff] }
 0x481   : > { %v6553_v18 = vpop.f32.mrf.mxu1  ;;  %v9156_v31 = vpack.c.bf16 %v9069_v9, %v9068_v29 }
 0x482   : > { %18025 = vst [vmem:[#allocation64_spill] sm:$0xff] %v16480_v62  ;;  %v16489_v14 = vadd.f32 %v12961_v60, %v6714_v57  ;;  %v6712_v17 = vadd.f32 %v6553_v18, %v15714_v59  ;;  %v12962_v63 = vpop.f32.mrf.mxu0  ;;  %v8030_v62 = vpack.c.bf16 %v7943_v42, %v7942_v56  ;;  %v9071_v57 = vld [vmem:[%s13372_s28 + $0x35e] sm:$0xff]  ;;  %v9073_v18 = vld [vmem:[%s13372_s28 + $0x36e] sm:$0xff] }
 0x483   : > { %v12824_v35 = vpop.f32.mrf.mxu1  ;;  %v7946_v42 = vld [vmem:[%s13372_s28 + $0x365] sm:$0xff] }
 0x484   : > { %v16492_v50 = vadd.f32 %v7679_v20, %v6712_v17  ;;  %v6715_v43 = vadd.f32 %v12824_v35, %v15717_v0  ;;  %v7682_v46 = vpop.f32.mrf.mxu0  ;;  %v7944_v0 = vld [vmem:[%s13372_s28 + $0x355] sm:$0xff]  ;;  %v7947_v17 = vld [vmem:[%s13372_s28 + $0x36d] sm:$0xff] }
 0x485   : > { %v6556_v40 = vpop.f32.mrf.mxu1 }
 0x486   : > { %v16495_v60 = vadd.f32 %v12962_v63, %v6715_v43  ;;  %v6713_v59 = vadd.f32 %v6556_v40, %v15725_v30  ;;  %v12965_v54 = vpop.f32.mrf.mxu0  ;;  %13200 = vmatmul.mubr.msk.bf16.gmra.mxu0 %vm646_vm1, %v9155_v51  ;;  %v7945_v30 = vld [vmem:[%s13372_s28 + $0x35d] sm:$0xff]  ;;  %v9072_v40 = vld [vmem:[%s13372_s28 + $0x366] sm:$0xff] }
 0x487   : > { %v12827_v47 = vpop.f32.mrf.mxu1  ;;  %13062 = vmatmul.mubr.msk.bf16.gmra.mxu1 %vm646_vm1, %v8029_v3  ;;  %13203 = vmatprep.mubr.msk.bf16.mxu0 %vm646_vm1, %v9156_v31  ;;  %v9157_v3 = vpack.c.bf16 %v9071_v57, %v9070_v23  ;;  %v8031_v43 = vpack.c.bf16 %v7945_v30, %v7944_v0  ;;  %v9074_v57 = vld [vmem:[%s13372_s28 + $0x376] sm:$0xff] }
 0x488   : > { %v16504_v20 = vadd.f32 %v7682_v46, %v6713_v59  ;;  %v6718_v29 = vadd.f32 %v12827_v47, %v18028_v28  ;;  %v7695_v9 = vpop.f32.mrf.mxu0  ;;  %13065 = vmatprep.mubr.msk.bf16.mxu1 %vm646_vm1, %v8030_v62  ;;  %v9158_v46 = vpack.c.bf16 %v9073_v18, %v9072_v40  ;;  %v8032_v28 = vpack.c.bf16 %v7947_v17, %v7946_v42  ;;  %v9077_v18 = vld [vmem:[%s13372_s28 + $0x38e] sm:$0xff]  ;;  %v7950_v17 = vld [vmem:[%s13372_s28 + $0x385] sm:$0xff] }
 0x489   : > { %v6569_v56 = vpop.f32.mrf.mxu1 }
 0x48a   : > { %18027 = vst [vmem:[#allocation66_spill] sm:$0xff] %v16504_v20  ;;  %v16513_v63 = vadd.f32 %v12965_v54, %v6718_v29  ;;  %v6716_v51 = vadd.f32 %v6569_v56, %v15734_v55  ;;  %v12966_v35 = vpop.f32.mrf.mxu0  ;;  %v9075_v29 = vld [vmem:[%s13372_s28 + $0x37e] sm:$0xff] }
 0x48b   : > { %v12828_v31 = vpop.f32.mrf.mxu1  ;;  %v16538_v56 = vld [vmem:[%s17357_s2] ss:$0 sm:$0xff] }
 0x48c   : > { %v16516_v59 = vadd.f32 %v7695_v9, %v6716_v51  ;;  %v6719_v62 = vadd.f32 %v12828_v31, %v15737_v15  ;;  %v7698_v47 = vpop.f32.mrf.mxu0  ;;  %v7948_v15 = vld [vmem:[%s13372_s28 + $0x375] sm:$0xff]  ;;  %v7951_v51 = vld [vmem:[%s13372_s28 + $0x38d] sm:$0xff] }
 0x48d   : > { %v6572_v20 = vpop.f32.mrf.mxu1 }
 0x48e   : > { %18029 = vst [vmem:[#allocation68_spill] sm:$0xff] %v16516_v59  ;;  %v16519_v54 = vadd.f32 %v12966_v35, %v6719_v62  ;;  %v6717_v55 = vadd.f32 %v6572_v20, %v15745_v10  ;;  %v13109_v23 = vpop.f32.mrf.mxu0  ;;  %13204 = vmatmul.mubr.msk.bf16.gmra.mxu0 %vm646_vm1, %v9157_v3  ;;  %v7949_v10 = vld [vmem:[%s13372_s28 + $0x37d] sm:$0xff]  ;;  %v9076_v20 = vld [vmem:[%s13372_s28 + $0x386] sm:$0xff] }
 0x48f   : > { %v12971_v0 = vpop.f32.mrf.mxu1  ;;  %13066 = vmatmul.mubr.msk.bf16.gmra.mxu1 %vm646_vm1, %v8031_v43  ;;  %13207 = vmatprep.mubr.msk.bf16.mxu0 %vm646_vm1, %v9158_v46  ;;  %v9159_v43 = vpack.c.bf16 %v9075_v29, %v9074_v57  ;;  %v8033_v62 = vpack.c.bf16 %v7949_v10, %v7948_v15  ;;  %v9078_v10 = vld [vmem:[%s13372_s28 + $0x396] sm:$0xff] }
 0x490   : > { %18030 = vst [vmem:[#allocation70_spill] sm:$0xff] %v16519_v54  ;;  %v16528_v9 = vadd.f32 %v7698_v47, %v6717_v55  ;;  %v8838_v30 = vadd.f32 %v12971_v0, %v15751_v19  ;;  %v9419_v40 = vpop.f32.mrf.mxu0  ;;  %13069 = vmatprep.mubr.msk.bf16.mxu1 %vm646_vm1, %v8032_v28  ;;  %v16547_v19 = vld [vmem:[%s17358_s3] ss:$0 sm:$0xff]  ;;  %v9160_v47 = vpack.c.bf16 %v9077_v18, %v9076_v20  ;;  %v7954_v18 = vld [vmem:[%s13372_s28 + $0x3a5] sm:$0xff] }
 0x491   : > { %v8293_v42 = vpop.f32.mrf.mxu1  ;;  %v7953_v20 = vld [vmem:[%s13372_s28 + $0x39d] sm:$0xff] }
 0x492   : > { %18031 = vst [vmem:[#allocation72_spill] sm:$0xff] %v16528_v9  ;;  %v9964_v35 = vadd.f32 %v13109_v23, %v8838_v30  ;;  %v8836_v3 = vadd.f32 %v8293_v42, %v15754_v37  ;;  %v13110_v31 = vpop.f32.mrf.mxu0  ;;  %v8034_v37 = vpack.c.bf16 %v7951_v51, %v7950_v17 }
 0x493   : > { %v12972_v46 = vpop.f32.mrf.mxu1 }
 0x494   : > { %v10107_v28 = vmul.f32 %v16538_v56, %v9964_v35  ;;  %v9962_v55 = vadd.f32 %v9419_v40, %v8836_v3  ;;  %v8839_v23 = vadd.f32 %v12972_v46, %v15757_v33  ;;  %v9422_v0 = vpop.f32.mrf.mxu0  ;;  %v9079_v40 = vld [vmem:[%s13372_s28 + $0x39e] sm:$0xff]  ;;  %v9080_v46 = vld [vmem:[%s13372_s28 + $0x3a6] sm:$0xff] }
 0x495   : > { %v8296_v57 = vpop.f32.mrf.mxu1 }
 0x496   : > { %v10250_v29 = vadd.f32 %v16547_v19, %v10107_v28  ;;  %v10105_v30 = vmul.f32 %v16538_v56, %v9962_v55  ;;  %v9965_v42 = vadd.f32 %v13110_v31, %v8839_v23  ;;  %v8837_v9 = vadd.f32 %v8296_v57, %v15765_v45  ;;  %v13113_v15 = vpop.f32.mrf.mxu0  ;;  %13208 = vmatmul.mubr.msk.bf16.gmra.mxu0 %vm646_vm1, %v9159_v43  ;;  %v7952_v45 = vld [vmem:[%s13372_s28 + $0x395] sm:$0xff]  ;;  %v7955_v43 = vld [vmem:[%s13372_s28 + $0x3ad] sm:$0xff] }
 0x497   : > { %v12975_v33 = vpop.f32.mrf.mxu1  ;;  %13070 = vmatmul.mubr.msk.bf16.gmra.mxu1 %vm646_vm1, %v8033_v62  ;;  %13211 = vmatprep.mubr.msk.bf16.mxu0 %vm646_vm1, %v9160_v47  ;;  %v9081_v28 = vld [vmem:[%s13372_s28 + $0x3ae] sm:$0xff]  ;;  %v9161_v55 = vpack.c.bf16 %v9079_v40, %v9078_v10  ;;  %v8036_v54 = vpack.c.bf16 %v7955_v43, %v7954_v18 }
 0x498   : > { %v10386_v17 = vmax.f32 %v10250_v29, 0.0  ;;  %v10248_v51 = vadd.f32 %v16547_v19, %v10105_v30  ;;  %v10108_v35 = vmul.f32 %v16538_v56, %v9965_v42  ;;  %v9963_v3 = vadd.f32 %v9422_v0, %v8837_v9  ;;  %v9435_v31 = vpop.f32.mrf.mxu0  ;;  %13073 = vmatprep.mubr.msk.bf16.mxu1 %vm646_vm1, %v8034_v37 }
 0x499   : > { %v8842_v62 = vadd.f32 %v12975_v33, %v15771_v44  ;;  %v8309_v47 = vpop.f32.mrf.mxu1  ;;  %v8035_v42 = vpack.c.bf16 %v7953_v20, %v7952_v45  ;;  %v9162_v59 = vpack.c.bf16 %v9081_v28, %v9080_v46  ;;  %v7956_v46 = vld [vmem:[%s13372_s28 + $0x3b5] sm:$0xff]  ;;  %v7957_v28 = vld [vmem:[%s13372_s28 + $0x3bd] sm:$0xff] }
 0x49a   : > { %10523 = vst.msk [vmem:[%s16560_s25 + $0x10] sm:$0xff] %vm10520_vm2, %v10386_v17  ;;  %v10384_v23 = vmax.f32 %v10248_v51, 0.0  ;;  %v10251_v57 = vadd.f32 %v16547_v19, %v10108_v35  ;;  %v10106_v29 = vmul.f32 %v16538_v56, %v9963_v3  ;;  %v8840_v9 = vadd.f32 %v8309_v47, %v15774_v58  ;;  %v13114_v0 = vpop.f32.mrf.mxu0  ;;  %v9083_v3 = vld [vmem:[%s13372_s28 + $0x3be] sm:$0xff] }
 0x49b   : > { %v9968_v37 = vadd.f32 %v13113_v15, %v8842_v62  ;;  %v12976_v30 = vpop.f32.mrf.mxu1  ;;  %v7958_v62 = vld [vmem:[%s13372_s28 + $0x3c5] sm:$0xff] }
 0x49c   : > { %10521 = vst.msk [vmem:[%s16560_s25] sm:$0xff] %vm10520_vm2, %v10384_v23  ;;  %v10387_v44 = vmax.f32 %v10251_v57, 0.0  ;;  %v10249_v10 = vadd.f32 %v16547_v19, %v10106_v29  ;;  %v9966_v40 = vadd.f32 %v9435_v31, %v8840_v9  ;;  %v8843_v33 = vadd.f32 %v12976_v30, %v15777_v26  ;;  %v9438_v17 = vpop.f32.mrf.mxu0  ;;  %v9082_v26 = vld [vmem:[%s13372_s28 + $0x3b6] sm:$0xff]  ;;  %v7959_v29 = vld [vmem:[%s13372_s28 + $0x3cd] sm:$0xff] }
 0x49d   : > { %v10111_v58 = vmul.f32 %v16538_v56, %v9968_v37  ;;  %v8312_v15 = vpop.f32.mrf.mxu1  ;;  %v9084_v9 = vld [vmem:[%s13372_s28 + $0x3c6] sm:$0xff]  ;;  %v9163_v30 = vpack.c.bf16 %v9083_v3, %v9082_v26 }
 0x49e   : > { %10524 = vst.msk [vmem:[%s16560_s25 + $0x18] sm:$0xff] %vm10520_vm2, %v10387_v44  ;;  %v10385_v45 = vmax.f32 %v10249_v10, 0.0  ;;  %v10109_v20 = vmul.f32 %v16538_v56, %v9966_v40  ;;  %v9969_v18 = vadd.f32 %v13114_v0, %v8843_v33  ;;  %v8841_v51 = vadd.f32 %v8312_v15, %v15785_v32  ;;  %v13117_v35 = vpop.f32.mrf.mxu0  ;;  %13212 = vmatmul.mubr.msk.bf16.gmra.mxu0 %vm646_vm1, %v9161_v55 }
 0x49f   : > { %v10254_v31 = vadd.f32 %v16547_v19, %v10111_v58  ;;  %v12979_v43 = vpop.f32.mrf.mxu1  ;;  %13074 = vmatmul.mubr.msk.bf16.gmra.mxu1 %vm646_vm1, %v8035_v42  ;;  %13215 = vmatprep.mubr.msk.bf16.mxu0 %vm646_vm1, %v9162_v59  ;;  %v9085_v59 = vld [vmem:[%s13372_s28 + $0x3ce] sm:$0xff]  ;;  %v8038_v58 = vpack.c.bf16 %v7959_v29, %v7958_v62  ;;  %v9086_v62 = vld [vmem:[%s13372_s28 + $0x3d6] sm:$0xff] }
 0x4a0   : > { %10522 = vst.msk [vmem:[%s16560_s25 + $0x8] sm:$0xff] %vm10520_vm2, %v10385_v45  ;;  %v10252_v32 = vadd.f32 %v16547_v19, %v10109_v20  ;;  %v10112_v47 = vmul.f32 %v16538_v56, %v9969_v18  ;;  %v9967_v55 = vadd.f32 %v9438_v17, %v8841_v51  ;;  %v8846_v23 = vadd.f32 %v12979_v43, %v15791_v11  ;;  %v9451_v57 = vpop.f32.mrf.mxu0 }
 0x4a1   : > { %13077 = vmatprep.mubr.msk.bf16.mxu1 %vm646_vm1, %v8036_v54  ;;  %v10390_v0 = vmax.f32 %v10254_v31, 0.0  ;;  %v8325_v37 = vpop.f32.mrf.mxu1  ;;  %v8037_v17 = vpack.c.bf16 %v7957_v28, %v7956_v46  ;;  %v9164_v15 = vpack.c.bf16 %v9085_v59, %v9084_v9 }
 0x4a2   : > { %v10388_v42 = vmax.f32 %v10252_v32, 0.0  ;;  %v10255_v44 = vadd.f32 %v16547_v19, %v10112_v47  ;;  %v10110_v10 = vmul.f32 %v16538_v56, %v9967_v55  ;;  %v9972_v40 = vadd.f32 %v13117_v35, %v8846_v23  ;;  %v13118_v33 = vpop.f32.mrf.mxu0  ;;  %v7960_v55 = vld [vmem:[%s13372_s28 + $0x3d5] sm:$0xff]  ;;  %v7961_v23 = vld [vmem:[%s13372_s28 + $0x3dd] sm:$0xff] }
 0x4a3   : > { %10527 = vst.msk [vmem:[%s16560_s25 + $0x30] sm:$0xff] %vm10520_vm2, %v10390_v0  ;;  %v8844_v11 = vadd.f32 %v8325_v37, %v15794_v25  ;;  %v12980_v54 = vpop.f32.mrf.mxu1  ;;  %v7963_v37 = vld [vmem:[%s13372_s28 + $0x3ed] sm:$0xff] }
 0x4a4   : > { %10525 = vst.msk [vmem:[%s16560_s25 + $0x20] sm:$0xff] %vm10520_vm2, %v10388_v42  ;;  %v10391_v45 = vmax.f32 %v10255_v44, 0.0  ;;  %v10253_v20 = vadd.f32 %v16547_v19, %v10110_v10  ;;  %v10115_v18 = vmul.f32 %v16538_v56, %v9972_v40  ;;  %v8847_v51 = vadd.f32 %v12980_v54, %v15797_v61  ;;  %v9454_v35 = vpop.f32.mrf.mxu0  ;;  %v9087_v61 = vld [vmem:[%s13372_s28 + $0x3de] sm:$0xff]  ;;  %v9089_v42 = vld [vmem:[%s13372_s28 + $0x3ee] sm:$0xff] }
 0x4a5   : > { %v9970_v26 = vadd.f32 %v9451_v57, %v8844_v11  ;;  %v8328_v25 = vpop.f32.mrf.mxu1  ;;  %v7962_v57 = vld [vmem:[%s13372_s28 + $0x3e5] sm:$0xff]  ;;  %v9165_v40 = vpack.c.bf16 %v9087_v61, %v9086_v62 }
 0x4a6   : > { %10528 = vst.msk [vmem:[%s16560_s25 + $0x38] sm:$0xff] %vm10520_vm2, %v10391_v45  ;;  %v10389_v3 = vmax.f32 %v10253_v20, 0.0  ;;  %v10258_v31 = vadd.f32 %v16547_v19, %v10115_v18  ;;  %v9973_v43 = vadd.f32 %v13118_v33, %v8847_v51  ;;  %v8845_v46 = vadd.f32 %v8328_v25, %v15805_v21  ;;  %v13121_v28 = vpop.f32.mrf.mxu0  ;;  %13216 = vmatmul.mubr.msk.bf16.gmra.mxu0 %vm646_vm1, %v9163_v30  ;;  %v9088_v30 = vld [vmem:[%s13372_s28 + $0x3e6] sm:$0xff] }
 0x4a7   : > { %v10113_v32 = vmul.f32 %v16538_v56, %v9970_v26  ;;  %v12983_v47 = vpop.f32.mrf.mxu1  ;;  %13078 = vmatmul.mubr.msk.bf16.gmra.mxu1 %vm646_vm1, %v8037_v17  ;;  %13219 = vmatprep.mubr.msk.bf16.mxu0 %vm646_vm1, %v9164_v15  ;;  %v8039_v45 = vpack.c.bf16 %v7961_v23, %v7960_v55  ;;  %v8040_v20 = vpack.c.bf16 %v7963_v37, %v7962_v57  ;;  %v7964_v23 = vld [vmem:[%s13372_s28 + $0x3f5] sm:$0xff]  ;;  %v7965_v57 = vld [vmem:[%s13372_s28 + $0x3fd] sm:$0xff]  ;;  %v7967_v37 = vld [vmem:[%s13372_s28 + $0x40d] sm:$0xff] }
 0x4a8   : > { %10526 = vst.msk [vmem:[%s16560_s25 + $0x28] sm:$0xff] %vm10520_vm2, %v10389_v3  ;;  %v10394_v21 = vmax.f32 %v10258_v31, 0.0  ;;  %v10116_v29 = vmul.f32 %v16538_v56, %v9973_v43  ;;  %v9971_v9 = vadd.f32 %v9454_v35, %v8845_v46  ;;  %v8850_v59 = vadd.f32 %v12983_v47, %v15811_v6  ;;  %v9467_v0 = vpop.f32.mrf.mxu0  ;;  %13081 = vmatprep.mubr.msk.bf16.mxu1 %vm646_vm1, %v8038_v58  ;;  %v9091_v47 = vld [vmem:[%s13372_s28 + $0x3fe] sm:$0xff] }
 0x4a9   : > { %v10256_v44 = vadd.f32 %v16547_v19, %v10113_v32  ;;  %v8341_v10 = vpop.f32.mrf.mxu1  ;;  %v9166_v18 = vpack.c.bf16 %v9089_v42, %v9088_v30  ;;  %v9090_v32 = vld [vmem:[%s13372_s28 + $0x3f6] sm:$0xff]  ;;  %v9092_v30 = vld [vmem:[%s13372_s28 + $0x406] sm:$0xff]  ;;  %v9093_v42 = vld [vmem:[%s13372_s28 + $0x40e] sm:$0xff] }
 0x4aa   : > { %10531 = vst.msk [vmem:[%s16560_s25 + $0x50] sm:$0xff] %vm10520_vm2, %v10394_v21  ;;  %v10259_v33 = vadd.f32 %v16547_v19, %v10116_v29  ;;  %v10114_v11 = vmul.f32 %v16538_v56, %v9971_v9  ;;  %v9976_v54 = vadd.f32 %v13121_v28, %v8850_v59  ;;  %v8848_v6 = vadd.f32 %v8341_v10, %v15814_v4  ;;  %v13122_v17 = vpop.f32.mrf.mxu0  ;;  %v7966_v21 = vld [vmem:[%s13372_s28 + $0x405] sm:$0xff] }
 0x4ab   : > { %v10392_v58 = vmax.f32 %v10256_v44, 0.0  ;;  %v12984_v15 = vpop.f32.mrf.mxu1 }
 0x4ac   : > { %v10395_v51 = vmax.f32 %v10259_v33, 0.0  ;;  %v10257_v35 = vadd.f32 %v16547_v19, %v10114_v11  ;;  %v10119_v26 = vmul.f32 %v16538_v56, %v9976_v54  ;;  %v9974_v25 = vadd.f32 %v9467_v0, %v8848_v6  ;;  %v9470_v3 = vpop.f32.mrf.mxu0 }
 0x4ad   : > { %10529 = vst.msk [vmem:[%s16560_s25 + $0x40] sm:$0xff] %vm10520_vm2, %v10392_v58  ;;  %v8851_v4 = vadd.f32 %v12984_v15, %v15817_v53  ;;  %v8344_v31 = vpop.f32.mrf.mxu1  ;;  %v8041_v15 = vpack.c.bf16 %v7965_v57, %v7964_v23 }
 0x4ae   : > { %10532 = vst.msk [vmem:[%s16560_s25 + $0x58] sm:$0xff] %vm10520_vm2, %v10395_v51  ;;  %v10393_v43 = vmax.f32 %v10257_v35, 0.0  ;;  %v10262_v46 = vadd.f32 %v16547_v19, %v10119_v26  ;;  %v10117_v28 = vmul.f32 %v16538_v56, %v9974_v25  ;;  %v8849_v62 = vadd.f32 %v8344_v31, %v15825_v38  ;;  %v13125_v61 = vpop.f32.mrf.mxu0  ;;  %13220 = vmatmul.mubr.msk.bf16.gmra.mxu0 %vm646_vm1, %v9165_v40 }
 0x4af   : > { %v9977_v53 = vadd.f32 %v13122_v17, %v8851_v4  ;;  %v12987_v55 = vpop.f32.mrf.mxu1  ;;  %13082 = vmatmul.mubr.msk.bf16.gmra.mxu1 %vm646_vm1, %v8039_v45  ;;  %13223 = vmatprep.mubr.msk.bf16.mxu0 %vm646_vm1, %v9166_v18  ;;  %v9167_v40 = vpack.c.bf16 %v9091_v47, %v9090_v32  ;;  %v8042_v45 = vpack.c.bf16 %v7967_v37, %v7966_v21  ;;  %v7968_v47 = vld [vmem:[%s13372_s28 + $0x415] sm:$0xff] }
 0x4b0   : > { %10530 = vst.msk [vmem:[%s16560_s25 + $0x48] sm:$0xff] %vm10520_vm2, %v10393_v43  ;;  %v10398_v38 = vmax.f32 %v10262_v46, 0.0  ;;  %v10260_v29 = vadd.f32 %v16547_v19, %v10117_v28  ;;  %v9975_v9 = vadd.f32 %v9470_v3, %v8849_v62  ;;  %v8854_v59 = vadd.f32 %v12987_v55, %v15831_v1  ;;  %v9483_v0 = vpop.f32.mrf.mxu0  ;;  %13085 = vmatprep.mubr.msk.bf16.mxu1 %vm646_vm1, %v8040_v20  ;;  %v9094_v62 = vld [vmem:[%s13372_s28 + $0x416] sm:$0xff]  ;;  %v7970_v55 = vld [vmem:[%s13372_s28 + $0x425] sm:$0xff] }
 0x4b1   : > { %v10120_v44 = vmul.f32 %v16538_v56, %v9977_v53  ;;  %v8357_v10 = vpop.f32.mrf.mxu1  ;;  %v9168_v20 = vpack.c.bf16 %v9093_v42, %v9092_v30  ;;  %v7969_v53 = vld [vmem:[%s13372_s28 + $0x41d] sm:$0xff] }
 0x4b2   : > { %10535 = vst.msk [vmem:[%s16560_s25 + $0x70] sm:$0xff] %vm10520_vm2, %v10398_v38  ;;  %v10396_v33 = vmax.f32 %v10260_v29, 0.0  ;;  %v10118_v11 = vmul.f32 %v16538_v56, %v9975_v9  ;;  %v9980_v54 = vadd.f32 %v13125_v61, %v8854_v59  ;;  %v8852_v6 = vadd.f32 %v8357_v10, %v15834_v5  ;;  %v13126_v1 = vpop.f32.mrf.mxu0  ;;  %v9095_v61 = vld [vmem:[%s13372_s28 + $0x41e] sm:$0xff]  ;;  %v7971_v29 = vld [vmem:[%s13372_s28 + $0x42d] sm:$0xff] }
 0x4b3   : > { %v10263_v17 = vadd.f32 %v16547_v19, %v10120_v44  ;;  %v12988_v58 = vpop.f32.mrf.mxu1  ;;  %v9096_v9 = vld [vmem:[%s13372_s28 + $0x426] sm:$0xff]  ;;  %v9097_v59 = vld [vmem:[%s13372_s28 + $0x42e] sm:$0xff]  ;;  %v9169_v30 = vpack.c.bf16 %v9095_v61, %v9094_v62 }
 0x4b4   : > { %10533 = vst.msk [vmem:[%s16560_s25 + $0x60] sm:$0xff] %vm10520_vm2, %v10396_v33  ;;  %v10261_v18 = vadd.f32 %v16547_v19, %v10118_v11  ;;  %v10123_v51 = vmul.f32 %v16538_v56, %v9980_v54  ;;  %v9978_v35 = vadd.f32 %v9483_v0, %v8852_v6  ;;  %v8855_v26 = vadd.f32 %v12988_v58, %v15837_v13  ;;  %v9486_v5 = vpop.f32.mrf.mxu0 }
 0x4b5   : > { %v10399_v25 = vmax.f32 %v10263_v17, 0.0  ;;  %v8360_v3 = vpop.f32.mrf.mxu1  ;;  %v8043_v54 = vpack.c.bf16 %v7969_v53, %v7968_v47  ;;  %v8044_v6 = vpack.c.bf16 %v7971_v29, %v7970_v55  ;;  %v7975_v47 = vld [vmem:[%s13372_s28 + $0x44d] sm:$0xff] }
 0x4b6   : > { %v10397_v4 = vmax.f32 %v10261_v18, 0.0  ;;  %v10266_v31 = vadd.f32 %v16547_v19, %v10123_v51  ;;  %v10121_v43 = vmul.f32 %v16538_v56, %v9978_v35  ;;  %v9981_v46 = vadd.f32 %v13126_v1, %v8855_v26  ;;  %v13129_v28 = vpop.f32.mrf.mxu0  ;;  %13224 = vmatmul.mubr.msk.bf16.gmra.mxu0 %vm646_vm1, %v9167_v40  ;;  %v9100_v53 = vld [vmem:[%s13372_s28 + $0x446] sm:$0xff]  ;;  %v9101_v55 = vld [vmem:[%s13372_s28 + $0x44e] sm:$0xff] }
 0x4b7   : > { %10536 = vst.msk [vmem:[%s16560_s25 + $0x78] sm:$0xff] %vm10520_vm2, %v10399_v25  ;;  %v8853_v13 = vadd.f32 %v8360_v3, %v15845_v2  ;;  %v12991_v32 = vpop.f32.mrf.mxu1  ;;  %13086 = vmatmul.mubr.msk.bf16.gmra.mxu1 %vm646_vm1, %v8041_v15  ;;  %13227 = vmatprep.mubr.msk.bf16.mxu0 %vm646_vm1, %v9168_v20  ;;  %v9170_v1 = vpack.c.bf16 %v9097_v59, %v9096_v9  ;;  %v9099_v3 = vld [vmem:[%s13372_s28 + $0x43e] sm:$0xff] }
 0x4b8   : > { %10534 = vst.msk [vmem:[%s16560_s25 + $0x68] sm:$0xff] %vm10520_vm2, %v10397_v4  ;;  %v10402_v23 = vmax.f32 %v10266_v31, 0.0  ;;  %v10264_v57 = vadd.f32 %v16547_v19, %v10121_v43  ;;  %v10124_v21 = vmul.f32 %v16538_v56, %v9981_v46  ;;  %v8858_v38 = vadd.f32 %v12991_v32, %v15851_v22  ;;  %v9499_v2 = vpop.f32.mrf.mxu0  ;;  %13089 = vmatprep.mubr.msk.bf16.mxu1 %vm646_vm1, %v8042_v45  ;;  %v7972_v43 = vld [vmem:[%s13372_s28 + $0x435] sm:$0xff]  ;;  %v7973_v46 = vld [vmem:[%s13372_s28 + $0x43d] sm:$0xff] }
 0x4b9   : > { %v9979_v0 = vadd.f32 %v9486_v5, %v8853_v13  ;;  %v8373_v37 = vpop.f32.mrf.mxu1 }
 0x4ba   : > { %10539 = vst.msk [vmem:[%s16560_s25 + $0x90] sm:$0xff] %vm10520_vm2, %v10402_v23  ;;  %v10400_v42 = vmax.f32 %v10264_v57, 0.0  ;;  %v10267_v44 = vadd.f32 %v16547_v19, %v10124_v21  ;;  %v9984_v10 = vadd.f32 %v13129_v28, %v8858_v38  ;;  %v8856_v40 = vadd.f32 %v8373_v37, %v15854_v49  ;;  %v13130_v22 = vpop.f32.mrf.mxu0  ;;  %v7974_v28 = vld [vmem:[%s13372_s28 + $0x445] sm:$0xff] }
 0x4bb   : > { %v10122_v33 = vmul.f32 %v16538_v56, %v9979_v0  ;;  %v12992_v11 = vpop.f32.mrf.mxu1 }
 0x4bc   : > { %10537 = vst.msk [vmem:[%s16560_s25 + $0x80] sm:$0xff] %vm10520_vm2, %v10400_v42  ;;  %v10403_v17 = vmax.f32 %v10267_v44, 0.0  ;;  %v10127_v58 = vmul.f32 %v16538_v56, %v9984_v10  ;;  %v9982_v15 = vadd.f32 %v9499_v2, %v8856_v40  ;;  %v8859_v45 = vadd.f32 %v12992_v11, %v15857_v41  ;;  %v9502_v20 = vpop.f32.mrf.mxu0  ;;  %v9098_v41 = vld [vmem:[%s13372_s28 + $0x436] sm:$0xff] }
 0x4bd   : > { %v10265_v49 = vadd.f32 %v16547_v19, %v10122_v33  ;;  %v8376_v18 = vpop.f32.mrf.mxu1  ;;  %v9171_v21 = vpack.c.bf16 %v9099_v3, %v9098_v41  ;;  %v8046_v42 = vpack.c.bf16 %v7975_v47, %v7974_v28  ;;  %v9172_v44 = vpack.c.bf16 %v9101_v55, %v9100_v53  ;;  %v7979_v41 = vld [vmem:[%s13372_s28 + $0x46d] sm:$0xff] }
 0x4be   : > { %10540 = vst.msk [vmem:[%s16560_s25 + $0x98] sm:$0xff] %vm10520_vm2, %v10403_v17  ;;  %v10270_v51 = vadd.f32 %v16547_v19, %v10127_v58  ;;  %v10125_v35 = vmul.f32 %v16538_v56, %v9982_v15  ;;  %v9985_v26 = vadd.f32 %v13130_v22, %v8859_v45  ;;  %v8857_v5 = vadd.f32 %v8376_v18, %v15865_v12  ;;  %v13133_v25 = vpop.f32.mrf.mxu0  ;;  %v9103_v15 = vld [vmem:[%s13372_s28 + $0x45e] sm:$0xff]  ;;  %v9104_v3 = vld [vmem:[%s13372_s28 + $0x466] sm:$0xff] }
 0x4bf   : > { %13228 = vmatmul.mubr.msk.bf16.gmra.mxu0 %vm646_vm1, %v9169_v30  ;;  %v10401_v4 = vmax.f32 %v10265_v49, 0.0  ;;  %v12995_v31 = vpop.f32.mrf.mxu1  ;;  %13090 = vmatmul.mubr.msk.bf16.gmra.mxu1 %vm646_vm1, %v8043_v54  ;;  %v8045_v30 = vpack.c.bf16 %v7973_v46, %v7972_v43  ;;  %v7976_v49 = vld [vmem:[%s13372_s28 + $0x455] sm:$0xff]  ;;  %v7977_v18 = vld [vmem:[%s13372_s28 + $0x45d] sm:$0xff] }
 0x4c0   : > { %13231 = vmatprep.mubr.msk.bf16.mxu0 %vm646_vm1, %v9170_v1  ;;  %v10406_v12 = vmax.f32 %v10270_v51, 0.0  ;;  %v10268_v62 = vadd.f32 %v16547_v19, %v10125_v35  ;;  %v10128_v61 = vmul.f32 %v16538_v56, %v9985_v26  ;;  %v9983_v13 = vadd.f32 %v9502_v20, %v8857_v5  ;;  %v9515_v32 = vpop.f32.mrf.mxu0  ;;  %13093 = vmatprep.mubr.msk.bf16.mxu1 %vm646_vm1, %v8044_v6  ;;  %v7978_v51 = vld [vmem:[%s13372_s28 + $0x465] sm:$0xff] }
 0x4c1   : > { %10538 = vst.msk [vmem:[%s16560_s25 + $0x88] sm:$0xff] %vm10520_vm2, %v10401_v4  ;;  %v8862_v23 = vadd.f32 %v12995_v31, %v15871_v48  ;;  %v8389_v57 = vpop.f32.mrf.mxu1  ;;  %v9105_v4 = vld [vmem:[%s13372_s28 + $0x46e] sm:$0xff]  ;;  %v8047_v47 = vpack.c.bf16 %v7977_v18, %v7976_v49  ;;  %v8048_v53 = vpack.c.bf16 %v7979_v41, %v7978_v51 }
 0x4c2   : > { %10543 = vst.msk [vmem:[%s16560_s25 + $0xb0] sm:$0xff] %vm10520_vm2, %v10406_v12  ;;  %v10404_v38 = vmax.f32 %v10268_v62, 0.0  ;;  %v10271_v2 = vadd.f32 %v16547_v19, %v10128_v61  ;;  %v10126_v29 = vmul.f32 %v16538_v56, %v9983_v13  ;;  %v8860_v9 = vadd.f32 %v8389_v57, %v15874_v24  ;;  %v13134_v59 = vpop.f32.mrf.mxu0 }
 0x4c3   : > { %v9988_v0 = vadd.f32 %v13133_v25, %v8862_v23  ;;  %v12996_v37 = vpop.f32.mrf.mxu1  ;;  %v9174_v55 = vpack.c.bf16 %v9105_v4, %v9104_v3  ;;  %v18034_v3 = vld [vmem:[#allocation82_spill] sm:$0xff] }
 0x4c4   : > { %10541 = vst.msk [vmem:[%s16560_s25 + $0xa0] sm:$0xff] %vm10520_vm2, %v10404_v38  ;;  %v10407_v48 = vmax.f32 %v10271_v2, 0.0  ;;  %v10269_v10 = vadd.f32 %v16547_v19, %v10126_v29  ;;  %v9986_v40 = vadd.f32 %v9515_v32, %v8860_v9  ;;  %v8863_v22 = vadd.f32 %v12996_v37, %v15877_v7  ;;  %v9518_v33 = vpop.f32.mrf.mxu0  ;;  %v9102_v7 = vld [vmem:[%s13372_s28 + $0x456] sm:$0xff]  ;;  %v18032_v37 = vld [vmem:[#allocation78_spill] sm:$0xff] }
 0x4c5   : > { %v10131_v24 = vmul.f32 %v16538_v56, %v9988_v0  ;;  %v8392_v11 = vpop.f32.mrf.mxu1  ;;  %v9173_v46 = vpack.c.bf16 %v9103_v15, %v9102_v7 }
 0x4c6   : > { %10544 = vst.msk [vmem:[%s16560_s25 + $0xb8] sm:$0xff] %vm10520_vm2, %v10407_v48  ;;  %v10405_v54 = vmax.f32 %v10269_v10, 0.0  ;;  %v10129_v6 = vmul.f32 %v16538_v56, %v9986_v40  ;;  %v9989_v1 = vadd.f32 %v13134_v59, %v8863_v22  ;;  %v8861_v17 = vadd.f32 %v8392_v11, %v15885_v16  ;;  %v13137_v58 = vpop.f32.mrf.mxu0  ;;  %v9107_v48 = vld [vmem:[%s13372_s28 + $0x47e] sm:$0xff] }
 0x4c7   : > { %13232 = vmatmul.mubr.msk.bf16.gmra.mxu0 %vm646_vm1, %v9171_v21  ;;  %v10274_v45 = vadd.f32 %v16547_v19, %v10131_v24  ;;  %v12999_v20 = vpop.f32.mrf.mxu1  ;;  %13094 = vmatmul.mubr.msk.bf16.gmra.mxu1 %vm646_vm1, %v8045_v30 }
 0x4c8   : > { %13235 = vmatprep.mubr.msk.bf16.mxu0 %vm646_vm1, %v9172_v44  ;;  %10542 = vst.msk [vmem:[%s16560_s25 + $0xa8] sm:$0xff] %vm10520_vm2, %v10405_v54  ;;  %v10272_v16 = vadd.f32 %v16547_v19, %v10129_v6  ;;  %v10132_v35 = vmul.f32 %v16538_v56, %v9989_v1  ;;  %v9987_v26 = vadd.f32 %v9518_v33, %v8861_v17  ;;  %v9531_v25 = vpop.f32.mrf.mxu0  ;;  %v9106_v44 = vld [vmem:[%s13372_s28 + $0x476] sm:$0xff] }
 0x4c9   : > { %v8866_v5 = vadd.f32 %v12999_v20, %v15891_v8  ;;  %13097 = vmatprep.mubr.msk.bf16.mxu1 %vm646_vm1, %v8046_v42  ;;  %v10410_v31 = vmax.f32 %v10274_v45, 0.0  ;;  %v8405_v43 = vpop.f32.mrf.mxu1  ;;  %v7980_v54 = vld [vmem:[%s13372_s28 + $0x475] sm:$0xff]  ;;  %v7981_v6 = vld [vmem:[%s13372_s28 + $0x47d] sm:$0xff] }
 0x4ca   : > { %v10408_v28 = vmax.f32 %v10272_v16, 0.0  ;;  %v10275_v12 = vadd.f32 %v16547_v19, %v10132_v35  ;;  %v10130_v62 = vmul.f32 %v16538_v56, %v9987_v26  ;;  %v13138_v13 = vpop.f32.mrf.mxu0  ;;  %v8864_v8 = vadd.f32 %v8405_v43, %v15894_v34  ;;  %v18033_v20 = vld [vmem:[#allocation80_spill] sm:$0xff] }
 0x4cb   : > { %v9992_v61 = vadd.f32 %v13137_v58, %v8866_v5  ;;  %10547 = vst.msk [vmem:[%s16560_s25 + $0xd0] sm:$0xff] %vm10520_vm2, %v10410_v31  ;;  %v13000_v32 = vpop.f32.mrf.mxu1  ;;  %v9175_v58 = vpack.c.bf16 %v9107_v48, %v9106_v44  ;;  %v8049_v16 = vpack.c.bf16 %v7981_v6, %v7980_v54 }
 0x4cc   : > { %10545 = vst.msk [vmem:[%s16560_s25 + $0xc0] sm:$0xff] %vm10520_vm2, %v10408_v28  ;;  %v10411_v23 = vmax.f32 %v10275_v12, 0.0  ;;  %v10273_v57 = vadd.f32 %v16547_v19, %v10130_v62  ;;  %v8867_v38 = vadd.f32 %v13000_v32, %v15897_v52  ;;  %v9534_v2 = vpop.f32.mrf.mxu0  ;;  %v9990_v29 = vadd.f32 %v9531_v25, %v8864_v8  ;;  %v18035_v12 = vld [vmem:[#allocation84_spill] sm:$0xff] }
 0x4cd   : > { %v10135_v21 = vmul.f32 %v16538_v56, %v9992_v61  ;;  %v8408_v9 = vpop.f32.mrf.mxu1 }
 0x4ce   : > { %10548 = vst.msk [vmem:[%s16560_s25 + $0xd8] sm:$0xff] %vm10520_vm2, %v10411_v23  ;;  %v10409_v34 = vmax.f32 %v10273_v57, 0.0  ;;  %v9993_v0 = vadd.f32 %v13138_v13, %v8867_v38  ;;  %v8865_v30 = vadd.f32 %v8408_v9, %v18032_v37  ;;  %v13141_v42 = vpop.f32.mrf.mxu0  ;;  %v10133_v52 = vmul.f32 %v16538_v56, %v9990_v29 }
 0x4cf   : > { %v10278_v59 = vadd.f32 %v16547_v19, %v10135_v21  ;;  %13236 = vmatmul.mubr.msk.bf16.gmra.mxu0 %vm646_vm1, %v9173_v46  ;;  %v13003_v10 = vpop.f32.mrf.mxu1  ;;  %13098 = vmatmul.mubr.msk.bf16.gmra.mxu1 %vm646_vm1, %v8047_v47 }
 0x4d0   : > { %13239 = vmatprep.mubr.msk.bf16.mxu0 %vm646_vm1, %v9174_v55  ;;  %10546 = vst.msk [vmem:[%s16560_s25 + $0xc8] sm:$0xff] %vm10520_vm2, %v10409_v34  ;;  %v10136_v22 = vmul.f32 %v16538_v56, %v9993_v0  ;;  %v9991_v33 = vadd.f32 %v9534_v2, %v8865_v30  ;;  %v8870_v24 = vadd.f32 %v13003_v10, %v15913_v27  ;;  %v9547_v11 = vpop.f32.mrf.mxu0  ;;  %v18036_v55 = vld [vmem:[#allocation86_spill] sm:$0xff]  ;;  %v18037_v34 = vld [vmem:[#allocation88_spill] sm:$0xff] }
 0x4d1   : > { %v10414_v40 = vmax.f32 %v10278_v59, 0.0  ;;  %13101 = vmatprep.mubr.msk.bf16.mxu1 %vm646_vm1, %v8048_v53  ;;  %v10276_v1 = vadd.f32 %v16547_v19, %v10133_v52  ;;  %v8421_v17 = vpop.f32.mrf.mxu1  ;;  %v18038_v52 = vld [vmem:[#allocation90_spill] sm:$0xff] }
 0x4d2   : > { %v10279_v7 = vadd.f32 %v16547_v19, %v10136_v22  ;;  %v10134_v15 = vmul.f32 %v16538_v56, %v9991_v33  ;;  %v9996_v45 = vadd.f32 %v13141_v42, %v8870_v24  ;;  %v8868_v27 = vadd.f32 %v8421_v17, %v18033_v20  ;;  %v13142_v49 = vpop.f32.mrf.mxu0  ;;  %v18039_v17 = vld [vmem:[#allocation92_spill] sm:$0xff] }
 0x4d3   : > { %10551 = vst.msk [vmem:[%s16560_s25 + $0xf0] sm:$0xff] %vm10520_vm2, %v10414_v40  ;;  %v10412_v18 = vmax.f32 %v10276_v1, 0.0  ;;  %v13004_v51 = vpop.f32.mrf.mxu1 }
 0x4d4   : > { %v10415_v35 = vmax.f32 %v10279_v7, 0.0  ;;  %v10277_v26 = vadd.f32 %v16547_v19, %v10134_v15  ;;  %v10139_v5 = vmul.f32 %v16538_v56, %v9996_v45  ;;  %v9994_v25 = vadd.f32 %v9547_v11, %v8868_v27  ;;  %v9550_v41 = vpop.f32.mrf.mxu0  ;;  %v18040_v27 = vld [vmem:[#allocation94_spill] sm:$0xff] }
 0x4d5   : > { %10549 = vst.msk [vmem:[%s16560_s25 + $0xe0] sm:$0xff] %vm10520_vm2, %v10412_v18  ;;  %v8871_v4 = vadd.f32 %v13004_v51, %v18034_v3  ;;  %v8424_v31 = vpop.f32.mrf.mxu1 }
 0x4d6   : > { %10552 = vst.msk [vmem:[%s16560_s25 + $0xf8] sm:$0xff] %vm10520_vm2, %v10415_v35  ;;  %v10413_v43 = vmax.f32 %v10277_v26, 0.0  ;;  %v10282_v46 = vadd.f32 %v16547_v19, %v10139_v5  ;;  %v10137_v28 = vmul.f32 %v16538_v56, %v9994_v25  ;;  %v8869_v62 = vadd.f32 %v8424_v31, %v18035_v12  ;;  %v13145_v61 = vpop.f32.mrf.mxu0  ;;  %v18041_v25 = vld [vmem:[#allocation96_spill] sm:$0xff]  ;;  %v18042_v12 = vld [vmem:[#allocation98_spill] sm:$0xff] }
 0x4d7   : > { %13240 = vmatmul.mubr.msk.bf16.gmra.mxu0 %vm646_vm1, %v9175_v58  ;;  %v9997_v13 = vadd.f32 %v13142_v49, %v8871_v4  ;;  %v13007_v8 = vpop.f32.mrf.mxu1  ;;  %13102 = vmatmul.mubr.msk.bf16.gmra.mxu1 %vm646_vm1, %v8049_v16 }
 0x4d8   : > { %10550 = vst.msk [vmem:[%s16560_s25 + $0xe8] sm:$0xff] %vm10520_vm2, %v10413_v43  ;;  %v10418_v32 = vmax.f32 %v10282_v46, 0.0  ;;  %v10280_v47 = vadd.f32 %v16547_v19, %v10137_v28  ;;  %v9995_v53 = vadd.f32 %v9550_v41, %v8869_v62  ;;  %v8874_v23 = vadd.f32 %v13007_v8, %v18036_v55  ;;  %v9563_v57 = vpop.f32.mrf.mxu0  ;;  %v18043_v55 = vld [vmem:[#allocation99_spill] sm:$0xff] }
 0x4d9   : > { %v10140_v21 = vmul.f32 %v16538_v56, %v9997_v13  ;;  %v8437_v38 = vpop.f32.mrf.mxu1 }
 0x4da   : > { %10555 = vst.msk [vmem:[%s16560_s25 + $0x110] sm:$0xff] %vm10520_vm2, %v10418_v32  ;;  %v10416_v2 = vmax.f32 %v10280_v47, 0.0  ;;  %v10138_v29 = vmul.f32 %v16538_v56, %v9995_v53  ;;  %v10000_v9 = vadd.f32 %v13145_v61, %v8874_v23  ;;  %v8872_v59 = vadd.f32 %v8437_v38, %v18037_v34  ;;  %v13146_v0 = vpop.f32.mrf.mxu0 }
 0x4db   : > { %v10283_v37 = vadd.f32 %v16547_v19, %v10140_v21  ;;  %v13008_v30 = vpop.f32.mrf.mxu1 }
 0x4dc   : > { %10553 = vst.msk [vmem:[%s16560_s25 + $0x100] sm:$0xff] %vm10520_vm2, %v10416_v2  ;;  %v10281_v42 = vadd.f32 %v16547_v19, %v10138_v29  ;;  %v10143_v44 = vmul.f32 %v16538_v56, %v10000_v9  ;;  %v9998_v48 = vadd.f32 %v9563_v57, %v8872_v59  ;;  %v8875_v10 = vadd.f32 %v13008_v30, %v18038_v52  ;;  %v9566_v40 = vpop.f32.mrf.mxu0  ;;  %v18045_v52 = vld [vmem:[#allocation52_spill] sm:$0xff] }
 0x4dd   : > { %v10419_v22 = vmax.f32 %v10283_v37, 0.0  ;;  %v8440_v33 = vpop.f32.mrf.mxu1 }
 0x4de   : > { %v10417_v24 = vmax.f32 %v10281_v42, 0.0  ;;  %v10286_v11 = vadd.f32 %v16547_v19, %v10143_v44  ;;  %v10141_v54 = vmul.f32 %v16538_v56, %v9998_v48  ;;  %v10001_v6 = vadd.f32 %v13146_v0, %v8875_v10  ;;  %v13149_v1 = vpop.f32.mrf.mxu0  ;;  %v18044_v0 = vld [vmem:[#allocation54_spill] sm:$0xff] }
 0x4df   : > { %10556 = vst.msk [vmem:[%s16560_s25 + $0x118] sm:$0xff] %vm10520_vm2, %v10419_v22  ;;  %v8873_v58 = vadd.f32 %v8440_v33, %v18039_v17  ;;  %v13011_v7 = vpop.f32.mrf.mxu1 }
 0x4e0   : > { %10554 = vst.msk [vmem:[%s16560_s25 + $0x108] sm:$0xff] %vm10520_vm2, %v10417_v24  ;;  %v10422_v15 = vmax.f32 %v10286_v11, 0.0  ;;  %v10284_v45 = vadd.f32 %v16547_v19, %v10141_v54  ;;  %v10144_v20 = vmul.f32 %v16538_v56, %v10001_v6  ;;  %v8878_v49 = vadd.f32 %v13011_v7, %v18040_v27  ;;  %v9579_v18 = vpop.f32.mrf.mxu0  ;;  %v18046_v6 = vld [vmem:[#allocation41_spill] sm:$0xff]  ;;  %v18047_v27 = vld [vmem:[#allocation43_spill] sm:$0xff] }
 0x4e1   : > { %v9999_v51 = vadd.f32 %v9566_v40, %v8873_v58  ;;  %v8453_v16 = vpop.f32.mrf.mxu1 }
 0x4e2   : > { %10559 = vst.msk [vmem:[%s16560_s25 + $0x130] sm:$0xff] %vm10520_vm2, %v10422_v15  ;;  %v10420_v35 = vmax.f32 %v10284_v45, 0.0  ;;  %v10287_v26 = vadd.f32 %v16547_v19, %v10144_v20  ;;  %v10004_v5 = vadd.f32 %v13149_v1, %v8878_v49  ;;  %v8876_v41 = vadd.f32 %v8453_v16, %v18041_v25  ;;  %v13150_v3 = vpop.f32.mrf.mxu0  ;;  %v18048_v25 = vld [vmem:[#allocation45_spill] sm:$0xff] }
 0x4e3   : > { %v10142_v4 = vmul.f32 %v16538_v56, %v9999_v51  ;;  %v13012_v31 = vpop.f32.mrf.mxu1 }
 0x4e4   : > { %10557 = vst.msk [vmem:[%s16560_s25 + $0x120] sm:$0xff] %vm10520_vm2, %v10420_v35  ;;  %v10423_v43 = vmax.f32 %v10287_v26, 0.0  ;;  %v10147_v46 = vmul.f32 %v16538_v56, %v10004_v5  ;;  %v10002_v28 = vadd.f32 %v9579_v18, %v8876_v41  ;;  %v8879_v62 = vadd.f32 %v13012_v31, %v18042_v12  ;;  %v9582_v61 = vpop.f32.mrf.mxu0 }
 0x4e5   : > { %v10285_v13 = vadd.f32 %v16547_v19, %v10142_v4  ;;  %v8456_v8 = vpop.f32.mrf.mxu1 }
 0x4e6   : > { %10560 = vst.msk [vmem:[%s16560_s25 + $0x138] sm:$0xff] %vm10520_vm2, %v10423_v43  ;;  %v10290_v32 = vadd.f32 %v16547_v19, %v10147_v46  ;;  %v10145_v47 = vmul.f32 %v16538_v56, %v10002_v28  ;;  %v10005_v53 = vadd.f32 %v13150_v3, %v8879_v62  ;;  %v8877_v23 = vadd.f32 %v8456_v8, %v18043_v55  ;;  %v13153_v57 = vpop.f32.mrf.mxu0  ;;  %v16880_v28 = vld [vmem:[%s17357_s2] ss:$0 sm:$0xff]  ;;  %v18050_v55 = vld [vmem:[#allocation49_spill] sm:$0xff] }
 0x4e7   : > { %v10421_v21 = vmax.f32 %v10285_v13, 0.0  ;;  %v13015_v38 = vpop.f32.mrf.mxu1 }
 0x4e8   : > { %v10426_v2 = vmax.f32 %v10290_v32, 0.0  ;;  %v10288_v29 = vadd.f32 %v16547_v19, %v10145_v47  ;;  %v10148_v9 = vmul.f32 %v16538_v56, %v10005_v53  ;;  %v10003_v34 = vadd.f32 %v9582_v61, %v8877_v23  ;;  %v9595_v59 = vpop.f32.mrf.mxu0 }
 0x4e9   : > { %10558 = vst.msk [vmem:[%s16560_s25 + $0x128] sm:$0xff] %vm10520_vm2, %v10421_v21  ;;  %v8882_v37 = vadd.f32 %v13015_v38, %v18044_v0  ;;  %v8469_v30 = vpop.f32.mrf.mxu1 }
 0x4ea   : > { %10563 = vst.msk [vmem:[%s16560_s25 + $0x150] sm:$0xff] %vm10520_vm2, %v10426_v2  ;;  %v10424_v42 = vmax.f32 %v10288_v29, 0.0  ;;  %v10291_v44 = vadd.f32 %v16547_v19, %v10148_v9  ;;  %v10146_v48 = vmul.f32 %v16538_v56, %v10003_v34  ;;  %v8880_v10 = vadd.f32 %v8469_v30, %v18045_v52  ;;  %v13154_v40 = vpop.f32.mrf.mxu0  ;;  %v16896_v29 = vld [vmem:[%s17358_s3] ss:$0 sm:$0xff]  ;;  %v18052_v52 = vld [vmem:[#allocation53_spill] sm:$0xff] }
 0x4eb   : > { %v10008_v22 = vadd.f32 %v13153_v57, %v8882_v37  ;;  %v13016_v33 = vpop.f32.mrf.mxu1 }
 0x4ec   : > { %10561 = vst.msk [vmem:[%s16560_s25 + $0x140] sm:$0xff] %vm10520_vm2, %v10424_v42  ;;  %v10427_v24 = vmax.f32 %v10291_v44, 0.0  ;;  %v10289_v11 = vadd.f32 %v16547_v19, %v10146_v48  ;;  %v10006_v54 = vadd.f32 %v9595_v59, %v8880_v10  ;;  %v8883_v1 = vadd.f32 %v13016_v33, %v18046_v6  ;;  %v9598_v17 = vpop.f32.mrf.mxu0  ;;  %v18053_v6 = vld [vmem:[#allocation55_spill] sm:$0xff] }
 0x4ed   : > { %v10151_v58 = vmul.f32 %v16538_v56, %v10008_v22  ;;  %v8472_v7 = vpop.f32.mrf.mxu1 }
 0x4ee   : > { %10564 = vst.msk [vmem:[%s16560_s25 + $0x158] sm:$0xff] %vm10520_vm2, %v10427_v24  ;;  %v10425_v15 = vmax.f32 %v10289_v11, 0.0  ;;  %v10149_v45 = vmul.f32 %v16538_v56, %v10006_v54  ;;  %v10009_v20 = vadd.f32 %v13154_v40, %v8883_v1  ;;  %v8881_v49 = vadd.f32 %v8472_v7, %v18047_v27  ;;  %v13157_v18 = vpop.f32.mrf.mxu0 }
 0x4ef   : > { %v10294_v51 = vadd.f32 %v16547_v19, %v10151_v58  ;;  %v13019_v16 = vpop.f32.mrf.mxu1 }
 0x4f0   : > { %10562 = vst.msk [vmem:[%s16560_s25 + $0x148] sm:$0xff] %vm10520_vm2, %v10425_v15  ;;  %v10292_v35 = vadd.f32 %v16547_v19, %v10149_v45  ;;  %v10152_v26 = vmul.f32 %v16538_v56, %v10009_v20  ;;  %v10007_v5 = vadd.f32 %v9598_v17, %v8881_v49  ;;  %v8886_v41 = vadd.f32 %v13019_v16, %v18048_v25  ;;  %v9611_v3 = vpop.f32.mrf.mxu0  ;;  %v18049_v56 = vld [vmem:[#allocation47_spill] sm:$0xff] }
 0x4f1   : > { %v10430_v4 = vmax.f32 %v10294_v51, 0.0  ;;  %v8485_v31 = vpop.f32.mrf.mxu1  ;;  %v18055_v25 = vld [vmem:[#allocation59_spill] sm:$0xff] }
 0x4f2   : > { %v10428_v43 = vmax.f32 %v10292_v35, 0.0  ;;  %v10295_v46 = vadd.f32 %v16547_v19, %v10152_v26  ;;  %v10150_v12 = vmul.f32 %v16880_v28, %v10007_v5  ;;  %v10012_v62 = vadd.f32 %v13157_v18, %v8886_v41  ;;  %v13158_v61 = vpop.f32.mrf.mxu0  ;;  %v18054_v18 = vld [vmem:[#allocation57_spill] sm:$0xff] }
 0x4f3   : > { %10567 = vst.msk [vmem:[%s16560_s25 + $0x170] sm:$0xff] %vm10520_vm2, %v10430_v4  ;;  %v8884_v13 = vadd.f32 %v8485_v31, %v18049_v56  ;;  %v13020_v8 = vpop.f32.mrf.mxu1 }
 0x4f4   : > { %10565 = vst.msk [vmem:[%s16560_s25 + $0x160] sm:$0xff] %vm10520_vm2, %v10428_v43  ;;  %v10431_v32 = vmax.f32 %v10295_v46, 0.0  ;;  %v10293_v47 = vadd.f32 %v16547_v19, %v10150_v12  ;;  %v10155_v53 = vmul.f32 %v16880_v28, %v10012_v62  ;;  %v8887_v23 = vadd.f32 %v13020_v8, %v18050_v55  ;;  %v9614_v57 = vpop.f32.mrf.mxu0  ;;  %v18051_v19 = vld [vmem:[#allocation51_spill] sm:$0xff]  ;;  %v18056_v62 = vld [vmem:[#allocation61_spill] sm:$0xff] }
 0x4f5   : > { %v10010_v21 = vadd.f32 %v9611_v3, %v8884_v13  ;;  %v8488_v38 = vpop.f32.mrf.mxu1  ;;  %v18057_v55 = vld [vmem:[#allocation63_spill] sm:$0xff] }
 0x4f6   : > { %10568 = vst.msk [vmem:[%s16560_s25 + $0x178] sm:$0xff] %vm10520_vm2, %v10431_v32  ;;  %v10429_v2 = vmax.f32 %v10293_v47, 0.0  ;;  %v10298_v9 = vadd.f32 %v16896_v29, %v10155_v53  ;;  %v10013_v34 = vadd.f32 %v13158_v61, %v8887_v23  ;;  %v8885_v59 = vadd.f32 %v8488_v38, %v18051_v19  ;;  %v13161_v0 = vpop.f32.mrf.mxu0  ;;  %v18058_v19 = vld [vmem:[#allocation65_spill] sm:$0xff] }
 0x4f7   : > { %v10153_v37 = vmul.f32 %v16880_v28, %v10010_v21  ;;  %v13023_v30 = vpop.f32.mrf.mxu1 }
 0x4f8   : > { %10566 = vst.msk [vmem:[%s16560_s25 + $0x168] sm:$0xff] %vm10520_vm2, %v10429_v2  ;;  %v10434_v42 = vmax.f32 %v10298_v9, 0.0  ;;  %v10156_v44 = vmul.f32 %v16880_v28, %v10013_v34  ;;  %v10011_v48 = vadd.f32 %v9614_v57, %v8885_v59  ;;  %v8890_v10 = vadd.f32 %v13023_v30, %v18052_v52  ;;  %v9627_v40 = vpop.f32.mrf.mxu0 }
 0x4f9   : > { %v10296_v22 = vadd.f32 %v16896_v29, %v10153_v37  ;;  %v8501_v33 = vpop.f32.mrf.mxu1 }
 0x4fa   : > { %10571 = vst.msk [vmem:[%s16560_s25 + $0x190] sm:$0xff] %vm10520_vm2, %v10434_v42  ;;  %v10299_v24 = vadd.f32 %v16896_v29, %v10156_v44  ;;  %v10154_v11 = vmul.f32 %v16880_v28, %v10011_v48  ;;  %v10016_v54 = vadd.f32 %v13161_v0, %v8890_v10  ;;  %v8888_v1 = vadd.f32 %v8501_v33, %v18053_v6  ;;  %v13162_v17 = vpop.f32.mrf.mxu0  ;;  %v18060_v6 = vld [vmem:[#allocation69_spill] sm:$0xff] }
 0x4fb   : > { %v10432_v58 = vmax.f32 %v10296_v22, 0.0  ;;  %v13024_v7 = vpop.f32.mrf.mxu1 }
 0x4fc   : > { %v10435_v15 = vmax.f32 %v10299_v24, 0.0  ;;  %v10297_v45 = vadd.f32 %v16896_v29, %v10154_v11  ;;  %v10159_v20 = vmul.f32 %v16880_v28, %v10016_v54  ;;  %v10014_v27 = vadd.f32 %v9627_v40, %v8888_v1  ;;  %v9630_v49 = vpop.f32.mrf.mxu0  ;;  %v18059_v40 = vld [vmem:[#allocation67_spill] sm:$0xff] }
 0x4fd   : > { %10569 = vst.msk [vmem:[%s16560_s25 + $0x180] sm:$0xff] %vm10520_vm2, %v10432_v58  ;;  %v8891_v51 = vadd.f32 %v13024_v7, %v18054_v18  ;;  %v8504_v16 = vpop.f32.mrf.mxu1 }
 0x4fe   : > { %10572 = vst.msk [vmem:[%s16560_s25 + $0x198] sm:$0xff] %vm10520_vm2, %v10435_v15  ;;  %v10433_v35 = vmax.f32 %v10297_v45, 0.0  ;;  %v10302_v26 = vadd.f32 %v16896_v29, %v10159_v20  ;;  %v10157_v5 = vmul.f32 %v16880_v28, %v10014_v27  ;;  %v8889_v41 = vadd.f32 %v8504_v16, %v18055_v25  ;;  %v13165_v3 = vpop.f32.mrf.mxu0  ;;  %v18061_v27 = vld [vmem:[#allocation71_spill] sm:$0xff]  ;;  %v18062_v25 = vld [vmem:[#allocation73_spill] sm:$0xff] }
 0x4ff   : > { %v10017_v4 = vadd.f32 %v13162_v17, %v8891_v51  ;;  %v13027_v31 = vpop.f32.mrf.mxu1 }
 0x500   : > { %10570 = vst.msk [vmem:[%s16560_s25 + $0x188] sm:$0xff] %vm10520_vm2, %v10433_v35  ;;  %v10438_v43 = vmax.f32 %v10302_v26, 0.0  ;;  %v10300_v46 = vadd.f32 %v16896_v29, %v10157_v5  ;;  %v10015_v12 = vadd.f32 %v9630_v49, %v8889_v41  ;;  %v8894_v61 = vadd.f32 %v13027_v31, %v18056_v62  ;;  %v9643_v56 = vpop.f32.mrf.mxu0  ;;  %v18063_v62 = vld [vmem:[#allocation75_spill] sm:$0xff] }
 0x501   : > { %v10160_v13 = vmul.f32 %v16880_v28, %v10017_v4  ;;  %v8517_v8 = vpop.f32.mrf.mxu1 }
 0x502   : > { %10575 = vst.msk [vmem:[%s16560_s25 + $0x1b0] sm:$0xff] %vm10520_vm2, %v10438_v43  ;;  %v10436_v32 = vmax.f32 %v10300_v46, 0.0  ;;  %v10158_v47 = vmul.f32 %v16880_v28, %v10015_v12  ;;  %v10020_v53 = vadd.f32 %v13165_v3, %v8894_v61  ;;  %v8892_v23 = vadd.f32 %v8517_v8, %v18057_v55  ;;  %v13166_v57 = vpop.f32.mrf.mxu0 }
 0x503   : > { %v10303_v21 = vadd.f32 %v16896_v29, %v10160_v13  ;;  %v13028_v38 = vpop.f32.mrf.mxu1 }
 0x504   : > { %10573 = vst.msk [vmem:[%s16560_s25 + $0x1a0] sm:$0xff] %vm10520_vm2, %v10436_v32  ;;  %v10301_v2 = vadd.f32 %v16896_v29, %v10158_v47  ;;  %v10163_v9 = vmul.f32 %v16880_v28, %v10020_v53  ;;  %v10018_v34 = vadd.f32 %v9643_v56, %v8892_v23  ;;  %v8895_v59 = vadd.f32 %v13028_v38, %v18058_v19  ;;  %v9646_v0 = vpop.f32.mrf.mxu0  ;;  %v18065_v19 = vld [vmem:[#allocation79_spill] sm:$0xff] }
 0x505   : > { %v10439_v37 = vmax.f32 %v10303_v21, 0.0  ;;  %v8520_v30 = vpop.f32.mrf.mxu1 }
 0x506   : > { %v10437_v42 = vmax.f32 %v10301_v2, 0.0  ;;  %v10306_v44 = vadd.f32 %v16896_v29, %v10163_v9  ;;  %v10161_v48 = vmul.f32 %v16880_v28, %v10018_v34  ;;  %v10021_v52 = vadd.f32 %v13166_v57, %v8895_v59  ;;  %v13169_v10 = vpop.f32.mrf.mxu0  ;;  %v18064_v57 = vld [vmem:[#allocation77_spill] sm:$0xff] }
 0x507   : > { %10576 = vst.msk [vmem:[%s16560_s25 + $0x1b8] sm:$0xff] %vm10520_vm2, %v10439_v37  ;;  %v8893_v22 = vadd.f32 %v8520_v30, %v18059_v40  ;;  %v13031_v33 = vpop.f32.mrf.mxu1 }
 0x508   : > { %10574 = vst.msk [vmem:[%s16560_s25 + $0x1a8] sm:$0xff] %vm10520_vm2, %v10437_v42  ;;  %v10442_v24 = vmax.f32 %v10306_v44, 0.0  ;;  %v10304_v11 = vadd.f32 %v16896_v29, %v10161_v48  ;;  %v10164_v54 = vmul.f32 %v16880_v28, %v10021_v52  ;;  %v8898_v1 = vadd.f32 %v13031_v33, %v18060_v6  ;;  %v9659_v17 = vpop.f32.mrf.mxu0  ;;  %v18066_v52 = vld [vmem:[#allocation81_spill] sm:$0xff]  ;;  %v18067_v6 = vld [vmem:[#allocation83_spill] sm:$0xff] }
 0x509   : > { %v10019_v58 = vadd.f32 %v9646_v0, %v8893_v22  ;;  %v8533_v7 = vpop.f32.mrf.mxu1 }
 0x50a   : > { %10579 = vst.msk [vmem:[%s16560_s25 + $0x1d0] sm:$0xff] %vm10520_vm2, %v10442_v24  ;;  %v10440_v15 = vmax.f32 %v10304_v11, 0.0  ;;  %v10307_v45 = vadd.f32 %v16896_v29, %v10164_v54  ;;  %v10024_v20 = vadd.f32 %v13169_v10, %v8898_v1  ;;  %v8896_v49 = vadd.f32 %v8533_v7, %v18061_v27  ;;  %v13170_v18 = vpop.f32.mrf.mxu0  ;;  %v18068_v27 = vld [vmem:[#allocation85_spill] sm:$0xff] }
 0x50b   : > { %v10162_v51 = vmul.f32 %v16880_v28, %v10019_v58  ;;  %v13032_v16 = vpop.f32.mrf.mxu1 }
 0x50c   : > { %10577 = vst.msk [vmem:[%s16560_s25 + $0x1c0] sm:$0xff] %vm10520_vm2, %v10440_v15  ;;  %v10443_v35 = vmax.f32 %v10307_v45, 0.0  ;;  %v10167_v26 = vmul.f32 %v16880_v28, %v10024_v20  ;;  %v10022_v5 = vadd.f32 %v9659_v17, %v8896_v49  ;;  %v8899_v41 = vadd.f32 %v13032_v16, %v18062_v25  ;;  %v9662_v3 = vpop.f32.mrf.mxu0 }
 0x50d   : > { %v10305_v4 = vadd.f32 %v16896_v29, %v10162_v51  ;;  %v8536_v31 = vpop.f32.mrf.mxu1 }
 0x50e   : > { %10580 = vst.msk [vmem:[%s16560_s25 + $0x1d8] sm:$0xff] %vm10520_vm2, %v10443_v35  ;;  %v10310_v43 = vadd.f32 %v16896_v29, %v10167_v26  ;;  %v10165_v46 = vmul.f32 %v16880_v28, %v10022_v5  ;;  %v10025_v12 = vadd.f32 %v13170_v18, %v8899_v41  ;;  %v8897_v61 = vadd.f32 %v8536_v31, %v18063_v62  ;;  %v13173_v56 = vpop.f32.mrf.mxu0  ;;  %v18070_v62 = vld [vmem:[#allocation89_spill] sm:$0xff] }
 0x50f   : > { %v10441_v13 = vmax.f32 %v10305_v4, 0.0  ;;  %v13035_v8 = vpop.f32.mrf.mxu1 }
 0x510   : > { %v10446_v32 = vmax.f32 %v10310_v43, 0.0  ;;  %v10308_v47 = vadd.f32 %v16896_v29, %v10165_v46  ;;  %v10168_v53 = vmul.f32 %v16880_v28, %v10025_v12  ;;  %v10023_v55 = vadd.f32 %v9662_v3, %v8897_v61  ;;  %v9675_v23 = vpop.f32.mrf.mxu0  ;;  %v18069_v3 = vld [vmem:[#allocation87_spill] sm:$0xff] }
 0x511   : > { %10578 = vst.msk [vmem:[%s16560_s25 + $0x1c8] sm:$0xff] %vm10520_vm2, %v10441_v13  ;;  %v8902_v21 = vadd.f32 %v13035_v8, %v18064_v57  ;;  %v8549_v38 = vpop.f32.mrf.mxu1 }
 0x512   : > { %10583 = vst.msk [vmem:[%s16560_s25 + $0x1f0] sm:$0xff] %vm10520_vm2, %v10446_v32  ;;  %v10444_v2 = vmax.f32 %v10308_v47, 0.0  ;;  %v10311_v9 = vadd.f32 %v16896_v29, %v10168_v53  ;;  %v10166_v34 = vmul.f32 %v16880_v28, %v10023_v55  ;;  %v8900_v59 = vadd.f32 %v8549_v38, %v18065_v19  ;;  %v13174_v0 = vpop.f32.mrf.mxu0  ;;  %v18071_v55 = vld [vmem:[#allocation91_spill] sm:$0xff]  ;;  %v18072_v19 = vld [vmem:[#allocation93_spill] sm:$0xff] }
 0x513   : > { %v10028_v37 = vadd.f32 %v13173_v56, %v8902_v21  ;;  %v13036_v30 = vpop.f32.mrf.mxu1 }
 0x514   : > { %10581 = vst.msk [vmem:[%s16560_s25 + $0x1e0] sm:$0xff] %vm10520_vm2, %v10444_v2  ;;  %v10447_v42 = vmax.f32 %v10311_v9, 0.0  ;;  %v10309_v44 = vadd.f32 %v16896_v29, %v10166_v34  ;;  %v10026_v48 = vadd.f32 %v9675_v23, %v8900_v59  ;;  %v8903_v10 = vadd.f32 %v13036_v30, %v18066_v52  ;;  %v9678_v40 = vpop.f32.mrf.mxu0  ;;  %v18073_v52 = vld [vmem:[#allocation95_spill] sm:$0xff] }
 0x515   : > { %v10171_v22 = vmul.f32 %v16880_v28, %v10028_v37  ;;  %v8552_v33 = vpop.f32.mrf.mxu1 }
 0x516   : > { %10584 = vst.msk [vmem:[%s16560_s25 + $0x1f8] sm:$0xff] %vm10520_vm2, %v10447_v42  ;;  %v10445_v24 = vmax.f32 %v10309_v44, 0.0  ;;  %v10169_v11 = vmul.f32 %v16880_v28, %v10026_v48  ;;  %v10029_v54 = vadd.f32 %v13174_v0, %v8903_v10  ;;  %v8901_v1 = vadd.f32 %v8552_v33, %v18067_v6  ;;  %v13177_v17 = vpop.f32.mrf.mxu0 }
 0x517   : > { %v10314_v58 = vadd.f32 %v16896_v29, %v10171_v22  ;;  %v13039_v7 = vpop.f32.mrf.mxu1 }
 0x518   : > { %10582 = vst.msk [vmem:[%s16560_s25 + $0x1e8] sm:$0xff] %vm10520_vm2, %v10445_v24  ;;  %v10312_v15 = vadd.f32 %v16896_v29, %v10169_v11  ;;  %v10172_v45 = vmul.f32 %v16880_v28, %v10029_v54  ;;  %v10027_v20 = vadd.f32 %v9678_v40, %v8901_v1  ;;  %v8906_v49 = vadd.f32 %v13039_v7, %v18068_v27  ;;  %v9691_v18 = vpop.f32.mrf.mxu0  ;;  %v18075_v27 = vld [vmem:[#allocation2_spill] sm:$0xff] }
 0x519   : > { %v10450_v51 = vmax.f32 %v10314_v58, 0.0  ;;  %v8565_v16 = vpop.f32.mrf.mxu1 }
 0x51a   : > { %v10448_v35 = vmax.f32 %v10312_v15, 0.0  ;;  %v10315_v26 = vadd.f32 %v16896_v29, %v10172_v45  ;;  %v10170_v5 = vmul.f32 %v16880_v28, %v10027_v20  ;;  %v10032_v25 = vadd.f32 %v13177_v17, %v8906_v49  ;;  %v13178_v41 = vpop.f32.mrf.mxu0  ;;  %v18074_v17 = vld [vmem:[#allocation97_spill] sm:$0xff] }
 0x51b   : > { %10587 = vst.msk [vmem:[%s16560_s25 + $0x210] sm:$0xff] %vm10520_vm2, %v10450_v51  ;;  %v8904_v4 = vadd.f32 %v8565_v16, %v18069_v3  ;;  %v13040_v31 = vpop.f32.mrf.mxu1 }
 0x51c   : > { %10585 = vst.msk [vmem:[%s16560_s25 + $0x200] sm:$0xff] %vm10520_vm2, %v10448_v35  ;;  %v10451_v43 = vmax.f32 %v10315_v26, 0.0  ;;  %v10313_v46 = vadd.f32 %v16896_v29, %v10170_v5  ;;  %v10175_v12 = vmul.f32 %v16880_v28, %v10032_v25  ;;  %v8907_v61 = vadd.f32 %v13040_v31, %v18070_v62  ;;  %v9694_v56 = vpop.f32.mrf.mxu0  ;;  %v18076_v25 = vld [vmem:[#allocation3_spill] sm:$0xff]  ;;  %v18077_v62 = vld [vmem:[#allocation4_spill] sm:$0xff] }
 0x51d   : > { %v10030_v13 = vadd.f32 %v9691_v18, %v8904_v4  ;;  %v8568_v8 = vpop.f32.mrf.mxu1 }
 0x51e   : > { %10588 = vst.msk [vmem:[%s16560_s25 + $0x218] sm:$0xff] %vm10520_vm2, %v10451_v43  ;;  %v10449_v32 = vmax.f32 %v10313_v46, 0.0  ;;  %v10318_v47 = vadd.f32 %v16896_v29, %v10175_v12  ;;  %v10033_v53 = vadd.f32 %v13178_v41, %v8907_v61  ;;  %v8905_v23 = vadd.f32 %v8568_v8, %v18071_v55  ;;  %v13181_v57 = vpop.f32.mrf.mxu0  ;;  %v18078_v55 = vld [vmem:[#allocation5_spill] sm:$0xff] }
 0x51f   : > { %v10173_v21 = vmul.f32 %v16880_v28, %v10030_v13  ;;  %v13043_v38 = vpop.f32.mrf.mxu1 }
 0x520   : > { %10586 = vst.msk [vmem:[%s16560_s25 + $0x208] sm:$0xff] %vm10520_vm2, %v10449_v32  ;;  %v10454_v2 = vmax.f32 %v10318_v47, 0.0  ;;  %v10176_v9 = vmul.f32 %v16880_v28, %v10033_v53  ;;  %v10031_v34 = vadd.f32 %v9694_v56, %v8905_v23  ;;  %v8910_v59 = vadd.f32 %v13043_v38, %v18072_v19  ;;  %v9707_v0 = vpop.f32.mrf.mxu0 }
 0x521   : > { %v10316_v37 = vadd.f32 %v16896_v29, %v10173_v21  ;;  %v8581_v30 = vpop.f32.mrf.mxu1 }
 0x522   : > { %10591 = vst.msk [vmem:[%s16560_s25 + $0x230] sm:$0xff] %vm10520_vm2, %v10454_v2  ;;  %v10319_v42 = vadd.f32 %v16896_v29, %v10176_v9  ;;  %v10174_v44 = vmul.f32 %v16880_v28, %v10031_v34  ;;  %v10036_v48 = vadd.f32 %v13181_v57, %v8910_v59  ;;  %v8908_v10 = vadd.f32 %v8581_v30, %v18073_v52  ;;  %v13182_v40 = vpop.f32.mrf.mxu0  ;;  %v18080_v52 = vld [vmem:[#allocation7_spill] sm:$0xff] }
 0x523   : > { %v10452_v22 = vmax.f32 %v10316_v37, 0.0  ;;  %v13044_v33 = vpop.f32.mrf.mxu1 }
 0x524   : > { %v10455_v24 = vmax.f32 %v10319_v42, 0.0  ;;  %v10317_v11 = vadd.f32 %v16896_v29, %v10174_v44  ;;  %v10179_v54 = vmul.f32 %v16880_v28, %v10036_v48  ;;  %v10034_v6 = vadd.f32 %v9707_v0, %v8908_v10  ;;  %v9710_v1 = vpop.f32.mrf.mxu0  ;;  %v18079_v0 = vld [vmem:[#allocation6_spill] sm:$0xff] }
 0x525   : > { %10589 = vst.msk [vmem:[%s16560_s25 + $0x220] sm:$0xff] %vm10520_vm2, %v10452_v22  ;;  %v8911_v58 = vadd.f32 %v13044_v33, %v18074_v17  ;;  %v8584_v7 = vpop.f32.mrf.mxu1 }
 0x526   : > { %10592 = vst.msk [vmem:[%s16560_s25 + $0x238] sm:$0xff] %vm10520_vm2, %v10455_v24  ;;  %v10453_v15 = vmax.f32 %v10317_v11, 0.0  ;;  %v10322_v45 = vadd.f32 %v16896_v29, %v10179_v54  ;;  %v10177_v20 = vmul.f32 %v16880_v28, %v10034_v6  ;;  %v8909_v49 = vadd.f32 %v8584_v7, %v18075_v27  ;;  %v13185_v18 = vpop.f32.mrf.mxu0  ;;  %v18081_v6 = vld [vmem:[#allocation8_spill] sm:$0xff]  ;;  %v18082_v27 = vld [vmem:[#allocation9_spill] sm:$0xff] }
 0x527   : > { %v10037_v51 = vadd.f32 %v13182_v40, %v8911_v58  ;;  %v13047_v16 = vpop.f32.mrf.mxu1 }
 0x528   : > { %10590 = vst.msk [vmem:[%s16560_s25 + $0x228] sm:$0xff] %vm10520_vm2, %v10453_v15  ;;  %v10458_v35 = vmax.f32 %v10322_v45, 0.0  ;;  %v10320_v26 = vadd.f32 %v16896_v29, %v10177_v20  ;;  %v10035_v5 = vadd.f32 %v9710_v1, %v8909_v49  ;;  %v8914_v41 = vadd.f32 %v13047_v16, %v18076_v25  ;;  %v9723_v3 = vpop.f32.mrf.mxu0  ;;  %v18083_v25 = vld [vmem:[#allocation10_spill] sm:$0xff] }
 0x529   : > { %v10180_v4 = vmul.f32 %v16880_v28, %v10037_v51  ;;  %v8597_v31 = vpop.f32.mrf.mxu1 }
 0x52a   : > { %10595 = vst.msk [vmem:[%s16560_s25 + $0x250] sm:$0xff] %vm10520_vm2, %v10458_v35  ;;  %v10456_v43 = vmax.f32 %v10320_v26, 0.0  ;;  %v10178_v46 = vmul.f32 %v16880_v28, %v10035_v5  ;;  %v10040_v12 = vadd.f32 %v13185_v18, %v8914_v41  ;;  %v8912_v61 = vadd.f32 %v8597_v31, %v18077_v62  ;;  %v13186_v56 = vpop.f32.mrf.mxu0 }
 0x52b   : > { %v10323_v13 = vadd.f32 %v16896_v29, %v10180_v4  ;;  %v13048_v8 = vpop.f32.mrf.mxu1 }
 0x52c   : > { %10593 = vst.msk [vmem:[%s16560_s25 + $0x240] sm:$0xff] %vm10520_vm2, %v10456_v43  ;;  %v10321_v32 = vadd.f32 %v16896_v29, %v10178_v46  ;;  %v10183_v47 = vmul.f32 %v16880_v28, %v10040_v12  ;;  %v10038_v53 = vadd.f32 %v9723_v3, %v8912_v61  ;;  %v8915_v23 = vadd.f32 %v13048_v8, %v18078_v55  ;;  %v9726_v57 = vpop.f32.mrf.mxu0  ;;  %v18085_v55 = vld [vmem:[#allocation12_spill] sm:$0xff] }
 0x52d   : > { %v10459_v21 = vmax.f32 %v10323_v13, 0.0  ;;  %v8600_v38 = vpop.f32.mrf.mxu1 }
 0x52e   : > { %v10457_v2 = vmax.f32 %v10321_v32, 0.0  ;;  %v10326_v9 = vadd.f32 %v16896_v29, %v10183_v47  ;;  %v10181_v34 = vmul.f32 %v16880_v28, %v10038_v53  ;;  %v10041_v19 = vadd.f32 %v13186_v56, %v8915_v23  ;;  %v13189_v59 = vpop.f32.mrf.mxu0  ;;  %v18084_v56 = vld [vmem:[#allocation11_spill] sm:$0xff] }
 0x52f   : > { %10596 = vst.msk [vmem:[%s16560_s25 + $0x258] sm:$0xff] %vm10520_vm2, %v10459_v21  ;;  %v8913_v37 = vadd.f32 %v8600_v38, %v18079_v0  ;;  %v13051_v30 = vpop.f32.mrf.mxu1 }
 0x530   : > { %10594 = vst.msk [vmem:[%s16560_s25 + $0x248] sm:$0xff] %vm10520_vm2, %v10457_v2  ;;  %v10462_v42 = vmax.f32 %v10326_v9, 0.0  ;;  %v10324_v44 = vadd.f32 %v16896_v29, %v10181_v34  ;;  %v10184_v48 = vmul.f32 %v16880_v28, %v10041_v19  ;;  %v8918_v10 = vadd.f32 %v13051_v30, %v18080_v52  ;;  %v9739_v40 = vpop.f32.mrf.mxu0  ;;  %v18086_v19 = vld [vmem:[#allocation13_spill] sm:$0xff]  ;;  %v18087_v52 = vld [vmem:[#allocation14_spill] sm:$0xff] }
 0x531   : > { %v10039_v22 = vadd.f32 %v9726_v57, %v8913_v37  ;;  %v8613_v33 = vpop.f32.mrf.mxu1 }
 0x532   : > { %10599 = vst.msk [vmem:[%s16560_s25 + $0x270] sm:$0xff] %vm10520_vm2, %v10462_v42  ;;  %v10460_v24 = vmax.f32 %v10324_v44, 0.0  ;;  %v10327_v11 = vadd.f32 %v16896_v29, %v10184_v48  ;;  %v10044_v54 = vadd.f32 %v13189_v59, %v8918_v10  ;;  %v8916_v1 = vadd.f32 %v8613_v33, %v18081_v6  ;;  %v13190_v17 = vpop.f32.mrf.mxu0  ;;  %v18088_v6 = vld [vmem:[#allocation15_spill] sm:$0xff] }
 0x533   : > { %v10182_v58 = vmul.f32 %v16880_v28, %v10039_v22  ;;  %v13052_v7 = vpop.f32.mrf.mxu1 }
 0x534   : > { %10597 = vst.msk [vmem:[%s16560_s25 + $0x260] sm:$0xff] %vm10520_vm2, %v10460_v24  ;;  %v10463_v15 = vmax.f32 %v10327_v11, 0.0  ;;  %v10187_v45 = vmul.f32 %v16880_v28, %v10044_v54  ;;  %v10042_v20 = vadd.f32 %v9739_v40, %v8916_v1  ;;  %v8919_v49 = vadd.f32 %v13052_v7, %v18082_v27  ;;  %v9742_v18 = vpop.f32.mrf.mxu0 }
 0x535   : > { %v10325_v51 = vadd.f32 %v16896_v29, %v10182_v58  ;;  %v8616_v16 = vpop.f32.mrf.mxu1 }
 0x536   : > { %10600 = vst.msk [vmem:[%s16560_s25 + $0x278] sm:$0xff] %vm10520_vm2, %v10463_v15  ;;  %v10330_v35 = vadd.f32 %v16896_v29, %v10187_v45  ;;  %v10185_v26 = vmul.f32 %v16880_v28, %v10042_v20  ;;  %v10045_v5 = vadd.f32 %v13190_v17, %v8919_v49  ;;  %v8917_v41 = vadd.f32 %v8616_v16, %v18083_v25  ;;  %v13193_v3 = vpop.f32.mrf.mxu0  ;;  %v18090_v25 = vld [vmem:[#allocation17_spill] sm:$0xff] }
 0x537   : > { %v10461_v4 = vmax.f32 %v10325_v51, 0.0  ;;  %v13055_v31 = vpop.f32.mrf.mxu1 }
 0x538   : > { %v10466_v43 = vmax.f32 %v10330_v35, 0.0  ;;  %v10328_v46 = vadd.f32 %v16896_v29, %v10185_v26  ;;  %v10188_v12 = vmul.f32 %v16880_v28, %v10045_v5  ;;  %v10043_v62 = vadd.f32 %v9742_v18, %v8917_v41  ;;  %v9755_v61 = vpop.f32.mrf.mxu0  ;;  %v18089_v18 = vld [vmem:[#allocation16_spill] sm:$0xff] }
 0x539   : > { %10598 = vst.msk [vmem:[%s16560_s25 + $0x268] sm:$0xff] %vm10520_vm2, %v10461_v4  ;;  %v8922_v13 = vadd.f32 %v13055_v31, %v18084_v56  ;;  %v8629_v8 = vpop.f32.mrf.mxu1 }
 0x53a   : > { %10603 = vst.msk [vmem:[%s16560_s25 + $0x290] sm:$0xff] %vm10520_vm2, %v10466_v43  ;;  %v10464_v32 = vmax.f32 %v10328_v46, 0.0  ;;  %v10331_v47 = vadd.f32 %v16896_v29, %v10188_v12  ;;  %v10186_v53 = vmul.f32 %v16880_v28, %v10043_v62  ;;  %v8920_v23 = vadd.f32 %v8629_v8, %v18085_v55  ;;  %v13194_v57 = vpop.f32.mrf.mxu0  ;;  %v18091_v62 = vld [vmem:[#allocation18_spill] sm:$0xff]  ;;  %v18092_v55 = vld [vmem:[#allocation19_spill] sm:$0xff] }
 0x53b   : > { %v10048_v21 = vadd.f32 %v13193_v3, %v8922_v13  ;;  %v13056_v38 = vpop.f32.mrf.mxu1 }
 0x53c   : > { %10601 = vst.msk [vmem:[%s16560_s25 + $0x280] sm:$0xff] %vm10520_vm2, %v10464_v32  ;;  %v10467_v2 = vmax.f32 %v10331_v47, 0.0  ;;  %v10329_v9 = vadd.f32 %v16896_v29, %v10186_v53  ;;  %v10046_v34 = vadd.f32 %v9755_v61, %v8920_v23  ;;  %v8923_v59 = vadd.f32 %v13056_v38, %v18086_v19  ;;  %v9758_v0 = vpop.f32.mrf.mxu0  ;;  %v18093_v19 = vld [vmem:[#allocation20_spill] sm:$0xff] }
 0x53d   : > { %v10191_v37 = vmul.f32 %v16880_v28, %v10048_v21  ;;  %v8632_v30 = vpop.f32.mrf.mxu1 }
 0x53e   : > { %10604 = vst.msk [vmem:[%s16560_s25 + $0x298] sm:$0xff] %vm10520_vm2, %v10467_v2  ;;  %v10465_v42 = vmax.f32 %v10329_v9, 0.0  ;;  %v10189_v44 = vmul.f32 %v16880_v28, %v10046_v34  ;;  %v10049_v48 = vadd.f32 %v13194_v57, %v8923_v59  ;;  %v8921_v10 = vadd.f32 %v8632_v30, %v18087_v52  ;;  %v13197_v40 = vpop.f32.mrf.mxu0 }
 0x53f   : > { %v10334_v22 = vadd.f32 %v16896_v29, %v10191_v37  ;;  %v13059_v33 = vpop.f32.mrf.mxu1 }
 0x540   : > { %10602 = vst.msk [vmem:[%s16560_s25 + $0x288] sm:$0xff] %vm10520_vm2, %v10465_v42  ;;  %v10332_v24 = vadd.f32 %v16896_v29, %v10189_v44  ;;  %v10192_v11 = vmul.f32 %v16880_v28, %v10049_v48  ;;  %v10047_v54 = vadd.f32 %v9758_v0, %v8921_v10  ;;  %v8926_v1 = vadd.f32 %v13059_v33, %v18088_v6  ;;  %v9771_v17 = vpop.f32.mrf.mxu0  ;;  %v18095_v6 = vld [vmem:[#allocation22_spill] sm:$0xff] }
 0x541   : > { %v10470_v58 = vmax.f32 %v10334_v22, 0.0  ;;  %v8645_v7 = vpop.f32.mrf.mxu1 }
 0x542   : > { %v10468_v15 = vmax.f32 %v10332_v24, 0.0  ;;  %v10335_v45 = vadd.f32 %v16896_v29, %v10192_v11  ;;  %v10190_v20 = vmul.f32 %v16880_v28, %v10047_v54  ;;  %v10052_v27 = vadd.f32 %v13197_v40, %v8926_v1  ;;  %v13198_v49 = vpop.f32.mrf.mxu0  ;;  %v18094_v40 = vld [vmem:[#allocation21_spill] sm:$0xff] }
 0x543   : > { %10607 = vst.msk [vmem:[%s16560_s25 + $0x2b0] sm:$0xff] %vm10520_vm2, %v10470_v58  ;;  %v8924_v51 = vadd.f32 %v8645_v7, %v18089_v18  ;;  %v13060_v16 = vpop.f32.mrf.mxu1 }
 0x544   : > { %10605 = vst.msk [vmem:[%s16560_s25 + $0x2a0] sm:$0xff] %vm10520_vm2, %v10468_v15  ;;  %v10471_v35 = vmax.f32 %v10335_v45, 0.0  ;;  %v10333_v26 = vadd.f32 %v16896_v29, %v10190_v20  ;;  %v10195_v5 = vmul.f32 %v16880_v28, %v10052_v27  ;;  %v8927_v41 = vadd.f32 %v13060_v16, %v18090_v25  ;;  %v9774_v3 = vpop.f32.mrf.mxu0  ;;  %v18096_v27 = vld [vmem:[#allocation23_spill] sm:$0xff]  ;;  %v18097_v25 = vld [vmem:[#allocation24_spill] sm:$0xff] }
 0x545   : > { %v10050_v4 = vadd.f32 %v9771_v17, %v8924_v51  ;;  %v8648_v31 = vpop.f32.mrf.mxu1 }
 0x546   : > { %10608 = vst.msk [vmem:[%s16560_s25 + $0x2b8] sm:$0xff] %vm10520_vm2, %v10471_v35  ;;  %v10469_v43 = vmax.f32 %v10333_v26, 0.0  ;;  %v10338_v46 = vadd.f32 %v16896_v29, %v10195_v5  ;;  %v10053_v12 = vadd.f32 %v13198_v49, %v8927_v41  ;;  %v8925_v61 = vadd.f32 %v8648_v31, %v18091_v62  ;;  %v13201_v56 = vpop.f32.mrf.mxu0  ;;  %v18098_v62 = vld [vmem:[#allocation25_spill] sm:$0xff] }
 0x547   : > { %v10193_v13 = vmul.f32 %v16880_v28, %v10050_v4  ;;  %v13063_v8 = vpop.f32.mrf.mxu1 }
 0x548   : > { %10606 = vst.msk [vmem:[%s16560_s25 + $0x2a8] sm:$0xff] %vm10520_vm2, %v10469_v43  ;;  %v10474_v32 = vmax.f32 %v10338_v46, 0.0  ;;  %v10196_v47 = vmul.f32 %v16880_v28, %v10053_v12  ;;  %v10051_v53 = vadd.f32 %v9774_v3, %v8925_v61  ;;  %v8930_v23 = vadd.f32 %v13063_v8, %v18092_v55  ;;  %v9787_v57 = vpop.f32.mrf.mxu0 }
 0x549   : > { %v10336_v21 = vadd.f32 %v16896_v29, %v10193_v13  ;;  %v8661_v38 = vpop.f32.mrf.mxu1 }
 0x54a   : > { %10611 = vst.msk [vmem:[%s16560_s25 + $0x2d0] sm:$0xff] %vm10520_vm2, %v10474_v32  ;;  %v10339_v2 = vadd.f32 %v16896_v29, %v10196_v47  ;;  %v10194_v9 = vmul.f32 %v16880_v28, %v10051_v53  ;;  %v10056_v34 = vadd.f32 %v13201_v56, %v8930_v23  ;;  %v8928_v59 = vadd.f32 %v8661_v38, %v18093_v19  ;;  %v13202_v0 = vpop.f32.mrf.mxu0  ;;  %v18100_v19 = vld [vmem:[#allocation27_spill] sm:$0xff] }
 0x54b   : > { %v10472_v37 = vmax.f32 %v10336_v21, 0.0  ;;  %v13064_v30 = vpop.f32.mrf.mxu1 }
 0x54c   : > { %v10475_v42 = vmax.f32 %v10339_v2, 0.0  ;;  %v10337_v44 = vadd.f32 %v16896_v29, %v10194_v9  ;;  %v10199_v48 = vmul.f32 %v16880_v28, %v10056_v34  ;;  %v10054_v52 = vadd.f32 %v9787_v57, %v8928_v59  ;;  %v9790_v10 = vpop.f32.mrf.mxu0  ;;  %v18099_v57 = vld [vmem:[#allocation26_spill] sm:$0xff] }
 0x54d   : > { %10609 = vst.msk [vmem:[%s16560_s25 + $0x2c0] sm:$0xff] %vm10520_vm2, %v10472_v37  ;;  %v8931_v22 = vadd.f32 %v13064_v30, %v18094_v40  ;;  %v8664_v33 = vpop.f32.mrf.mxu1 }
 0x54e   : > { %10612 = vst.msk [vmem:[%s16560_s25 + $0x2d8] sm:$0xff] %vm10520_vm2, %v10475_v42  ;;  %v10473_v24 = vmax.f32 %v10337_v44, 0.0  ;;  %v10342_v11 = vadd.f32 %v16896_v29, %v10199_v48  ;;  %v10197_v54 = vmul.f32 %v16880_v28, %v10054_v52  ;;  %v8929_v1 = vadd.f32 %v8664_v33, %v18095_v6  ;;  %v13205_v17 = vpop.f32.mrf.mxu0  ;;  %v18101_v52 = vld [vmem:[#allocation28_spill] sm:$0xff]  ;;  %v18102_v6 = vld [vmem:[#allocation29_spill] sm:$0xff] }
 0x54f   : > { %v10057_v58 = vadd.f32 %v13202_v0, %v8931_v22  ;;  %v13067_v7 = vpop.f32.mrf.mxu1 }
 0x550   : > { %10610 = vst.msk [vmem:[%s16560_s25 + $0x2c8] sm:$0xff] %vm10520_vm2, %v10473_v24  ;;  %v10478_v15 = vmax.f32 %v10342_v11, 0.0  ;;  %v10340_v45 = vadd.f32 %v16896_v29, %v10197_v54  ;;  %v10055_v20 = vadd.f32 %v9790_v10, %v8929_v1  ;;  %v8934_v49 = vadd.f32 %v13067_v7, %v18096_v27  ;;  %v9803_v18 = vpop.f32.mrf.mxu0  ;;  %v18103_v27 = vld [vmem:[#allocation30_spill] sm:$0xff] }
 0x551   : > { %v10200_v51 = vmul.f32 %v16880_v28, %v10057_v58  ;;  %v8677_v16 = vpop.f32.mrf.mxu1 }
 0x552   : > { %10615 = vst.msk [vmem:[%s16560_s25 + $0x2f0] sm:$0xff] %vm10520_vm2, %v10478_v15  ;;  %v10476_v35 = vmax.f32 %v10340_v45, 0.0  ;;  %v10198_v26 = vmul.f32 %v16880_v28, %v10055_v20  ;;  %v10060_v5 = vadd.f32 %v13205_v17, %v8934_v49  ;;  %v8932_v41 = vadd.f32 %v8677_v16, %v18097_v25  ;;  %v13206_v3 = vpop.f32.mrf.mxu0 }
 0x553   : > { %v10343_v4 = vadd.f32 %v16896_v29, %v10200_v51  ;;  %v13068_v31 = vpop.f32.mrf.mxu1 }
 0x554   : > { %10613 = vst.msk [vmem:[%s16560_s25 + $0x2e0] sm:$0xff] %vm10520_vm2, %v10476_v35  ;;  %v10341_v43 = vadd.f32 %v16896_v29, %v10198_v26  ;;  %v10203_v46 = vmul.f32 %v16880_v28, %v10060_v5  ;;  %v10058_v12 = vadd.f32 %v9803_v18, %v8932_v41  ;;  %v8935_v61 = vadd.f32 %v13068_v31, %v18098_v62  ;;  %v9806_v56 = vpop.f32.mrf.mxu0  ;;  %v18105_v62 = vld [vmem:[#allocation32_spill] sm:$0xff] }
 0x555   : > { %v10479_v13 = vmax.f32 %v10343_v4, 0.0  ;;  %v8680_v8 = vpop.f32.mrf.mxu1 }
 0x556   : > { %v10477_v32 = vmax.f32 %v10341_v43, 0.0  ;;  %v10346_v47 = vadd.f32 %v16896_v29, %v10203_v46  ;;  %v10201_v53 = vmul.f32 %v16880_v28, %v10058_v12  ;;  %v10061_v55 = vadd.f32 %v13206_v3, %v8935_v61  ;;  %v13209_v23 = vpop.f32.mrf.mxu0  ;;  %v18104_v3 = vld [vmem:[#allocation31_spill] sm:$0xff] }
 0x557   : > { %10616 = vst.msk [vmem:[%s16560_s25 + $0x2f8] sm:$0xff] %vm10520_vm2, %v10479_v13  ;;  %v8933_v21 = vadd.f32 %v8680_v8, %v18099_v57  ;;  %v13071_v38 = vpop.f32.mrf.mxu1 }
 0x558   : > { %10614 = vst.msk [vmem:[%s16560_s25 + $0x2e8] sm:$0xff] %vm10520_vm2, %v10477_v32  ;;  %v10482_v2 = vmax.f32 %v10346_v47, 0.0  ;;  %v10344_v9 = vadd.f32 %v16896_v29, %v10201_v53  ;;  %v10204_v34 = vmul.f32 %v16880_v28, %v10061_v55  ;;  %v8938_v59 = vadd.f32 %v13071_v38, %v18100_v19  ;;  %v9819_v0 = vpop.f32.mrf.mxu0  ;;  %v18106_v55 = vld [vmem:[#allocation33_spill] sm:$0xff]  ;;  %v18107_v19 = vld [vmem:[#allocation34_spill] sm:$0xff] }
 0x559   : > { %v10059_v37 = vadd.f32 %v9806_v56, %v8933_v21  ;;  %v8693_v30 = vpop.f32.mrf.mxu1 }
 0x55a   : > { %10619 = vst.msk [vmem:[%s16560_s25 + $0x310] sm:$0xff] %vm10520_vm2, %v10482_v2  ;;  %v10480_v42 = vmax.f32 %v10344_v9, 0.0  ;;  %v10347_v44 = vadd.f32 %v16896_v29, %v10204_v34  ;;  %v10064_v48 = vadd.f32 %v13209_v23, %v8938_v59  ;;  %v8936_v10 = vadd.f32 %v8693_v30, %v18101_v52  ;;  %v13210_v40 = vpop.f32.mrf.mxu0  ;;  %v18108_v52 = vld [vmem:[#allocation35_spill] sm:$0xff] }
 0x55b   : > { %v10202_v22 = vmul.f32 %v16880_v28, %v10059_v37  ;;  %v13072_v33 = vpop.f32.mrf.mxu1 }
 0x55c   : > { %10617 = vst.msk [vmem:[%s16560_s25 + $0x300] sm:$0xff] %vm10520_vm2, %v10480_v42  ;;  %v10483_v24 = vmax.f32 %v10347_v44, 0.0  ;;  %v10207_v11 = vmul.f32 %v16880_v28, %v10064_v48  ;;  %v10062_v54 = vadd.f32 %v9819_v0, %v8936_v10  ;;  %v8939_v1 = vadd.f32 %v13072_v33, %v18102_v6  ;;  %v9822_v17 = vpop.f32.mrf.mxu0 }
 0x55d   : > { %v10345_v58 = vadd.f32 %v16896_v29, %v10202_v22  ;;  %v8696_v7 = vpop.f32.mrf.mxu1 }
 0x55e   : > { %10620 = vst.msk [vmem:[%s16560_s25 + $0x318] sm:$0xff] %vm10520_vm2, %v10483_v24  ;;  %v10350_v15 = vadd.f32 %v16896_v29, %v10207_v11  ;;  %v10205_v45 = vmul.f32 %v16880_v28, %v10062_v54  ;;  %v10065_v20 = vadd.f32 %v13210_v40, %v8939_v1  ;;  %v8937_v49 = vadd.f32 %v8696_v7, %v18103_v27  ;;  %v13213_v18 = vpop.f32.mrf.mxu0  ;;  %v18110_v27 = vld [vmem:[#allocation37_spill] sm:$0xff] }
 0x55f   : > { %v10481_v51 = vmax.f32 %v10345_v58, 0.0  ;;  %v13075_v16 = vpop.f32.mrf.mxu1 }
 0x560   : > { %v10486_v35 = vmax.f32 %v10350_v15, 0.0  ;;  %v10348_v26 = vadd.f32 %v16896_v29, %v10205_v45  ;;  %v10208_v5 = vmul.f32 %v16880_v28, %v10065_v20  ;;  %v10063_v25 = vadd.f32 %v9822_v17, %v8937_v49  ;;  %v9835_v41 = vpop.f32.mrf.mxu0  ;;  %v18109_v17 = vld [vmem:[#allocation36_spill] sm:$0xff] }
 0x561   : > { %10618 = vst.msk [vmem:[%s16560_s25 + $0x308] sm:$0xff] %vm10520_vm2, %v10481_v51  ;;  %v8942_v4 = vadd.f32 %v13075_v16, %v18104_v3  ;;  %v8709_v31 = vpop.f32.mrf.mxu1 }
 0x562   : > { %10623 = vst.msk [vmem:[%s16560_s25 + $0x330] sm:$0xff] %vm10520_vm2, %v10486_v35  ;;  %v10484_v43 = vmax.f32 %v10348_v26, 0.0  ;;  %v10351_v46 = vadd.f32 %v16896_v29, %v10208_v5  ;;  %v10206_v12 = vmul.f32 %v16880_v28, %v10063_v25  ;;  %v8940_v61 = vadd.f32 %v8709_v31, %v18105_v62  ;;  %v13214_v56 = vpop.f32.mrf.mxu0  ;;  %v18111_v25 = vld [vmem:[#allocation38_spill] sm:$0xff]  ;;  %v18112_v62 = vld [vmem:[#allocation39_spill] sm:$0xff] }
 0x563   : > { %v10068_v13 = vadd.f32 %v13213_v18, %v8942_v4  ;;  %v13076_v8 = vpop.f32.mrf.mxu1 }
 0x564   : > { %10621 = vst.msk [vmem:[%s16560_s25 + $0x320] sm:$0xff] %vm10520_vm2, %v10484_v43  ;;  %v10487_v32 = vmax.f32 %v10351_v46, 0.0  ;;  %v10349_v47 = vadd.f32 %v16896_v29, %v10206_v12  ;;  %v10066_v53 = vadd.f32 %v9835_v41, %v8940_v61  ;;  %v8943_v23 = vadd.f32 %v13076_v8, %v18106_v55  ;;  %v9838_v57 = vpop.f32.mrf.mxu0  ;;  %v18113_v55 = vld [vmem:[#allocation40_spill] sm:$0xff] }
 0x565   : > { %v10211_v21 = vmul.f32 %v16880_v28, %v10068_v13  ;;  %v8712_v38 = vpop.f32.mrf.mxu1 }
 0x566   : > { %10624 = vst.msk [vmem:[%s16560_s25 + $0x338] sm:$0xff] %vm10520_vm2, %v10487_v32  ;;  %v10485_v2 = vmax.f32 %v10349_v47, 0.0  ;;  %v10209_v9 = vmul.f32 %v16880_v28, %v10066_v53  ;;  %v10069_v34 = vadd.f32 %v13214_v56, %v8943_v23  ;;  %v8941_v59 = vadd.f32 %v8712_v38, %v18107_v19  ;;  %v13217_v0 = vpop.f32.mrf.mxu0  ;;  %v17212_v47 = vld [vmem:[%s17357_s2] ss:$0 sm:$0xff] }
 0x567   : > { %v10354_v37 = vadd.f32 %v16896_v29, %v10211_v21  ;;  %v13079_v30 = vpop.f32.mrf.mxu1 }
 0x568   : > { %10622 = vst.msk [vmem:[%s16560_s25 + $0x328] sm:$0xff] %vm10520_vm2, %v10485_v2  ;;  %v10352_v42 = vadd.f32 %v16896_v29, %v10209_v9  ;;  %v10212_v44 = vmul.f32 %v16880_v28, %v10069_v34  ;;  %v10067_v48 = vadd.f32 %v9838_v57, %v8941_v59  ;;  %v8946_v10 = vadd.f32 %v13079_v30, %v18108_v52  ;;  %v9851_v40 = vpop.f32.mrf.mxu0  ;;  %v18115_v52 = vld [vmem:[#allocation44_spill] sm:$0xff] }
 0x569   : > { %v10490_v22 = vmax.f32 %v10354_v37, 0.0  ;;  %v8725_v33 = vpop.f32.mrf.mxu1 }
 0x56a   : > { %v10488_v24 = vmax.f32 %v10352_v42, 0.0  ;;  %v10355_v11 = vadd.f32 %v16896_v29, %v10212_v44  ;;  %v10210_v54 = vmul.f32 %v16880_v28, %v10067_v48  ;;  %v10072_v6 = vadd.f32 %v13217_v0, %v8946_v10  ;;  %v13218_v1 = vpop.f32.mrf.mxu0  ;;  %v18114_v0 = vld [vmem:[#allocation42_spill] sm:$0xff] }
 0x56b   : > { %10627 = vst.msk [vmem:[%s16560_s25 + $0x350] sm:$0xff] %vm10520_vm2, %v10490_v22  ;;  %v8944_v58 = vadd.f32 %v8725_v33, %v18109_v17  ;;  %v13080_v7 = vpop.f32.mrf.mxu1  ;;  %v17226_v44 = vld [vmem:[%s17358_s3] ss:$0 sm:$0xff] }
 0x56c   : > { %10625 = vst.msk [vmem:[%s16560_s25 + $0x340] sm:$0xff] %vm10520_vm2, %v10488_v24  ;;  %v10491_v15 = vmax.f32 %v10355_v11, 0.0  ;;  %v10353_v45 = vadd.f32 %v16896_v29, %v10210_v54  ;;  %v10215_v20 = vmul.f32 %v16880_v28, %v10072_v6  ;;  %v8947_v49 = vadd.f32 %v13080_v7, %v18110_v27  ;;  %v9854_v18 = vpop.f32.mrf.mxu0  ;;  %v18116_v6 = vld [vmem:[#allocation46_spill] sm:$0xff]  ;;  %v18117_v27 = vld [vmem:[#allocation48_spill] sm:$0xff] }
 0x56d   : > { %v10070_v51 = vadd.f32 %v9851_v40, %v8944_v58  ;;  %v8728_v16 = vpop.f32.mrf.mxu1 }
 0x56e   : > { %10628 = vst.msk [vmem:[%s16560_s25 + $0x358] sm:$0xff] %vm10520_vm2, %v10491_v15  ;;  %v10489_v35 = vmax.f32 %v10353_v45, 0.0  ;;  %v10358_v26 = vadd.f32 %v16896_v29, %v10215_v20  ;;  %v10073_v5 = vadd.f32 %v13218_v1, %v8947_v49  ;;  %v8945_v41 = vadd.f32 %v8728_v16, %v18111_v25  ;;  %v13221_v3 = vpop.f32.mrf.mxu0  ;;  %v18118_v25 = vld [vmem:[#allocation50_spill] sm:$0xff] }
 0x56f   : > { %v10213_v4 = vmul.f32 %v16880_v28, %v10070_v51  ;;  %v13083_v31 = vpop.f32.mrf.mxu1 }
 0x570   : > { %10626 = vst.msk [vmem:[%s16560_s25 + $0x348] sm:$0xff] %vm10520_vm2, %v10489_v35  ;;  %v10494_v43 = vmax.f32 %v10358_v26, 0.0  ;;  %v10216_v46 = vmul.f32 %v16880_v28, %v10073_v5  ;;  %v10071_v12 = vadd.f32 %v9854_v18, %v8945_v41  ;;  %v8950_v61 = vadd.f32 %v13083_v31, %v18112_v62  ;;  %v9867_v56 = vpop.f32.mrf.mxu0 }
 0x571   : > { %v10356_v13 = vadd.f32 %v16896_v29, %v10213_v4  ;;  %v8741_v8 = vpop.f32.mrf.mxu1 }
 0x572   : > { %10631 = vst.msk [vmem:[%s16560_s25 + $0x370] sm:$0xff] %vm10520_vm2, %v10494_v43  ;;  %v10359_v32 = vadd.f32 %v16896_v29, %v10216_v46  ;;  %v10214_v28 = vmul.f32 %v17212_v47, %v10071_v12  ;;  %v10076_v53 = vadd.f32 %v13221_v3, %v8950_v61  ;;  %v8948_v23 = vadd.f32 %v8741_v8, %v18113_v55  ;;  %v13222_v57 = vpop.f32.mrf.mxu0  ;;  %v18120_v55 = vld [vmem:[#allocation101_spill] sm:$0xff] }
 0x573   : > { %v10492_v21 = vmax.f32 %v10356_v13, 0.0  ;;  %v13084_v38 = vpop.f32.mrf.mxu1 }
 0x574   : > { %v10495_v2 = vmax.f32 %v10359_v32, 0.0  ;;  %v10357_v9 = vadd.f32 %v16896_v29, %v10214_v28  ;;  %v10219_v34 = vmul.f32 %v17212_v47, %v10076_v53  ;;  %v10074_v19 = vadd.f32 %v9867_v56, %v8948_v23  ;;  %v9870_v59 = vpop.f32.mrf.mxu0  ;;  %v18119_v56 = vld [vmem:[#allocation100_spill] sm:$0xff] }
 0x575   : > { %10629 = vst.msk [vmem:[%s16560_s25 + $0x360] sm:$0xff] %vm10520_vm2, %v10492_v21  ;;  %v8951_v37 = vadd.f32 %v13084_v38, %v18114_v0  ;;  %v8744_v30 = vpop.f32.mrf.mxu1 }
 0x576   : > { %10632 = vst.msk [vmem:[%s16560_s25 + $0x378] sm:$0xff] %vm10520_vm2, %v10495_v2  ;;  %v10493_v42 = vmax.f32 %v10357_v9, 0.0  ;;  %v10362_v29 = vadd.f32 %v17226_v44, %v10219_v34  ;;  %v10217_v48 = vmul.f32 %v17212_v47, %v10074_v19  ;;  %v8949_v10 = vadd.f32 %v8744_v30, %v18115_v52  ;;  %v13225_v40 = vpop.f32.mrf.mxu0  ;;  %v18121_v19 = vld [vmem:[#allocation56_spill] sm:$0xff]  ;;  %v18122_v52 = vld [vmem:[#allocation58_spill] sm:$0xff] }
 0x577   : > { %v10077_v22 = vadd.f32 %v13222_v57, %v8951_v37  ;;  %v13087_v33 = vpop.f32.mrf.mxu1 }
 0x578   : > { %10630 = vst.msk [vmem:[%s16560_s25 + $0x368] sm:$0xff] %vm10520_vm2, %v10493_v42  ;;  %v10498_v24 = vmax.f32 %v10362_v29, 0.0  ;;  %v10360_v11 = vadd.f32 %v17226_v44, %v10217_v48  ;;  %v10075_v54 = vadd.f32 %v9870_v59, %v8949_v10  ;;  %v8954_v1 = vadd.f32 %v13087_v33, %v18116_v6  ;;  %v9883_v17 = vpop.f32.mrf.mxu0  ;;  %v18123_v6 = vld [vmem:[#allocation60_spill] sm:$0xff] }
 0x579   : > { %v10220_v58 = vmul.f32 %v17212_v47, %v10077_v22  ;;  %v8757_v7 = vpop.f32.mrf.mxu1 }
 0x57a   : > { %10635 = vst.msk [vmem:[%s16560_s25 + $0x390] sm:$0xff] %vm10520_vm2, %v10498_v24  ;;  %v10496_v15 = vmax.f32 %v10360_v11, 0.0  ;;  %v10218_v45 = vmul.f32 %v17212_v47, %v10075_v54  ;;  %v10080_v20 = vadd.f32 %v13225_v40, %v8954_v1  ;;  %v8952_v49 = vadd.f32 %v8757_v7, %v18117_v27  ;;  %v13226_v18 = vpop.f32.mrf.mxu0 }
 0x57b   : > { %v10363_v51 = vadd.f32 %v17226_v44, %v10220_v58  ;;  %v13088_v16 = vpop.f32.mrf.mxu1 }
 0x57c   : > { %10633 = vst.msk [vmem:[%s16560_s25 + $0x380] sm:$0xff] %vm10520_vm2, %v10496_v15  ;;  %v10361_v35 = vadd.f32 %v17226_v44, %v10218_v45  ;;  %v10223_v26 = vmul.f32 %v17212_v47, %v10080_v20  ;;  %v10078_v5 = vadd.f32 %v9883_v17, %v8952_v49  ;;  %v8955_v41 = vadd.f32 %v13088_v16, %v18118_v25  ;;  %v9886_v3 = vpop.f32.mrf.mxu0 }
 0x57d   : > { %v10499_v4 = vmax.f32 %v10363_v51, 0.0  ;;  %v8760_v31 = vpop.f32.mrf.mxu1 }
 0x57e   : > { %v10497_v43 = vmax.f32 %v10361_v35, 0.0  ;;  %v10366_v46 = vadd.f32 %v17226_v44, %v10223_v26  ;;  %v10221_v12 = vmul.f32 %v17212_v47, %v10078_v5  ;;  %v10081_v62 = vadd.f32 %v13226_v18, %v8955_v41 }
 0x57f   : > { %v13229_v61 = vpop.f32.mrf.mxu0  ;;  %10636 = vst.msk [vmem:[%s16560_s25 + $0x398] sm:$0xff] %vm10520_vm2, %v10499_v4  ;;  %v8953_v13 = vadd.f32 %v8760_v31, %v18119_v56  ;;  %v13091_v8 = vpop.f32.mrf.mxu1 }
 0x580   : > { %10634 = vst.msk [vmem:[%s16560_s25 + $0x388] sm:$0xff] %vm10520_vm2, %v10497_v43  ;;  %v10502_v32 = vmax.f32 %v10366_v46, 0.0  ;;  %v10364_v28 = vadd.f32 %v17226_v44, %v10221_v12  ;;  %v10224_v53 = vmul.f32 %v17212_v47, %v10081_v62  ;;  %v8958_v23 = vadd.f32 %v13091_v8, %v18120_v55  ;;  %v18124_v43 = vld [vmem:[#allocation62_spill] sm:$0xff]  ;;  %v18125_v8 = vld [vmem:[#allocation64_spill] sm:$0xff] }
 0x581   : > { %v9899_v57 = vpop.f32.mrf.mxu0  ;;  %v10079_v21 = vadd.f32 %v9886_v3, %v8953_v13  ;;  %v8773_v38 = vpop.f32.mrf.mxu1 }
 0x582   : > { %10639 = vst.msk [vmem:[%s16560_s25 + $0x3b0] sm:$0xff] %vm10520_vm2, %v10502_v32  ;;  %v10500_v2 = vmax.f32 %v10364_v28, 0.0  ;;  %v10367_v9 = vadd.f32 %v17226_v44, %v10224_v53  ;;  %v10084_v34 = vadd.f32 %v13229_v61, %v8958_v23  ;;  %v8956_v59 = vadd.f32 %v8773_v38, %v18121_v19 }
 0x583   : > { %v13230_v0 = vpop.f32.mrf.mxu0  ;;  %v10222_v37 = vmul.f32 %v17212_v47, %v10079_v21  ;;  %v13092_v30 = vpop.f32.mrf.mxu1 }
 0x584   : > { %10637 = vst.msk [vmem:[%s16560_s25 + $0x3a0] sm:$0xff] %vm10520_vm2, %v10500_v2  ;;  %v10503_v42 = vmax.f32 %v10367_v9, 0.0  ;;  %v10227_v29 = vmul.f32 %v17212_v47, %v10084_v34  ;;  %v10082_v48 = vadd.f32 %v9899_v57, %v8956_v59  ;;  %v8959_v10 = vadd.f32 %v13092_v30, %v18122_v52 }
 0x585   : > { %v9902_v40 = vpop.f32.mrf.mxu0  ;;  %v10365_v22 = vadd.f32 %v17226_v44, %v10222_v37  ;;  %v8776_v33 = vpop.f32.mrf.mxu1 }
 0x586   : > { %10640 = vst.msk [vmem:[%s16560_s25 + $0x3b8] sm:$0xff] %vm10520_vm2, %v10503_v42  ;;  %v10370_v24 = vadd.f32 %v17226_v44, %v10227_v29  ;;  %v10225_v11 = vmul.f32 %v17212_v47, %v10082_v48  ;;  %v10085_v54 = vadd.f32 %v13230_v0, %v8959_v10  ;;  %v8957_v1 = vadd.f32 %v8776_v33, %v18123_v6 }
 0x587   : > { %v13233_v17 = vpop.f32.mrf.mxu0  ;;  %v10501_v58 = vmax.f32 %v10365_v22, 0.0  ;;  %v13095_v7 = vpop.f32.mrf.mxu1 }
 0x588   : > { %v10506_v15 = vmax.f32 %v10370_v24, 0.0  ;;  %v10368_v45 = vadd.f32 %v17226_v44, %v10225_v11  ;;  %v10228_v20 = vmul.f32 %v17212_v47, %v10085_v54  ;;  %v10083_v27 = vadd.f32 %v9902_v40, %v8957_v1  ;;  %v18126_v54 = vld [vmem:[#allocation66_spill] sm:$0xff] }
 0x589   : > { %v9915_v49 = vpop.f32.mrf.mxu0  ;;  %10638 = vst.msk [vmem:[%s16560_s25 + $0x3a8] sm:$0xff] %vm10520_vm2, %v10501_v58  ;;  %v8962_v18 = vadd.f32 %v13095_v7, %v16465_v39  ;;  %v8789_v51 = vpop.f32.mrf.mxu1 }
 0x58a   : > { %10643 = vst.msk [vmem:[%s16560_s25 + $0x3d0] sm:$0xff] %vm10520_vm2, %v10506_v15  ;;  %v10504_v16 = vmax.f32 %v10368_v45, 0.0  ;;  %v10371_v35 = vadd.f32 %v17226_v44, %v10228_v20  ;;  %v10226_v26 = vmul.f32 %v17212_v47, %v10083_v27  ;;  %v8960_v5 = vadd.f32 %v8789_v51, %v16468_v36 }
 0x58b   : > { %v13234_v25 = vpop.f32.mrf.mxu0  ;;  %v10088_v41 = vadd.f32 %v13233_v17, %v8962_v18  ;;  %v13096_v3 = vpop.f32.mrf.mxu1 }
 0x58c   : > { %10641 = vst.msk [vmem:[%s16560_s25 + $0x3c0] sm:$0xff] %vm10520_vm2, %v10504_v16  ;;  %v10507_v4 = vmax.f32 %v10371_v35, 0.0  ;;  %v10369_v39 = vadd.f32 %v17226_v44, %v10226_v26  ;;  %v10086_v31 = vadd.f32 %v9915_v49, %v8960_v5  ;;  %v8963_v46 = vadd.f32 %v13096_v3, %v18124_v43  ;;  %v18127_v35 = vld [vmem:[#allocation68_spill] sm:$0xff] }
 0x58d   : > { %v9918_v12 = vpop.f32.mrf.mxu0  ;;  %v10231_v62 = vmul.f32 %v17212_v47, %v10088_v41  ;;  %v8792_v61 = vpop.f32.mrf.mxu1 }
 0x58e   : > { %10644 = vst.msk [vmem:[%s16560_s25 + $0x3d8] sm:$0xff] %vm10520_vm2, %v10507_v4  ;;  %v10505_v56 = vmax.f32 %v10369_v39, 0.0  ;;  %v10229_v36 = vmul.f32 %v17212_v47, %v10086_v31  ;;  %v10089_v13 = vadd.f32 %v13234_v25, %v8963_v46  ;;  %v8961_v32 = vadd.f32 %v8792_v61, %v18125_v8  ;;  %v18128_v31 = vld [vmem:[#allocation70_spill] sm:$0xff] }
 0x58f   : > { %v13237_v28 = vpop.f32.mrf.mxu0  ;;  %v10374_v53 = vadd.f32 %v17226_v44, %v10231_v62  ;;  %v13099_v55 = vpop.f32.mrf.mxu1 }
 0x590   : > { %10642 = vst.msk [vmem:[%s16560_s25 + $0x3c8] sm:$0xff] %vm10520_vm2, %v10505_v56  ;;  %v10372_v23 = vadd.f32 %v17226_v44, %v10229_v36  ;;  %v10232_v57 = vmul.f32 %v17212_v47, %v10089_v13  ;;  %v10087_v21 = vadd.f32 %v9918_v12, %v8961_v32  ;;  %v8966_v38 = vadd.f32 %v13099_v55, %v16489_v14  ;;  %v18129_v56 = vld [vmem:[#allocation72_spill] sm:$0xff] }
 0x591   : > { %v9931_v2 = vpop.f32.mrf.mxu0  ;;  %v10510_v9 = vmax.f32 %v10374_v53, 0.0  ;;  %v8805_v34 = vpop.f32.mrf.mxu1 }
 0x592   : > { %v10508_v19 = vmax.f32 %v10372_v23, 0.0  ;;  %v10375_v59 = vadd.f32 %v17226_v44, %v10232_v57  ;;  %v10230_v0 = vmul.f32 %v17212_v47, %v10087_v21  ;;  %v10092_v37 = vadd.f32 %v13237_v28, %v8966_v38 }
 0x593   : > { %v13238_v30 = vpop.f32.mrf.mxu0  ;;  %10647 = vst.msk [vmem:[%s16560_s25 + $0x3f0] sm:$0xff] %vm10520_vm2, %v10510_v9  ;;  %v8964_v42 = vadd.f32 %v8805_v34, %v16492_v50  ;;  %v13100_v29 = vpop.f32.mrf.mxu1 }
 0x594   : > { %10645 = vst.msk [vmem:[%s16560_s25 + $0x3e0] sm:$0xff] %vm10520_vm2, %v10508_v19  ;;  %v10511_v14 = vmax.f32 %v10375_v59, 0.0  ;;  %v10373_v48 = vadd.f32 %v17226_v44, %v10230_v0  ;;  %v10235_v52 = vmul.f32 %v17212_v47, %v10092_v37  ;;  %v8967_v10 = vadd.f32 %v13100_v29, %v16495_v60 }
 0x595   : > { %v9934_v40 = vpop.f32.mrf.mxu0  ;;  %v10090_v22 = vadd.f32 %v9931_v2, %v8964_v42  ;;  %v8808_v33 = vpop.f32.mrf.mxu1 }
 0x596   : > { %10648 = vst.msk [vmem:[%s16560_s25 + $0x3f8] sm:$0xff] %vm10520_vm2, %v10511_v14  ;;  %v10509_v24 = vmax.f32 %v10373_v48, 0.0  ;;  %v10378_v50 = vadd.f32 %v17226_v44, %v10235_v52  ;;  %v10093_v11 = vadd.f32 %v13238_v30, %v8967_v10  ;;  %v8965_v6 = vadd.f32 %v8808_v33, %v18126_v54 }
 0x597   : > { %v13241_v1 = vpop.f32.mrf.mxu0  ;;  %v10233_v17 = vmul.f32 %v17212_v47, %v10090_v22  ;;  %v13103_v58 = vpop.f32.mrf.mxu1 }
 0x598   : > { %10646 = vst.msk [vmem:[%s16560_s25 + $0x3e8] sm:$0xff] %vm10520_vm2, %v10509_v24  ;;  %v10514_v7 = vmax.f32 %v10378_v50, 0.0  ;;  %v10236_v60 = vmul.f32 %v17212_v47, %v10093_v11  ;;  %v10091_v15 = vadd.f32 %v9934_v40, %v8965_v6  ;;  %v8970_v45 = vadd.f32 %v13103_v58, %v16513_v63 }
 0x599   : > { %v9947_v20 = vpop.f32.mrf.mxu0  ;;  %v10376_v27 = vadd.f32 %v17226_v44, %v10233_v17  ;;  %v8821_v49 = vpop.f32.mrf.mxu1 }
 0x59a   : > { %10651 = vst.msk [vmem:[%s16560_s25 + $0x410] sm:$0xff] %vm10520_vm2, %v10514_v7  ;;  %v10379_v18 = vadd.f32 %v17226_v44, %v10236_v60  ;;  %v10234_v51 = vmul.f32 %v17212_v47, %v10091_v15  ;;  %v10096_v16 = vadd.f32 %v13241_v1, %v8970_v45  ;;  %v8968_v26 = vadd.f32 %v8821_v49, %v18127_v35 }
 0x59b   : > { %v10512_v5 = vmax.f32 %v10376_v27, 0.0  ;;  %v13104_v25 = vpop.f32.mrf.mxu1  ;;  %v13242_v41 = vpop.f32.mrf.mxu0 }
 0x59c   : > { %v10515_v63 = vmax.f32 %v10379_v18, 0.0  ;;  %v10377_v3 = vadd.f32 %v17226_v44, %v10234_v51  ;;  %v10239_v4 = vmul.f32 %v17212_v47, %v10096_v16  ;;  %v10094_v39 = vadd.f32 %v9947_v20, %v8968_v26 }
 0x59d   : > { %10649 = vst.msk [vmem:[%s16560_s25 + $0x400] sm:$0xff] %vm10520_vm2, %v10512_v5  ;;  %v8971_v43 = vadd.f32 %v13104_v25, %v18128_v31  ;;  %v8824_v46 = vpop.f32.mrf.mxu1  ;;  %v9950_v8 = vpop.f32.mrf.mxu0 }
 0x59e   : > { %10652 = vst.msk [vmem:[%s16560_s25 + $0x418] sm:$0xff] %vm10520_vm2, %v10515_v63  ;;  %v10513_v12 = vmax.f32 %v10377_v3, 0.0  ;;  %v10382_v62 = vadd.f32 %v17226_v44, %v10239_v4  ;;  %v10237_v61 = vmul.f32 %v17212_v47, %v10094_v39  ;;  %v8969_v36 = vadd.f32 %v8824_v46, %v18129_v56 }
 0x59f   : > { %v10097_v13 = vadd.f32 %v13242_v41, %v8971_v43 }
 0x5a0   : > { %10650 = vst.msk [vmem:[%s16560_s25 + $0x408] sm:$0xff] %vm10520_vm2, %v10513_v12  ;;  %v10518_v32 = vmax.f32 %v10382_v62, 0.0  ;;  %v10380_v28 = vadd.f32 %v17226_v44, %v10237_v61  ;;  %v10095_v53 = vadd.f32 %v9950_v8, %v8969_v36 }
 0x5a1   : > { %v10240_v55 = vmul.f32 %v17212_v47, %v10097_v13 }
 0x5a2   : > { %10655 = vst.msk [vmem:[%s16560_s25 + $0x430] sm:$0xff] %vm10520_vm2, %v10518_v32  ;;  %v10516_v23 = vmax.f32 %v10380_v28, 0.0  ;;  %v10238_v57 = vmul.f32 %v17212_v47, %v10095_v53 }
 0x5a3   : > { %v10383_v21 = vadd.f32 %v17226_v44, %v10240_v55 }
 0x5a4   : > { %10653 = vst.msk [vmem:[%s16560_s25 + $0x420] sm:$0xff] %vm10520_vm2, %v10516_v23  ;;  %v10381_v38 = vadd.f32 %v17226_v44, %v10238_v57 }
 0x5a5   : > { %v10519_v2 = vmax.f32 %v10383_v21, 0.0 }
 0x5a6   : > { %v10517_v9 = vmax.f32 %v10381_v38, 0.0 }
 0x5a7   : > { %10656 = vst.msk [vmem:[%s16560_s25 + $0x438] sm:$0xff] %vm10520_vm2, %v10519_v2 }
 0x5a8   : > { %10654 = vst.msk [vmem:[%s16560_s25 + $0x428] sm:$0xff] %vm10520_vm2, %v10517_v9 }
 0x5a9 PF: > { %s14_s17 = sadd.s32 1, %s13307_s17   ;;  %s18130_s15 = smov %s13303_s16 }
 0x5aa   : > { %p11_p5 = scmp.ge.s32.totalorder %s14_s17, 5   ;;  %s18131_s16 = smov %s18133_s18 }
 0x5ac   :  { %13 = sbr.rel (!%p11_p5) target bundleno = 2 (0x2), region = 74 }

</bundles_post_ra>
